<compile_context>
chip_gen: v7x
topology: tpu7x:2x2x1
jax: 0.10.0
libtpu: 0.0.40
codegen_flags: <defaults>
</compile_context>

<pallas_src>
import functools
import math

import jax
import jax.numpy as jnp
from jax.experimental import pallas as pl
from jax.experimental.pallas import tpu as pltpu


# ---------------------------------------------------------------------------
# Fused y = relu(x @ w + b) kernel.  K and N live in a single block, so the
# grid only iterates over M tiles; bias-add + ReLU + cast happen in the same
# epilogue store.
# ---------------------------------------------------------------------------
def _mm_bias_act_kernel(x_ref, w_ref, b_ref, o_ref, *, relu):
    acc = jnp.dot(x_ref[...], w_ref[...], preferred_element_type=jnp.float32)
    acc = acc + b_ref[...]
    if relu:
        acc = jnp.maximum(acc, 0.0)
    o_ref[...] = acc.astype(o_ref.dtype)


def linear_pallas(x, w, b, relu=True, out_dtype=None, tile_m=512):
    """y = relu(x @ w + b); x (M,K) bf16, w (K,N) bf16, b (1,N) f32."""
    M, K = x.shape
    K2, N = w.shape
    assert K == K2 and b.shape == (1, N)
    out_dtype = out_dtype or x.dtype

    tm = M if M <= tile_m else tile_m          # full-M block for small layers
    grid = (pl.cdiv(M, tm),)

    return pl.pallas_call(
        functools.partial(_mm_bias_act_kernel, relu=relu),
        out_shape=jax.ShapeDtypeStruct((M, N), out_dtype),
        grid_spec=pltpu.PrefetchScalarGridSpec(
            num_scalar_prefetch=0,
            grid=grid,
            in_specs=[
                pl.BlockSpec((tm, K), lambda i: (i, 0)),   # x: M tiled, full K
                pl.BlockSpec((K, N), lambda i: (0, 0)),    # w: resident
                pl.BlockSpec((1, N), lambda i: (0, 0)),    # bias: resident
            ],
            out_specs=pl.BlockSpec((tm, N), lambda i: (i, 0)),
        ),
        compiler_params=pltpu.CompilerParams(
            dimension_semantics=("parallel",)),
    )(x, w, b)


# ---------------------------------------------------------------------------
# Fused MLP head: latent = relu(state @ sw + sb)
#                 h      = relu(flat @ w1f + latent @ w1l + b1)   (== cat+Linear)
#                 out    = relu(h @ w2 + b2)
# All operands fit in VMEM (M = batch = 2), single grid step.
# ---------------------------------------------------------------------------
def _head_kernel(flat_ref, state_ref, sw_ref, sb_ref,
                 w1f_ref, w1l_ref, b1_ref, w2_ref, b2_ref, o_ref):
    latent = jnp.dot(state_ref[...], sw_ref[...],
                     preferred_element_type=jnp.float32) + sb_ref[...]
    latent = jnp.maximum(latent, 0.0)

    h = jnp.dot(flat_ref[...], w1f_ref[...],
                preferred_element_type=jnp.float32)
    h = h + jnp.dot(latent.astype(w1l_ref.dtype), w1l_ref[...],
                    preferred_element_type=jnp.float32)
    h = jnp.maximum(h + b1_ref[...], 0.0)

    out = jnp.dot(h.astype(w2_ref.dtype), w2_ref[...],
                  preferred_element_type=jnp.float32) + b2_ref[...]
    o_ref[...] = jnp.maximum(out, 0.0).astype(o_ref.dtype)


def head_pallas(flat, state, sw, sb, w1f, w1l, b1, w2, b2):
    B = flat.shape[0]
    N = w2.shape[1]
    args = (flat, state, sw, sb, w1f, w1l, b1, w2, b2)
    in_specs = [pl.BlockSpec(a.shape, lambda i: (0, 0)) for a in args]
    return pl.pallas_call(
        _head_kernel,
        out_shape=jax.ShapeDtypeStruct((B, N), jnp.float32),
        grid_spec=pltpu.PrefetchScalarGridSpec(
            num_scalar_prefetch=0,
            grid=(1,),
            in_specs=in_specs,
            out_specs=pl.BlockSpec((B, N), lambda i: (0, 0)),
        ),
        compiler_params=pltpu.CompilerParams(
            dimension_semantics=("arbitrary",)),
    )(*args)


# ---------------------------------------------------------------------------
# im2col glue (plain-JAX strided slices), patch order (kh, kw, Cin) matching
# the (k*k*Cin, Cout) weight layout.
# ---------------------------------------------------------------------------
def _extract_patches(x, k, s):
    B, H, W, C = x.shape
    Ho = (H - k) // s + 1
    Wo = (W - k) // s + 1
    cols = []
    for i in range(k):
        for j in range(k):
            cols.append(x[:, i:i + s * Ho:s, j:j + s * Wo:s, :])
    p = jnp.stack(cols, axis=3)                      # (B, Ho, Wo, k*k, C)
    return p.reshape(B, Ho, Wo, k * k * C), Ho, Wo


# ---------------------------------------------------------------------------
# Deterministic parameter init (mirrors module shapes / xavier+0.1 conv init).
# Conv weights stored pre-reshaped as (k*k*Cin, Cout) bf16; biases (1, N) f32.
# lin1 weight is pre-split into the flat-part / latent-part of the concat.
# ---------------------------------------------------------------------------
_CONV_CFG = [  # (Cout, k, stride)
    (8, 5, 2), (16, 5, 2), (32, 5, 2), (64, 3, 2), (128, 3, 2), (256, 3, 1),
]


def init_params(key, c_in, state_dim, H, W,
                features_dim=256, states_neurons=(256,)):
    gain = math.sqrt(2.0)  # relu gain, as in the module's xavier init
    keys = jax.random.split(key, len(_CONV_CFG) + len(states_neurons) + 2)
    ki = 0

    conv_w, conv_b = [], []
    cin = c_in
    h, w_ = H, W
    for (cout, k, s) in _CONV_CFG:
        fan_in, fan_out = cin * k * k, cout * k * k
        limit = gain * math.sqrt(6.0 / (fan_in + fan_out))
        wgt = jax.random.uniform(keys[ki], (k, k, cin, cout),
                                 jnp.float32, -limit, limit)
        ki += 1
        conv_w.append(wgt.reshape(k * k * cin, cout).astype(jnp.bfloat16))
        conv_b.append(jnp.full((1, cout), 0.1, jnp.float32))
        cin = cout
        h = (h - k) // s + 1
        w_ = (w_ - k) // s + 1
    n_flatten = cin * h * w_

    def _lin(kk, fi, fo):
        lim = 1.0 / math.sqrt(fi)
        wgt = jax.random.uniform(kk, (fi, fo), jnp.float32, -lim, lim)
        return wgt, jnp.zeros((1, fo), jnp.float32)

    state_w, state_b = [], []
    dims = [state_dim] + list(states_neurons)
    for i in range(len(dims) - 1):
        w, b = _lin(keys[ki], dims[i], dims[i + 1]); ki += 1
        state_w.append(w.astype(jnp.bfloat16)); state_b.append(b)

    w1, b1 = _lin(keys[ki], n_flatten + states_neurons[-1], 512); ki += 1
    w2, b2 = _lin(keys[ki], 512, features_dim); ki += 1

    return {
        "conv_w": conv_w, "conv_b": conv_b,
        "state_w": state_w, "state_b": state_b,
        "lin1_wf": w1[:n_flatten].astype(jnp.bfloat16),
        "lin1_wl": w1[n_flatten:].astype(jnp.bfloat16),
        "lin1_b": b1,
        "lin2_w": w2.astype(jnp.bfloat16),
        "lin2_b": b2,
    }


# ---------------------------------------------------------------------------
# Forward pass (matches XtMaCNN.forward semantics).
# ---------------------------------------------------------------------------
def xtma_cnn_forward(birdview_nchw, state, params):
    B = birdview_nchw.shape[0]
    x = jnp.transpose(birdview_nchw, (0, 2, 3, 1)).astype(jnp.bfloat16)  # NHWC

    # self.cnn: six Conv2d + ReLU (as im2col + fused matmul), then Flatten
    for (cout, k, s), w, b in zip(_CONV_CFG, params["conv_w"], params["conv_b"]):
        patches, Ho, Wo = _extract_patches(x, k, s)
        y = linear_pallas(patches.reshape(B * Ho * Wo, -1), w, b,
                          relu=True, out_dtype=jnp.bfloat16)
        x = y.reshape(B, Ho, Wo, cout)
    flat = jnp.transpose(x, (0, 3, 1, 2)).reshape(B, -1)  # NCHW flatten order

    # self.state_linear (all but its last layer; the last one is fused into
    # the head kernel together with cat + self.linear)
    latent = state.astype(jnp.bfloat16)
    for w, b in zip(params["state_w"][:-1], params["state_b"][:-1]):
        latent = linear_pallas(latent, w, b, relu=True, out_dtype=jnp.bfloat16)

    return head_pallas(flat, latent,
                       params["state_w"][-1], params["state_b"][-1],
                       params["lin1_wf"], params["lin1_wl"], params["lin1_b"],
                       params["lin2_w"], params["lin2_b"])


if __name__ == "__main__":
    # Smallest spatial size compatible with the 6 no-padding convs is ~141;
    # use 144 so the final conv feature map is 1x1x256 (n_flatten = 256).
    B, C_IN, H, W = 2, 4, 144, 144
    STATE_DIM = 8

    key = jax.random.PRNGKey(0)
    kb, ks = jax.random.split(key)
    birdview = jax.random.uniform(kb, (B, C_IN, H, W), jnp.float32)
    state = jax.random.normal(ks, (B, STATE_DIM), jnp.float32)

    params = init_params(jax.random.PRNGKey(42), C_IN, STATE_DIM, H, W)

    fwd = jax.jit(xtma_cnn_forward)
    out = fwd(birdview, state, params)
    out = jax.block_until_ready(out)
    assert out.shape == (B, 256), out.shape
    assert bool(jnp.all(jnp.isfinite(out)))
    print("KERNEL_OK")
</pallas_src>

<mosaic_0001>
module attributes {stable_mosaic.version = 11 : i64} {
  func.func @_mm_bias_act_kernel(%arg0: i32, %arg1: memref<512x100xbf16, #tpu.memory_space<vmem>>, %arg2: memref<100x8xbf16, #tpu.memory_space<vmem>>, %arg3: memref<1x8xf32, #tpu.memory_space<vmem>>, %arg4: memref<512x8xbf16, #tpu.memory_space<vmem>>) attributes {dimension_semantics = [#tpu.dimension_semantics<parallel>], iteration_bounds = array<i64: 20>, scalar_prefetch = 0 : i64, scratch_operands = 0 : i64, tpu.core_type = #tpu.core_type<tc>, window_params = [{transform_indices = @transform_0, window_bounds = array<i64: 512, 100>}, {pipeline_mode = #tpu.pipeline_mode<synchronous>, transform_indices = @transform_1, window_bounds = array<i64: 100, 8>}, {pipeline_mode = #tpu.pipeline_mode<synchronous>, transform_indices = @transform_2, window_bounds = array<i64: 1, 8>}, {transform_indices = @transform_3, window_bounds = array<i64: 512, 8>}]} {
    %c0 = arith.constant 0 : index
    %c0_0 = arith.constant 0 : index
    %0 = vector.load %arg1[%c0, %c0_0] : memref<512x100xbf16, #tpu.memory_space<vmem>>, vector<512x100xbf16>
    %c0_1 = arith.constant 0 : index
    %c0_2 = arith.constant 0 : index
    %1 = vector.load %arg2[%c0_1, %c0_2] : memref<100x8xbf16, #tpu.memory_space<vmem>>, vector<100x8xbf16>
    %cst = arith.constant dense<0.000000e+00> : vector<512x8xf32>
    %2 = tpu.matmul %0, %1, %cst {dimension_numbers = #tpu.dot_dimension_numbers<[1], [0], [0], [1], [0, 0, 1, 1], [], []>} : vector<512x100xbf16>, vector<100x8xbf16>, vector<512x8xf32> -> vector<512x8xf32>
    %c0_3 = arith.constant 0 : index
    %c0_4 = arith.constant 0 : index
    %3 = vector.load %arg3[%c0_3, %c0_4] : memref<1x8xf32, #tpu.memory_space<vmem>>, vector<1x8xf32>
    %4 = vector.broadcast %3 : vector<1x8xf32> to vector<512x8xf32>
    %5 = arith.addf %2, %4 : vector<512x8xf32>
    %cst_5 = arith.constant 0.000000e+00 : f32
    %6 = vector.broadcast %cst_5 : f32 to vector<512x8xf32>
    %7 = arith.maximumf %5, %6 : vector<512x8xf32>
    %8 = arith.truncf %7 : vector<512x8xf32> to vector<512x8xbf16>
    %c0_6 = arith.constant 0 : index
    %c0_7 = arith.constant 0 : index
    %9 = vector.load %arg4[%c0_6, %c0_7] : memref<512x8xbf16, #tpu.memory_space<vmem>>, vector<512x8xbf16>
    tpu.vector_store %arg4[%c0_6, %c0_7], %8 {strides = array<i32>} : memref<512x8xbf16, #tpu.memory_space<vmem>>, vector<512x8xbf16>,
    return
  }
  func.func @transform_0(%arg0: i32) -> (i32, i32) {
    %c0_i32 = arith.constant 0 : i32
    %c0_i32_0 = arith.constant 0 : i32
    return %arg0, %c0_i32 : i32, i32
  }
  func.func @transform_1(%arg0: i32) -> (i32, i32) {
    %c0_i32 = arith.constant 0 : i32
    %c0_i32_0 = arith.constant 0 : i32
    %c0_i32_1 = arith.constant 0 : i32
    return %c0_i32, %c0_i32_0 : i32, i32
  }
  func.func @transform_2(%arg0: i32) -> (i32, i32) {
    %c0_i32 = arith.constant 0 : i32
    %c0_i32_0 = arith.constant 0 : i32
    %c0_i32_1 = arith.constant 0 : i32
    return %c0_i32, %c0_i32_0 : i32, i32
  }
  func.func @transform_3(%arg0: i32) -> (i32, i32) {
    %c0_i32 = arith.constant 0 : i32
    %c0_i32_0 = arith.constant 0 : i32
    return %arg0, %c0_i32 : i32, i32
  }
}

module attributes {stable_mosaic.version = 11 : i64} {
  func.func @_mm_bias_act_kernel(%arg0: i32, %arg1: memref<512x200xbf16, #tpu.memory_space<vmem>>, %arg2: memref<200x16xbf16, #tpu.memory_space<vmem>>, %arg3: memref<1x16xf32, #tpu.memory_space<vmem>>, %arg4: memref<512x16xbf16, #tpu.memory_space<vmem>>) attributes {dimension_semantics = [#tpu.dimension_semantics<parallel>], iteration_bounds = array<i64: 5>, scalar_prefetch = 0 : i64, scratch_operands = 0 : i64, tpu.core_type = #tpu.core_type<tc>, window_params = [{transform_indices = @transform_0, window_bounds = array<i64: 512, 200>}, {pipeline_mode = #tpu.pipeline_mode<synchronous>, transform_indices = @transform_1, window_bounds = array<i64: 200, 16>}, {pipeline_mode = #tpu.pipeline_mode<synchronous>, transform_indices = @transform_2, window_bounds = array<i64: 1, 16>}, {transform_indices = @transform_3, window_bounds = array<i64: 512, 16>}]} {
    %c0 = arith.constant 0 : index
    %c0_0 = arith.constant 0 : index
    %0 = vector.load %arg1[%c0, %c0_0] : memref<512x200xbf16, #tpu.memory_space<vmem>>, vector<512x200xbf16>
    %c0_1 = arith.constant 0 : index
    %c0_2 = arith.constant 0 : index
    %1 = vector.load %arg2[%c0_1, %c0_2] : memref<200x16xbf16, #tpu.memory_space<vmem>>, vector<200x16xbf16>
    %cst = arith.constant dense<0.000000e+00> : vector<512x16xf32>
    %2 = tpu.matmul %0, %1, %cst {dimension_numbers = #tpu.dot_dimension_numbers<[1], [0], [0], [1], [0, 0, 1, 1], [], []>} : vector<512x200xbf16>, vector<200x16xbf16>, vector<512x16xf32> -> vector<512x16xf32>
    %c0_3 = arith.constant 0 : index
    %c0_4 = arith.constant 0 : index
    %3 = vector.load %arg3[%c0_3, %c0_4] : memref<1x16xf32, #tpu.memory_space<vmem>>, vector<1x16xf32>
    %4 = vector.broadcast %3 : vector<1x16xf32> to vector<512x16xf32>
    %5 = arith.addf %2, %4 : vector<512x16xf32>
    %cst_5 = arith.constant 0.000000e+00 : f32
    %6 = vector.broadcast %cst_5 : f32 to vector<512x16xf32>
    %7 = arith.maximumf %5, %6 : vector<512x16xf32>
    %8 = arith.truncf %7 : vector<512x16xf32> to vector<512x16xbf16>
    %c0_6 = arith.constant 0 : index
    %c0_7 = arith.constant 0 : index
    %9 = vector.load %arg4[%c0_6, %c0_7] : memref<512x16xbf16, #tpu.memory_space<vmem>>, vector<512x16xbf16>
    tpu.vector_store %arg4[%c0_6, %c0_7], %8 {strides = array<i32>} : memref<512x16xbf16, #tpu.memory_space<vmem>>, vector<512x16xbf16>,
    return
  }
  func.func @transform_0(%arg0: i32) -> (i32, i32) {
    %c0_i32 = arith.constant 0 : i32
    %c0_i32_0 = arith.constant 0 : i32
    return %arg0, %c0_i32 : i32, i32
  }
  func.func @transform_1(%arg0: i32) -> (i32, i32) {
    %c0_i32 = arith.constant 0 : i32
    %c0_i32_0 = arith.constant 0 : i32
    %c0_i32_1 = arith.constant 0 : i32
    return %c0_i32, %c0_i32_0 : i32, i32
  }
  func.func @transform_2(%arg0: i32) -> (i32, i32) {
    %c0_i32 = arith.constant 0 : i32
    %c0_i32_0 = arith.constant 0 : i32
    %c0_i32_1 = arith.constant 0 : i32
    return %c0_i32, %c0_i32_0 : i32, i32
  }
  func.func @transform_3(%arg0: i32) -> (i32, i32) {
    %c0_i32 = arith.constant 0 : i32
    %c0_i32_0 = arith.constant 0 : i32
    return %arg0, %c0_i32 : i32, i32
  }
}

module attributes {stable_mosaic.version = 11 : i64} {
  func.func @_mm_bias_act_kernel(%arg0: i32, %arg1: memref<450x400xbf16, #tpu.memory_space<vmem>>, %arg2: memref<400x32xbf16, #tpu.memory_space<vmem>>, %arg3: memref<1x32xf32, #tpu.memory_space<vmem>>, %arg4: memref<450x32xbf16, #tpu.memory_space<vmem>>) attributes {dimension_semantics = [#tpu.dimension_semantics<parallel>], iteration_bounds = array<i64: 1>, scalar_prefetch = 0 : i64, scratch_operands = 0 : i64, tpu.core_type = #tpu.core_type<tc>, window_params = [{transform_indices = @transform_0, window_bounds = array<i64: 450, 400>}, {pipeline_mode = #tpu.pipeline_mode<synchronous>, transform_indices = @transform_1, window_bounds = array<i64: 400, 32>}, {pipeline_mode = #tpu.pipeline_mode<synchronous>, transform_indices = @transform_2, window_bounds = array<i64: 1, 32>}, {transform_indices = @transform_3, window_bounds = array<i64: 450, 32>}]} {
    %c0 = arith.constant 0 : index
    %c0_0 = arith.constant 0 : index
    %0 = vector.load %arg1[%c0, %c0_0] : memref<450x400xbf16, #tpu.memory_space<vmem>>, vector<450x400xbf16>
    %c0_1 = arith.constant 0 : index
    %c0_2 = arith.constant 0 : index
    %1 = vector.load %arg2[%c0_1, %c0_2] : memref<400x32xbf16, #tpu.memory_space<vmem>>, vector<400x32xbf16>
    %cst = arith.constant dense<0.000000e+00> : vector<450x32xf32>
    %2 = tpu.matmul %0, %1, %cst {dimension_numbers = #tpu.dot_dimension_numbers<[1], [0], [0], [1], [0, 0, 1, 1], [], []>} : vector<450x400xbf16>, vector<400x32xbf16>, vector<450x32xf32> -> vector<450x32xf32>
    %c0_3 = arith.constant 0 : index
    %c0_4 = arith.constant 0 : index
    %3 = vector.load %arg3[%c0_3, %c0_4] : memref<1x32xf32, #tpu.memory_space<vmem>>, vector<1x32xf32>
    %4 = vector.broadcast %3 : vector<1x32xf32> to vector<450x32xf32>
    %5 = arith.addf %2, %4 : vector<450x32xf32>
    %cst_5 = arith.constant 0.000000e+00 : f32
    %6 = vector.broadcast %cst_5 : f32 to vector<450x32xf32>
    %7 = arith.maximumf %5, %6 : vector<450x32xf32>
    %8 = arith.truncf %7 : vector<450x32xf32> to vector<450x32xbf16>
    %c0_6 = arith.constant 0 : index
    %c0_7 = arith.constant 0 : index
    %9 = vector.load %arg4[%c0_6, %c0_7] : memref<450x32xbf16, #tpu.memory_space<vmem>>, vector<450x32xbf16>
    tpu.vector_store %arg4[%c0_6, %c0_7], %8 {strides = array<i32>} : memref<450x32xbf16, #tpu.memory_space<vmem>>, vector<450x32xbf16>,
    return
  }
  func.func @transform_0(%arg0: i32) -> (i32, i32) {
    %c0_i32 = arith.constant 0 : i32
    %c0_i32_0 = arith.constant 0 : i32
    return %arg0, %c0_i32 : i32, i32
  }
  func.func @transform_1(%arg0: i32) -> (i32, i32) {
    %c0_i32 = arith.constant 0 : i32
    %c0_i32_0 = arith.constant 0 : i32
    %c0_i32_1 = arith.constant 0 : i32
    return %c0_i32, %c0_i32_0 : i32, i32
  }
  func.func @transform_2(%arg0: i32) -> (i32, i32) {
    %c0_i32 = arith.constant 0 : i32
    %c0_i32_0 = arith.constant 0 : i32
    %c0_i32_1 = arith.constant 0 : i32
    return %c0_i32, %c0_i32_0 : i32, i32
  }
  func.func @transform_3(%arg0: i32) -> (i32, i32) {
    %c0_i32 = arith.constant 0 : i32
    %c0_i32_0 = arith.constant 0 : i32
    return %arg0, %c0_i32 : i32, i32
  }
}

module attributes {stable_mosaic.version = 11 : i64} {
  func.func @_mm_bias_act_kernel(%arg0: i32, %arg1: memref<98x288xbf16, #tpu.memory_space<vmem>>, %arg2: memref<288x64xbf16, #tpu.memory_space<vmem>>, %arg3: memref<1x64xf32, #tpu.memory_space<vmem>>, %arg4: memref<98x64xbf16, #tpu.memory_space<vmem>>) attributes {dimension_semantics = [#tpu.dimension_semantics<parallel>], iteration_bounds = array<i64: 1>, scalar_prefetch = 0 : i64, scratch_operands = 0 : i64, tpu.core_type = #tpu.core_type<tc>, window_params = [{transform_indices = @transform_0, window_bounds = array<i64: 98, 288>}, {pipeline_mode = #tpu.pipeline_mode<synchronous>, transform_indices = @transform_1, window_bounds = array<i64: 288, 64>}, {pipeline_mode = #tpu.pipeline_mode<synchronous>, transform_indices = @transform_2, window_bounds = array<i64: 1, 64>}, {transform_indices = @transform_3, window_bounds = array<i64: 98, 64>}]} {
    %c0 = arith.constant 0 : index
    %c0_0 = arith.constant 0 : index
    %0 = vector.load %arg1[%c0, %c0_0] : memref<98x288xbf16, #tpu.memory_space<vmem>>, vector<98x288xbf16>
    %c0_1 = arith.constant 0 : index
    %c0_2 = arith.constant 0 : index
    %1 = vector.load %arg2[%c0_1, %c0_2] : memref<288x64xbf16, #tpu.memory_space<vmem>>, vector<288x64xbf16>
    %cst = arith.constant dense<0.000000e+00> : vector<98x64xf32>
    %2 = tpu.matmul %0, %1, %cst {dimension_numbers = #tpu.dot_dimension_numbers<[1], [0], [0], [1], [0, 0, 1, 1], [], []>} : vector<98x288xbf16>, vector<288x64xbf16>, vector<98x64xf32> -> vector<98x64xf32>
    %c0_3 = arith.constant 0 : index
    %c0_4 = arith.constant 0 : index
    %3 = vector.load %arg3[%c0_3, %c0_4] : memref<1x64xf32, #tpu.memory_space<vmem>>, vector<1x64xf32>
    %4 = vector.broadcast %3 : vector<1x64xf32> to vector<98x64xf32>
    %5 = arith.addf %2, %4 : vector<98x64xf32>
    %cst_5 = arith.constant 0.000000e+00 : f32
    %6 = vector.broadcast %cst_5 : f32 to vector<98x64xf32>
    %7 = arith.maximumf %5, %6 : vector<98x64xf32>
    %8 = arith.truncf %7 : vector<98x64xf32> to vector<98x64xbf16>
    %c0_6 = arith.constant 0 : index
    %c0_7 = arith.constant 0 : index
    %9 = vector.load %arg4[%c0_6, %c0_7] : memref<98x64xbf16, #tpu.memory_space<vmem>>, vector<98x64xbf16>
    tpu.vector_store %arg4[%c0_6, %c0_7], %8 {strides = array<i32>} : memref<98x64xbf16, #tpu.memory_space<vmem>>, vector<98x64xbf16>,
    return
  }
  func.func @transform_0(%arg0: i32) -> (i32, i32) {
    %c0_i32 = arith.constant 0 : i32
    %c0_i32_0 = arith.constant 0 : i32
    return %arg0, %c0_i32 : i32, i32
  }
  func.func @transform_1(%arg0: i32) -> (i32, i32) {
    %c0_i32 = arith.constant 0 : i32
    %c0_i32_0 = arith.constant 0 : i32
    %c0_i32_1 = arith.constant 0 : i32
    return %c0_i32, %c0_i32_0 : i32, i32
  }
  func.func @transform_2(%arg0: i32) -> (i32, i32) {
    %c0_i32 = arith.constant 0 : i32
    %c0_i32_0 = arith.constant 0 : i32
    %c0_i32_1 = arith.constant 0 : i32
    return %c0_i32, %c0_i32_0 : i32, i32
  }
  func.func @transform_3(%arg0: i32) -> (i32, i32) {
    %c0_i32 = arith.constant 0 : i32
    %c0_i32_0 = arith.constant 0 : i32
    return %arg0, %c0_i32 : i32, i32
  }
}

module attributes {stable_mosaic.version = 11 : i64} {
  func.func @_mm_bias_act_kernel(%arg0: i32, %arg1: memref<18x576xbf16, #tpu.memory_space<vmem>>, %arg2: memref<576x128xbf16, #tpu.memory_space<vmem>>, %arg3: memref<1x128xf32, #tpu.memory_space<vmem>>, %arg4: memref<18x128xbf16, #tpu.memory_space<vmem>>) attributes {dimension_semantics = [#tpu.dimension_semantics<parallel>], iteration_bounds = array<i64: 1>, scalar_prefetch = 0 : i64, scratch_operands = 0 : i64, tpu.core_type = #tpu.core_type<tc>, window_params = [{transform_indices = @transform_0, window_bounds = array<i64: 18, 576>}, {pipeline_mode = #tpu.pipeline_mode<synchronous>, transform_indices = @transform_1, window_bounds = array<i64: 576, 128>}, {pipeline_mode = #tpu.pipeline_mode<synchronous>, transform_indices = @transform_2, window_bounds = array<i64: 1, 128>}, {transform_indices = @transform_3, window_bounds = array<i64: 18, 128>}]} {
    %c0 = arith.constant 0 : index
    %c0_0 = arith.constant 0 : index
    %0 = vector.load %arg1[%c0, %c0_0] : memref<18x576xbf16, #tpu.memory_space<vmem>>, vector<18x576xbf16>
    %c0_1 = arith.constant 0 : index
    %c0_2 = arith.constant 0 : index
    %1 = vector.load %arg2[%c0_1, %c0_2] : memref<576x128xbf16, #tpu.memory_space<vmem>>, vector<576x128xbf16>
    %cst = arith.constant dense<0.000000e+00> : vector<18x128xf32>
    %2 = tpu.matmul %0, %1, %cst {dimension_numbers = #tpu.dot_dimension_numbers<[1], [0], [0], [1], [0, 0, 1, 1], [], []>} : vector<18x576xbf16>, vector<576x128xbf16>, vector<18x128xf32> -> vector<18x128xf32>
    %c0_3 = arith.constant 0 : index
    %c0_4 = arith.constant 0 : index
    %3 = vector.load %arg3[%c0_3, %c0_4] : memref<1x128xf32, #tpu.memory_space<vmem>>, vector<1x128xf32>
    %4 = vector.broadcast %3 : vector<1x128xf32> to vector<18x128xf32>
    %5 = arith.addf %2, %4 : vector<18x128xf32>
    %cst_5 = arith.constant 0.000000e+00 : f32
    %6 = vector.broadcast %cst_5 : f32 to vector<18x128xf32>
    %7 = arith.maximumf %5, %6 : vector<18x128xf32>
    %8 = arith.truncf %7 : vector<18x128xf32> to vector<18x128xbf16>
    %c0_6 = arith.constant 0 : index
    %c0_7 = arith.constant 0 : index
    %9 = vector.load %arg4[%c0_6, %c0_7] : memref<18x128xbf16, #tpu.memory_space<vmem>>, vector<18x128xbf16>
    tpu.vector_store %arg4[%c0_6, %c0_7], %8 {strides = array<i32>} : memref<18x128xbf16, #tpu.memory_space<vmem>>, vector<18x128xbf16>,
    return
  }
  func.func @transform_0(%arg0: i32) -> (i32, i32) {
    %c0_i32 = arith.constant 0 : i32
    %c0_i32_0 = arith.constant 0 : i32
    return %arg0, %c0_i32 : i32, i32
  }
  func.func @transform_1(%arg0: i32) -> (i32, i32) {
    %c0_i32 = arith.constant 0 : i32
    %c0_i32_0 = arith.constant 0 : i32
    %c0_i32_1 = arith.constant 0 : i32
    return %c0_i32, %c0_i32_0 : i32, i32
  }
  func.func @transform_2(%arg0: i32) -> (i32, i32) {
    %c0_i32 = arith.constant 0 : i32
    %c0_i32_0 = arith.constant 0 : i32
    %c0_i32_1 = arith.constant 0 : i32
    return %c0_i32, %c0_i32_0 : i32, i32
  }
  func.func @transform_3(%arg0: i32) -> (i32, i32) {
    %c0_i32 = arith.constant 0 : i32
    %c0_i32_0 = arith.constant 0 : i32
    return %arg0, %c0_i32 : i32, i32
  }
}

module attributes {stable_mosaic.version = 11 : i64} {
  func.func @_mm_bias_act_kernel(%arg0: i32, %arg1: memref<2x1152xbf16, #tpu.memory_space<vmem>>, %arg2: memref<1152x256xbf16, #tpu.memory_space<vmem>>, %arg3: memref<1x256xf32, #tpu.memory_space<vmem>>, %arg4: memref<2x256xbf16, #tpu.memory_space<vmem>>) attributes {dimension_semantics = [#tpu.dimension_semantics<parallel>], iteration_bounds = array<i64: 1>, scalar_prefetch = 0 : i64, scratch_operands = 0 : i64, tpu.core_type = #tpu.core_type<tc>, window_params = [{transform_indices = @transform_0, window_bounds = array<i64: 2, 1152>}, {pipeline_mode = #tpu.pipeline_mode<synchronous>, transform_indices = @transform_1, window_bounds = array<i64: 1152, 256>}, {pipeline_mode = #tpu.pipeline_mode<synchronous>, transform_indices = @transform_2, window_bounds = array<i64: 1, 256>}, {transform_indices = @transform_3, window_bounds = array<i64: 2, 256>}]} {
    %c0 = arith.constant 0 : index
    %c0_0 = arith.constant 0 : index
    %0 = vector.load %arg1[%c0, %c0_0] : memref<2x1152xbf16, #tpu.memory_space<vmem>>, vector<2x1152xbf16>
    %c0_1 = arith.constant 0 : index
    %c0_2 = arith.constant 0 : index
    %1 = vector.load %arg2[%c0_1, %c0_2] : memref<1152x256xbf16, #tpu.memory_space<vmem>>, vector<1152x256xbf16>
    %cst = arith.constant dense<0.000000e+00> : vector<2x256xf32>
    %2 = tpu.matmul %0, %1, %cst {dimension_numbers = #tpu.dot_dimension_numbers<[1], [0], [0], [1], [0, 0, 1, 1], [], []>} : vector<2x1152xbf16>, vector<1152x256xbf16>, vector<2x256xf32> -> vector<2x256xf32>
    %c0_3 = arith.constant 0 : index
    %c0_4 = arith.constant 0 : index
    %3 = vector.load %arg3[%c0_3, %c0_4] : memref<1x256xf32, #tpu.memory_space<vmem>>, vector<1x256xf32>
    %4 = vector.broadcast %3 : vector<1x256xf32> to vector<2x256xf32>
    %5 = arith.addf %2, %4 : vector<2x256xf32>
    %cst_5 = arith.constant 0.000000e+00 : f32
    %6 = vector.broadcast %cst_5 : f32 to vector<2x256xf32>
    %7 = arith.maximumf %5, %6 : vector<2x256xf32>
    %8 = arith.truncf %7 : vector<2x256xf32> to vector<2x256xbf16>
    %c0_6 = arith.constant 0 : index
    %c0_7 = arith.constant 0 : index
    %9 = vector.load %arg4[%c0_6, %c0_7] : memref<2x256xbf16, #tpu.memory_space<vmem>>, vector<2x256xbf16>
    tpu.vector_store %arg4[%c0_6, %c0_7], %8 {strides = array<i32>} : memref<2x256xbf16, #tpu.memory_space<vmem>>, vector<2x256xbf16>,
    return
  }
  func.func @transform_0(%arg0: i32) -> (i32, i32) {
    %c0_i32 = arith.constant 0 : i32
    %c0_i32_0 = arith.constant 0 : i32
    return %arg0, %c0_i32 : i32, i32
  }
  func.func @transform_1(%arg0: i32) -> (i32, i32) {
    %c0_i32 = arith.constant 0 : i32
    %c0_i32_0 = arith.constant 0 : i32
    %c0_i32_1 = arith.constant 0 : i32
    return %c0_i32, %c0_i32_0 : i32, i32
  }
  func.func @transform_2(%arg0: i32) -> (i32, i32) {
    %c0_i32 = arith.constant 0 : i32
    %c0_i32_0 = arith.constant 0 : i32
    %c0_i32_1 = arith.constant 0 : i32
    return %c0_i32, %c0_i32_0 : i32, i32
  }
  func.func @transform_3(%arg0: i32) -> (i32, i32) {
    %c0_i32 = arith.constant 0 : i32
    %c0_i32_0 = arith.constant 0 : i32
    return %arg0, %c0_i32 : i32, i32
  }
}

module attributes {stable_mosaic.version = 11 : i64} {
  func.func @_head_kernel(%arg0: i32, %arg1: memref<2x256xbf16, #tpu.memory_space<vmem>>, %arg2: memref<2x8xbf16, #tpu.memory_space<vmem>>, %arg3: memref<8x256xbf16, #tpu.memory_space<vmem>>, %arg4: memref<1x256xf32, #tpu.memory_space<vmem>>, %arg5: memref<256x512xbf16, #tpu.memory_space<vmem>>, %arg6: memref<256x512xbf16, #tpu.memory_space<vmem>>, %arg7: memref<1x512xf32, #tpu.memory_space<vmem>>, %arg8: memref<512x256xbf16, #tpu.memory_space<vmem>>, %arg9: memref<1x256xf32, #tpu.memory_space<vmem>>, %arg10: memref<2x256xf32, #tpu.memory_space<vmem>>) attributes {dimension_semantics = [#tpu.dimension_semantics<arbitrary>], iteration_bounds = array<i64: 1>, scalar_prefetch = 0 : i64, scratch_operands = 0 : i64, tpu.core_type = #tpu.core_type<tc>, window_params = [{pipeline_mode = #tpu.pipeline_mode<synchronous>, transform_indices = @transform_0, window_bounds = array<i64: 2, 256>}, {pipeline_mode = #tpu.pipeline_mode<synchronous>, transform_indices = @transform_1, window_bounds = array<i64: 2, 8>}, {pipeline_mode = #tpu.pipeline_mode<synchronous>, transform_indices = @transform_2, window_bounds = array<i64: 8, 256>}, {pipeline_mode = #tpu.pipeline_mode<synchronous>, transform_indices = @transform_3, window_bounds = array<i64: 1, 256>}, {pipeline_mode = #tpu.pipeline_mode<synchronous>, transform_indices = @transform_4, window_bounds = array<i64: 256, 512>}, {pipeline_mode = #tpu.pipeline_mode<synchronous>, transform_indices = @transform_5, window_bounds = array<i64: 256, 512>}, {pipeline_mode = #tpu.pipeline_mode<synchronous>, transform_indices = @transform_6, window_bounds = array<i64: 1, 512>}, {pipeline_mode = #tpu.pipeline_mode<synchronous>, transform_indices = @transform_7, window_bounds = array<i64: 512, 256>}, {pipeline_mode = #tpu.pipeline_mode<synchronous>, transform_indices = @transform_8, window_bounds = array<i64: 1, 256>}, {pipeline_mode = #tpu.pipeline_mode<synchronous>, transform_indices = @transform_9, window_bounds = array<i64: 2, 256>}]} {
    %c0 = arith.constant 0 : index
    %c0_0 = arith.constant 0 : index
    %0 = vector.load %arg2[%c0, %c0_0] : memref<2x8xbf16, #tpu.memory_space<vmem>>, vector<2x8xbf16>
    %c0_1 = arith.constant 0 : index
    %c0_2 = arith.constant 0 : index
    %1 = vector.load %arg3[%c0_1, %c0_2] : memref<8x256xbf16, #tpu.memory_space<vmem>>, vector<8x256xbf16>
    %cst = arith.constant dense<0.000000e+00> : vector<2x256xf32>
    %2 = tpu.matmul %0, %1, %cst {dimension_numbers = #tpu.dot_dimension_numbers<[1], [0], [0], [1], [0, 0, 1, 1], [], []>} : vector<2x8xbf16>, vector<8x256xbf16>, vector<2x256xf32> -> vector<2x256xf32>
    %c0_3 = arith.constant 0 : index
    %c0_4 = arith.constant 0 : index
    %3 = vector.load %arg4[%c0_3, %c0_4] : memref<1x256xf32, #tpu.memory_space<vmem>>, vector<1x256xf32>
    %4 = vector.broadcast %3 : vector<1x256xf32> to vector<2x256xf32>
    %5 = arith.addf %2, %4 : vector<2x256xf32>
    %cst_5 = arith.constant 0.000000e+00 : f32
    %6 = vector.broadcast %cst_5 : f32 to vector<2x256xf32>
    %7 = arith.maximumf %5, %6 : vector<2x256xf32>
    %c0_6 = arith.constant 0 : index
    %c0_7 = arith.constant 0 : index
    %8 = vector.load %arg1[%c0_6, %c0_7] : memref<2x256xbf16, #tpu.memory_space<vmem>>, vector<2x256xbf16>
    %c0_8 = arith.constant 0 : index
    %c0_9 = arith.constant 0 : index
    %9 = vector.load %arg5[%c0_8, %c0_9] : memref<256x512xbf16, #tpu.memory_space<vmem>>, vector<256x512xbf16>
    %cst_10 = arith.constant dense<0.000000e+00> : vector<2x512xf32>
    %10 = tpu.matmul %8, %9, %cst_10 {dimension_numbers = #tpu.dot_dimension_numbers<[1], [0], [0], [1], [0, 0, 1, 1], [], []>} : vector<2x256xbf16>, vector<256x512xbf16>, vector<2x512xf32> -> vector<2x512xf32>
    %11 = arith.truncf %7 : vector<2x256xf32> to vector<2x256xbf16>
    %c0_11 = arith.constant 0 : index
    %c0_12 = arith.constant 0 : index
    %12 = vector.load %arg6[%c0_11, %c0_12] : memref<256x512xbf16, #tpu.memory_space<vmem>>, vector<256x512xbf16>
    %cst_13 = arith.constant dense<0.000000e+00> : vector<2x512xf32>
    %13 = tpu.matmul %11, %12, %cst_13 {dimension_numbers = #tpu.dot_dimension_numbers<[1], [0], [0], [1], [0, 0, 1, 1], [], []>} : vector<2x256xbf16>, vector<256x512xbf16>, vector<2x512xf32> -> vector<2x512xf32>
    %14 = arith.addf %10, %13 : vector<2x512xf32>
    %c0_14 = arith.constant 0 : index
    %c0_15 = arith.constant 0 : index
    %15 = vector.load %arg7[%c0_14, %c0_15] : memref<1x512xf32, #tpu.memory_space<vmem>>, vector<1x512xf32>
    %16 = vector.broadcast %15 : vector<1x512xf32> to vector<2x512xf32>
    %17 = arith.addf %14, %16 : vector<2x512xf32>
    %cst_16 = arith.constant 0.000000e+00 : f32
    %18 = vector.broadcast %cst_16 : f32 to vector<2x512xf32>
    %19 = arith.maximumf %17, %18 : vector<2x512xf32>
    %20 = arith.truncf %19 : vector<2x512xf32> to vector<2x512xbf16>
    %c0_17 = arith.constant 0 : index
    %c0_18 = arith.constant 0 : index
    %21 = vector.load %arg8[%c0_17, %c0_18] : memref<512x256xbf16, #tpu.memory_space<vmem>>, vector<512x256xbf16>
    %cst_19 = arith.constant dense<0.000000e+00> : vector<2x256xf32>
    %22 = tpu.matmul %20, %21, %cst_19 {dimension_numbers = #tpu.dot_dimension_numbers<[1], [0], [0], [1], [0, 0, 1, 1], [], []>} : vector<2x512xbf16>, vector<512x256xbf16>, vector<2x256xf32> -> vector<2x256xf32>
    %c0_20 = arith.constant 0 : index
    %c0_21 = arith.constant 0 : index
    %23 = vector.load %arg9[%c0_20, %c0_21] : memref<1x256xf32, #tpu.memory_space<vmem>>, vector<1x256xf32>
    %24 = vector.broadcast %23 : vector<1x256xf32> to vector<2x256xf32>
    %25 = arith.addf %22, %24 : vector<2x256xf32>
    %cst_22 = arith.constant 0.000000e+00 : f32
    %26 = vector.broadcast %cst_22 : f32 to vector<2x256xf32>
    %27 = arith.maximumf %25, %26 : vector<2x256xf32>
    %c0_23 = arith.constant 0 : index
    %c0_24 = arith.constant 0 : index
    %28 = vector.load %arg10[%c0_23, %c0_24] : memref<2x256xf32, #tpu.memory_space<vmem>>, vector<2x256xf32>
    tpu.vector_store %arg10[%c0_23, %c0_24], %27 {strides = array<i32>} : memref<2x256xf32, #tpu.memory_space<vmem>>, vector<2x256xf32>,
    return
  }
  func.func @transform_0(%arg0: i32) -> (i32, i32) {
    %c0_i32 = arith.constant 0 : i32
    %c0_i32_0 = arith.constant 0 : i32
    %c0_i32_1 = arith.constant 0 : i32
    return %c0_i32, %c0_i32_0 : i32, i32
  }
  func.func @transform_1(%arg0: i32) -> (i32, i32) {
    %c0_i32 = arith.constant 0 : i32
    %c0_i32_0 = arith.constant 0 : i32
    %c0_i32_1 = arith.constant 0 : i32
    return %c0_i32, %c0_i32_0 : i32, i32
  }
  func.func @transform_2(%arg0: i32) -> (i32, i32) {
    %c0_i32 = arith.constant 0 : i32
    %c0_i32_0 = arith.constant 0 : i32
    %c0_i32_1 = arith.constant 0 : i32
    return %c0_i32, %c0_i32_0 : i32, i32
  }
  func.func @transform_3(%arg0: i32) -> (i32, i32) {
    %c0_i32 = arith.constant 0 : i32
    %c0_i32_0 = arith.constant 0 : i32
    %c0_i32_1 = arith.constant 0 : i32
    return %c0_i32, %c0_i32_0 : i32, i32
  }
  func.func @transform_4(%arg0: i32) -> (i32, i32) {
    %c0_i32 = arith.constant 0 : i32
    %c0_i32_0 = arith.constant 0 : i32
    %c0_i32_1 = arith.constant 0 : i32
    return %c0_i32, %c0_i32_0 : i32, i32
  }
  func.func @transform_5(%arg0: i32) -> (i32, i32) {
    %c0_i32 = arith.constant 0 : i32
    %c0_i32_0 = arith.constant 0 : i32
    %c0_i32_1 = arith.constant 0 : i32
    return %c0_i32, %c0_i32_0 : i32, i32
  }
  func.func @transform_6(%arg0: i32) -> (i32, i32) {
    %c0_i32 = arith.constant 0 : i32
    %c0_i32_0 = arith.constant 0 : i32
    %c0_i32_1 = arith.constant 0 : i32
    return %c0_i32, %c0_i32_0 : i32, i32
  }
  func.func @transform_7(%arg0: i32) -> (i32, i32) {
    %c0_i32 = arith.constant 0 : i32
    %c0_i32_0 = arith.constant 0 : i32
    %c0_i32_1 = arith.constant 0 : i32
    return %c0_i32, %c0_i32_0 : i32, i32
  }
  func.func @transform_8(%arg0: i32) -> (i32, i32) {
    %c0_i32 = arith.constant 0 : i32
    %c0_i32_0 = arith.constant 0 : i32
    %c0_i32_1 = arith.constant 0 : i32
    return %c0_i32, %c0_i32_0 : i32, i32
  }
  func.func @transform_9(%arg0: i32) -> (i32, i32) {
    %c0_i32 = arith.constant 0 : i32
    %c0_i32_0 = arith.constant 0 : i32
    %c0_i32_1 = arith.constant 0 : i32
    return %c0_i32, %c0_i32_0 : i32, i32
  }
}

</mosaic_0001>

<bundles_post_ra>
// kernel: xtma_cnn_forward.7
= control target key start
LH: loop header
LB: loop body
LE: loop exit
PB: predicated region body
PF: predicated region fallthrough
CT: control target
= control target key end

     0   :  { %s2312_s12 = smov 0   ;;  %s2314_s13 = smov 0   ;;  %s2835_s0 = inlined_call_operand.vmem [shape: bf16[9800,100], index: 0, kind: input, shape index: {}]   ;;  %s2836_s1 = inlined_call_operand.vmem [shape: bf16[100,8], index: 1, kind: input, shape index: {}]   ;;  %s2837_s2 = inlined_call_operand.vmem [shape: f32[1,8], index: 2, kind: input, shape index: {}]   ;;  %s2838_s3 = inlined_call_operand.vmem [shape: bf16[9800,8], index: 3, kind: output, shape index: {}]  }
   0x1   :  { %s2316_s14 = smov 0  }
   0x2 LB: > { %s2325_s15 = sadd.s32 4294967295, %s2258_s14   ;;  %s2327_s16 = sadd.s32 1, %s2258_s14   ;;  %s2258_s14 = sphi %s2316_s14, %s2845_s14   ;;  %s2254_s13 = sphi %s2314_s13, %s2844_s13   ;;  %s2250_s12 = sphi %s2312_s12, %s2843_s12  }
   0x3   : > { %s85_s17 = ssub.s32 %s2258_s14, %s2327_s16  ;;  %s88_s18 = sadd.s32 1, %s2254_s13 }
   0x4   : > { %p86_p0 = scmp.eq.s32.totalorder %s85_s17, 0  ;;  %p98_p1 = scmp.ne.s32.totalorder %s2254_s13, %s2250_s12 }
   0x5   : > { %p99_p2 = scmp.eq.s32.totalorder %s2325_s15, 19  ;;  %p1720_p3 = scmp.ge.s32.totalorder %s2258_s14, 1 }
   0x6   : > { %s2335_s19 = scalar_select %p86_p0, %s2254_s13, %s88_s18  }
   0x7   : > { %p2337_p4 = por %p99_p2, %p98_p1  ;;  %p146_p5 = scmp.lt.s32.totalorder %s2258_s14, 21 }
   0x9   : > { %p147_p6 = pnand %p1720_p3, %p146_p5 }
   0xa   : > { %v2165_v0 = vld [vmem:[%s2836_s1] sm:$0xff] (!%p147_p6)   ;;  %v2166_v1 = vld [vmem:[%s2836_s1 + $0x8] sm:$0xff] (!%p147_p6)   ;;  %s2348_s25 = sshll.u32 (!%p147_p6), %s2325_s15, 6  ;;  %v2167_v2 = vld [vmem:[%s2836_s1 + $0x10] sm:$0xff] (!%p147_p6)   ;;  %vm476_vm0 = vcmask (!%p147_p6), 818176   ;;  %vm573_vm1 = vcmask (!%p147_p6), 1041408  }
   0xb   : > { %150 = sbr.rel (%p147_p6) target bundleno = 409 (0x199), region = 32  ;;  %1983 = vmatprep.subr.bf16.mxu0 (!%p147_p6), %v2165_v0  ;;  %2061 = vmatprep.subr.bf16.mxu1 (!%p147_p6), %v2165_v0  ;;  %p178_p7 = scmp.lt.s32.totalorder (!%p147_p6), %s2348_s25, 1224  ;;  %v2168_v3 = vld [vmem:[%s2836_s1 + $0x18] sm:$0xff] (!%p147_p6)   ;;  %v2169_v6 = vld [vmem:[%s2836_s1 + $0x20] sm:$0xff] (!%p147_p6)   ;;  %v2170_v7 = vld [vmem:[%s2836_s1 + $0x28] sm:$0xff] (!%p147_p6)   ;;  %vm1186_vm2 = vcmask (!%p147_p6), 60416  }
   0xc   : > { %1984 = vmatpush3.bf16.msra.mxu0 (!%p147_p6), %v2165_v0  ;;  %2068 = vmatpush3.bf16.msra.mxu1 (!%p147_p6), %v2165_v0  ;;  %v2171_v8 = vld [vmem:[%s2836_s1 + $0x30] ss:$0 sps:$4 sm:$0x33] (!%p147_p6)   ;;  %s170_s18 = sand.u32 (!%p147_p6), 1, %s2250_s12   ;;  %v2440_v40 = vld [vmem:[%s2837_s2] ss:$0 sm:$0xff] (!%p147_p6) }
   0xd   : > { %1985 = vmatprep.subr.bf16.mxu0 (!%p147_p6), %v2166_v1  ;;  %2062 = vmatprep.subr.bf16.mxu1 (!%p147_p6), %v2166_v1  ;;  %v575_v9 = vsel (!%p147_p6), %vm573_vm1, %v2171_v8, 0  ;;  %s1721_s23 = sshll.u32 (!%p147_p6), %s170_s18, 8 }
   0xe   : > { %s2450_s12 = scalar_lea.vmem (!%p147_p6), [#allocation2], %s1721_s23  }
  0x10   : > { %1986 = vmatpush3.bf16.msra.mxu0 (!%p147_p6), %v2166_v1  ;;  %2069 = vmatpush3.bf16.msra.mxu1 (!%p147_p6), %v2166_v1 }
  0x11   : > { %1987 = vmatprep.subr.bf16.mxu0 (!%p147_p6), %v2167_v2  ;;  %2063 = vmatprep.subr.bf16.mxu1 (!%p147_p6), %v2167_v2 }
  0x12   : > { %s179_s28 = scalar_select %p178_p7, %s2348_s25, 1224 }
  0x13   : > { %s1259_s24 = ssub.s32 (%p2337_p4), 1225, %s2348_s25  ;;  %s1941_s26 = sshll.u32 (%p2337_p4), %s2325_s15, 8 }
  0x14   : > { %s1723_s29 = sshll.u32 %s179_s28, 2  ;;  %1988 = vmatpush3.bf16.msra.mxu0 %v2167_v2  ;;  %2070 = vmatpush3.bf16.msra.mxu1 %v2167_v2  ;;  %p1260_p8 = scmp.lt.s32.totalorder (%p2337_p4), %s1259_s24, 64 }
  0x15   : > { %s2361_s7 = scalar_lea.vmem %s2835_s0, %s1723_s29  ;;  %1989 = vmatprep.subr.bf16.mxu0 %v2168_v3  ;;  %2064 = vmatprep.subr.bf16.mxu1 %v2168_v3  ;;  %s2643_s29 = scalar_lea.vmem (%p2337_p4), %s2838_s3, %s1941_s26  }
  0x16   : > { %v2172_v4 = vld [vmem:[%s2361_s7] sm:$0xff]   ;;  %v2174_v10 = vld [vmem:[%s2361_s7 + $0x8] sm:$0xff]   ;;  %v2176_v12 = vld [vmem:[%s2361_s7 + $0x10] sm:$0xff]  }
  0x17   : > { %v2173_v5 = vld [vmem:[%s2361_s7 + $0x80] sm:$0xff]   ;;  %1997 = vmatprep.mubr.msk.bf16.mxu0 %vm476_vm0, %v2172_v4  ;;  %v2175_v11 = vld [vmem:[%s2361_s7 + $0x88] sm:$0xff]   ;;  %v2177_v13 = vld [vmem:[%s2361_s7 + $0x90] sm:$0xff]  }
  0x18   : > { %2029 = vmatprep.mubr.msk.bf16.mxu1 %vm476_vm0, %v2173_v5  ;;  %1990 = vmatpush3.bf16.msra.mxu0 %v2168_v3  ;;  %v2178_v14 = vld [vmem:[%s2361_s7 + $0x18] sm:$0xff]   ;;  %v2180_v16 = vld [vmem:[%s2361_s7 + $0x20] sm:$0xff]   ;;  %v2182_v18 = vld [vmem:[%s2361_s7 + $0x28] sm:$0xff]  }
  0x19   : > { %2071 = vmatpush3.bf16.msra.mxu1 %v2168_v3  ;;  %1991 = vmatprep.subr.bf16.mxu0 %v2169_v6  ;;  %v2179_v15 = vld [vmem:[%s2361_s7 + $0x98] sm:$0xff]   ;;  %v2181_v17 = vld [vmem:[%s2361_s7 + $0xa0] sm:$0xff]   ;;  %v2183_v19 = vld [vmem:[%s2361_s7 + $0xa8] sm:$0xff]  }
  0x1a   : > { %2065 = vmatprep.subr.bf16.mxu1 %v2169_v6  ;;  %v2184_v20 = vld [vmem:[%s2361_s7 + $0x30] sm:$0xff]   ;;  %v2186_v22 = vld [vmem:[%s2361_s7 + $0x38] sm:$0xff]   ;;  %v2188_v24 = vld [vmem:[%s2361_s7 + $0x40] sm:$0xff]  }
  0x1b   : > { %v2185_v21 = vld [vmem:[%s2361_s7 + $0xb0] sm:$0xff]   ;;  %v2187_v23 = vld [vmem:[%s2361_s7 + $0xb8] sm:$0xff]   ;;  %v2189_v25 = vld [vmem:[%s2361_s7 + $0xc0] sm:$0xff]  }
  0x1c   : > { %1992 = vmatpush3.bf16.msra.mxu0 %v2169_v6  ;;  %v2190_v26 = vld [vmem:[%s2361_s7 + $0x48] sm:$0xff]   ;;  %v2192_v28 = vld [vmem:[%s2361_s7 + $0x50] sm:$0xff]   ;;  %v2194_v30 = vld [vmem:[%s2361_s7 + $0x58] sm:$0xff]  }
  0x1d   : > { %2072 = vmatpush3.bf16.msra.mxu1 %v2169_v6  ;;  %1993 = vmatprep.subr.bf16.mxu0 %v2170_v7  ;;  %v2191_v27 = vld [vmem:[%s2361_s7 + $0xc8] sm:$0xff]   ;;  %v2193_v29 = vld [vmem:[%s2361_s7 + $0xd0] sm:$0xff]   ;;  %v2195_v31 = vld [vmem:[%s2361_s7 + $0xd8] sm:$0xff]  }
  0x1e   : > { %2066 = vmatprep.subr.bf16.mxu1 %v2170_v7  ;;  %v2196_v32 = vld [vmem:[%s2361_s7 + $0x60] sm:$0xff]   ;;  %v2198_v34 = vld [vmem:[%s2361_s7 + $0x68] sm:$0xff]   ;;  %v2200_v36 = vld [vmem:[%s2361_s7 + $0x70] sm:$0xff]  }
  0x1f   : > { %v2197_v33 = vld [vmem:[%s2361_s7 + $0xe0] sm:$0xff]   ;;  %v2199_v35 = vld [vmem:[%s2361_s7 + $0xe8] sm:$0xff]   ;;  %v2201_v37 = vld [vmem:[%s2361_s7 + $0xf0] sm:$0xff]  }
  0x20   : > { %1994 = vmatpush3.bf16.msra.mxu0 %v2170_v7  ;;  %v2202_v38 = vld [vmem:[%s2361_s7 + $0x78] sm:$0xff]  }
  0x21   : > { %2073 = vmatpush3.bf16.msra.mxu1 %v2170_v7  ;;  %2075 = vmatprep.subr.msk.bf16.mxu0 %vm573_vm1, %v2171_v8  ;;  %v2203_v39 = vld [vmem:[%s2361_s7 + $0xf8] sm:$0xff]  }
  0x22   : > { %2076 = vmatprep.subr.msk.bf16.mxu1 %vm573_vm1, %v2171_v8 }
  0x24   : > { %1996 = vmatpush3.bf16.msra.mxu0 %v575_v9 }
  0x25   : > { %2074 = vmatpush3.bf16.msra.mxu1 %v575_v9 }
  0x27   : > { %1998 = vmatmul.mubr.msk.bf16.vlgmr.msra.gmra.mrb[0].mxu0 %vm476_vm0, %v2174_v10 }
  0x28   : > { %2030 = vmatmul.mubr.msk.bf16.vlgmr.msra.gmra.mrb[0].mxu1 %vm476_vm0, %v2175_v11  ;;  %2001 = vmatprep.mubr.msk.bf16.mxu0 %vm476_vm0, %v2176_v12 }
  0x29   : > { %2033 = vmatprep.mubr.msk.bf16.mxu1 %vm476_vm0, %v2177_v13 }
  0x2f   : > { %2002 = vmatmul.mubr.msk.bf16.gmra.mrb[4].mxu0 %vm476_vm0, %v2178_v14 }
  0x30   : > { %2034 = vmatmul.mubr.msk.bf16.gmra.mrb[4].mxu1 %vm476_vm0, %v2179_v15  ;;  %2005 = vmatprep.mubr.msk.bf16.mxu0 %vm476_vm0, %v2180_v16 }
  0x31   : > { %2037 = vmatprep.mubr.msk.bf16.mxu1 %vm476_vm0, %v2181_v17 }
  0x37   : > { %2006 = vmatmul.mubr.msk.bf16.gmra.mrb[8].mxu0 %vm476_vm0, %v2182_v18 }
  0x38   : > { %2038 = vmatmul.mubr.msk.bf16.gmra.mrb[8].mxu1 %vm476_vm0, %v2183_v19  ;;  %2009 = vmatprep.mubr.msk.bf16.mxu0 %vm476_vm0, %v2184_v20 }
  0x39   : > { %2041 = vmatprep.mubr.msk.bf16.mxu1 %vm476_vm0, %v2185_v21 }
  0x3f   : > { %2010 = vmatmul.mubr.msk.bf16.gmra.mrb[12].mxu0 %vm476_vm0, %v2186_v22 }
  0x40   : > { %2042 = vmatmul.mubr.msk.bf16.gmra.mrb[12].mxu1 %vm476_vm0, %v2187_v23  ;;  %2013 = vmatprep.mubr.msk.bf16.mxu0 %vm476_vm0, %v2188_v24 }
  0x41   : > { %2045 = vmatprep.mubr.msk.bf16.mxu1 %vm476_vm0, %v2189_v25 }
  0x47   : > { %2014 = vmatmul.mubr.msk.bf16.gmra.mrb[16].mxu0 %vm476_vm0, %v2190_v26 }
  0x48   : > { %2046 = vmatmul.mubr.msk.bf16.gmra.mrb[16].mxu1 %vm476_vm0, %v2191_v27  ;;  %2017 = vmatprep.mubr.msk.bf16.mxu0 %vm476_vm0, %v2192_v28 }
  0x49   : > { %2049 = vmatprep.mubr.msk.bf16.mxu1 %vm476_vm0, %v2193_v29 }
  0x4f   : > { %2018 = vmatmul.mubr.msk.bf16.gmra.mrb[20].mxu0 %vm476_vm0, %v2194_v30 }
  0x50   : > { %2050 = vmatmul.mubr.msk.bf16.gmra.mrb[20].mxu1 %vm476_vm0, %v2195_v31  ;;  %2021 = vmatprep.mubr.msk.bf16.mxu0 %vm476_vm0, %v2196_v32 }
  0x51   : > { %2053 = vmatprep.mubr.msk.bf16.mxu1 %vm476_vm0, %v2197_v33 }
  0x57   : > { %2022 = vmatmul.mubr.msk.bf16.gmra.mrb[24].mxu0 %vm476_vm0, %v2198_v34 }
  0x58   : > { %2054 = vmatmul.mubr.msk.bf16.gmra.mrb[24].mxu1 %vm476_vm0, %v2199_v35  ;;  %2025 = vmatprep.mubr.msk.bf16.mxu0 %vm476_vm0, %v2200_v36 }
  0x59   : > { %2057 = vmatprep.mubr.msk.bf16.mxu1 %vm476_vm0, %v2201_v37 }
  0x5f   : > { %2026 = vmatmul.mubr.msk.bf16.gmra.mrb[28].mxu0 %vm476_vm0, %v2202_v38 }
  0x60   : > { %2058 = vmatmul.mubr.msk.bf16.gmra.mrb[28].mxu1 %vm476_vm0, %v2203_v39 }
  0xfa   : > { %v1999_v41 = vpop.f32.mrb[0].mxu0 }
  0xfb   : > { %v2031_v42 = vpop.f32.mrb[0].mxu1  ;;  %v620_v43 = vadd.f32 %v1999_v41, %v2440_v40  ;;  %v611_v45 = vpop.f32.mrb[1].mxu0 }
  0xfc   : > { %v748_v44 = vadd.f32 %v2031_v42, %v2440_v40  ;;  %v739_v46 = vpop.f32.mrb[1].mxu1  ;;  %v612_v47 = vadd.f32 %v2440_v40, %v611_v45  ;;  %v2000_v49 = vpop.f32.mrb[2].mxu0 }
  0xfd   : > { %v740_v48 = vadd.f32 %v2440_v40, %v739_v46  ;;  %v2032_v50 = vpop.f32.mrb[2].mxu1  ;;  %v868_v51 = vmax.f32 %v620_v43, 0.0  ;;  %v623_v53 = vadd.f32 %v2000_v49, %v2440_v40  ;;  %v614_v55 = vpop.f32.mrb[3].mxu0 }
  0xfe   : > { %v900_v52 = vmax.f32 %v748_v44, 0.0  ;;  %v751_v54 = vadd.f32 %v2032_v50, %v2440_v40  ;;  %v742_v56 = vpop.f32.mrb[3].mxu1  ;;  %v866_v57 = vmax.f32 %v612_v47, 0.0  ;;  %v615_v59 = vadd.f32 %v2440_v40, %v614_v55 }
  0xff   : > { %v898_v58 = vmax.f32 %v740_v48, 0.0  ;;  %v743_v60 = vadd.f32 %v2440_v40, %v742_v56  ;;  %v1879_v61 = vpack.c.bf16 %v868_v51, %v868_v51  ;;  %v869_v63 = vmax.f32 %v623_v53, 0.0 }
 0x100   : > { %v1911_v62 = vpack.c.bf16 %v900_v52, %v900_v52  ;;  %v901_v0 = vmax.f32 %v751_v54, 0.0  ;;  %v1877_v1 = vpack.c.bf16 %v866_v57, %v866_v57  ;;  %v867_v3 = vmax.f32 %v615_v59, 0.0 }
 0x101   : > { %v1909_v2 = vpack.c.bf16 %v898_v58, %v898_v58  ;;  %v899_v4 = vmax.f32 %v743_v60, 0.0  ;;  %1189 = vst.msk [vmem:[%s2450_s12 + $0x8] sm:$0xf] %vm1186_vm2, %v1879_v61  ;;  %v1880_v5 = vpack.c.bf16 %v869_v63, %v869_v63 }
 0x102   : > { %1221 = vst.msk [vmem:[%s2450_s12 + $0x88] sm:$0xf] %vm1186_vm2, %v1911_v62  ;;  %v1912_v6 = vpack.c.bf16 %v901_v0, %v901_v0  ;;  %1187 = vst.msk [vmem:[%s2450_s12] sm:$0xf] %vm1186_vm2, %v1877_v1  ;;  %v1878_v7 = vpack.c.bf16 %v867_v3, %v867_v3  ;;  %v2003_v9 = vpop.f32.mrb[4].mxu0 }
 0x103   : > { %1219 = vst.msk [vmem:[%s2450_s12 + $0x80] sm:$0xf] %vm1186_vm2, %v1909_v2  ;;  %v1910_v8 = vpack.c.bf16 %v899_v4, %v899_v4  ;;  %v2035_v10 = vpop.f32.mrb[4].mxu1  ;;  %1190 = vst.msk [vmem:[%s2450_s12 + $0xc] sm:$0xf] %vm1186_vm2, %v1880_v5  ;;  %v636_v11 = vadd.f32 %v2003_v9, %v2440_v40  ;;  %v627_v13 = vpop.f32.mrb[5].mxu0 }
 0x104   : > { %1222 = vst.msk [vmem:[%s2450_s12 + $0x8c] sm:$0xf] %vm1186_vm2, %v1912_v6  ;;  %v764_v12 = vadd.f32 %v2035_v10, %v2440_v40  ;;  %v755_v14 = vpop.f32.mrb[5].mxu1  ;;  %1188 = vst.msk [vmem:[%s2450_s12 + $0x4] sm:$0xf] %vm1186_vm2, %v1878_v7  ;;  %v628_v15 = vadd.f32 %v2440_v40, %v627_v13  ;;  %v2004_v17 = vpop.f32.mrb[6].mxu0 }
 0x105   : > { %1220 = vst.msk [vmem:[%s2450_s12 + $0x84] sm:$0xf] %vm1186_vm2, %v1910_v8  ;;  %v756_v16 = vadd.f32 %v2440_v40, %v755_v14  ;;  %v2036_v18 = vpop.f32.mrb[6].mxu1  ;;  %v872_v19 = vmax.f32 %v636_v11, 0.0  ;;  %v639_v21 = vadd.f32 %v2004_v17, %v2440_v40  ;;  %v630_v23 = vpop.f32.mrb[7].mxu0 }
 0x106   : > { %v904_v20 = vmax.f32 %v764_v12, 0.0  ;;  %v767_v22 = vadd.f32 %v2036_v18, %v2440_v40  ;;  %v758_v24 = vpop.f32.mrb[7].mxu1  ;;  %v870_v25 = vmax.f32 %v628_v15, 0.0  ;;  %v631_v27 = vadd.f32 %v2440_v40, %v630_v23 }
 0x107   : > { %v902_v26 = vmax.f32 %v756_v16, 0.0  ;;  %v759_v28 = vadd.f32 %v2440_v40, %v758_v24  ;;  %v1883_v29 = vpack.c.bf16 %v872_v19, %v872_v19  ;;  %v873_v31 = vmax.f32 %v639_v21, 0.0 }
 0x108   : > { %v1915_v30 = vpack.c.bf16 %v904_v20, %v904_v20  ;;  %v905_v32 = vmax.f32 %v767_v22, 0.0  ;;  %v1881_v33 = vpack.c.bf16 %v870_v25, %v870_v25  ;;  %v871_v35 = vmax.f32 %v631_v27, 0.0 }
 0x109   : > { %v1913_v34 = vpack.c.bf16 %v902_v26, %v902_v26  ;;  %v903_v36 = vmax.f32 %v759_v28, 0.0  ;;  %1193 = vst.msk [vmem:[%s2450_s12 + $0x18] sm:$0xf] %vm1186_vm2, %v1883_v29  ;;  %v1884_v37 = vpack.c.bf16 %v873_v31, %v873_v31 }
 0x10a   : > { %1225 = vst.msk [vmem:[%s2450_s12 + $0x98] sm:$0xf] %vm1186_vm2, %v1915_v30  ;;  %v1916_v38 = vpack.c.bf16 %v905_v32, %v905_v32  ;;  %1191 = vst.msk [vmem:[%s2450_s12 + $0x10] sm:$0xf] %vm1186_vm2, %v1881_v33  ;;  %v1882_v39 = vpack.c.bf16 %v871_v35, %v871_v35  ;;  %v2007_v42 = vpop.f32.mrb[8].mxu0 }
 0x10b   : > { %1223 = vst.msk [vmem:[%s2450_s12 + $0x90] sm:$0xf] %vm1186_vm2, %v1913_v34  ;;  %v1914_v41 = vpack.c.bf16 %v903_v36, %v903_v36  ;;  %v2039_v43 = vpop.f32.mrb[8].mxu1  ;;  %1194 = vst.msk [vmem:[%s2450_s12 + $0x1c] sm:$0xf] %vm1186_vm2, %v1884_v37  ;;  %v652_v44 = vadd.f32 %v2007_v42, %v2440_v40  ;;  %v643_v46 = vpop.f32.mrb[9].mxu0 }
 0x10c   : > { %1226 = vst.msk [vmem:[%s2450_s12 + $0x9c] sm:$0xf] %vm1186_vm2, %v1916_v38  ;;  %v780_v45 = vadd.f32 %v2039_v43, %v2440_v40  ;;  %v771_v47 = vpop.f32.mrb[9].mxu1  ;;  %1192 = vst.msk [vmem:[%s2450_s12 + $0x14] sm:$0xf] %vm1186_vm2, %v1882_v39  ;;  %v644_v48 = vadd.f32 %v2440_v40, %v643_v46  ;;  %v2008_v50 = vpop.f32.mrb[10].mxu0 }
 0x10d   : > { %1224 = vst.msk [vmem:[%s2450_s12 + $0x94] sm:$0xf] %vm1186_vm2, %v1914_v41  ;;  %v772_v49 = vadd.f32 %v2440_v40, %v771_v47  ;;  %v2040_v51 = vpop.f32.mrb[10].mxu1  ;;  %v876_v52 = vmax.f32 %v652_v44, 0.0  ;;  %v655_v54 = vadd.f32 %v2008_v50, %v2440_v40  ;;  %v646_v56 = vpop.f32.mrb[11].mxu0 }
 0x10e   : > { %v908_v53 = vmax.f32 %v780_v45, 0.0  ;;  %v783_v55 = vadd.f32 %v2040_v51, %v2440_v40  ;;  %v774_v57 = vpop.f32.mrb[11].mxu1  ;;  %v874_v58 = vmax.f32 %v644_v48, 0.0  ;;  %v647_v60 = vadd.f32 %v2440_v40, %v646_v56 }
 0x10f   : > { %v906_v59 = vmax.f32 %v772_v49, 0.0  ;;  %v775_v61 = vadd.f32 %v2440_v40, %v774_v57  ;;  %v1887_v62 = vpack.c.bf16 %v876_v52, %v876_v52  ;;  %v877_v0 = vmax.f32 %v655_v54, 0.0 }
 0x110   : > { %v1919_v63 = vpack.c.bf16 %v908_v53, %v908_v53  ;;  %v909_v1 = vmax.f32 %v783_v55, 0.0  ;;  %v1885_v2 = vpack.c.bf16 %v874_v58, %v874_v58  ;;  %v875_v4 = vmax.f32 %v647_v60, 0.0 }
 0x111   : > { %v1917_v3 = vpack.c.bf16 %v906_v59, %v906_v59  ;;  %v907_v5 = vmax.f32 %v775_v61, 0.0  ;;  %1197 = vst.msk [vmem:[%s2450_s12 + $0x28] sm:$0xf] %vm1186_vm2, %v1887_v62  ;;  %v1888_v6 = vpack.c.bf16 %v877_v0, %v877_v0 }
 0x112   : > { %1229 = vst.msk [vmem:[%s2450_s12 + $0xa8] sm:$0xf] %vm1186_vm2, %v1919_v63  ;;  %v1920_v7 = vpack.c.bf16 %v909_v1, %v909_v1  ;;  %1195 = vst.msk [vmem:[%s2450_s12 + $0x20] sm:$0xf] %vm1186_vm2, %v1885_v2  ;;  %v1886_v8 = vpack.c.bf16 %v875_v4, %v875_v4  ;;  %v2011_v10 = vpop.f32.mrb[12].mxu0 }
 0x113   : > { %1227 = vst.msk [vmem:[%s2450_s12 + $0xa0] sm:$0xf] %vm1186_vm2, %v1917_v3  ;;  %v1918_v9 = vpack.c.bf16 %v907_v5, %v907_v5  ;;  %v2043_v11 = vpop.f32.mrb[12].mxu1  ;;  %1198 = vst.msk [vmem:[%s2450_s12 + $0x2c] sm:$0xf] %vm1186_vm2, %v1888_v6  ;;  %v668_v12 = vadd.f32 %v2011_v10, %v2440_v40  ;;  %v659_v14 = vpop.f32.mrb[13].mxu0 }
 0x114   : > { %1230 = vst.msk [vmem:[%s2450_s12 + $0xac] sm:$0xf] %vm1186_vm2, %v1920_v7  ;;  %v796_v13 = vadd.f32 %v2043_v11, %v2440_v40  ;;  %v787_v15 = vpop.f32.mrb[13].mxu1  ;;  %1196 = vst.msk [vmem:[%s2450_s12 + $0x24] sm:$0xf] %vm1186_vm2, %v1886_v8  ;;  %v660_v16 = vadd.f32 %v2440_v40, %v659_v14  ;;  %v2012_v18 = vpop.f32.mrb[14].mxu0 }
 0x115   : > { %1228 = vst.msk [vmem:[%s2450_s12 + $0xa4] sm:$0xf] %vm1186_vm2, %v1918_v9  ;;  %v788_v17 = vadd.f32 %v2440_v40, %v787_v15  ;;  %v2044_v19 = vpop.f32.mrb[14].mxu1  ;;  %v880_v20 = vmax.f32 %v668_v12, 0.0  ;;  %v671_v22 = vadd.f32 %v2012_v18, %v2440_v40  ;;  %v662_v24 = vpop.f32.mrb[15].mxu0 }
 0x116   : > { %v912_v21 = vmax.f32 %v796_v13, 0.0  ;;  %v799_v23 = vadd.f32 %v2044_v19, %v2440_v40  ;;  %v790_v25 = vpop.f32.mrb[15].mxu1  ;;  %v878_v26 = vmax.f32 %v660_v16, 0.0  ;;  %v663_v28 = vadd.f32 %v2440_v40, %v662_v24 }
 0x117   : > { %v910_v27 = vmax.f32 %v788_v17, 0.0  ;;  %v791_v29 = vadd.f32 %v2440_v40, %v790_v25  ;;  %v1891_v30 = vpack.c.bf16 %v880_v20, %v880_v20  ;;  %v881_v32 = vmax.f32 %v671_v22, 0.0 }
 0x118   : > { %v1923_v31 = vpack.c.bf16 %v912_v21, %v912_v21  ;;  %v913_v33 = vmax.f32 %v799_v23, 0.0  ;;  %v1889_v34 = vpack.c.bf16 %v878_v26, %v878_v26  ;;  %v879_v36 = vmax.f32 %v663_v28, 0.0 }
 0x119   : > { %v1921_v35 = vpack.c.bf16 %v910_v27, %v910_v27  ;;  %v911_v37 = vmax.f32 %v791_v29, 0.0  ;;  %1201 = vst.msk [vmem:[%s2450_s12 + $0x38] sm:$0xf] %vm1186_vm2, %v1891_v30  ;;  %v1892_v38 = vpack.c.bf16 %v881_v32, %v881_v32 }
 0x11a   : > { %1233 = vst.msk [vmem:[%s2450_s12 + $0xb8] sm:$0xf] %vm1186_vm2, %v1923_v31  ;;  %v1924_v39 = vpack.c.bf16 %v913_v33, %v913_v33  ;;  %1199 = vst.msk [vmem:[%s2450_s12 + $0x30] sm:$0xf] %vm1186_vm2, %v1889_v34  ;;  %v1890_v41 = vpack.c.bf16 %v879_v36, %v879_v36  ;;  %v2015_v43 = vpop.f32.mrb[16].mxu0 }
 0x11b   : > { %1231 = vst.msk [vmem:[%s2450_s12 + $0xb0] sm:$0xf] %vm1186_vm2, %v1921_v35  ;;  %v1922_v42 = vpack.c.bf16 %v911_v37, %v911_v37  ;;  %v2047_v44 = vpop.f32.mrb[16].mxu1  ;;  %1202 = vst.msk [vmem:[%s2450_s12 + $0x3c] sm:$0xf] %vm1186_vm2, %v1892_v38  ;;  %v684_v45 = vadd.f32 %v2015_v43, %v2440_v40  ;;  %v675_v47 = vpop.f32.mrb[17].mxu0 }
 0x11c   : > { %1234 = vst.msk [vmem:[%s2450_s12 + $0xbc] sm:$0xf] %vm1186_vm2, %v1924_v39  ;;  %v812_v46 = vadd.f32 %v2047_v44, %v2440_v40  ;;  %v803_v48 = vpop.f32.mrb[17].mxu1  ;;  %1200 = vst.msk [vmem:[%s2450_s12 + $0x34] sm:$0xf] %vm1186_vm2, %v1890_v41  ;;  %v676_v49 = vadd.f32 %v2440_v40, %v675_v47  ;;  %v2016_v51 = vpop.f32.mrb[18].mxu0 }
 0x11d   : > { %1232 = vst.msk [vmem:[%s2450_s12 + $0xb4] sm:$0xf] %vm1186_vm2, %v1922_v42  ;;  %v804_v50 = vadd.f32 %v2440_v40, %v803_v48  ;;  %v2048_v52 = vpop.f32.mrb[18].mxu1  ;;  %v884_v53 = vmax.f32 %v684_v45, 0.0  ;;  %v687_v55 = vadd.f32 %v2016_v51, %v2440_v40  ;;  %v678_v57 = vpop.f32.mrb[19].mxu0 }
 0x11e   : > { %v916_v54 = vmax.f32 %v812_v46, 0.0  ;;  %v815_v56 = vadd.f32 %v2048_v52, %v2440_v40  ;;  %v806_v58 = vpop.f32.mrb[19].mxu1  ;;  %v882_v59 = vmax.f32 %v676_v49, 0.0  ;;  %v679_v61 = vadd.f32 %v2440_v40, %v678_v57 }
 0x11f   : > { %v914_v60 = vmax.f32 %v804_v50, 0.0  ;;  %v807_v62 = vadd.f32 %v2440_v40, %v806_v58  ;;  %v1895_v63 = vpack.c.bf16 %v884_v53, %v884_v53  ;;  %v885_v1 = vmax.f32 %v687_v55, 0.0 }
 0x120   : > { %v1927_v0 = vpack.c.bf16 %v916_v54, %v916_v54  ;;  %v917_v2 = vmax.f32 %v815_v56, 0.0  ;;  %v1893_v3 = vpack.c.bf16 %v882_v59, %v882_v59  ;;  %v883_v5 = vmax.f32 %v679_v61, 0.0 }
 0x121   : > { %v1925_v4 = vpack.c.bf16 %v914_v60, %v914_v60  ;;  %v915_v6 = vmax.f32 %v807_v62, 0.0  ;;  %1205 = vst.msk [vmem:[%s2450_s12 + $0x48] sm:$0xf] %vm1186_vm2, %v1895_v63  ;;  %v1896_v7 = vpack.c.bf16 %v885_v1, %v885_v1 }
 0x122   : > { %1237 = vst.msk [vmem:[%s2450_s12 + $0xc8] sm:$0xf] %vm1186_vm2, %v1927_v0  ;;  %v1928_v8 = vpack.c.bf16 %v917_v2, %v917_v2  ;;  %1203 = vst.msk [vmem:[%s2450_s12 + $0x40] sm:$0xf] %vm1186_vm2, %v1893_v3  ;;  %v1894_v9 = vpack.c.bf16 %v883_v5, %v883_v5  ;;  %v2019_v11 = vpop.f32.mrb[20].mxu0 }
 0x123   : > { %1235 = vst.msk [vmem:[%s2450_s12 + $0xc0] sm:$0xf] %vm1186_vm2, %v1925_v4  ;;  %v1926_v10 = vpack.c.bf16 %v915_v6, %v915_v6  ;;  %v2051_v12 = vpop.f32.mrb[20].mxu1  ;;  %1206 = vst.msk [vmem:[%s2450_s12 + $0x4c] sm:$0xf] %vm1186_vm2, %v1896_v7  ;;  %v700_v13 = vadd.f32 %v2019_v11, %v2440_v40  ;;  %v691_v15 = vpop.f32.mrb[21].mxu0 }
 0x124   : > { %1238 = vst.msk [vmem:[%s2450_s12 + $0xcc] sm:$0xf] %vm1186_vm2, %v1928_v8  ;;  %v828_v14 = vadd.f32 %v2051_v12, %v2440_v40  ;;  %v819_v16 = vpop.f32.mrb[21].mxu1  ;;  %1204 = vst.msk [vmem:[%s2450_s12 + $0x44] sm:$0xf] %vm1186_vm2, %v1894_v9  ;;  %v692_v17 = vadd.f32 %v2440_v40, %v691_v15  ;;  %v2020_v19 = vpop.f32.mrb[22].mxu0 }
 0x125   : > { %1236 = vst.msk [vmem:[%s2450_s12 + $0xc4] sm:$0xf] %vm1186_vm2, %v1926_v10  ;;  %v820_v18 = vadd.f32 %v2440_v40, %v819_v16  ;;  %v2052_v20 = vpop.f32.mrb[22].mxu1  ;;  %v888_v21 = vmax.f32 %v700_v13, 0.0  ;;  %v703_v23 = vadd.f32 %v2020_v19, %v2440_v40  ;;  %v694_v25 = vpop.f32.mrb[23].mxu0 }
 0x126   : > { %v920_v22 = vmax.f32 %v828_v14, 0.0  ;;  %v831_v24 = vadd.f32 %v2052_v20, %v2440_v40  ;;  %v822_v26 = vpop.f32.mrb[23].mxu1  ;;  %v886_v27 = vmax.f32 %v692_v17, 0.0  ;;  %v695_v29 = vadd.f32 %v2440_v40, %v694_v25 }
 0x127   : > { %v918_v28 = vmax.f32 %v820_v18, 0.0  ;;  %v823_v30 = vadd.f32 %v2440_v40, %v822_v26  ;;  %v1899_v31 = vpack.c.bf16 %v888_v21, %v888_v21  ;;  %v889_v33 = vmax.f32 %v703_v23, 0.0 }
 0x128   : > { %v1931_v32 = vpack.c.bf16 %v920_v22, %v920_v22  ;;  %v921_v34 = vmax.f32 %v831_v24, 0.0  ;;  %v1897_v35 = vpack.c.bf16 %v886_v27, %v886_v27  ;;  %v887_v37 = vmax.f32 %v695_v29, 0.0 }
 0x129   : > { %v1929_v36 = vpack.c.bf16 %v918_v28, %v918_v28  ;;  %v919_v38 = vmax.f32 %v823_v30, 0.0  ;;  %1209 = vst.msk [vmem:[%s2450_s12 + $0x58] sm:$0xf] %vm1186_vm2, %v1899_v31  ;;  %v1900_v39 = vpack.c.bf16 %v889_v33, %v889_v33 }
 0x12a   : > { %1241 = vst.msk [vmem:[%s2450_s12 + $0xd8] sm:$0xf] %vm1186_vm2, %v1931_v32  ;;  %v1932_v41 = vpack.c.bf16 %v921_v34, %v921_v34  ;;  %1207 = vst.msk [vmem:[%s2450_s12 + $0x50] sm:$0xf] %vm1186_vm2, %v1897_v35  ;;  %v1898_v42 = vpack.c.bf16 %v887_v37, %v887_v37  ;;  %v2023_v44 = vpop.f32.mrb[24].mxu0 }
 0x12b   : > { %1239 = vst.msk [vmem:[%s2450_s12 + $0xd0] sm:$0xf] %vm1186_vm2, %v1929_v36  ;;  %v1930_v43 = vpack.c.bf16 %v919_v38, %v919_v38  ;;  %v2055_v45 = vpop.f32.mrb[24].mxu1  ;;  %1210 = vst.msk [vmem:[%s2450_s12 + $0x5c] sm:$0xf] %vm1186_vm2, %v1900_v39  ;;  %v716_v46 = vadd.f32 %v2023_v44, %v2440_v40  ;;  %v707_v48 = vpop.f32.mrb[25].mxu0 }
 0x12c   : > { %1242 = vst.msk [vmem:[%s2450_s12 + $0xdc] sm:$0xf] %vm1186_vm2, %v1932_v41  ;;  %v844_v47 = vadd.f32 %v2055_v45, %v2440_v40  ;;  %v835_v49 = vpop.f32.mrb[25].mxu1  ;;  %1208 = vst.msk [vmem:[%s2450_s12 + $0x54] sm:$0xf] %vm1186_vm2, %v1898_v42  ;;  %v708_v50 = vadd.f32 %v2440_v40, %v707_v48  ;;  %v2024_v52 = vpop.f32.mrb[26].mxu0 }
 0x12d   : > { %1240 = vst.msk [vmem:[%s2450_s12 + $0xd4] sm:$0xf] %vm1186_vm2, %v1930_v43  ;;  %v836_v51 = vadd.f32 %v2440_v40, %v835_v49  ;;  %v2056_v53 = vpop.f32.mrb[26].mxu1  ;;  %v892_v54 = vmax.f32 %v716_v46, 0.0  ;;  %v719_v56 = vadd.f32 %v2024_v52, %v2440_v40  ;;  %v710_v58 = vpop.f32.mrb[27].mxu0 }
 0x12e   : > { %v924_v55 = vmax.f32 %v844_v47, 0.0  ;;  %v847_v57 = vadd.f32 %v2056_v53, %v2440_v40  ;;  %v838_v59 = vpop.f32.mrb[27].mxu1  ;;  %v890_v60 = vmax.f32 %v708_v50, 0.0  ;;  %v711_v62 = vadd.f32 %v2440_v40, %v710_v58 }
 0x12f   : > { %v922_v61 = vmax.f32 %v836_v51, 0.0  ;;  %v839_v63 = vadd.f32 %v2440_v40, %v838_v59  ;;  %v1903_v0 = vpack.c.bf16 %v892_v54, %v892_v54  ;;  %v893_v2 = vmax.f32 %v719_v56, 0.0 }
 0x130   : > { %v1935_v1 = vpack.c.bf16 %v924_v55, %v924_v55  ;;  %v925_v3 = vmax.f32 %v847_v57, 0.0  ;;  %v1901_v4 = vpack.c.bf16 %v890_v60, %v890_v60  ;;  %v891_v6 = vmax.f32 %v711_v62, 0.0 }
 0x131   : > { %v1933_v5 = vpack.c.bf16 %v922_v61, %v922_v61  ;;  %v923_v7 = vmax.f32 %v839_v63, 0.0  ;;  %1213 = vst.msk [vmem:[%s2450_s12 + $0x68] sm:$0xf] %vm1186_vm2, %v1903_v0  ;;  %v1904_v8 = vpack.c.bf16 %v893_v2, %v893_v2 }
 0x132   : > { %1245 = vst.msk [vmem:[%s2450_s12 + $0xe8] sm:$0xf] %vm1186_vm2, %v1935_v1  ;;  %v1936_v9 = vpack.c.bf16 %v925_v3, %v925_v3  ;;  %1211 = vst.msk [vmem:[%s2450_s12 + $0x60] sm:$0xf] %vm1186_vm2, %v1901_v4  ;;  %v1902_v10 = vpack.c.bf16 %v891_v6, %v891_v6  ;;  %v2027_v12 = vpop.f32.mrb[28].mxu0 }
 0x133   : > { %1243 = vst.msk [vmem:[%s2450_s12 + $0xe0] sm:$0xf] %vm1186_vm2, %v1933_v5  ;;  %v1934_v11 = vpack.c.bf16 %v923_v7, %v923_v7  ;;  %v2059_v13 = vpop.f32.mrb[28].mxu1  ;;  %1214 = vst.msk [vmem:[%s2450_s12 + $0x6c] sm:$0xf] %vm1186_vm2, %v1904_v8  ;;  %v732_v14 = vadd.f32 %v2027_v12, %v2440_v40  ;;  %v723_v16 = vpop.f32.mrb[29].mxu0 }
 0x134   : > { %1246 = vst.msk [vmem:[%s2450_s12 + $0xec] sm:$0xf] %vm1186_vm2, %v1936_v9  ;;  %v860_v15 = vadd.f32 %v2059_v13, %v2440_v40  ;;  %v851_v17 = vpop.f32.mrb[29].mxu1  ;;  %1212 = vst.msk [vmem:[%s2450_s12 + $0x64] sm:$0xf] %vm1186_vm2, %v1902_v10  ;;  %v724_v18 = vadd.f32 %v2440_v40, %v723_v16  ;;  %v2028_v20 = vpop.f32.mrb[30].mxu0 }
 0x135   : > { %1244 = vst.msk [vmem:[%s2450_s12 + $0xe4] sm:$0xf] %vm1186_vm2, %v1934_v11  ;;  %v852_v19 = vadd.f32 %v2440_v40, %v851_v17  ;;  %v2060_v21 = vpop.f32.mrb[30].mxu1  ;;  %v896_v22 = vmax.f32 %v732_v14, 0.0  ;;  %v735_v24 = vadd.f32 %v2028_v20, %v2440_v40  ;;  %v726_v26 = vpop.f32.mrb[31].mxu0 }
 0x136   : > { %v928_v23 = vmax.f32 %v860_v15, 0.0  ;;  %v863_v25 = vadd.f32 %v2060_v21, %v2440_v40  ;;  %v854_v27 = vpop.f32.mrb[31].mxu1  ;;  %v894_v28 = vmax.f32 %v724_v18, 0.0  ;;  %v727_v30 = vadd.f32 %v2440_v40, %v726_v26 }
 0x137   : > { %v926_v29 = vmax.f32 %v852_v19, 0.0  ;;  %v855_v31 = vadd.f32 %v2440_v40, %v854_v27  ;;  %v1907_v32 = vpack.c.bf16 %v896_v22, %v896_v22  ;;  %v897_v34 = vmax.f32 %v735_v24, 0.0  ;;  %1257 = sbr.rel (!%p2337_p4) target bundleno = 409 (0x199), region = 36 }
 0x138   : > { %v1939_v33 = vpack.c.bf16 %v928_v23, %v928_v23  ;;  %v929_v35 = vmax.f32 %v863_v25, 0.0  ;;  %v1905_v36 = vpack.c.bf16 %v894_v28, %v894_v28  ;;  %v895_v38 = vmax.f32 %v727_v30, 0.0 }
 0x139   : > { %v1937_v37 = vpack.c.bf16 %v926_v29, %v926_v29  ;;  %v927_v39 = vmax.f32 %v855_v31, 0.0  ;;  %1217 = vst.msk [vmem:[%s2450_s12 + $0x78] sm:$0xf] %vm1186_vm2, %v1907_v32  ;;  %v1908_v41 = vpack.c.bf16 %v897_v34, %v897_v34 }
 0x13a   : > { %1249 = vst.msk [vmem:[%s2450_s12 + $0xf8] sm:$0xf] %vm1186_vm2, %v1939_v33  ;;  %v1940_v42 = vpack.c.bf16 %v929_v35, %v929_v35  ;;  %1215 = vst.msk [vmem:[%s2450_s12 + $0x70] sm:$0xf] %vm1186_vm2, %v1905_v36  ;;  %v1906_v40 = vpack.c.bf16 %v895_v38, %v895_v38 }
 0x13b   : > { %1247 = vst.msk [vmem:[%s2450_s12 + $0xf0] sm:$0xf] %vm1186_vm2, %v1937_v37  ;;  %v1938_v43 = vpack.c.bf16 %v927_v39, %v927_v39  ;;  %1218 = vst.msk [vmem:[%s2450_s12 + $0x7c] sm:$0xf] %vm1186_vm2, %v1908_v41 }
 0x13c   : > { %1250 = vst.msk [vmem:[%s2450_s12 + $0xfc] sm:$0xf] %vm1186_vm2, %v1940_v42  ;;  %1216 = vst.msk [vmem:[%s2450_s12 + $0x74] sm:$0xf] %vm1186_vm2, %v1906_v40 }
 0x13d   : > { %1248 = vst.msk [vmem:[%s2450_s12 + $0xf4] sm:$0xf] %vm1186_vm2, %v1938_v43 }
 0x13e   : > { %s2847_s24 = smov (!%p1260_p8, %s1259_s24), 64 }
 0x13f   : > { %s1862_s30 = sshll.u32 %s2847_s24, 6 }
 0x140   : > { %p1865_p9 = scmp.eq.s32.totalorder %s1862_s30, 0 }
 0x141   : > { %s2649_s4 = sshrl.u32 (!%p1865_p9), %s2847_s24, 6 }
 0x142   : > { %1268 = sbr.rel (%p1865_p9) target bundleno = 409 (0x199), region = 40  ;;  %p1866_p10 = scmp.le.s32.totalorder (!%p1865_p9), %s2649_s4, 0 }
 0x149   : > { %1673 = sbr.rel (%p1866_p10) target bundleno = 388 (0x184), region = 112  ;;  %s2840_s15 = smov (!%p1866_p10), %s2643_s29 }
 0x14a   : > { %s2841_s20 = smov (!%p1866_p10), %s2450_s12  ;;  %s2658_s25 = smov (!%p1866_p10), 0  }
 0x14b   : > { %s2660_s5 = smov (!%p1866_p10), 0  }
 0x150 LB: >> { %v1284_v44 = vld [vmem:[%s2266_s20] sm:$0xf]  ;;  %v1286_v45 = vld [vmem:[%s2266_s20 + $0x4] sm:$0xf]  ;;  %v1288_v46 = vld [vmem:[%s2266_s20 + $0x8] sm:$0xf]  ;;  %s2274_s5 = sphi %s2660_s5, %s1278_s5   ;;  %s2270_s25 = sphi %s2658_s25, %s2842_s25   ;;  %s2266_s20 = sphi %s2841_s20, %s1417_s20   ;;  %s2262_s15 = sphi %s2840_s15, %s1418_s15  }
 0x151   : >> { %1285 = vst [vmem:[%s2262_s15] sm:$0xf] %v1284_v44  ;;  %1287 = vst [vmem:[%s2262_s15 + $0x4] sm:$0xf] %v1286_v45  ;;  %v1290_v47 = vld [vmem:[%s2266_s20 + $0xc] sm:$0xf]  ;;  %s1412_s6 = sadd.s32 1, %s2270_s25 }
 0x152   : >> { %1289 = vst [vmem:[%s2262_s15 + $0x8] sm:$0xf] %v1288_v46  ;;  %v1292_v48 = vld [vmem:[%s2266_s20 + $0x10] sm:$0xf]  ;;  %v1294_v49 = vld [vmem:[%s2266_s20 + $0x14] sm:$0xf]  ;;  %p1413_p11 = scmp.ge.s32.totalorder %s1412_s6, %s2649_s4 }
 0x153   : >> { %1291 = vst [vmem:[%s2262_s15 + $0xc] sm:$0xf] %v1290_v47  ;;  %1293 = vst [vmem:[%s2262_s15 + $0x10] sm:$0xf] %v1292_v48  ;;  %v1296_v50 = vld [vmem:[%s2266_s20 + $0x18] sm:$0xf] }
 0x154   : >> { %1295 = vst [vmem:[%s2262_s15 + $0x14] sm:$0xf] %v1294_v49  ;;  %v1298_v51 = vld [vmem:[%s2266_s20 + $0x1c] sm:$0xf]  ;;  %v1300_v52 = vld [vmem:[%s2266_s20 + $0x20] sm:$0xf] }
 0x155   : >> { %1297 = vst [vmem:[%s2262_s15 + $0x18] sm:$0xf] %v1296_v50  ;;  %1299 = vst [vmem:[%s2262_s15 + $0x1c] sm:$0xf] %v1298_v51  ;;  %v1302_v53 = vld [vmem:[%s2266_s20 + $0x24] sm:$0xf] }
 0x156   : >> { %1301 = vst [vmem:[%s2262_s15 + $0x20] sm:$0xf] %v1300_v52  ;;  %v1304_v54 = vld [vmem:[%s2266_s20 + $0x28] sm:$0xf]  ;;  %v1306_v55 = vld [vmem:[%s2266_s20 + $0x2c] sm:$0xf] }
 0x157   : >> { %1303 = vst [vmem:[%s2262_s15 + $0x24] sm:$0xf] %v1302_v53  ;;  %1305 = vst [vmem:[%s2262_s15 + $0x28] sm:$0xf] %v1304_v54  ;;  %v1308_v56 = vld [vmem:[%s2266_s20 + $0x30] sm:$0xf] }
 0x158   : >> { %1307 = vst [vmem:[%s2262_s15 + $0x2c] sm:$0xf] %v1306_v55  ;;  %v1310_v57 = vld [vmem:[%s2266_s20 + $0x34] sm:$0xf]  ;;  %v1312_v58 = vld [vmem:[%s2266_s20 + $0x38] sm:$0xf] }
 0x159   : >> { %1309 = vst [vmem:[%s2262_s15 + $0x30] sm:$0xf] %v1308_v56  ;;  %1311 = vst [vmem:[%s2262_s15 + $0x34] sm:$0xf] %v1310_v57  ;;  %v1314_v59 = vld [vmem:[%s2266_s20 + $0x3c] sm:$0xf] }
 0x15a   : >> { %1313 = vst [vmem:[%s2262_s15 + $0x38] sm:$0xf] %v1312_v58  ;;  %v1316_v60 = vld [vmem:[%s2266_s20 + $0x40] sm:$0xf]  ;;  %v1318_v61 = vld [vmem:[%s2266_s20 + $0x44] sm:$0xf] }
 0x15b   : >> { %1315 = vst [vmem:[%s2262_s15 + $0x3c] sm:$0xf] %v1314_v59  ;;  %1317 = vst [vmem:[%s2262_s15 + $0x40] sm:$0xf] %v1316_v60  ;;  %v1320_v62 = vld [vmem:[%s2266_s20 + $0x48] sm:$0xf] }
 0x15c   : >> { %1319 = vst [vmem:[%s2262_s15 + $0x44] sm:$0xf] %v1318_v61  ;;  %v1322_v63 = vld [vmem:[%s2266_s20 + $0x4c] sm:$0xf]  ;;  %v1324_v0 = vld [vmem:[%s2266_s20 + $0x50] sm:$0xf] }
 0x15d   : >> { %1321 = vst [vmem:[%s2262_s15 + $0x48] sm:$0xf] %v1320_v62  ;;  %1323 = vst [vmem:[%s2262_s15 + $0x4c] sm:$0xf] %v1322_v63  ;;  %v1326_v1 = vld [vmem:[%s2266_s20 + $0x54] sm:$0xf] }
 0x15e   : >> { %1325 = vst [vmem:[%s2262_s15 + $0x50] sm:$0xf] %v1324_v0  ;;  %v1328_v2 = vld [vmem:[%s2266_s20 + $0x58] sm:$0xf]  ;;  %v1330_v3 = vld [vmem:[%s2266_s20 + $0x5c] sm:$0xf] }
 0x15f   : >> { %1327 = vst [vmem:[%s2262_s15 + $0x54] sm:$0xf] %v1326_v1  ;;  %1329 = vst [vmem:[%s2262_s15 + $0x58] sm:$0xf] %v1328_v2  ;;  %v1332_v4 = vld [vmem:[%s2266_s20 + $0x60] sm:$0xf] }
 0x160   : >> { %1331 = vst [vmem:[%s2262_s15 + $0x5c] sm:$0xf] %v1330_v3  ;;  %v1334_v5 = vld [vmem:[%s2266_s20 + $0x64] sm:$0xf]  ;;  %v1336_v6 = vld [vmem:[%s2266_s20 + $0x68] sm:$0xf] }
 0x161   : >> { %1333 = vst [vmem:[%s2262_s15 + $0x60] sm:$0xf] %v1332_v4  ;;  %1335 = vst [vmem:[%s2262_s15 + $0x64] sm:$0xf] %v1334_v5  ;;  %v1338_v7 = vld [vmem:[%s2266_s20 + $0x6c] sm:$0xf] }
 0x162   : >> { %1337 = vst [vmem:[%s2262_s15 + $0x68] sm:$0xf] %v1336_v6  ;;  %v1340_v8 = vld [vmem:[%s2266_s20 + $0x70] sm:$0xf]  ;;  %v1342_v9 = vld [vmem:[%s2266_s20 + $0x74] sm:$0xf] }
 0x163   : >> { %1339 = vst [vmem:[%s2262_s15 + $0x6c] sm:$0xf] %v1338_v7  ;;  %1341 = vst [vmem:[%s2262_s15 + $0x70] sm:$0xf] %v1340_v8  ;;  %v1344_v10 = vld [vmem:[%s2266_s20 + $0x78] sm:$0xf] }
 0x164   : >> { %1343 = vst [vmem:[%s2262_s15 + $0x74] sm:$0xf] %v1342_v9  ;;  %v1346_v11 = vld [vmem:[%s2266_s20 + $0x7c] sm:$0xf]  ;;  %v1348_v12 = vld [vmem:[%s2266_s20 + $0x80] sm:$0xf] }
 0x165   : >> { %1345 = vst [vmem:[%s2262_s15 + $0x78] sm:$0xf] %v1344_v10  ;;  %1347 = vst [vmem:[%s2262_s15 + $0x7c] sm:$0xf] %v1346_v11  ;;  %v1350_v13 = vld [vmem:[%s2266_s20 + $0x84] sm:$0xf] }
 0x166   : >> { %1349 = vst [vmem:[%s2262_s15 + $0x80] sm:$0xf] %v1348_v12  ;;  %v1352_v14 = vld [vmem:[%s2266_s20 + $0x88] sm:$0xf]  ;;  %v1354_v15 = vld [vmem:[%s2266_s20 + $0x8c] sm:$0xf] }
 0x167   : >> { %1351 = vst [vmem:[%s2262_s15 + $0x84] sm:$0xf] %v1350_v13  ;;  %1353 = vst [vmem:[%s2262_s15 + $0x88] sm:$0xf] %v1352_v14  ;;  %v1356_v16 = vld [vmem:[%s2266_s20 + $0x90] sm:$0xf] }
 0x168   : >> { %1355 = vst [vmem:[%s2262_s15 + $0x8c] sm:$0xf] %v1354_v15  ;;  %v1358_v17 = vld [vmem:[%s2266_s20 + $0x94] sm:$0xf]  ;;  %v1360_v18 = vld [vmem:[%s2266_s20 + $0x98] sm:$0xf] }
 0x169   : >> { %1357 = vst [vmem:[%s2262_s15 + $0x90] sm:$0xf] %v1356_v16  ;;  %1359 = vst [vmem:[%s2262_s15 + $0x94] sm:$0xf] %v1358_v17  ;;  %v1362_v19 = vld [vmem:[%s2266_s20 + $0x9c] sm:$0xf] }
 0x16a   : >> { %1361 = vst [vmem:[%s2262_s15 + $0x98] sm:$0xf] %v1360_v18  ;;  %v1364_v20 = vld [vmem:[%s2266_s20 + $0xa0] sm:$0xf]  ;;  %v1366_v21 = vld [vmem:[%s2266_s20 + $0xa4] sm:$0xf] }
 0x16b   : >> { %1363 = vst [vmem:[%s2262_s15 + $0x9c] sm:$0xf] %v1362_v19  ;;  %1365 = vst [vmem:[%s2262_s15 + $0xa0] sm:$0xf] %v1364_v20  ;;  %v1368_v22 = vld [vmem:[%s2266_s20 + $0xa8] sm:$0xf] }
 0x16c   : >> { %1367 = vst [vmem:[%s2262_s15 + $0xa4] sm:$0xf] %v1366_v21  ;;  %v1370_v23 = vld [vmem:[%s2266_s20 + $0xac] sm:$0xf]  ;;  %v1372_v24 = vld [vmem:[%s2266_s20 + $0xb0] sm:$0xf] }
 0x16d   : >> { %1369 = vst [vmem:[%s2262_s15 + $0xa8] sm:$0xf] %v1368_v22  ;;  %1371 = vst [vmem:[%s2262_s15 + $0xac] sm:$0xf] %v1370_v23  ;;  %v1374_v25 = vld [vmem:[%s2266_s20 + $0xb4] sm:$0xf] }
 0x16e   : >> { %1373 = vst [vmem:[%s2262_s15 + $0xb0] sm:$0xf] %v1372_v24  ;;  %v1376_v26 = vld [vmem:[%s2266_s20 + $0xb8] sm:$0xf]  ;;  %v1378_v27 = vld [vmem:[%s2266_s20 + $0xbc] sm:$0xf] }
 0x16f   : >> { %1375 = vst [vmem:[%s2262_s15 + $0xb4] sm:$0xf] %v1374_v25  ;;  %1377 = vst [vmem:[%s2262_s15 + $0xb8] sm:$0xf] %v1376_v26  ;;  %v1380_v28 = vld [vmem:[%s2266_s20 + $0xc0] sm:$0xf] }
 0x170   : >> { %1379 = vst [vmem:[%s2262_s15 + $0xbc] sm:$0xf] %v1378_v27  ;;  %v1382_v29 = vld [vmem:[%s2266_s20 + $0xc4] sm:$0xf]  ;;  %v1384_v30 = vld [vmem:[%s2266_s20 + $0xc8] sm:$0xf] }
 0x171   : >> { %1381 = vst [vmem:[%s2262_s15 + $0xc0] sm:$0xf] %v1380_v28  ;;  %1383 = vst [vmem:[%s2262_s15 + $0xc4] sm:$0xf] %v1382_v29  ;;  %v1386_v31 = vld [vmem:[%s2266_s20 + $0xcc] sm:$0xf] }
 0x172   : >> { %1385 = vst [vmem:[%s2262_s15 + $0xc8] sm:$0xf] %v1384_v30  ;;  %v1388_v32 = vld [vmem:[%s2266_s20 + $0xd0] sm:$0xf]  ;;  %v1390_v33 = vld [vmem:[%s2266_s20 + $0xd4] sm:$0xf] }
 0x173   : >> { %1387 = vst [vmem:[%s2262_s15 + $0xcc] sm:$0xf] %v1386_v31  ;;  %1389 = vst [vmem:[%s2262_s15 + $0xd0] sm:$0xf] %v1388_v32  ;;  %v1392_v34 = vld [vmem:[%s2266_s20 + $0xd8] sm:$0xf] }
 0x174   : >> { %1391 = vst [vmem:[%s2262_s15 + $0xd4] sm:$0xf] %v1390_v33  ;;  %v1394_v35 = vld [vmem:[%s2266_s20 + $0xdc] sm:$0xf]  ;;  %v1396_v36 = vld [vmem:[%s2266_s20 + $0xe0] sm:$0xf] }
 0x175   : >> { %1393 = vst [vmem:[%s2262_s15 + $0xd8] sm:$0xf] %v1392_v34  ;;  %1395 = vst [vmem:[%s2262_s15 + $0xdc] sm:$0xf] %v1394_v35  ;;  %v1398_v37 = vld [vmem:[%s2266_s20 + $0xe4] sm:$0xf] }
 0x176   : >> { %1397 = vst [vmem:[%s2262_s15 + $0xe0] sm:$0xf] %v1396_v36  ;;  %v1400_v38 = vld [vmem:[%s2266_s20 + $0xe8] sm:$0xf]  ;;  %v1402_v39 = vld [vmem:[%s2266_s20 + $0xec] sm:$0xf] }
 0x177   : >> { %1399 = vst [vmem:[%s2262_s15 + $0xe4] sm:$0xf] %v1398_v37  ;;  %1401 = vst [vmem:[%s2262_s15 + $0xe8] sm:$0xf] %v1400_v38  ;;  %v1404_v41 = vld [vmem:[%s2266_s20 + $0xf0] sm:$0xf] }
 0x178   : >> { %1403 = vst [vmem:[%s2262_s15 + $0xec] sm:$0xf] %v1402_v39  ;;  %v1406_v42 = vld [vmem:[%s2266_s20 + $0xf4] sm:$0xf]  ;;  %v1408_v40 = vld [vmem:[%s2266_s20 + $0xf8] sm:$0xf] }
 0x179   : >> { %1405 = vst [vmem:[%s2262_s15 + $0xf0] sm:$0xf] %v1404_v41  ;;  %1407 = vst [vmem:[%s2262_s15 + $0xf4] sm:$0xf] %v1406_v42  ;;  %v1410_v43 = vld [vmem:[%s2266_s20 + $0xfc] sm:$0xf] }
 0x17a   : >> { %1409 = vst [vmem:[%s2262_s15 + $0xf8] sm:$0xf] %v1408_v40  ;;  %1411 = vst [vmem:[%s2262_s15 + $0xfc] sm:$0xf] %v1410_v43  ;;  %s2849_s6 = smov (%p1413_p11, %s1412_s6), 0  ;;  %s1278_s5 = sadd.s32 1, %s2274_s5  }
 0x17b   : >> { %s1867_s7 = sshll.u32 %s2849_s6, 8  ;;  %p1277_p12 = scmp.ge.s32.totalorder %s1278_s5, %s2649_s4 }
 0x17c   : >> { %s1417_s20 = scalar_lea.vmem %s2450_s12, %s1867_s7 [#allocation2]   ;;  %s1418_s15 = scalar_lea.vmem %s2643_s29, %s1867_s7  }
 0x17d   : >> { %s2842_s25 = smov %s2849_s6  ;;  %1280 = sbr.rel (!%p1277_p12) target bundleno = 336 (0x150), region = 118 }
 0x184 PF: > { %s2817_s8 = sand.u32 63, %s2847_s24   ;;  %s1942_s9 = sshll.u32 %s2649_s4, 8 }
 0x185   : > { %s1423_s10 = scalar_lea.vmem %s2450_s12, %s1942_s9 [#allocation2]   ;;  %s1425_s11 = scalar_lea.vmem %s2643_s29, %s1942_s9  }
 0x186   : > { %p1872_p13 = scmp.le.s32.totalorder %s2817_s8, 0 }
 0x187   : > { %s2276_s14 = smov (!%p1872_p13), %s1425_s11   ;;  %s2280_s17 = smov (!%p1872_p13), %s1423_s10  }
 0x188   : > { %1687 = sbr.rel (%p1872_p13) target bundleno = 409 (0x199), region = 123  ;;  %s2284_s18 = smov (!%p1872_p13), 0  }
 0x189   : > { %s2288_s21 = smov (!%p1872_p13), 0  }
 0x18f LB: >> { %v1435_v44 = vld [vmem:[%s2282_s17] sm:$0xf]  ;;  %s1437_s22 = sadd.s32 1, %s2286_s18  ;;  %s1429_s21 = sadd.s32 1, %s2290_s21   ;;  %s2290_s21 = sphi %s2288_s21, %s1429_s21   ;;  %s2286_s18 = sphi %s2284_s18, %s2285_s18   ;;  %s2282_s17 = sphi %s2280_s17, %s1442_s17   ;;  %s2278_s14 = sphi %s2276_s14, %s1443_s14  }
 0x190   : >> { %1436 = vst [vmem:[%s2278_s14] sm:$0xf] %v1435_v44  ;;  %p1438_p0 = scmp.ge.s32.totalorder %s1437_s22, %s2817_s8  ;;  %p1428_p1 = scmp.ge.s32.totalorder %s1429_s21, %s2817_s8 }
 0x192   : >> { %s2851_s22 = smov (%p1438_p0, %s1437_s22), 0  ;;  %1431 = sbr.rel (!%p1428_p1) target bundleno = 399 (0x18f), region = 129 }
 0x193   : >> { %s1873_s23 = sshll.u32 %s2851_s22, 2  ;;  %s2285_s18 = smov %s2851_s22  }
 0x194   : >> { %s1442_s17 = scalar_lea.vmem %s1423_s10, %s1873_s23 [#allocation2]   ;;  %s1443_s14 = scalar_lea.vmem %s1425_s11, %s1873_s23  }
 0x199 PF: > { %p10_p2 = scmp.ge.s32.totalorder %s2327_s16, 22   ;;  %s2843_s12 = smov %s2254_s13 }
 0x19a   : > { %s2844_s13 = smov %s2335_s19  ;;  %s2845_s14 = smov %s2327_s16 }
 0x19b   :  { %12 = sbr.rel (!%p10_p2) target bundleno = 2 (0x2), region = 140 }

// kernel: xtma_cnn_forward.8
= control target key start
LH: loop header
LB: loop body
LE: loop exit
PB: predicated region body
PF: predicated region fallthrough
CT: control target
= control target key end

     0   :  { %s2501_s12 = smov 0   ;;  %s2503_s13 = smov 0   ;;  %s3100_s0 = inlined_call_operand.vmem [shape: bf16[2178,200], index: 0, kind: input, shape index: {}]   ;;  %s3101_s1 = inlined_call_operand.vmem [shape: bf16[200,16], index: 1, kind: input, shape index: {}]   ;;  %s3102_s2 = inlined_call_operand.vmem [shape: f32[1,16], index: 2, kind: input, shape index: {}]   ;;  %s3103_s3 = inlined_call_operand.vmem [shape: bf16[2178,16], index: 3, kind: output, shape index: {}]  }
   0x1   :  { %s2505_s14 = smov 0  }
   0x2 LB: > { %s2514_s15 = sadd.s32 4294967295, %s2446_s14   ;;  %s2516_s16 = sadd.s32 1, %s2446_s14   ;;  %s2446_s14 = sphi %s2505_s14, %s3110_s14   ;;  %s2442_s13 = sphi %s2503_s13, %s3109_s13   ;;  %s2438_s12 = sphi %s2501_s12, %s3108_s12  }
   0x3   : > { %s85_s17 = ssub.s32 %s2446_s14, %s2516_s16  ;;  %s88_s18 = sadd.s32 1, %s2442_s13 }
   0x4   : > { %p86_p0 = scmp.eq.s32.totalorder %s85_s17, 0  ;;  %p98_p1 = scmp.ne.s32.totalorder %s2442_s13, %s2438_s12 }
   0x5   : > { %p99_p2 = scmp.eq.s32.totalorder %s2514_s15, 4  ;;  %p1904_p3 = scmp.ge.s32.totalorder %s2446_s14, 1 }
   0x6   : > { %s2524_s19 = scalar_select %p86_p0, %s2442_s13, %s88_s18  }
   0x7   : > { %p2526_p4 = por %p99_p2, %p98_p1  ;;  %p149_p5 = scmp.lt.s32.totalorder %s2446_s14, 6 }
   0x9   : > { %p150_p6 = pnand %p1904_p3, %p149_p5 }
   0xa   : > { %v2283_v0 = vld [vmem:[%s3101_s1] sm:$0xff] (!%p150_p6)   ;;  %v2480_v1 = vmov (!%p150_p6), 0   ;;  %v2284_v2 = vld [vmem:[%s3101_s1 + $0x8] sm:$0xff] (!%p150_p6)   ;;  %s2539_s25 = sshll.u32 (!%p150_p6), %s2514_s15, 6  ;;  %v2285_v3 = vld [vmem:[%s3101_s1 + $0x10] sm:$0xff] (!%p150_p6)   ;;  %vm660_vm0 = vcmask (!%p150_p6), 588800  }
   0xb   : > { %153 = sbr.rel (%p150_p6) target bundleno = 495 (0x1ef), region = 32  ;;  %761 = vmatprep.subr.bf16.mxu0 (!%p150_p6), %v2480_v1  ;;  %2168 = vmatprep.subr.bf16.mxu1 (!%p150_p6), %v2480_v1  ;;  %p184_p7 = scmp.lt.s32.totalorder (!%p150_p6), %s2539_s25, 272  ;;  %v2286_v4 = vld [vmem:[%s3101_s1 + $0x18] sm:$0xff] (!%p150_p6)   ;;  %v2287_v6 = vld [vmem:[%s3101_s1 + $0x20] sm:$0xff] (!%p150_p6)   ;;  %v2288_v8 = vld [vmem:[%s3101_s1 + $0x28] sm:$0xff] (!%p150_p6)   ;;  %vm757_vm1 = vcmask (!%p150_p6), 1043456  }
   0xc   : > { %762 = vmatpush1.bf16.msra.mxu0 (!%p150_p6), %v2283_v0  ;;  %2181 = vmatpush1.bf16.msra.mxu1 (!%p150_p6), %v2283_v0  ;;  %v2289_v9 = vld [vmem:[%s3101_s1 + $0x30] sm:$0xff] (!%p150_p6)   ;;  %v2290_v10 = vld [vmem:[%s3101_s1 + $0x38] sm:$0xff] (!%p150_p6)   ;;  %v2291_v11 = vld [vmem:[%s3101_s1 + $0x40] sm:$0xff] (!%p150_p6)   ;;  %s175_s6 = sand.u32 (!%p150_p6), 1, %s2438_s12   ;;  %vm1370_vm2 = vcmask (!%p150_p6), 125952  }
   0xd   : > { %763 = vmatprep.subr.bf16.mxu0 (!%p150_p6), %v2480_v1  ;;  %2169 = vmatprep.subr.bf16.mxu1 (!%p150_p6), %v2480_v1  ;;  %v2292_v12 = vld [vmem:[%s3101_s1 + $0x48] sm:$0xff] (!%p150_p6)   ;;  %v2293_v13 = vld [vmem:[%s3101_s1 + $0x50] sm:$0xff] (!%p150_p6)   ;;  %v2294_v14 = vld [vmem:[%s3101_s1 + $0x58] sm:$0xff] (!%p150_p6)   ;;  %s1905_s10 = sshll.u32 (!%p150_p6), %s175_s6, 8 }
   0xe   : > { %v2295_v15 = vld [vmem:[%s3101_s1 + $0x60] ss:$0 sps:$4 sm:$0xff] (!%p150_p6)   ;;  %s2711_s12 = scalar_lea.vmem (!%p150_p6), [#allocation2], %s1905_s10  }
   0xf   : > { %v759_v16 = vsel (!%p150_p6), %vm757_vm1, %v2295_v15, 0  ;;  %v2705_v15 = vld [vmem:[%s3102_s2] ss:$0 sm:$0xff] (!%p150_p6) }
  0x10   : > { %764 = vmatpush1.bf16.msra.mxu0 (!%p150_p6), %v2284_v2  ;;  %2182 = vmatpush1.bf16.msra.mxu1 (!%p150_p6), %v2284_v2 }
  0x11   : > { %765 = vmatprep.subr.bf16.mxu0 (!%p150_p6), %v2480_v1  ;;  %2170 = vmatprep.subr.bf16.mxu1 (!%p150_p6), %v2480_v1 }
  0x12   : > { %s185_s26 = scalar_select %p184_p7, %s2539_s25, 272 }
  0x13   : > { %s2165_s11 = sshll.u32 (%p2526_p4), %s2514_s15, 8 }
  0x14   : > { %s2100_s29 = sshll.u32 %s185_s26, 3  ;;  %766 = vmatpush1.bf16.msra.mxu0 %v2285_v3  ;;  %2183 = vmatpush1.bf16.msra.mxu1 %v2285_v3  ;;  %s2908_s18 = scalar_lea.vmem (%p2526_p4), %s3103_s3, %s2165_s11  }
  0x15   : > { %s2556_s7 = scalar_lea.vmem %s3100_s0, %s2100_s29  ;;  %767 = vmatprep.subr.bf16.mxu0 %v2480_v1  ;;  %2171 = vmatprep.subr.bf16.mxu1 %v2480_v1 }
  0x16   : > { %v2298_v5 = vld [vmem:[%s2556_s7 + $0x4] ss:$8 sps:$4 sm:$0xff]   ;;  %v2296_v17 = vld [vmem:[%s2556_s7] ss:$8 sps:$4 sm:$0xff]   ;;  %v2302_v19 = vld [vmem:[%s2556_s7 + $0x14] ss:$8 sps:$4 sm:$0xff]  }
  0x17   : > { %v2301_v7 = vld [vmem:[%s2556_s7 + $0x104] ss:$8 sps:$4 sm:$0xff]   ;;  %1987 = vmatprep.mubr.msk.bf16.mxu0 %vm660_vm0, %v2298_v5  ;;  %v2299_v18 = vld [vmem:[%s2556_s7 + $0x100] ss:$8 sps:$4 sm:$0xff]   ;;  %v2304_v20 = vld [vmem:[%s2556_s7 + $0x114] ss:$8 sps:$4 sm:$0xff]  }
  0x18   : > { %768 = vmatpush1.bf16.msra.mxu0 %v2286_v4  ;;  %2184 = vmatpush1.bf16.msra.mxu1 %v2286_v4  ;;  %v2306_v21 = vld [vmem:[%s2556_s7 + $0x10] ss:$8 sps:$4 sm:$0xff]   ;;  %v2308_v23 = vld [vmem:[%s2556_s7 + $0x24] ss:$8 sps:$4 sm:$0xff]   ;;  %v2312_v25 = vld [vmem:[%s2556_s7 + $0x20] ss:$8 sps:$4 sm:$0xff]  }
  0x19   : > { %769 = vmatprep.subr.bf16.mxu0 %v2480_v1  ;;  %2172 = vmatprep.subr.bf16.mxu1 %v2480_v1  ;;  %v2307_v22 = vld [vmem:[%s2556_s7 + $0x110] ss:$8 sps:$4 sm:$0xff]   ;;  %v2310_v24 = vld [vmem:[%s2556_s7 + $0x124] ss:$8 sps:$4 sm:$0xff]   ;;  %v2313_v26 = vld [vmem:[%s2556_s7 + $0x120] ss:$8 sps:$4 sm:$0xff]  }
  0x1a   : > { %2003 = vmatprep.mubr.msk.bf16.mxu1 %vm660_vm0, %v2301_v7  ;;  %v2314_v27 = vld [vmem:[%s2556_s7 + $0x34] ss:$8 sps:$4 sm:$0xff]   ;;  %v2318_v29 = vld [vmem:[%s2556_s7 + $0x30] ss:$8 sps:$4 sm:$0xff]   ;;  %v2320_v31 = vld [vmem:[%s2556_s7 + $0x44] ss:$8 sps:$4 sm:$0xff]  }
  0x1b   : > { %v2316_v28 = vld [vmem:[%s2556_s7 + $0x134] ss:$8 sps:$4 sm:$0xff]   ;;  %v2319_v30 = vld [vmem:[%s2556_s7 + $0x130] ss:$8 sps:$4 sm:$0xff]   ;;  %v2322_v32 = vld [vmem:[%s2556_s7 + $0x144] ss:$8 sps:$4 sm:$0xff]  }
  0x1c   : > { %770 = vmatpush1.bf16.msra.mxu0 %v2287_v6  ;;  %2185 = vmatpush1.bf16.msra.mxu1 %v2287_v6  ;;  %v2324_v33 = vld [vmem:[%s2556_s7 + $0x40] ss:$8 sps:$4 sm:$0xff]   ;;  %v2326_v35 = vld [vmem:[%s2556_s7 + $0x54] ss:$8 sps:$4 sm:$0xff]   ;;  %v2330_v37 = vld [vmem:[%s2556_s7 + $0x50] ss:$8 sps:$4 sm:$0xff]  }
  0x1d   : > { %771 = vmatprep.subr.bf16.mxu0 %v2480_v1  ;;  %2173 = vmatprep.subr.bf16.mxu1 %v2480_v1  ;;  %v2325_v34 = vld [vmem:[%s2556_s7 + $0x140] ss:$8 sps:$4 sm:$0xff]   ;;  %v2328_v36 = vld [vmem:[%s2556_s7 + $0x154] ss:$8 sps:$4 sm:$0xff]   ;;  %v2331_v38 = vld [vmem:[%s2556_s7 + $0x150] ss:$8 sps:$4 sm:$0xff]  }
  0x1e   : > { %v2332_v39 = vld [vmem:[%s2556_s7 + $0x64] ss:$8 sps:$4 sm:$0xff]   ;;  %v2336_v41 = vld [vmem:[%s2556_s7 + $0x60] ss:$8 sps:$4 sm:$0xff]   ;;  %v2338_v43 = vld [vmem:[%s2556_s7 + $0x74] ss:$8 sps:$4 sm:$0xff]  }
  0x1f   : > { %v2334_v40 = vld [vmem:[%s2556_s7 + $0x164] ss:$8 sps:$4 sm:$0xff]   ;;  %v2337_v42 = vld [vmem:[%s2556_s7 + $0x160] ss:$8 sps:$4 sm:$0xff]   ;;  %v2340_v44 = vld [vmem:[%s2556_s7 + $0x174] ss:$8 sps:$4 sm:$0xff]  }
  0x20   : > { %772 = vmatpush1.bf16.msra.mxu0 %v2288_v8  ;;  %2186 = vmatpush1.bf16.msra.mxu1 %v2288_v8  ;;  %v2342_v45 = vld [vmem:[%s2556_s7 + $0x70] ss:$8 sps:$4 sm:$0xff]   ;;  %v2344_v47 = vld [vmem:[%s2556_s7 + $0x84] ss:$8 sps:$4 sm:$0xff]   ;;  %v2348_v49 = vld [vmem:[%s2556_s7 + $0x80] ss:$8 sps:$4 sm:$0xff]  }
  0x21   : > { %773 = vmatprep.subr.bf16.mxu0 %v2480_v1  ;;  %2174 = vmatprep.subr.bf16.mxu1 %v2480_v1  ;;  %v2343_v46 = vld [vmem:[%s2556_s7 + $0x170] ss:$8 sps:$4 sm:$0xff]   ;;  %v2346_v48 = vld [vmem:[%s2556_s7 + $0x184] ss:$8 sps:$4 sm:$0xff]   ;;  %v2349_v50 = vld [vmem:[%s2556_s7 + $0x180] ss:$8 sps:$4 sm:$0xff]  }
  0x22   : > { %v2350_v51 = vld [vmem:[%s2556_s7 + $0x94] ss:$8 sps:$4 sm:$0xff]   ;;  %v2354_v53 = vld [vmem:[%s2556_s7 + $0x90] ss:$8 sps:$4 sm:$0xff]   ;;  %v2356_v55 = vld [vmem:[%s2556_s7 + $0xa4] ss:$8 sps:$4 sm:$0xff]  }
  0x23   : > { %v2352_v52 = vld [vmem:[%s2556_s7 + $0x194] ss:$8 sps:$4 sm:$0xff]   ;;  %v2355_v54 = vld [vmem:[%s2556_s7 + $0x190] ss:$8 sps:$4 sm:$0xff]   ;;  %v2358_v56 = vld [vmem:[%s2556_s7 + $0x1a4] ss:$8 sps:$4 sm:$0xff]  }
  0x24   : > { %774 = vmatpush1.bf16.msra.mxu0 %v2289_v9  ;;  %2187 = vmatpush1.bf16.msra.mxu1 %v2289_v9  ;;  %v2360_v57 = vld [vmem:[%s2556_s7 + $0xa0] ss:$8 sps:$4 sm:$0xff]   ;;  %v2362_v59 = vld [vmem:[%s2556_s7 + $0xb4] ss:$8 sps:$4 sm:$0xff]   ;;  %v2366_v61 = vld [vmem:[%s2556_s7 + $0xb0] ss:$8 sps:$4 sm:$0xff]  }
  0x25   : > { %775 = vmatprep.subr.bf16.mxu0 %v2480_v1  ;;  %2175 = vmatprep.subr.bf16.mxu1 %v2480_v1  ;;  %v2361_v58 = vld [vmem:[%s2556_s7 + $0x1a0] ss:$8 sps:$4 sm:$0xff]   ;;  %v2364_v60 = vld [vmem:[%s2556_s7 + $0x1b4] ss:$8 sps:$4 sm:$0xff]   ;;  %v2367_v62 = vld [vmem:[%s2556_s7 + $0x1b0] ss:$8 sps:$4 sm:$0xff]  }
  0x26   : > { %v2368_v63 = vld [vmem:[%s2556_s7 + $0xc4] ss:$8 sps:$4 sm:$0xff]   ;;  %v2373_v2 = vld [vmem:[%s2556_s7 + $0x1c0] ss:$8 sps:$4 sm:$0xff]   ;;  %v2374_v3 = vld [vmem:[%s2556_s7 + $0xd4] ss:$8 sps:$4 sm:$0xff]  }
  0x27   : > { %v2370_v0 = vld [vmem:[%s2556_s7 + $0x1c4] ss:$8 sps:$4 sm:$0xff]   ;;  %v2376_v4 = vld [vmem:[%s2556_s7 + $0x1d4] ss:$8 sps:$4 sm:$0xff]   ;;  %v2378_v5 = vld [vmem:[%s2556_s7 + $0xd0] ss:$8 sps:$4 sm:$0xff]  }
  0x28   : > { %776 = vmatpush1.bf16.msra.mxu0 %v2290_v10  ;;  %2188 = vmatpush1.bf16.msra.mxu1 %v2290_v10  ;;  %v2379_v6 = vld [vmem:[%s2556_s7 + $0x1d0] ss:$8 sps:$4 sm:$0xff]   ;;  %v2380_v7 = vld [vmem:[%s2556_s7 + $0xe4] ss:$8 sps:$4 sm:$0xff]   ;;  %v2384_v9 = vld [vmem:[%s2556_s7 + $0xe0] ss:$8 sps:$4 sm:$0xff]  }
  0x29   : > { %777 = vmatprep.subr.bf16.mxu0 %v2480_v1  ;;  %2176 = vmatprep.subr.bf16.mxu1 %v2480_v1  ;;  %v2382_v8 = vld [vmem:[%s2556_s7 + $0x1e4] ss:$8 sps:$4 sm:$0xff]   ;;  %v2385_v10 = vld [vmem:[%s2556_s7 + $0x1e0] ss:$8 sps:$4 sm:$0xff]  }
  0x2c   : > { %778 = vmatpush1.bf16.msra.mxu0 %v2291_v11  ;;  %2189 = vmatpush1.bf16.msra.mxu1 %v2291_v11  ;;  %v2386_v11 = vld [vmem:[%s2556_s7 + $0xf4] ss:$8 sps:$4 sm:$0xff]  }
  0x2d   : > { %779 = vmatprep.subr.bf16.mxu0 %v2480_v1  ;;  %2177 = vmatprep.subr.bf16.mxu1 %v2480_v1 }
  0x30   : > { %780 = vmatpush1.bf16.msra.mxu0 %v2292_v12  ;;  %2190 = vmatpush1.bf16.msra.mxu1 %v2292_v12  ;;  %v2388_v12 = vld [vmem:[%s2556_s7 + $0x1f4] ss:$8 sps:$4 sm:$0xff]  }
  0x31   : > { %781 = vmatprep.subr.bf16.mxu0 %v2480_v1  ;;  %2178 = vmatprep.subr.bf16.mxu1 %v2480_v1 }
  0x34   : > { %782 = vmatpush1.bf16.msra.mxu0 %v2293_v13  ;;  %2191 = vmatpush1.bf16.msra.mxu1 %v2293_v13  ;;  %v2390_v13 = vld [vmem:[%s2556_s7 + $0xf0] ss:$8 sps:$4 sm:$0xff]  }
  0x35   : > { %783 = vmatprep.subr.bf16.mxu0 %v2480_v1  ;;  %2179 = vmatprep.subr.bf16.mxu1 %v2480_v1 }
  0x38   : > { %784 = vmatpush1.bf16.msra.mxu0 %v2294_v14  ;;  %2192 = vmatpush1.bf16.msra.mxu1 %v2294_v14  ;;  %v2391_v14 = vld [vmem:[%s2556_s7 + $0x1f0] ss:$8 sps:$4 sm:$0xff]  }
  0x39   : > { %785 = vmatprep.subr.bf16.mxu0 %v2480_v1  ;;  %2180 = vmatprep.subr.bf16.mxu1 %v2480_v1  ;;  %v2372_v1 = vld [vmem:[%s2556_s7 + $0xc0] ss:$8 sps:$4 sm:$0xff]   ;;  %s1443_s7 = ssub.s32 (%p2526_p4), 273, %s2539_s25 }
  0x3a   : > { %p1444_p8 = scmp.lt.s32.totalorder (%p2526_p4), %s1443_s7, 64 }
  0x3c   : > { %786 = vmatpush1.bf16.msra.mxu0 %v759_v16  ;;  %2193 = vmatpush1.bf16.msra.mxu1 %v759_v16 }
  0x3f   : > { %794 = vmatmul.mubr.bf16.vlgmr.msra.gmra.mrb[0].mxu0 %v2296_v17  ;;  %922 = vmatmul.mubr.bf16.vlgmr.msra.gmra.mrb[0].mxu1 %v2299_v18 }
  0x40   : > { %1988 = vmatprep.mubr.msk.bf16.mxu0 %vm660_vm0, %v2302_v19  ;;  %2004 = vmatprep.mubr.msk.bf16.mxu1 %vm660_vm0, %v2304_v20 }
  0x47   : > { %802 = vmatmul.mubr.bf16.gmra.mrb[4].mxu0 %v2306_v21  ;;  %930 = vmatmul.mubr.bf16.gmra.mrb[4].mxu1 %v2307_v22 }
  0x48   : > { %1989 = vmatprep.mubr.msk.bf16.mxu0 %vm660_vm0, %v2308_v23  ;;  %2005 = vmatprep.mubr.msk.bf16.mxu1 %vm660_vm0, %v2310_v24 }
  0x4f   : > { %810 = vmatmul.mubr.bf16.gmra.mrb[8].mxu0 %v2312_v25  ;;  %938 = vmatmul.mubr.bf16.gmra.mrb[8].mxu1 %v2313_v26 }
  0x50   : > { %1990 = vmatprep.mubr.msk.bf16.mxu0 %vm660_vm0, %v2314_v27  ;;  %2006 = vmatprep.mubr.msk.bf16.mxu1 %vm660_vm0, %v2316_v28 }
  0x57   : > { %818 = vmatmul.mubr.bf16.gmra.mrb[12].mxu0 %v2318_v29  ;;  %946 = vmatmul.mubr.bf16.gmra.mrb[12].mxu1 %v2319_v30 }
  0x58   : > { %1991 = vmatprep.mubr.msk.bf16.mxu0 %vm660_vm0, %v2320_v31  ;;  %2007 = vmatprep.mubr.msk.bf16.mxu1 %vm660_vm0, %v2322_v32 }
  0x5f   : > { %826 = vmatmul.mubr.bf16.gmra.mrb[16].mxu0 %v2324_v33  ;;  %954 = vmatmul.mubr.bf16.gmra.mrb[16].mxu1 %v2325_v34 }
  0x60   : > { %1992 = vmatprep.mubr.msk.bf16.mxu0 %vm660_vm0, %v2326_v35  ;;  %2008 = vmatprep.mubr.msk.bf16.mxu1 %vm660_vm0, %v2328_v36 }
  0x67   : > { %834 = vmatmul.mubr.bf16.gmra.mrb[20].mxu0 %v2330_v37  ;;  %962 = vmatmul.mubr.bf16.gmra.mrb[20].mxu1 %v2331_v38 }
  0x68   : > { %1993 = vmatprep.mubr.msk.bf16.mxu0 %vm660_vm0, %v2332_v39  ;;  %2009 = vmatprep.mubr.msk.bf16.mxu1 %vm660_vm0, %v2334_v40 }
  0x6f   : > { %842 = vmatmul.mubr.bf16.gmra.mrb[24].mxu0 %v2336_v41  ;;  %970 = vmatmul.mubr.bf16.gmra.mrb[24].mxu1 %v2337_v42 }
  0x70   : > { %1994 = vmatprep.mubr.msk.bf16.mxu0 %vm660_vm0, %v2338_v43  ;;  %2010 = vmatprep.mubr.msk.bf16.mxu1 %vm660_vm0, %v2340_v44 }
  0x77   : > { %850 = vmatmul.mubr.bf16.gmra.mrb[28].mxu0 %v2342_v45  ;;  %978 = vmatmul.mubr.bf16.gmra.mrb[28].mxu1 %v2343_v46 }
  0x78   : > { %1995 = vmatprep.mubr.msk.bf16.mxu0 %vm660_vm0, %v2344_v47  ;;  %2011 = vmatprep.mubr.msk.bf16.mxu1 %vm660_vm0, %v2346_v48 }
  0x7f   : > { %858 = vmatmul.mubr.bf16.gmra.mrb[32].mxu0 %v2348_v49  ;;  %986 = vmatmul.mubr.bf16.gmra.mrb[32].mxu1 %v2349_v50 }
  0x80   : > { %1996 = vmatprep.mubr.msk.bf16.mxu0 %vm660_vm0, %v2350_v51  ;;  %2012 = vmatprep.mubr.msk.bf16.mxu1 %vm660_vm0, %v2352_v52 }
  0x87   : > { %866 = vmatmul.mubr.bf16.gmra.mrb[36].mxu0 %v2354_v53  ;;  %994 = vmatmul.mubr.bf16.gmra.mrb[36].mxu1 %v2355_v54 }
  0x88   : > { %1997 = vmatprep.mubr.msk.bf16.mxu0 %vm660_vm0, %v2356_v55  ;;  %2013 = vmatprep.mubr.msk.bf16.mxu1 %vm660_vm0, %v2358_v56 }
  0x8f   : > { %874 = vmatmul.mubr.bf16.gmra.mrb[40].mxu0 %v2360_v57  ;;  %1002 = vmatmul.mubr.bf16.gmra.mrb[40].mxu1 %v2361_v58 }
  0x90   : > { %1998 = vmatprep.mubr.msk.bf16.mxu0 %vm660_vm0, %v2362_v59  ;;  %2014 = vmatprep.mubr.msk.bf16.mxu1 %vm660_vm0, %v2364_v60 }
  0x97   : > { %882 = vmatmul.mubr.bf16.gmra.mrb[44].mxu0 %v2366_v61  ;;  %1010 = vmatmul.mubr.bf16.gmra.mrb[44].mxu1 %v2367_v62 }
  0x98   : > { %1999 = vmatprep.mubr.msk.bf16.mxu0 %vm660_vm0, %v2368_v63  ;;  %2015 = vmatprep.mubr.msk.bf16.mxu1 %vm660_vm0, %v2370_v0 }
  0x9f   : > { %890 = vmatmul.mubr.bf16.gmra.mrb[48].mxu0 %v2372_v1  ;;  %1018 = vmatmul.mubr.bf16.gmra.mrb[48].mxu1 %v2373_v2 }
  0xa0   : > { %2000 = vmatprep.mubr.msk.bf16.mxu0 %vm660_vm0, %v2374_v3  ;;  %2016 = vmatprep.mubr.msk.bf16.mxu1 %vm660_vm0, %v2376_v4 }
  0xa7   : > { %898 = vmatmul.mubr.bf16.gmra.mrb[52].mxu0 %v2378_v5  ;;  %1026 = vmatmul.mubr.bf16.gmra.mrb[52].mxu1 %v2379_v6 }
  0xa8   : > { %2001 = vmatprep.mubr.msk.bf16.mxu0 %vm660_vm0, %v2380_v7  ;;  %2017 = vmatprep.mubr.msk.bf16.mxu1 %vm660_vm0, %v2382_v8 }
  0xaf   : > { %906 = vmatmul.mubr.bf16.gmra.mrb[56].mxu0 %v2384_v9  ;;  %1034 = vmatmul.mubr.bf16.gmra.mrb[56].mxu1 %v2385_v10 }
  0xb0   : > { %2002 = vmatprep.mubr.msk.bf16.mxu0 %vm660_vm0, %v2386_v11  ;;  %2018 = vmatprep.mubr.msk.bf16.mxu1 %vm660_vm0, %v2388_v12 }
  0xb7   : > { %914 = vmatmul.mubr.bf16.gmra.mrb[60].mxu0 %v2390_v13  ;;  %1042 = vmatmul.mubr.bf16.gmra.mrb[60].mxu1 %v2391_v14 }
 0x112   : > { %v795_v16 = vpop.f32.mrb[0].mxu0  ;;  %v923_v17 = vpop.f32.mrb[0].mxu1 }
 0x113   : > { %v796_v18 = vadd.f32 %v2705_v15, %v795_v16  ;;  %v924_v19 = vadd.f32 %v2705_v15, %v923_v17  ;;  %v797_v20 = vpop.f32.mrb[1].mxu0  ;;  %v925_v21 = vpop.f32.mrb[1].mxu1 }
 0x114   : > { %v798_v22 = vpop.f32.mrb[2].mxu0  ;;  %v926_v23 = vpop.f32.mrb[2].mxu1 }
 0x115   : > { %v1050_v24 = vmax.f32 %v796_v18, 0.0  ;;  %v1082_v25 = vmax.f32 %v924_v19, 0.0  ;;  %v799_v26 = vadd.f32 %v2705_v15, %v798_v22  ;;  %v927_v27 = vadd.f32 %v2705_v15, %v926_v23  ;;  %v800_v28 = vpop.f32.mrb[3].mxu0  ;;  %v928_v29 = vpop.f32.mrb[3].mxu1 }
 0x117   : > { %v2101_v30 = vpack.c.bf16 %v1050_v24, %v1050_v24  ;;  %v2133_v31 = vpack.c.bf16 %v1082_v25, %v1082_v25  ;;  %v1051_v32 = vmax.f32 %v799_v26, 0.0  ;;  %v1083_v33 = vmax.f32 %v927_v27, 0.0 }
 0x119   : > { %1371 = vst.msk [vmem:[%s2711_s12] sm:$0xf] %vm1370_vm2, %v2101_v30  ;;  %1403 = vst.msk [vmem:[%s2711_s12 + $0x80] sm:$0xf] %vm1370_vm2, %v2133_v31  ;;  %v2102_v34 = vpack.c.bf16 %v1051_v32, %v1051_v32  ;;  %v2134_v35 = vpack.c.bf16 %v1083_v33, %v1083_v33 }
 0x11a   : > { %v803_v36 = vpop.f32.mrb[4].mxu0  ;;  %v931_v37 = vpop.f32.mrb[4].mxu1 }
 0x11b   : > { %1372 = vst.msk [vmem:[%s2711_s12 + $0x4] sm:$0xf] %vm1370_vm2, %v2102_v34  ;;  %1404 = vst.msk [vmem:[%s2711_s12 + $0x84] sm:$0xf] %vm1370_vm2, %v2134_v35  ;;  %v804_v38 = vadd.f32 %v2705_v15, %v803_v36  ;;  %v932_v39 = vadd.f32 %v2705_v15, %v931_v37  ;;  %v805_v40 = vpop.f32.mrb[5].mxu0  ;;  %v933_v41 = vpop.f32.mrb[5].mxu1 }
 0x11c   : > { %v806_v42 = vpop.f32.mrb[6].mxu0  ;;  %v934_v43 = vpop.f32.mrb[6].mxu1 }
 0x11d   : > { %v1052_v44 = vmax.f32 %v804_v38, 0.0  ;;  %v1084_v45 = vmax.f32 %v932_v39, 0.0  ;;  %v807_v46 = vadd.f32 %v2705_v15, %v806_v42  ;;  %v935_v47 = vadd.f32 %v2705_v15, %v934_v43  ;;  %v808_v48 = vpop.f32.mrb[7].mxu0  ;;  %v936_v49 = vpop.f32.mrb[7].mxu1 }
 0x11f   : > { %v2103_v50 = vpack.c.bf16 %v1052_v44, %v1052_v44  ;;  %v2135_v51 = vpack.c.bf16 %v1084_v45, %v1084_v45  ;;  %v1053_v52 = vmax.f32 %v807_v46, 0.0  ;;  %v1085_v53 = vmax.f32 %v935_v47, 0.0 }
 0x121   : > { %1373 = vst.msk [vmem:[%s2711_s12 + $0x8] sm:$0xf] %vm1370_vm2, %v2103_v50  ;;  %1405 = vst.msk [vmem:[%s2711_s12 + $0x88] sm:$0xf] %vm1370_vm2, %v2135_v51  ;;  %v2104_v54 = vpack.c.bf16 %v1053_v52, %v1053_v52  ;;  %v2136_v55 = vpack.c.bf16 %v1085_v53, %v1085_v53 }
 0x122   : > { %v811_v56 = vpop.f32.mrb[8].mxu0  ;;  %v939_v57 = vpop.f32.mrb[8].mxu1 }
 0x123   : > { %1374 = vst.msk [vmem:[%s2711_s12 + $0xc] sm:$0xf] %vm1370_vm2, %v2104_v54  ;;  %1406 = vst.msk [vmem:[%s2711_s12 + $0x8c] sm:$0xf] %vm1370_vm2, %v2136_v55  ;;  %v812_v58 = vadd.f32 %v2705_v15, %v811_v56  ;;  %v940_v59 = vadd.f32 %v2705_v15, %v939_v57  ;;  %v813_v60 = vpop.f32.mrb[9].mxu0  ;;  %v941_v61 = vpop.f32.mrb[9].mxu1 }
 0x124   : > { %v814_v62 = vpop.f32.mrb[10].mxu0  ;;  %v942_v63 = vpop.f32.mrb[10].mxu1 }
 0x125   : > { %v1054_v0 = vmax.f32 %v812_v58, 0.0  ;;  %v1086_v1 = vmax.f32 %v940_v59, 0.0  ;;  %v815_v2 = vadd.f32 %v2705_v15, %v814_v62  ;;  %v943_v3 = vadd.f32 %v2705_v15, %v942_v63  ;;  %v816_v4 = vpop.f32.mrb[11].mxu0  ;;  %v944_v5 = vpop.f32.mrb[11].mxu1 }
 0x127   : > { %v2105_v6 = vpack.c.bf16 %v1054_v0, %v1054_v0  ;;  %v2137_v7 = vpack.c.bf16 %v1086_v1, %v1086_v1  ;;  %v1055_v8 = vmax.f32 %v815_v2, 0.0  ;;  %v1087_v9 = vmax.f32 %v943_v3, 0.0 }
 0x129   : > { %1375 = vst.msk [vmem:[%s2711_s12 + $0x10] sm:$0xf] %vm1370_vm2, %v2105_v6  ;;  %1407 = vst.msk [vmem:[%s2711_s12 + $0x90] sm:$0xf] %vm1370_vm2, %v2137_v7  ;;  %v2106_v10 = vpack.c.bf16 %v1055_v8, %v1055_v8  ;;  %v2138_v11 = vpack.c.bf16 %v1087_v9, %v1087_v9 }
 0x12a   : > { %v819_v12 = vpop.f32.mrb[12].mxu0  ;;  %v947_v13 = vpop.f32.mrb[12].mxu1 }
 0x12b   : > { %1376 = vst.msk [vmem:[%s2711_s12 + $0x14] sm:$0xf] %vm1370_vm2, %v2106_v10  ;;  %1408 = vst.msk [vmem:[%s2711_s12 + $0x94] sm:$0xf] %vm1370_vm2, %v2138_v11  ;;  %v820_v14 = vadd.f32 %v2705_v15, %v819_v12  ;;  %v948_v16 = vadd.f32 %v2705_v15, %v947_v13  ;;  %v821_v17 = vpop.f32.mrb[13].mxu0  ;;  %v949_v18 = vpop.f32.mrb[13].mxu1 }
 0x12c   : > { %v822_v19 = vpop.f32.mrb[14].mxu0  ;;  %v950_v20 = vpop.f32.mrb[14].mxu1 }
 0x12d   : > { %v1056_v21 = vmax.f32 %v820_v14, 0.0  ;;  %v1088_v22 = vmax.f32 %v948_v16, 0.0  ;;  %v823_v23 = vadd.f32 %v2705_v15, %v822_v19  ;;  %v951_v24 = vadd.f32 %v2705_v15, %v950_v20  ;;  %v824_v25 = vpop.f32.mrb[15].mxu0  ;;  %v952_v26 = vpop.f32.mrb[15].mxu1 }
 0x12f   : > { %v2107_v27 = vpack.c.bf16 %v1056_v21, %v1056_v21  ;;  %v2139_v28 = vpack.c.bf16 %v1088_v22, %v1088_v22  ;;  %v1057_v29 = vmax.f32 %v823_v23, 0.0  ;;  %v1089_v30 = vmax.f32 %v951_v24, 0.0 }
 0x131   : > { %1377 = vst.msk [vmem:[%s2711_s12 + $0x18] sm:$0xf] %vm1370_vm2, %v2107_v27  ;;  %1409 = vst.msk [vmem:[%s2711_s12 + $0x98] sm:$0xf] %vm1370_vm2, %v2139_v28  ;;  %v2108_v31 = vpack.c.bf16 %v1057_v29, %v1057_v29  ;;  %v2140_v32 = vpack.c.bf16 %v1089_v30, %v1089_v30 }
 0x132   : > { %v827_v33 = vpop.f32.mrb[16].mxu0  ;;  %v955_v34 = vpop.f32.mrb[16].mxu1 }
 0x133   : > { %1378 = vst.msk [vmem:[%s2711_s12 + $0x1c] sm:$0xf] %vm1370_vm2, %v2108_v31  ;;  %1410 = vst.msk [vmem:[%s2711_s12 + $0x9c] sm:$0xf] %vm1370_vm2, %v2140_v32  ;;  %v828_v35 = vadd.f32 %v2705_v15, %v827_v33  ;;  %v956_v36 = vadd.f32 %v2705_v15, %v955_v34  ;;  %v829_v37 = vpop.f32.mrb[17].mxu0  ;;  %v957_v38 = vpop.f32.mrb[17].mxu1 }
 0x134   : > { %v830_v39 = vpop.f32.mrb[18].mxu0  ;;  %v958_v40 = vpop.f32.mrb[18].mxu1 }
 0x135   : > { %v1058_v41 = vmax.f32 %v828_v35, 0.0  ;;  %v1090_v42 = vmax.f32 %v956_v36, 0.0  ;;  %v831_v43 = vadd.f32 %v2705_v15, %v830_v39  ;;  %v959_v44 = vadd.f32 %v2705_v15, %v958_v40  ;;  %v832_v45 = vpop.f32.mrb[19].mxu0  ;;  %v960_v46 = vpop.f32.mrb[19].mxu1 }
 0x137   : > { %v2109_v47 = vpack.c.bf16 %v1058_v41, %v1058_v41  ;;  %v2141_v48 = vpack.c.bf16 %v1090_v42, %v1090_v42  ;;  %v1059_v49 = vmax.f32 %v831_v43, 0.0  ;;  %v1091_v50 = vmax.f32 %v959_v44, 0.0 }
 0x139   : > { %1379 = vst.msk [vmem:[%s2711_s12 + $0x20] sm:$0xf] %vm1370_vm2, %v2109_v47  ;;  %1411 = vst.msk [vmem:[%s2711_s12 + $0xa0] sm:$0xf] %vm1370_vm2, %v2141_v48  ;;  %v2110_v51 = vpack.c.bf16 %v1059_v49, %v1059_v49  ;;  %v2142_v52 = vpack.c.bf16 %v1091_v50, %v1091_v50 }
 0x13a   : > { %v835_v53 = vpop.f32.mrb[20].mxu0  ;;  %v963_v54 = vpop.f32.mrb[20].mxu1 }
 0x13b   : > { %1380 = vst.msk [vmem:[%s2711_s12 + $0x24] sm:$0xf] %vm1370_vm2, %v2110_v51  ;;  %1412 = vst.msk [vmem:[%s2711_s12 + $0xa4] sm:$0xf] %vm1370_vm2, %v2142_v52  ;;  %v836_v55 = vadd.f32 %v2705_v15, %v835_v53  ;;  %v964_v56 = vadd.f32 %v2705_v15, %v963_v54  ;;  %v837_v57 = vpop.f32.mrb[21].mxu0  ;;  %v965_v58 = vpop.f32.mrb[21].mxu1 }
 0x13c   : > { %v838_v59 = vpop.f32.mrb[22].mxu0  ;;  %v966_v60 = vpop.f32.mrb[22].mxu1 }
 0x13d   : > { %v1060_v61 = vmax.f32 %v836_v55, 0.0  ;;  %v1092_v62 = vmax.f32 %v964_v56, 0.0  ;;  %v839_v63 = vadd.f32 %v2705_v15, %v838_v59  ;;  %v967_v0 = vadd.f32 %v2705_v15, %v966_v60  ;;  %v840_v1 = vpop.f32.mrb[23].mxu0  ;;  %v968_v2 = vpop.f32.mrb[23].mxu1 }
 0x13f   : > { %v2111_v3 = vpack.c.bf16 %v1060_v61, %v1060_v61  ;;  %v2143_v4 = vpack.c.bf16 %v1092_v62, %v1092_v62  ;;  %v1061_v5 = vmax.f32 %v839_v63, 0.0  ;;  %v1093_v6 = vmax.f32 %v967_v0, 0.0 }
 0x141   : > { %1381 = vst.msk [vmem:[%s2711_s12 + $0x28] sm:$0xf] %vm1370_vm2, %v2111_v3  ;;  %1413 = vst.msk [vmem:[%s2711_s12 + $0xa8] sm:$0xf] %vm1370_vm2, %v2143_v4  ;;  %v2112_v7 = vpack.c.bf16 %v1061_v5, %v1061_v5  ;;  %v2144_v8 = vpack.c.bf16 %v1093_v6, %v1093_v6 }
 0x142   : > { %v843_v9 = vpop.f32.mrb[24].mxu0  ;;  %v971_v10 = vpop.f32.mrb[24].mxu1 }
 0x143   : > { %1382 = vst.msk [vmem:[%s2711_s12 + $0x2c] sm:$0xf] %vm1370_vm2, %v2112_v7  ;;  %1414 = vst.msk [vmem:[%s2711_s12 + $0xac] sm:$0xf] %vm1370_vm2, %v2144_v8  ;;  %v844_v11 = vadd.f32 %v2705_v15, %v843_v9  ;;  %v972_v12 = vadd.f32 %v2705_v15, %v971_v10  ;;  %v845_v13 = vpop.f32.mrb[25].mxu0  ;;  %v973_v14 = vpop.f32.mrb[25].mxu1 }
 0x144   : > { %v846_v16 = vpop.f32.mrb[26].mxu0  ;;  %v974_v17 = vpop.f32.mrb[26].mxu1 }
 0x145   : > { %v1062_v18 = vmax.f32 %v844_v11, 0.0  ;;  %v1094_v19 = vmax.f32 %v972_v12, 0.0  ;;  %v847_v20 = vadd.f32 %v2705_v15, %v846_v16  ;;  %v975_v21 = vadd.f32 %v2705_v15, %v974_v17  ;;  %v848_v22 = vpop.f32.mrb[27].mxu0  ;;  %v976_v23 = vpop.f32.mrb[27].mxu1 }
 0x147   : > { %v2113_v24 = vpack.c.bf16 %v1062_v18, %v1062_v18  ;;  %v2145_v25 = vpack.c.bf16 %v1094_v19, %v1094_v19  ;;  %v1063_v26 = vmax.f32 %v847_v20, 0.0  ;;  %v1095_v27 = vmax.f32 %v975_v21, 0.0 }
 0x149   : > { %1383 = vst.msk [vmem:[%s2711_s12 + $0x30] sm:$0xf] %vm1370_vm2, %v2113_v24  ;;  %1415 = vst.msk [vmem:[%s2711_s12 + $0xb0] sm:$0xf] %vm1370_vm2, %v2145_v25  ;;  %v2114_v28 = vpack.c.bf16 %v1063_v26, %v1063_v26  ;;  %v2146_v29 = vpack.c.bf16 %v1095_v27, %v1095_v27 }
 0x14a   : > { %v851_v30 = vpop.f32.mrb[28].mxu0  ;;  %v979_v31 = vpop.f32.mrb[28].mxu1 }
 0x14b   : > { %1384 = vst.msk [vmem:[%s2711_s12 + $0x34] sm:$0xf] %vm1370_vm2, %v2114_v28  ;;  %1416 = vst.msk [vmem:[%s2711_s12 + $0xb4] sm:$0xf] %vm1370_vm2, %v2146_v29  ;;  %v852_v32 = vadd.f32 %v2705_v15, %v851_v30  ;;  %v980_v33 = vadd.f32 %v2705_v15, %v979_v31  ;;  %v853_v34 = vpop.f32.mrb[29].mxu0  ;;  %v981_v35 = vpop.f32.mrb[29].mxu1 }
 0x14c   : > { %v854_v36 = vpop.f32.mrb[30].mxu0  ;;  %v982_v37 = vpop.f32.mrb[30].mxu1 }
 0x14d   : > { %v1064_v38 = vmax.f32 %v852_v32, 0.0  ;;  %v1096_v39 = vmax.f32 %v980_v33, 0.0  ;;  %v855_v40 = vadd.f32 %v2705_v15, %v854_v36  ;;  %v983_v41 = vadd.f32 %v2705_v15, %v982_v37  ;;  %v856_v42 = vpop.f32.mrb[31].mxu0  ;;  %v984_v43 = vpop.f32.mrb[31].mxu1 }
 0x14f   : > { %v2115_v44 = vpack.c.bf16 %v1064_v38, %v1064_v38  ;;  %v2147_v45 = vpack.c.bf16 %v1096_v39, %v1096_v39  ;;  %v1065_v46 = vmax.f32 %v855_v40, 0.0  ;;  %v1097_v47 = vmax.f32 %v983_v41, 0.0 }
 0x151   : > { %1385 = vst.msk [vmem:[%s2711_s12 + $0x38] sm:$0xf] %vm1370_vm2, %v2115_v44  ;;  %1417 = vst.msk [vmem:[%s2711_s12 + $0xb8] sm:$0xf] %vm1370_vm2, %v2147_v45  ;;  %v2116_v48 = vpack.c.bf16 %v1065_v46, %v1065_v46  ;;  %v2148_v49 = vpack.c.bf16 %v1097_v47, %v1097_v47 }
 0x152   : > { %v859_v50 = vpop.f32.mrb[32].mxu0  ;;  %v987_v51 = vpop.f32.mrb[32].mxu1 }
 0x153   : > { %1386 = vst.msk [vmem:[%s2711_s12 + $0x3c] sm:$0xf] %vm1370_vm2, %v2116_v48  ;;  %1418 = vst.msk [vmem:[%s2711_s12 + $0xbc] sm:$0xf] %vm1370_vm2, %v2148_v49  ;;  %v860_v52 = vadd.f32 %v2705_v15, %v859_v50  ;;  %v988_v53 = vadd.f32 %v2705_v15, %v987_v51  ;;  %v861_v54 = vpop.f32.mrb[33].mxu0  ;;  %v989_v55 = vpop.f32.mrb[33].mxu1 }
 0x154   : > { %v862_v56 = vpop.f32.mrb[34].mxu0  ;;  %v990_v57 = vpop.f32.mrb[34].mxu1 }
 0x155   : > { %v1066_v58 = vmax.f32 %v860_v52, 0.0  ;;  %v1098_v59 = vmax.f32 %v988_v53, 0.0  ;;  %v863_v60 = vadd.f32 %v2705_v15, %v862_v56  ;;  %v991_v61 = vadd.f32 %v2705_v15, %v990_v57  ;;  %v864_v62 = vpop.f32.mrb[35].mxu0  ;;  %v992_v63 = vpop.f32.mrb[35].mxu1 }
 0x157   : > { %v2117_v0 = vpack.c.bf16 %v1066_v58, %v1066_v58  ;;  %v2149_v1 = vpack.c.bf16 %v1098_v59, %v1098_v59  ;;  %v1067_v2 = vmax.f32 %v863_v60, 0.0  ;;  %v1099_v3 = vmax.f32 %v991_v61, 0.0 }
 0x159   : > { %1387 = vst.msk [vmem:[%s2711_s12 + $0x40] sm:$0xf] %vm1370_vm2, %v2117_v0  ;;  %1419 = vst.msk [vmem:[%s2711_s12 + $0xc0] sm:$0xf] %vm1370_vm2, %v2149_v1  ;;  %v2118_v4 = vpack.c.bf16 %v1067_v2, %v1067_v2  ;;  %v2150_v5 = vpack.c.bf16 %v1099_v3, %v1099_v3 }
 0x15a   : > { %v867_v6 = vpop.f32.mrb[36].mxu0  ;;  %v995_v7 = vpop.f32.mrb[36].mxu1 }
 0x15b   : > { %1388 = vst.msk [vmem:[%s2711_s12 + $0x44] sm:$0xf] %vm1370_vm2, %v2118_v4  ;;  %1420 = vst.msk [vmem:[%s2711_s12 + $0xc4] sm:$0xf] %vm1370_vm2, %v2150_v5  ;;  %v868_v8 = vadd.f32 %v2705_v15, %v867_v6  ;;  %v996_v9 = vadd.f32 %v2705_v15, %v995_v7  ;;  %v869_v10 = vpop.f32.mrb[37].mxu0  ;;  %v997_v11 = vpop.f32.mrb[37].mxu1 }
 0x15c   : > { %v870_v12 = vpop.f32.mrb[38].mxu0  ;;  %v998_v13 = vpop.f32.mrb[38].mxu1 }
 0x15d   : > { %v1068_v14 = vmax.f32 %v868_v8, 0.0  ;;  %v1100_v16 = vmax.f32 %v996_v9, 0.0  ;;  %v871_v17 = vadd.f32 %v2705_v15, %v870_v12  ;;  %v999_v18 = vadd.f32 %v2705_v15, %v998_v13  ;;  %v872_v19 = vpop.f32.mrb[39].mxu0  ;;  %v1000_v20 = vpop.f32.mrb[39].mxu1 }
 0x15f   : > { %v2119_v21 = vpack.c.bf16 %v1068_v14, %v1068_v14  ;;  %v2151_v22 = vpack.c.bf16 %v1100_v16, %v1100_v16  ;;  %v1069_v23 = vmax.f32 %v871_v17, 0.0  ;;  %v1101_v24 = vmax.f32 %v999_v18, 0.0 }
 0x161   : > { %1389 = vst.msk [vmem:[%s2711_s12 + $0x48] sm:$0xf] %vm1370_vm2, %v2119_v21  ;;  %1421 = vst.msk [vmem:[%s2711_s12 + $0xc8] sm:$0xf] %vm1370_vm2, %v2151_v22  ;;  %v2120_v25 = vpack.c.bf16 %v1069_v23, %v1069_v23  ;;  %v2152_v26 = vpack.c.bf16 %v1101_v24, %v1101_v24 }
 0x162   : > { %v875_v27 = vpop.f32.mrb[40].mxu0  ;;  %v1003_v28 = vpop.f32.mrb[40].mxu1 }
 0x163   : > { %1390 = vst.msk [vmem:[%s2711_s12 + $0x4c] sm:$0xf] %vm1370_vm2, %v2120_v25  ;;  %1422 = vst.msk [vmem:[%s2711_s12 + $0xcc] sm:$0xf] %vm1370_vm2, %v2152_v26  ;;  %v876_v29 = vadd.f32 %v2705_v15, %v875_v27  ;;  %v1004_v30 = vadd.f32 %v2705_v15, %v1003_v28  ;;  %v877_v31 = vpop.f32.mrb[41].mxu0  ;;  %v1005_v32 = vpop.f32.mrb[41].mxu1 }
 0x164   : > { %v878_v33 = vpop.f32.mrb[42].mxu0  ;;  %v1006_v34 = vpop.f32.mrb[42].mxu1 }
 0x165   : > { %v1070_v35 = vmax.f32 %v876_v29, 0.0  ;;  %v1102_v36 = vmax.f32 %v1004_v30, 0.0  ;;  %v879_v37 = vadd.f32 %v2705_v15, %v878_v33  ;;  %v1007_v38 = vadd.f32 %v2705_v15, %v1006_v34  ;;  %v880_v39 = vpop.f32.mrb[43].mxu0  ;;  %v1008_v40 = vpop.f32.mrb[43].mxu1 }
 0x167   : > { %v2121_v41 = vpack.c.bf16 %v1070_v35, %v1070_v35  ;;  %v2153_v42 = vpack.c.bf16 %v1102_v36, %v1102_v36  ;;  %v1071_v43 = vmax.f32 %v879_v37, 0.0  ;;  %v1103_v44 = vmax.f32 %v1007_v38, 0.0 }
 0x169   : > { %1391 = vst.msk [vmem:[%s2711_s12 + $0x50] sm:$0xf] %vm1370_vm2, %v2121_v41  ;;  %1423 = vst.msk [vmem:[%s2711_s12 + $0xd0] sm:$0xf] %vm1370_vm2, %v2153_v42  ;;  %v2122_v45 = vpack.c.bf16 %v1071_v43, %v1071_v43  ;;  %v2154_v46 = vpack.c.bf16 %v1103_v44, %v1103_v44 }
 0x16a   : > { %v883_v47 = vpop.f32.mrb[44].mxu0  ;;  %v1011_v48 = vpop.f32.mrb[44].mxu1 }
 0x16b   : > { %1392 = vst.msk [vmem:[%s2711_s12 + $0x54] sm:$0xf] %vm1370_vm2, %v2122_v45  ;;  %1424 = vst.msk [vmem:[%s2711_s12 + $0xd4] sm:$0xf] %vm1370_vm2, %v2154_v46  ;;  %v884_v49 = vadd.f32 %v2705_v15, %v883_v47  ;;  %v1012_v50 = vadd.f32 %v2705_v15, %v1011_v48  ;;  %v885_v51 = vpop.f32.mrb[45].mxu0  ;;  %v1013_v52 = vpop.f32.mrb[45].mxu1 }
 0x16c   : > { %v886_v53 = vpop.f32.mrb[46].mxu0  ;;  %v1014_v54 = vpop.f32.mrb[46].mxu1 }
 0x16d   : > { %v1072_v55 = vmax.f32 %v884_v49, 0.0  ;;  %v1104_v56 = vmax.f32 %v1012_v50, 0.0  ;;  %v887_v57 = vadd.f32 %v2705_v15, %v886_v53  ;;  %v1015_v58 = vadd.f32 %v2705_v15, %v1014_v54  ;;  %v888_v59 = vpop.f32.mrb[47].mxu0  ;;  %v1016_v60 = vpop.f32.mrb[47].mxu1 }
 0x16f   : > { %v2123_v61 = vpack.c.bf16 %v1072_v55, %v1072_v55  ;;  %v2155_v62 = vpack.c.bf16 %v1104_v56, %v1104_v56  ;;  %v1073_v63 = vmax.f32 %v887_v57, 0.0  ;;  %v1105_v0 = vmax.f32 %v1015_v58, 0.0 }
 0x171   : > { %1393 = vst.msk [vmem:[%s2711_s12 + $0x58] sm:$0xf] %vm1370_vm2, %v2123_v61  ;;  %1425 = vst.msk [vmem:[%s2711_s12 + $0xd8] sm:$0xf] %vm1370_vm2, %v2155_v62  ;;  %v2124_v1 = vpack.c.bf16 %v1073_v63, %v1073_v63  ;;  %v2156_v2 = vpack.c.bf16 %v1105_v0, %v1105_v0 }
 0x172   : > { %v891_v3 = vpop.f32.mrb[48].mxu0  ;;  %v1019_v4 = vpop.f32.mrb[48].mxu1 }
 0x173   : > { %1394 = vst.msk [vmem:[%s2711_s12 + $0x5c] sm:$0xf] %vm1370_vm2, %v2124_v1  ;;  %1426 = vst.msk [vmem:[%s2711_s12 + $0xdc] sm:$0xf] %vm1370_vm2, %v2156_v2  ;;  %v892_v5 = vadd.f32 %v2705_v15, %v891_v3  ;;  %v1020_v6 = vadd.f32 %v2705_v15, %v1019_v4  ;;  %v893_v7 = vpop.f32.mrb[49].mxu0  ;;  %v1021_v8 = vpop.f32.mrb[49].mxu1 }
 0x174   : > { %v894_v9 = vpop.f32.mrb[50].mxu0  ;;  %v1022_v10 = vpop.f32.mrb[50].mxu1 }
 0x175   : > { %v1074_v11 = vmax.f32 %v892_v5, 0.0  ;;  %v1106_v12 = vmax.f32 %v1020_v6, 0.0  ;;  %v895_v13 = vadd.f32 %v2705_v15, %v894_v9  ;;  %v1023_v14 = vadd.f32 %v2705_v15, %v1022_v10  ;;  %v896_v16 = vpop.f32.mrb[51].mxu0  ;;  %v1024_v17 = vpop.f32.mrb[51].mxu1 }
 0x177   : > { %v2125_v18 = vpack.c.bf16 %v1074_v11, %v1074_v11  ;;  %v2157_v19 = vpack.c.bf16 %v1106_v12, %v1106_v12  ;;  %v1075_v20 = vmax.f32 %v895_v13, 0.0  ;;  %v1107_v21 = vmax.f32 %v1023_v14, 0.0 }
 0x179   : > { %1395 = vst.msk [vmem:[%s2711_s12 + $0x60] sm:$0xf] %vm1370_vm2, %v2125_v18  ;;  %1427 = vst.msk [vmem:[%s2711_s12 + $0xe0] sm:$0xf] %vm1370_vm2, %v2157_v19  ;;  %v2126_v22 = vpack.c.bf16 %v1075_v20, %v1075_v20  ;;  %v2158_v23 = vpack.c.bf16 %v1107_v21, %v1107_v21 }
 0x17a   : > { %v899_v24 = vpop.f32.mrb[52].mxu0  ;;  %v1027_v25 = vpop.f32.mrb[52].mxu1 }
 0x17b   : > { %1396 = vst.msk [vmem:[%s2711_s12 + $0x64] sm:$0xf] %vm1370_vm2, %v2126_v22  ;;  %1428 = vst.msk [vmem:[%s2711_s12 + $0xe4] sm:$0xf] %vm1370_vm2, %v2158_v23  ;;  %v900_v26 = vadd.f32 %v2705_v15, %v899_v24  ;;  %v1028_v27 = vadd.f32 %v2705_v15, %v1027_v25  ;;  %v901_v28 = vpop.f32.mrb[53].mxu0  ;;  %v1029_v29 = vpop.f32.mrb[53].mxu1 }
 0x17c   : > { %v902_v30 = vpop.f32.mrb[54].mxu0  ;;  %v1030_v31 = vpop.f32.mrb[54].mxu1 }
 0x17d   : > { %v1076_v32 = vmax.f32 %v900_v26, 0.0  ;;  %v1108_v33 = vmax.f32 %v1028_v27, 0.0  ;;  %v903_v34 = vadd.f32 %v2705_v15, %v902_v30  ;;  %v1031_v35 = vadd.f32 %v2705_v15, %v1030_v31  ;;  %v904_v36 = vpop.f32.mrb[55].mxu0  ;;  %v1032_v37 = vpop.f32.mrb[55].mxu1 }
 0x17f   : > { %v2127_v38 = vpack.c.bf16 %v1076_v32, %v1076_v32  ;;  %v2159_v39 = vpack.c.bf16 %v1108_v33, %v1108_v33  ;;  %v1077_v40 = vmax.f32 %v903_v34, 0.0  ;;  %v1109_v41 = vmax.f32 %v1031_v35, 0.0 }
 0x181   : > { %1397 = vst.msk [vmem:[%s2711_s12 + $0x68] sm:$0xf] %vm1370_vm2, %v2127_v38  ;;  %1429 = vst.msk [vmem:[%s2711_s12 + $0xe8] sm:$0xf] %vm1370_vm2, %v2159_v39  ;;  %v2128_v42 = vpack.c.bf16 %v1077_v40, %v1077_v40  ;;  %v2160_v43 = vpack.c.bf16 %v1109_v41, %v1109_v41 }
 0x182   : > { %v907_v44 = vpop.f32.mrb[56].mxu0  ;;  %v1035_v45 = vpop.f32.mrb[56].mxu1 }
 0x183   : > { %1398 = vst.msk [vmem:[%s2711_s12 + $0x6c] sm:$0xf] %vm1370_vm2, %v2128_v42  ;;  %1430 = vst.msk [vmem:[%s2711_s12 + $0xec] sm:$0xf] %vm1370_vm2, %v2160_v43  ;;  %v908_v46 = vadd.f32 %v2705_v15, %v907_v44  ;;  %v1036_v47 = vadd.f32 %v2705_v15, %v1035_v45  ;;  %v909_v48 = vpop.f32.mrb[57].mxu0  ;;  %v1037_v49 = vpop.f32.mrb[57].mxu1 }
 0x184   : > { %v910_v50 = vpop.f32.mrb[58].mxu0  ;;  %v1038_v51 = vpop.f32.mrb[58].mxu1 }
 0x185   : > { %v1078_v52 = vmax.f32 %v908_v46, 0.0  ;;  %v1110_v53 = vmax.f32 %v1036_v47, 0.0  ;;  %v911_v54 = vadd.f32 %v2705_v15, %v910_v50  ;;  %v1039_v55 = vadd.f32 %v2705_v15, %v1038_v51  ;;  %v912_v56 = vpop.f32.mrb[59].mxu0  ;;  %v1040_v57 = vpop.f32.mrb[59].mxu1 }
 0x187   : > { %v2129_v58 = vpack.c.bf16 %v1078_v52, %v1078_v52  ;;  %v2161_v59 = vpack.c.bf16 %v1110_v53, %v1110_v53  ;;  %v1079_v60 = vmax.f32 %v911_v54, 0.0  ;;  %v1111_v61 = vmax.f32 %v1039_v55, 0.0 }
 0x189   : > { %1399 = vst.msk [vmem:[%s2711_s12 + $0x70] sm:$0xf] %vm1370_vm2, %v2129_v58  ;;  %1431 = vst.msk [vmem:[%s2711_s12 + $0xf0] sm:$0xf] %vm1370_vm2, %v2161_v59  ;;  %v2130_v62 = vpack.c.bf16 %v1079_v60, %v1079_v60  ;;  %v2162_v63 = vpack.c.bf16 %v1111_v61, %v1111_v61 }
 0x18a   : > { %v915_v0 = vpop.f32.mrb[60].mxu0  ;;  %v1043_v1 = vpop.f32.mrb[60].mxu1 }
 0x18b   : > { %1400 = vst.msk [vmem:[%s2711_s12 + $0x74] sm:$0xf] %vm1370_vm2, %v2130_v62  ;;  %1432 = vst.msk [vmem:[%s2711_s12 + $0xf4] sm:$0xf] %vm1370_vm2, %v2162_v63  ;;  %v916_v2 = vadd.f32 %v2705_v15, %v915_v0  ;;  %v1044_v3 = vadd.f32 %v2705_v15, %v1043_v1  ;;  %v917_v4 = vpop.f32.mrb[61].mxu0  ;;  %v1045_v5 = vpop.f32.mrb[61].mxu1 }
 0x18c   : > { %v918_v6 = vpop.f32.mrb[62].mxu0  ;;  %v1046_v7 = vpop.f32.mrb[62].mxu1 }
 0x18d   : > { %v1080_v8 = vmax.f32 %v916_v2, 0.0  ;;  %v1112_v9 = vmax.f32 %v1044_v3, 0.0  ;;  %v919_v10 = vadd.f32 %v2705_v15, %v918_v6  ;;  %v1047_v11 = vadd.f32 %v2705_v15, %v1046_v7  ;;  %v920_v12 = vpop.f32.mrb[63].mxu0  ;;  %v1048_v13 = vpop.f32.mrb[63].mxu1  ;;  %1441 = sbr.rel (!%p2526_p4) target bundleno = 495 (0x1ef), region = 36 }
 0x18f   : > { %v2131_v14 = vpack.c.bf16 %v1080_v8, %v1080_v8  ;;  %v2163_v16 = vpack.c.bf16 %v1112_v9, %v1112_v9  ;;  %v1081_v17 = vmax.f32 %v919_v10, 0.0  ;;  %v1113_v18 = vmax.f32 %v1047_v11, 0.0 }
 0x191   : > { %1401 = vst.msk [vmem:[%s2711_s12 + $0x78] sm:$0xf] %vm1370_vm2, %v2131_v14  ;;  %1433 = vst.msk [vmem:[%s2711_s12 + $0xf8] sm:$0xf] %vm1370_vm2, %v2163_v16  ;;  %v2132_v19 = vpack.c.bf16 %v1081_v17, %v1081_v17  ;;  %v2164_v20 = vpack.c.bf16 %v1113_v18, %v1113_v18 }
 0x193   : > { %1402 = vst.msk [vmem:[%s2711_s12 + $0x7c] sm:$0xf] %vm1370_vm2, %v2132_v19  ;;  %1434 = vst.msk [vmem:[%s2711_s12 + $0xfc] sm:$0xf] %vm1370_vm2, %v2164_v20 }
 0x194   : > { %s3112_s7 = smov (!%p1444_p8, %s1443_s7), 64 }
 0x195   : > { %s2085_s21 = sshll.u32 %s3112_s7, 6 }
 0x196   : > { %p2088_p9 = scmp.eq.s32.totalorder %s2085_s21, 0 }
 0x197   : > { %s2914_s22 = sshrl.u32 (!%p2088_p9), %s3112_s7, 6 }
 0x198   : > { %1452 = sbr.rel (%p2088_p9) target bundleno = 495 (0x1ef), region = 40  ;;  %p2089_p10 = scmp.le.s32.totalorder (!%p2088_p9), %s2914_s22, 0 }
 0x19f   : > { %1857 = sbr.rel (%p2089_p10) target bundleno = 474 (0x1da), region = 112  ;;  %s3105_s15 = smov (!%p2089_p10), %s2908_s18 }
 0x1a0   : > { %s3106_s20 = smov (!%p2089_p10), %s2711_s12  ;;  %s2923_s25 = smov (!%p2089_p10), 0  }
 0x1a1   : > { %s2925_s23 = smov (!%p2089_p10), 0  }
 0x1a6 LB: >> { %v1468_v15 = vld [vmem:[%s2454_s20] sm:$0xf]  ;;  %v1470_v21 = vld [vmem:[%s2454_s20 + $0x4] sm:$0xf]  ;;  %v1472_v22 = vld [vmem:[%s2454_s20 + $0x8] sm:$0xf]  ;;  %s2462_s23 = sphi %s2925_s23, %s1462_s23   ;;  %s2458_s25 = sphi %s2923_s25, %s3107_s25   ;;  %s2454_s20 = sphi %s3106_s20, %s1601_s20   ;;  %s2450_s15 = sphi %s3105_s15, %s1602_s15  }
 0x1a7   : >> { %1469 = vst [vmem:[%s2450_s15] sm:$0xf] %v1468_v15  ;;  %1471 = vst [vmem:[%s2450_s15 + $0x4] sm:$0xf] %v1470_v21  ;;  %v1474_v23 = vld [vmem:[%s2454_s20 + $0xc] sm:$0xf]  ;;  %s1596_s24 = sadd.s32 1, %s2458_s25 }
 0x1a8   : >> { %1473 = vst [vmem:[%s2450_s15 + $0x8] sm:$0xf] %v1472_v22  ;;  %v1476_v24 = vld [vmem:[%s2454_s20 + $0x10] sm:$0xf]  ;;  %v1478_v25 = vld [vmem:[%s2454_s20 + $0x14] sm:$0xf]  ;;  %p1597_p11 = scmp.ge.s32.totalorder %s1596_s24, %s2914_s22 }
 0x1a9   : >> { %1475 = vst [vmem:[%s2450_s15 + $0xc] sm:$0xf] %v1474_v23  ;;  %1477 = vst [vmem:[%s2450_s15 + $0x10] sm:$0xf] %v1476_v24  ;;  %v1480_v26 = vld [vmem:[%s2454_s20 + $0x18] sm:$0xf] }
 0x1aa   : >> { %1479 = vst [vmem:[%s2450_s15 + $0x14] sm:$0xf] %v1478_v25  ;;  %v1482_v27 = vld [vmem:[%s2454_s20 + $0x1c] sm:$0xf]  ;;  %v1484_v28 = vld [vmem:[%s2454_s20 + $0x20] sm:$0xf] }
 0x1ab   : >> { %1481 = vst [vmem:[%s2450_s15 + $0x18] sm:$0xf] %v1480_v26  ;;  %1483 = vst [vmem:[%s2450_s15 + $0x1c] sm:$0xf] %v1482_v27  ;;  %v1486_v29 = vld [vmem:[%s2454_s20 + $0x24] sm:$0xf] }
 0x1ac   : >> { %1485 = vst [vmem:[%s2450_s15 + $0x20] sm:$0xf] %v1484_v28  ;;  %v1488_v30 = vld [vmem:[%s2454_s20 + $0x28] sm:$0xf]  ;;  %v1490_v31 = vld [vmem:[%s2454_s20 + $0x2c] sm:$0xf] }
 0x1ad   : >> { %1487 = vst [vmem:[%s2450_s15 + $0x24] sm:$0xf] %v1486_v29  ;;  %1489 = vst [vmem:[%s2450_s15 + $0x28] sm:$0xf] %v1488_v30  ;;  %v1492_v32 = vld [vmem:[%s2454_s20 + $0x30] sm:$0xf] }
 0x1ae   : >> { %1491 = vst [vmem:[%s2450_s15 + $0x2c] sm:$0xf] %v1490_v31  ;;  %v1494_v33 = vld [vmem:[%s2454_s20 + $0x34] sm:$0xf]  ;;  %v1496_v34 = vld [vmem:[%s2454_s20 + $0x38] sm:$0xf] }
 0x1af   : >> { %1493 = vst [vmem:[%s2450_s15 + $0x30] sm:$0xf] %v1492_v32  ;;  %1495 = vst [vmem:[%s2450_s15 + $0x34] sm:$0xf] %v1494_v33  ;;  %v1498_v35 = vld [vmem:[%s2454_s20 + $0x3c] sm:$0xf] }
 0x1b0   : >> { %1497 = vst [vmem:[%s2450_s15 + $0x38] sm:$0xf] %v1496_v34  ;;  %v1500_v36 = vld [vmem:[%s2454_s20 + $0x40] sm:$0xf]  ;;  %v1502_v37 = vld [vmem:[%s2454_s20 + $0x44] sm:$0xf] }
 0x1b1   : >> { %1499 = vst [vmem:[%s2450_s15 + $0x3c] sm:$0xf] %v1498_v35  ;;  %1501 = vst [vmem:[%s2450_s15 + $0x40] sm:$0xf] %v1500_v36  ;;  %v1504_v38 = vld [vmem:[%s2454_s20 + $0x48] sm:$0xf] }
 0x1b2   : >> { %1503 = vst [vmem:[%s2450_s15 + $0x44] sm:$0xf] %v1502_v37  ;;  %v1506_v39 = vld [vmem:[%s2454_s20 + $0x4c] sm:$0xf]  ;;  %v1508_v40 = vld [vmem:[%s2454_s20 + $0x50] sm:$0xf] }
 0x1b3   : >> { %1505 = vst [vmem:[%s2450_s15 + $0x48] sm:$0xf] %v1504_v38  ;;  %1507 = vst [vmem:[%s2450_s15 + $0x4c] sm:$0xf] %v1506_v39  ;;  %v1510_v41 = vld [vmem:[%s2454_s20 + $0x54] sm:$0xf] }
 0x1b4   : >> { %1509 = vst [vmem:[%s2450_s15 + $0x50] sm:$0xf] %v1508_v40  ;;  %v1512_v42 = vld [vmem:[%s2454_s20 + $0x58] sm:$0xf]  ;;  %v1514_v43 = vld [vmem:[%s2454_s20 + $0x5c] sm:$0xf] }
 0x1b5   : >> { %1511 = vst [vmem:[%s2450_s15 + $0x54] sm:$0xf] %v1510_v41  ;;  %1513 = vst [vmem:[%s2450_s15 + $0x58] sm:$0xf] %v1512_v42  ;;  %v1516_v44 = vld [vmem:[%s2454_s20 + $0x60] sm:$0xf] }
 0x1b6   : >> { %1515 = vst [vmem:[%s2450_s15 + $0x5c] sm:$0xf] %v1514_v43  ;;  %v1518_v45 = vld [vmem:[%s2454_s20 + $0x64] sm:$0xf]  ;;  %v1520_v46 = vld [vmem:[%s2454_s20 + $0x68] sm:$0xf] }
 0x1b7   : >> { %1517 = vst [vmem:[%s2450_s15 + $0x60] sm:$0xf] %v1516_v44  ;;  %1519 = vst [vmem:[%s2450_s15 + $0x64] sm:$0xf] %v1518_v45  ;;  %v1522_v47 = vld [vmem:[%s2454_s20 + $0x6c] sm:$0xf] }
 0x1b8   : >> { %1521 = vst [vmem:[%s2450_s15 + $0x68] sm:$0xf] %v1520_v46  ;;  %v1524_v48 = vld [vmem:[%s2454_s20 + $0x70] sm:$0xf]  ;;  %v1526_v49 = vld [vmem:[%s2454_s20 + $0x74] sm:$0xf] }
 0x1b9   : >> { %1523 = vst [vmem:[%s2450_s15 + $0x6c] sm:$0xf] %v1522_v47  ;;  %1525 = vst [vmem:[%s2450_s15 + $0x70] sm:$0xf] %v1524_v48  ;;  %v1528_v50 = vld [vmem:[%s2454_s20 + $0x78] sm:$0xf] }
 0x1ba   : >> { %1527 = vst [vmem:[%s2450_s15 + $0x74] sm:$0xf] %v1526_v49  ;;  %v1530_v51 = vld [vmem:[%s2454_s20 + $0x7c] sm:$0xf]  ;;  %v1532_v52 = vld [vmem:[%s2454_s20 + $0x80] sm:$0xf] }
 0x1bb   : >> { %1529 = vst [vmem:[%s2450_s15 + $0x78] sm:$0xf] %v1528_v50  ;;  %1531 = vst [vmem:[%s2450_s15 + $0x7c] sm:$0xf] %v1530_v51  ;;  %v1534_v53 = vld [vmem:[%s2454_s20 + $0x84] sm:$0xf] }
 0x1bc   : >> { %1533 = vst [vmem:[%s2450_s15 + $0x80] sm:$0xf] %v1532_v52  ;;  %v1536_v54 = vld [vmem:[%s2454_s20 + $0x88] sm:$0xf]  ;;  %v1538_v55 = vld [vmem:[%s2454_s20 + $0x8c] sm:$0xf] }
 0x1bd   : >> { %1535 = vst [vmem:[%s2450_s15 + $0x84] sm:$0xf] %v1534_v53  ;;  %1537 = vst [vmem:[%s2450_s15 + $0x88] sm:$0xf] %v1536_v54  ;;  %v1540_v56 = vld [vmem:[%s2454_s20 + $0x90] sm:$0xf] }
 0x1be   : >> { %1539 = vst [vmem:[%s2450_s15 + $0x8c] sm:$0xf] %v1538_v55  ;;  %v1542_v57 = vld [vmem:[%s2454_s20 + $0x94] sm:$0xf]  ;;  %v1544_v58 = vld [vmem:[%s2454_s20 + $0x98] sm:$0xf] }
 0x1bf   : >> { %1541 = vst [vmem:[%s2450_s15 + $0x90] sm:$0xf] %v1540_v56  ;;  %1543 = vst [vmem:[%s2450_s15 + $0x94] sm:$0xf] %v1542_v57  ;;  %v1546_v59 = vld [vmem:[%s2454_s20 + $0x9c] sm:$0xf] }
 0x1c0   : >> { %1545 = vst [vmem:[%s2450_s15 + $0x98] sm:$0xf] %v1544_v58  ;;  %v1548_v60 = vld [vmem:[%s2454_s20 + $0xa0] sm:$0xf]  ;;  %v1550_v61 = vld [vmem:[%s2454_s20 + $0xa4] sm:$0xf] }
 0x1c1   : >> { %1547 = vst [vmem:[%s2450_s15 + $0x9c] sm:$0xf] %v1546_v59  ;;  %1549 = vst [vmem:[%s2450_s15 + $0xa0] sm:$0xf] %v1548_v60  ;;  %v1552_v62 = vld [vmem:[%s2454_s20 + $0xa8] sm:$0xf] }
 0x1c2   : >> { %1551 = vst [vmem:[%s2450_s15 + $0xa4] sm:$0xf] %v1550_v61  ;;  %v1554_v63 = vld [vmem:[%s2454_s20 + $0xac] sm:$0xf]  ;;  %v1556_v0 = vld [vmem:[%s2454_s20 + $0xb0] sm:$0xf] }
 0x1c3   : >> { %1553 = vst [vmem:[%s2450_s15 + $0xa8] sm:$0xf] %v1552_v62  ;;  %1555 = vst [vmem:[%s2450_s15 + $0xac] sm:$0xf] %v1554_v63  ;;  %v1558_v1 = vld [vmem:[%s2454_s20 + $0xb4] sm:$0xf] }
 0x1c4   : >> { %1557 = vst [vmem:[%s2450_s15 + $0xb0] sm:$0xf] %v1556_v0  ;;  %v1560_v2 = vld [vmem:[%s2454_s20 + $0xb8] sm:$0xf]  ;;  %v1562_v3 = vld [vmem:[%s2454_s20 + $0xbc] sm:$0xf] }
 0x1c5   : >> { %1559 = vst [vmem:[%s2450_s15 + $0xb4] sm:$0xf] %v1558_v1  ;;  %1561 = vst [vmem:[%s2450_s15 + $0xb8] sm:$0xf] %v1560_v2  ;;  %v1564_v4 = vld [vmem:[%s2454_s20 + $0xc0] sm:$0xf] }
 0x1c6   : >> { %1563 = vst [vmem:[%s2450_s15 + $0xbc] sm:$0xf] %v1562_v3  ;;  %v1566_v5 = vld [vmem:[%s2454_s20 + $0xc4] sm:$0xf]  ;;  %v1568_v6 = vld [vmem:[%s2454_s20 + $0xc8] sm:$0xf] }
 0x1c7   : >> { %1565 = vst [vmem:[%s2450_s15 + $0xc0] sm:$0xf] %v1564_v4  ;;  %1567 = vst [vmem:[%s2450_s15 + $0xc4] sm:$0xf] %v1566_v5  ;;  %v1570_v7 = vld [vmem:[%s2454_s20 + $0xcc] sm:$0xf] }
 0x1c8   : >> { %1569 = vst [vmem:[%s2450_s15 + $0xc8] sm:$0xf] %v1568_v6  ;;  %v1572_v8 = vld [vmem:[%s2454_s20 + $0xd0] sm:$0xf]  ;;  %v1574_v9 = vld [vmem:[%s2454_s20 + $0xd4] sm:$0xf] }
 0x1c9   : >> { %1571 = vst [vmem:[%s2450_s15 + $0xcc] sm:$0xf] %v1570_v7  ;;  %1573 = vst [vmem:[%s2450_s15 + $0xd0] sm:$0xf] %v1572_v8  ;;  %v1576_v10 = vld [vmem:[%s2454_s20 + $0xd8] sm:$0xf] }
 0x1ca   : >> { %1575 = vst [vmem:[%s2450_s15 + $0xd4] sm:$0xf] %v1574_v9  ;;  %v1578_v11 = vld [vmem:[%s2454_s20 + $0xdc] sm:$0xf]  ;;  %v1580_v12 = vld [vmem:[%s2454_s20 + $0xe0] sm:$0xf] }
 0x1cb   : >> { %1577 = vst [vmem:[%s2450_s15 + $0xd8] sm:$0xf] %v1576_v10  ;;  %1579 = vst [vmem:[%s2450_s15 + $0xdc] sm:$0xf] %v1578_v11  ;;  %v1582_v13 = vld [vmem:[%s2454_s20 + $0xe4] sm:$0xf] }
 0x1cc   : >> { %1581 = vst [vmem:[%s2450_s15 + $0xe0] sm:$0xf] %v1580_v12  ;;  %v1584_v14 = vld [vmem:[%s2454_s20 + $0xe8] sm:$0xf]  ;;  %v1586_v16 = vld [vmem:[%s2454_s20 + $0xec] sm:$0xf] }
 0x1cd   : >> { %1583 = vst [vmem:[%s2450_s15 + $0xe4] sm:$0xf] %v1582_v13  ;;  %1585 = vst [vmem:[%s2450_s15 + $0xe8] sm:$0xf] %v1584_v14  ;;  %v1588_v17 = vld [vmem:[%s2454_s20 + $0xf0] sm:$0xf] }
 0x1ce   : >> { %1587 = vst [vmem:[%s2450_s15 + $0xec] sm:$0xf] %v1586_v16  ;;  %v1590_v18 = vld [vmem:[%s2454_s20 + $0xf4] sm:$0xf]  ;;  %v1592_v19 = vld [vmem:[%s2454_s20 + $0xf8] sm:$0xf] }
 0x1cf   : >> { %1589 = vst [vmem:[%s2450_s15 + $0xf0] sm:$0xf] %v1588_v17  ;;  %1591 = vst [vmem:[%s2450_s15 + $0xf4] sm:$0xf] %v1590_v18  ;;  %v1594_v20 = vld [vmem:[%s2454_s20 + $0xfc] sm:$0xf] }
 0x1d0   : >> { %1593 = vst [vmem:[%s2450_s15 + $0xf8] sm:$0xf] %v1592_v19  ;;  %1595 = vst [vmem:[%s2450_s15 + $0xfc] sm:$0xf] %v1594_v20  ;;  %s3114_s24 = smov (%p1597_p11, %s1596_s24), 0  ;;  %s1462_s23 = sadd.s32 1, %s2462_s23  }
 0x1d1   : >> { %s2090_s26 = sshll.u32 %s3114_s24, 8  ;;  %p1461_p12 = scmp.ge.s32.totalorder %s1462_s23, %s2914_s22 }
 0x1d2   : >> { %s1601_s20 = scalar_lea.vmem %s2711_s12, %s2090_s26 [#allocation2]   ;;  %s1602_s15 = scalar_lea.vmem %s2908_s18, %s2090_s26  }
 0x1d3   : >> { %s3107_s25 = smov %s3114_s24  ;;  %1464 = sbr.rel (!%p1461_p12) target bundleno = 422 (0x1a6), region = 118 }
 0x1da PF: > { %s3082_s27 = sand.u32 63, %s3112_s7   ;;  %s2166_s28 = sshll.u32 %s2914_s22, 8 }
 0x1db   : > { %s1607_s29 = scalar_lea.vmem %s2711_s12, %s2166_s28 [#allocation2]   ;;  %s1609_s30 = scalar_lea.vmem %s2908_s18, %s2166_s28  }
 0x1dc   : > { %p2095_p13 = scmp.le.s32.totalorder %s3082_s27, 0 }
 0x1dd   : > { %s2464_s4 = smov (!%p2095_p13), %s1609_s30   ;;  %s2468_s5 = smov (!%p2095_p13), %s1607_s29  }
 0x1de   : > { %1871 = sbr.rel (%p2095_p13) target bundleno = 495 (0x1ef), region = 123  ;;  %s2472_s6 = smov (!%p2095_p13), 0  }
 0x1df   : > { %s2476_s8 = smov (!%p2095_p13), 0  }
 0x1e5 LB: >> { %v1619_v15 = vld [vmem:[%s2470_s5] sm:$0xf]  ;;  %s1621_s9 = sadd.s32 1, %s2474_s6  ;;  %s1613_s8 = sadd.s32 1, %s2478_s8   ;;  %s2478_s8 = sphi %s2476_s8, %s1613_s8   ;;  %s2474_s6 = sphi %s2472_s6, %s2473_s6   ;;  %s2470_s5 = sphi %s2468_s5, %s1626_s5   ;;  %s2466_s4 = sphi %s2464_s4, %s1627_s4  }
 0x1e6   : >> { %1620 = vst [vmem:[%s2466_s4] sm:$0xf] %v1619_v15  ;;  %p1622_p0 = scmp.ge.s32.totalorder %s1621_s9, %s3082_s27  ;;  %p1612_p1 = scmp.ge.s32.totalorder %s1613_s8, %s3082_s27 }
 0x1e8   : >> { %s3116_s9 = smov (%p1622_p0, %s1621_s9), 0  ;;  %1615 = sbr.rel (!%p1612_p1) target bundleno = 485 (0x1e5), region = 129 }
 0x1e9   : >> { %s2096_s10 = sshll.u32 %s3116_s9, 2  ;;  %s2473_s6 = smov %s3116_s9  }
 0x1ea   : >> { %s1626_s5 = scalar_lea.vmem %s1607_s29, %s2096_s10 [#allocation2]   ;;  %s1627_s4 = scalar_lea.vmem %s1609_s30, %s2096_s10  }
 0x1ef PF: > { %p10_p2 = scmp.ge.s32.totalorder %s2516_s16, 7   ;;  %s3108_s12 = smov %s2442_s13 }
 0x1f0   : > { %s3109_s13 = smov %s2524_s19  ;;  %s3110_s14 = smov %s2516_s16 }
 0x1f1   :  { %12 = sbr.rel (!%p10_p2) target bundleno = 2 (0x2), region = 140 }

// kernel: xtma_cnn_forward.9
= control target key start
LH: loop header
LB: loop body
LE: loop exit
PB: predicated region body
PF: predicated region fallthrough
CT: control target
= control target key end

     0   :  { %v2443_v0 = vmov 0   ;;  %vm881_vm0 = vcmask 130048   ;;  %vm1783_vm1 = vcmask 257024   ;;  %vm1840_vm2 = vcmask 253952   ;;  %s3224_s1 = inlined_call_operand.vmem [shape: bf16[400,32], index: 1, kind: input, shape index: {}]   ;;  %s3225_s0 = inlined_call_operand.vmem [shape: bf16[450,400], index: 0, kind: input, shape index: {}]   ;;  %s3226_s2 = inlined_call_operand.vmem [shape: f32[1,32], index: 2, kind: input, shape index: {}]   ;;  %s3227_s3 = inlined_call_operand.vmem [shape: bf16[450,32], index: 3, kind: output, shape index: {}]  }
   0x1   :  { %969 = vmatprep.subr.bf16.mxu1 %v2443_v0  ;;  %v2246_v1 = vld [vmem:[%s3224_s1] sm:$0xff]   ;;  %1233 = vmatprep.subr.bf16.mxu0 %v2443_v0  ;;  %v2247_v2 = vld [vmem:[%s3224_s1 + $0x8] sm:$0xff]   ;;  %v2248_v3 = vld [vmem:[%s3224_s1 + $0x10] sm:$0xff]  }
   0x2   :  { %970 = vmatpush1.bf16.msra.mxu1 %v2246_v1  ;;  %v2253_v4 = vld [vmem:[%s3224_s1 + $0x80] sm:$0xff]   ;;  %v2255_v5 = vld [vmem:[%s3224_s1 + $0x88] sm:$0xff]   ;;  %v2249_v6 = vld [vmem:[%s3224_s1 + $0x18] sm:$0xff]  }
   0x3   :  { %971 = vmatprep.subr.bf16.mxu1 %v2443_v0  ;;  %1234 = vmatpush1.bf16.msra.mxu0 %v2253_v4  ;;  %v2257_v7 = vld [vmem:[%s3224_s1 + $0x90] sm:$0xff]   ;;  %v2250_v8 = vld [vmem:[%s3224_s1 + $0x20] sm:$0xff]   ;;  %v2259_v9 = vld [vmem:[%s3224_s1 + $0x98] sm:$0xff]  }
   0x4   :  { %1235 = vmatprep.subr.bf16.mxu0 %v2443_v0  ;;  %v2251_v10 = vld [vmem:[%s3224_s1 + $0x28] sm:$0xff]   ;;  %v2261_v11 = vld [vmem:[%s3224_s1 + $0xa0] sm:$0xff]   ;;  %v2252_v12 = vld [vmem:[%s3224_s1 + $0x30] sm:$0xff]  }
   0x5   :  { %v2254_v13 = vld [vmem:[%s3224_s1 + $0x38] sm:$0xff]   ;;  %v2263_v14 = vld [vmem:[%s3224_s1 + $0xa8] sm:$0xff]   ;;  %v2276_v16 = vld [vmem:[%s3225_s0 + $0x4] ss:$16 sps:$4 sm:$0xff]  }
   0x6   :  { %972 = vmatpush1.bf16.msra.mxu1 %v2247_v2  ;;  %v2273_v15 = vld [vmem:[%s3225_s0 + $0xc] ss:$16 sps:$4 sm:$0xff]   ;;  %v2265_v17 = vld [vmem:[%s3224_s1 + $0xb0] sm:$0xff]   ;;  %1001 = vmatprep.mubr.bf16.mxu1 %v2276_v16  ;;  %v2256_v18 = vld [vmem:[%s3224_s1 + $0x40] sm:$0xff]  }
   0x7   :  { %973 = vmatprep.subr.bf16.mxu1 %v2443_v0  ;;  %1236 = vmatpush1.bf16.msra.mxu0 %v2255_v5  ;;  %v2267_v19 = vld [vmem:[%s3224_s1 + $0xb8] sm:$0xff]   ;;  %v2258_v20 = vld [vmem:[%s3224_s1 + $0x48] sm:$0xff]   ;;  %v2269_v21 = vld [vmem:[%s3224_s1 + $0xc0] sm:$0xff]  }
   0x8   :  { %1237 = vmatprep.subr.bf16.mxu0 %v2443_v0  ;;  %1988 = vmatprep.mubr.msk.bf16.mxu0 %vm881_vm0, %v2273_v15  ;;  %v2260_v22 = vld [vmem:[%s3224_s1 + $0x50] sm:$0xff]   ;;  %v2271_v23 = vld [vmem:[%s3225_s0 + $0x8] ss:$16 sps:$4 sm:$0xff]   ;;  %v2277_v24 = vld [vmem:[%s3225_s0 + $0x2c] ss:$16 sps:$4 sm:$0xff]  }
   0x9   :  { %v2262_v25 = vld [vmem:[%s3224_s1 + $0x58] sm:$0xff]   ;;  %v2264_v26 = vld [vmem:[%s3224_s1 + $0x60] sm:$0xff]   ;;  %v2266_v29 = vld [vmem:[%s3224_s1 + $0x68] sm:$0xff]  }
   0xa   :  { %974 = vmatpush1.bf16.msra.mxu1 %v2248_v3  ;;  %v2281_v27 = vld [vmem:[%s3225_s0 + $0x28] ss:$16 sps:$4 sm:$0xff]   ;;  %v2283_v28 = vld [vmem:[%s3225_s0 + $0x4c] ss:$16 sps:$4 sm:$0xff]   ;;  %v2268_v30 = vld [vmem:[%s3224_s1 + $0x70] sm:$0xff]  }
   0xb   :  { %975 = vmatprep.subr.bf16.mxu1 %v2443_v0  ;;  %1238 = vmatpush1.bf16.msra.mxu0 %v2257_v7  ;;  %v2287_v31 = vld [vmem:[%s3225_s0 + $0x48] ss:$16 sps:$4 sm:$0xff]   ;;  %v2289_v32 = vld [vmem:[%s3225_s0 + $0x6c] ss:$16 sps:$4 sm:$0xff]   ;;  %v2274_v34 = vld [vmem:[%s3225_s0] ss:$16 sps:$4 sm:$0xff]  }
   0xc   :  { %1239 = vmatprep.subr.bf16.mxu0 %v2443_v0  ;;  %v2270_v33 = vld [vmem:[%s3224_s1 + $0x78] sm:$0xff]   ;;  %v2279_v35 = vld [vmem:[%s3225_s0 + $0x24] ss:$16 sps:$4 sm:$0xff]   ;;  %v2282_v38 = vld [vmem:[%s3225_s0 + $0x20] ss:$16 sps:$4 sm:$0xff]  }
   0xd   :  { %v2293_v36 = vld [vmem:[%s3225_s0 + $0x68] ss:$16 sps:$4 sm:$0xff]   ;;  %v2295_v37 = vld [vmem:[%s3225_s0 + $0x8c] ss:$16 sps:$4 sm:$0xff]   ;;  %v2285_v39 = vld [vmem:[%s3225_s0 + $0x44] ss:$16 sps:$4 sm:$0xff]  }
   0xe   :  { %976 = vmatpush1.bf16.msra.mxu1 %v2249_v6  ;;  %v2299_v40 = vld [vmem:[%s3225_s0 + $0x88] ss:$16 sps:$4 sm:$0xff]   ;;  %v2301_v41 = vld [vmem:[%s3225_s0 + $0xac] ss:$16 sps:$4 sm:$0xff]   ;;  %v2288_v42 = vld [vmem:[%s3225_s0 + $0x40] ss:$16 sps:$4 sm:$0xff]  }
   0xf   :  { %977 = vmatprep.subr.bf16.mxu1 %v2443_v0  ;;  %1240 = vmatpush1.bf16.msra.mxu0 %v2259_v9  ;;  %v2291_v43 = vld [vmem:[%s3225_s0 + $0x64] ss:$16 sps:$4 sm:$0xff]   ;;  %v2305_v44 = vld [vmem:[%s3225_s0 + $0xa8] ss:$16 sps:$4 sm:$0xff]   ;;  %v2307_v45 = vld [vmem:[%s3225_s0 + $0xcc] ss:$16 sps:$4 sm:$0xff]  }
  0x10   :  { %1241 = vmatprep.subr.bf16.mxu0 %v2443_v0  ;;  %v2294_v46 = vld [vmem:[%s3225_s0 + $0x60] ss:$16 sps:$4 sm:$0xff]   ;;  %v2297_v47 = vld [vmem:[%s3225_s0 + $0x84] ss:$16 sps:$4 sm:$0xff]   ;;  %v2311_v48 = vld [vmem:[%s3225_s0 + $0xc8] ss:$16 sps:$4 sm:$0xff]  }
  0x11   :  { %v2313_v49 = vld [vmem:[%s3225_s0 + $0xec] ss:$16 sps:$4 sm:$0xff]   ;;  %v2300_v50 = vld [vmem:[%s3225_s0 + $0x80] ss:$16 sps:$4 sm:$0xff]   ;;  %v2303_v51 = vld [vmem:[%s3225_s0 + $0xa4] ss:$16 sps:$4 sm:$0xff]  }
  0x12   :  { %978 = vmatpush1.bf16.msra.mxu1 %v2250_v8  ;;  %v2317_v52 = vld [vmem:[%s3225_s0 + $0xe8] ss:$16 sps:$4 sm:$0xff]   ;;  %v2319_v53 = vld [vmem:[%s3225_s0 + $0x10c] ss:$16 sps:$4 sm:$0xff]   ;;  %v2306_v54 = vld [vmem:[%s3225_s0 + $0xa0] ss:$16 sps:$4 sm:$0xff]  }
  0x13   :  { %979 = vmatprep.subr.bf16.mxu1 %v2443_v0  ;;  %1242 = vmatpush1.bf16.msra.mxu0 %v2261_v11  ;;  %v2309_v55 = vld [vmem:[%s3225_s0 + $0xc4] ss:$16 sps:$4 sm:$0xff]   ;;  %v2323_v56 = vld [vmem:[%s3225_s0 + $0x108] ss:$16 sps:$4 sm:$0xff]   ;;  %v2325_v57 = vld [vmem:[%s3225_s0 + $0x12c] ss:$16 sps:$4 sm:$0xff]  }
  0x14   :  { %1243 = vmatprep.subr.bf16.mxu0 %v2443_v0  ;;  %v2312_v58 = vld [vmem:[%s3225_s0 + $0xc0] ss:$16 sps:$4 sm:$0xff]   ;;  %v2315_v59 = vld [vmem:[%s3225_s0 + $0xe4] ss:$16 sps:$4 sm:$0xff]   ;;  %v2329_v60 = vld [vmem:[%s3225_s0 + $0x128] ss:$16 sps:$4 sm:$0xff]  }
  0x15   :  { %v2331_v61 = vld [vmem:[%s3225_s0 + $0x14c] ss:$16 sps:$4 sm:$0xff]   ;;  %v2318_v62 = vld [vmem:[%s3225_s0 + $0xe0] ss:$16 sps:$4 sm:$0xff]   ;;  %v2321_v63 = vld [vmem:[%s3225_s0 + $0x104] ss:$16 sps:$4 sm:$0xff]  }
  0x16   :  { %980 = vmatpush1.bf16.msra.mxu1 %v2251_v10  ;;  %v2337_v1 = vld [vmem:[%s3225_s0 + $0x16c] ss:$16 sps:$4 sm:$0xff]   ;;  %v2324_v2 = vld [vmem:[%s3225_s0 + $0x100] ss:$16 sps:$4 sm:$0xff]   ;;  %v2327_v3 = vld [vmem:[%s3225_s0 + $0x124] ss:$16 sps:$4 sm:$0xff]  }
  0x17   :  { %981 = vmatprep.subr.bf16.mxu1 %v2443_v0  ;;  %1244 = vmatpush1.bf16.msra.mxu0 %v2263_v14  ;;  %v2341_v4 = vld [vmem:[%s3225_s0 + $0x168] ss:$16 sps:$4 sm:$0xff]   ;;  %v2343_v5 = vld [vmem:[%s3225_s0 + $0x18c] ss:$16 sps:$4 sm:$0xff]   ;;  %v2330_v6 = vld [vmem:[%s3225_s0 + $0x120] ss:$16 sps:$4 sm:$0xff]  }
  0x18   :  { %1245 = vmatprep.subr.bf16.mxu0 %v2443_v0  ;;  %v2333_v7 = vld [vmem:[%s3225_s0 + $0x144] ss:$16 sps:$4 sm:$0xff]   ;;  %v2347_v8 = vld [vmem:[%s3225_s0 + $0x188] ss:$16 sps:$4 sm:$0xff]   ;;  %v2349_v9 = vld [vmem:[%s3225_s0 + $0x1ac] ss:$16 sps:$4 sm:$0xff]  }
  0x19   :  { %v2336_v10 = vld [vmem:[%s3225_s0 + $0x140] ss:$16 sps:$4 sm:$0xff]   ;;  %v2339_v11 = vld [vmem:[%s3225_s0 + $0x164] ss:$16 sps:$4 sm:$0xff]   ;;  %v2359_v16 = vld [vmem:[%s3225_s0 + $0x1c8] ss:$16 sps:$4 sm:$0xff]  }
  0x1a   :  { %982 = vmatpush1.bf16.msra.mxu1 %v2252_v12  ;;  %v2353_v12 = vld [vmem:[%s3225_s0 + $0x1a8] ss:$16 sps:$4 sm:$0xff]   ;;  %v2342_v14 = vld [vmem:[%s3225_s0 + $0x160] ss:$16 sps:$4 sm:$0xff]   ;;  %v2345_v15 = vld [vmem:[%s3225_s0 + $0x184] ss:$16 sps:$4 sm:$0xff]  }
  0x1b   :  { %983 = vmatprep.subr.bf16.mxu1 %v2443_v0  ;;  %1246 = vmatpush1.bf16.msra.mxu0 %v2265_v17  ;;  %v2361_v17 = vld [vmem:[%s3225_s0 + $0x1ec] ss:$16 sps:$4 sm:$0xff]  }
  0x1c   :  { %1247 = vmatprep.subr.bf16.mxu0 %v2443_v0 }
  0x1e   :  { %984 = vmatpush1.bf16.msra.mxu1 %v2254_v13  ;;  %v2355_v13 = vld [vmem:[%s3225_s0 + $0x1cc] ss:$16 sps:$4 sm:$0xff]  }
  0x1f   :  { %985 = vmatprep.subr.bf16.mxu1 %v2443_v0  ;;  %1248 = vmatpush1.bf16.msra.mxu0 %v2267_v19  ;;  %v2351_v19 = vld [vmem:[%s3225_s0 + $0x1a4] ss:$16 sps:$4 sm:$0xff]  }
  0x20   :  { %1249 = vmatprep.subr.bf16.mxu0 %v2443_v0 }
  0x22   :  { %986 = vmatpush1.bf16.msra.mxu1 %v2256_v18  ;;  %v2348_v18 = vld [vmem:[%s3225_s0 + $0x180] ss:$16 sps:$4 sm:$0xff]  }
  0x23   :  { %987 = vmatprep.subr.bf16.mxu1 %v2443_v0  ;;  %1250 = vmatpush1.bf16.msra.mxu0 %v2269_v21  ;;  %v2367_v21 = vld [vmem:[%s3225_s0 + $0x20c] ss:$16 sps:$4 sm:$0xff]  }
  0x26   :  { %988 = vmatpush1.bf16.msra.mxu1 %v2258_v20  ;;  %1266 = vmatmul.mubr.bf16.vlgmr.msra.gmra.mrb[0].mxu0 %v2271_v23  ;;  %v2365_v20 = vld [vmem:[%s3225_s0 + $0x1e8] ss:$16 sps:$4 sm:$0xff]   ;;  %v2357_v23 = vld [vmem:[%s3225_s0 + $0x1c4] ss:$16 sps:$4 sm:$0xff]  }
  0x27   :  { %989 = vmatprep.subr.bf16.mxu1 %v2443_v0  ;;  %1989 = vmatprep.mubr.msk.bf16.mxu0 %vm881_vm0, %v2277_v24  ;;  %v2371_v24 = vld [vmem:[%s3225_s0 + $0x208] ss:$16 sps:$4 sm:$0xff]  }
  0x2a   :  { %990 = vmatpush1.bf16.msra.mxu1 %v2260_v22  ;;  %v2354_v22 = vld [vmem:[%s3225_s0 + $0x1a0] ss:$16 sps:$4 sm:$0xff]  }
  0x2b   :  { %991 = vmatprep.subr.bf16.mxu1 %v2443_v0 }
  0x2e   :  { %992 = vmatpush1.bf16.msra.mxu1 %v2262_v25  ;;  %1274 = vmatmul.mubr.bf16.gmra.mrb[4].mxu0 %v2281_v27  ;;  %v2373_v25 = vld [vmem:[%s3225_s0 + $0x22c] ss:$16 sps:$4 sm:$0xff]   ;;  %v2363_v27 = vld [vmem:[%s3225_s0 + $0x1e4] ss:$16 sps:$4 sm:$0xff]  }
  0x2f   :  { %993 = vmatprep.subr.bf16.mxu1 %v2443_v0  ;;  %1990 = vmatprep.mubr.msk.bf16.mxu0 %vm881_vm0, %v2283_v28  ;;  %v2377_v28 = vld [vmem:[%s3225_s0 + $0x228] ss:$16 sps:$4 sm:$0xff]  }
  0x32   :  { %994 = vmatpush1.bf16.msra.mxu1 %v2264_v26  ;;  %v2360_v26 = vld [vmem:[%s3225_s0 + $0x1c0] ss:$16 sps:$4 sm:$0xff]  }
  0x33   :  { %995 = vmatprep.subr.bf16.mxu1 %v2443_v0 }
  0x36   :  { %996 = vmatpush1.bf16.msra.mxu1 %v2266_v29  ;;  %1282 = vmatmul.mubr.bf16.gmra.mrb[8].mxu0 %v2287_v31  ;;  %v2379_v29 = vld [vmem:[%s3225_s0 + $0x24c] ss:$16 sps:$4 sm:$0xff]   ;;  %v2369_v31 = vld [vmem:[%s3225_s0 + $0x204] ss:$16 sps:$4 sm:$0xff]  }
  0x37   :  { %997 = vmatprep.subr.bf16.mxu1 %v2443_v0  ;;  %1991 = vmatprep.mubr.msk.bf16.mxu0 %vm881_vm0, %v2289_v32  ;;  %v2383_v32 = vld [vmem:[%s3225_s0 + $0x248] ss:$16 sps:$4 sm:$0xff]  }
  0x3a   :  { %998 = vmatpush1.bf16.msra.mxu1 %v2268_v30  ;;  %v2366_v30 = vld [vmem:[%s3225_s0 + $0x1e0] ss:$16 sps:$4 sm:$0xff]  }
  0x3b   :  { %999 = vmatprep.subr.bf16.mxu1 %v2443_v0  ;;  %v2335_v0 = vld [vmem:[%s3225_s0 + $0x148] ss:$16 sps:$4 sm:$0xff]  }
  0x3e   :  { %1000 = vmatpush1.bf16.msra.mxu1 %v2270_v33  ;;  %1290 = vmatmul.mubr.bf16.gmra.mrb[12].mxu0 %v2293_v36  ;;  %v2385_v33 = vld [vmem:[%s3225_s0 + $0x26c] ss:$16 sps:$4 sm:$0xff]   ;;  %v2389_v36 = vld [vmem:[%s3225_s0 + $0x268] ss:$16 sps:$4 sm:$0xff]  }
  0x3f   :  { %1992 = vmatprep.mubr.msk.bf16.mxu0 %vm881_vm0, %v2295_v37  ;;  %v2391_v37 = vld [vmem:[%s3225_s0 + $0x28c] ss:$16 sps:$4 sm:$0xff]  }
  0x41   :  { %1002 = vmatmul.mubr.bf16.vlgmr.msra.gmra.mrb[0].mxu1 %v2274_v34  ;;  %v2372_v34 = vld [vmem:[%s3225_s0 + $0x200] ss:$16 sps:$4 sm:$0xff]  }
  0x42   :  { %1009 = vmatprep.mubr.bf16.mxu1 %v2279_v35  ;;  %v2375_v35 = vld [vmem:[%s3225_s0 + $0x224] ss:$16 sps:$4 sm:$0xff]  }
  0x46   :  { %1298 = vmatmul.mubr.bf16.gmra.mrb[16].mxu0 %v2299_v40  ;;  %v2395_v40 = vld [vmem:[%s3225_s0 + $0x288] ss:$16 sps:$4 sm:$0xff]  }
  0x47   :  { %1993 = vmatprep.mubr.msk.bf16.mxu0 %vm881_vm0, %v2301_v41  ;;  %v2397_v41 = vld [vmem:[%s3225_s0 + $0x2ac] ss:$16 sps:$4 sm:$0xff]  }
  0x49   :  { %1010 = vmatmul.mubr.bf16.gmra.mrb[4].mxu1 %v2282_v38  ;;  %v2378_v38 = vld [vmem:[%s3225_s0 + $0x220] ss:$16 sps:$4 sm:$0xff]  }
  0x4a   :  { %1017 = vmatprep.mubr.bf16.mxu1 %v2285_v39  ;;  %v2381_v39 = vld [vmem:[%s3225_s0 + $0x244] ss:$16 sps:$4 sm:$0xff]  }
  0x4e   :  { %1306 = vmatmul.mubr.bf16.gmra.mrb[20].mxu0 %v2305_v44  ;;  %v2401_v44 = vld [vmem:[%s3225_s0 + $0x2a8] ss:$16 sps:$4 sm:$0xff]  }
  0x4f   :  { %1994 = vmatprep.mubr.msk.bf16.mxu0 %vm881_vm0, %v2307_v45  ;;  %v2403_v45 = vld [vmem:[%s3225_s0 + $0x2cc] ss:$16 sps:$4 sm:$0xff]  }
  0x51   :  { %1018 = vmatmul.mubr.bf16.gmra.mrb[8].mxu1 %v2288_v42  ;;  %v2384_v42 = vld [vmem:[%s3225_s0 + $0x240] ss:$16 sps:$4 sm:$0xff]  }
  0x52   :  { %1025 = vmatprep.mubr.bf16.mxu1 %v2291_v43  ;;  %v2387_v43 = vld [vmem:[%s3225_s0 + $0x264] ss:$16 sps:$4 sm:$0xff]  }
  0x56   :  { %1314 = vmatmul.mubr.bf16.gmra.mrb[24].mxu0 %v2311_v48  ;;  %v2407_v48 = vld [vmem:[%s3225_s0 + $0x2c8] ss:$16 sps:$4 sm:$0xff]  }
  0x57   :  { %1995 = vmatprep.mubr.msk.bf16.mxu0 %vm881_vm0, %v2313_v49  ;;  %v2409_v49 = vld [vmem:[%s3225_s0 + $0x2ec] ss:$16 sps:$4 sm:$0xff]  }
  0x59   :  { %1026 = vmatmul.mubr.bf16.gmra.mrb[12].mxu1 %v2294_v46  ;;  %v2390_v46 = vld [vmem:[%s3225_s0 + $0x260] ss:$16 sps:$4 sm:$0xff]  }
  0x5a   :  { %1033 = vmatprep.mubr.bf16.mxu1 %v2297_v47  ;;  %v2393_v47 = vld [vmem:[%s3225_s0 + $0x284] ss:$16 sps:$4 sm:$0xff]  }
  0x5e   :  { %1322 = vmatmul.mubr.bf16.gmra.mrb[28].mxu0 %v2317_v52  ;;  %v2413_v52 = vld [vmem:[%s3225_s0 + $0x2e8] ss:$16 sps:$4 sm:$0xff]  }
  0x5f   :  { %1996 = vmatprep.mubr.msk.bf16.mxu0 %vm881_vm0, %v2319_v53  ;;  %v2415_v53 = vld [vmem:[%s3225_s0 + $0x30c] ss:$16 sps:$4 sm:$0xff]  }
  0x61   :  { %1034 = vmatmul.mubr.bf16.gmra.mrb[16].mxu1 %v2300_v50  ;;  %v2396_v50 = vld [vmem:[%s3225_s0 + $0x280] ss:$16 sps:$4 sm:$0xff]  }
  0x62   :  { %1041 = vmatprep.mubr.bf16.mxu1 %v2303_v51  ;;  %v2399_v51 = vld [vmem:[%s3225_s0 + $0x2a4] ss:$16 sps:$4 sm:$0xff]  }
  0x66   :  { %1330 = vmatmul.mubr.bf16.gmra.mrb[32].mxu0 %v2323_v56  ;;  %v2419_v56 = vld [vmem:[%s3225_s0 + $0x308] ss:$16 sps:$4 sm:$0xff]  }
  0x67   :  { %1997 = vmatprep.mubr.msk.bf16.mxu0 %vm881_vm0, %v2325_v57  ;;  %v2421_v57 = vld [vmem:[%s3225_s0 + $0x32c] ss:$16 sps:$4 sm:$0xff]  }
  0x69   :  { %1042 = vmatmul.mubr.bf16.gmra.mrb[20].mxu1 %v2306_v54  ;;  %v2402_v54 = vld [vmem:[%s3225_s0 + $0x2a0] ss:$16 sps:$4 sm:$0xff]  }
  0x6a   :  { %1049 = vmatprep.mubr.bf16.mxu1 %v2309_v55  ;;  %v2405_v55 = vld [vmem:[%s3225_s0 + $0x2c4] ss:$16 sps:$4 sm:$0xff]  }
  0x6e   :  { %1338 = vmatmul.mubr.bf16.gmra.mrb[36].mxu0 %v2329_v60  ;;  %v2425_v60 = vld [vmem:[%s3225_s0 + $0x328] ss:$16 sps:$4 sm:$0xff]  }
  0x6f   :  { %1998 = vmatprep.mubr.msk.bf16.mxu0 %vm881_vm0, %v2331_v61  ;;  %v2427_v61 = vld [vmem:[%s3225_s0 + $0x34c] ss:$16 sps:$4 sm:$0xff]  }
  0x71   :  { %1050 = vmatmul.mubr.bf16.gmra.mrb[24].mxu1 %v2312_v58  ;;  %v2408_v58 = vld [vmem:[%s3225_s0 + $0x2c0] ss:$16 sps:$4 sm:$0xff]  }
  0x72   :  { %1057 = vmatprep.mubr.bf16.mxu1 %v2315_v59  ;;  %v2411_v59 = vld [vmem:[%s3225_s0 + $0x2e4] ss:$16 sps:$4 sm:$0xff]  }
  0x76   :  { %1346 = vmatmul.mubr.bf16.gmra.mrb[40].mxu0 %v2335_v0  ;;  %v2431_v0 = vld [vmem:[%s3225_s0 + $0x348] ss:$16 sps:$4 sm:$0xff]  }
  0x77   :  { %1999 = vmatprep.mubr.msk.bf16.mxu0 %vm881_vm0, %v2337_v1  ;;  %v2433_v1 = vld [vmem:[%s3225_s0 + $0x36c] ss:$16 sps:$4 sm:$0xff]  }
  0x79   :  { %1058 = vmatmul.mubr.bf16.gmra.mrb[28].mxu1 %v2318_v62  ;;  %v2414_v62 = vld [vmem:[%s3225_s0 + $0x2e0] ss:$16 sps:$4 sm:$0xff]  }
  0x7a   :  { %1065 = vmatprep.mubr.bf16.mxu1 %v2321_v63  ;;  %v2417_v63 = vld [vmem:[%s3225_s0 + $0x304] ss:$16 sps:$4 sm:$0xff]  }
  0x7e   :  { %1354 = vmatmul.mubr.bf16.gmra.mrb[44].mxu0 %v2341_v4  ;;  %v128_v4 = vld [vmem:[%s3225_s0 + $0x388] sm:$0x11] }
  0x7f   :  { %2000 = vmatprep.mubr.msk.bf16.mxu0 %vm881_vm0, %v2343_v5 }
  0x81   :  { %1066 = vmatmul.mubr.bf16.gmra.mrb[32].mxu1 %v2324_v2  ;;  %v2420_v2 = vld [vmem:[%s3225_s0 + $0x300] ss:$16 sps:$4 sm:$0xff]  }
  0x82   :  { %1073 = vmatprep.mubr.bf16.mxu1 %v2327_v3  ;;  %v2423_v3 = vld [vmem:[%s3225_s0 + $0x324] ss:$16 sps:$4 sm:$0xff]  }
  0x86   :  { %1362 = vmatmul.mubr.bf16.gmra.mrb[48].mxu0 %v2347_v8 }
  0x87   :  { %2001 = vmatprep.mubr.msk.bf16.mxu0 %vm881_vm0, %v2349_v9  ;;  %v1962_v9 = vcombine.high %v128_v4, %v128_v4 }
  0x89   :  { %1074 = vmatmul.mubr.bf16.gmra.mrb[36].mxu1 %v2330_v6 }
  0x8a   :  { %1081 = vmatprep.mubr.bf16.mxu1 %v2333_v7  ;;  %v2437_v7 = vld [vmem:[%s3225_s0 + $0x368] ss:$16 sps:$4 sm:$0xff]  }
  0x8e   :  { %1370 = vmatmul.mubr.bf16.gmra.mrb[52].mxu0 %v2353_v12  ;;  %v2429_v12 = vld [vmem:[%s3225_s0 + $0x344] ss:$16 sps:$4 sm:$0xff]  }
  0x8f   :  { %2002 = vmatprep.mubr.msk.bf16.mxu0 %vm881_vm0, %v2355_v13 }
  0x91   :  { %1082 = vmatmul.mubr.bf16.gmra.mrb[40].mxu1 %v2336_v10 }
  0x92   :  { %1089 = vmatprep.mubr.bf16.mxu1 %v2339_v11  ;;  %v2426_v11 = vld [vmem:[%s3225_s0 + $0x320] ss:$16 sps:$4 sm:$0xff]  }
  0x96   :  { %1378 = vmatmul.mubr.bf16.gmra.mrb[56].mxu0 %v2359_v16 }
  0x97   :  { %2003 = vmatprep.mubr.msk.bf16.mxu0 %vm881_vm0, %v2361_v17 }
  0x99   :  { %1090 = vmatmul.mubr.bf16.gmra.mrb[44].mxu1 %v2342_v14 }
  0x9a   :  { %1097 = vmatprep.mubr.bf16.mxu1 %v2345_v15  ;;  %v1961_v15 = vcombine.low %v128_v4, %v128_v4 }
  0x9e   :  { %1386 = vmatmul.mubr.bf16.gmra.mrb[60].mxu0 %v2365_v20 }
  0x9f   :  { %2004 = vmatprep.mubr.msk.bf16.mxu0 %vm881_vm0, %v2367_v21 }
  0xa1   :  { %1098 = vmatmul.mubr.bf16.gmra.mrb[48].mxu1 %v2348_v18  ;;  %v2432_v18 = vld [vmem:[%s3225_s0 + $0x340] ss:$16 sps:$4 sm:$0xff]  }
  0xa2   :  { %1105 = vmatprep.mubr.bf16.mxu1 %v2351_v19  ;;  %v2435_v19 = vld [vmem:[%s3225_s0 + $0x364] ss:$16 sps:$4 sm:$0xff]  }
  0xa6   :  { %1394 = vmatmul.mubr.bf16.gmra.mrb[64].mxu0 %v2371_v24 }
  0xa7   :  { %2005 = vmatprep.mubr.msk.bf16.mxu0 %vm881_vm0, %v2373_v25  ;;  %v127_v25 = vld [vmem:[%s3225_s0 + $0x380] sm:$0x11] }
  0xa9   :  { %1106 = vmatmul.mubr.bf16.gmra.mrb[52].mxu1 %v2354_v22 }
  0xaa   :  { %1113 = vmatprep.mubr.bf16.mxu1 %v2357_v23  ;;  %v2932_v23 = vld [vmem:[%s3226_s2] ss:$0 sm:$0xff] }
  0xae   :  { %1402 = vmatmul.mubr.bf16.gmra.mrb[68].mxu0 %v2377_v28 }
  0xaf   :  { %2006 = vmatprep.mubr.msk.bf16.mxu0 %vm881_vm0, %v2379_v29  ;;  %v2438_v29 = vld [vmem:[%s3225_s0 + $0x360] ss:$16 sps:$4 sm:$0xff]  }
  0xb1   :  { %1114 = vmatmul.mubr.bf16.gmra.mrb[56].mxu1 %v2360_v26 }
  0xb2   :  { %1121 = vmatprep.mubr.bf16.mxu1 %v2363_v27 }
  0xb6   :  { %1410 = vmatmul.mubr.bf16.gmra.mrb[72].mxu0 %v2383_v32 }
  0xb7   :  { %2007 = vmatprep.mubr.msk.bf16.mxu0 %vm881_vm0, %v2385_v33 }
  0xb9   :  { %1122 = vmatmul.mubr.bf16.gmra.mrb[60].mxu1 %v2366_v30 }
  0xba   :  { %1129 = vmatprep.mubr.bf16.mxu1 %v2369_v31  ;;  %v1960_v31 = vcombine.high %v127_v25, %v127_v25 }
  0xbe   :  { %1418 = vmatmul.mubr.bf16.gmra.mrb[76].mxu0 %v2389_v36 }
  0xbf   :  { %2008 = vmatprep.mubr.msk.bf16.mxu0 %vm881_vm0, %v2391_v37 }
  0xc1   :  { %1130 = vmatmul.mubr.bf16.gmra.mrb[64].mxu1 %v2372_v34 }
  0xc2   :  { %1137 = vmatprep.mubr.bf16.mxu1 %v2375_v35 }
  0xc6   :  { %1426 = vmatmul.mubr.bf16.gmra.mrb[80].mxu0 %v2395_v40 }
  0xc7   :  { %2009 = vmatprep.mubr.msk.bf16.mxu0 %vm881_vm0, %v2397_v41 }
  0xc9   :  { %1138 = vmatmul.mubr.bf16.gmra.mrb[68].mxu1 %v2378_v38 }
  0xca   :  { %1145 = vmatprep.mubr.bf16.mxu1 %v2381_v39 }
  0xce   :  { %1434 = vmatmul.mubr.bf16.gmra.mrb[84].mxu0 %v2401_v44 }
  0xcf   :  { %2010 = vmatprep.mubr.msk.bf16.mxu0 %vm881_vm0, %v2403_v45 }
  0xd1   :  { %1146 = vmatmul.mubr.bf16.gmra.mrb[72].mxu1 %v2384_v42 }
  0xd2   :  { %1153 = vmatprep.mubr.bf16.mxu1 %v2387_v43 }
  0xd6   :  { %1442 = vmatmul.mubr.bf16.gmra.mrb[88].mxu0 %v2407_v48 }
  0xd7   :  { %2011 = vmatprep.mubr.msk.bf16.mxu0 %vm881_vm0, %v2409_v49 }
  0xd9   :  { %1154 = vmatmul.mubr.bf16.gmra.mrb[76].mxu1 %v2390_v46 }
  0xda   :  { %1161 = vmatprep.mubr.bf16.mxu1 %v2393_v47  ;;  %v1959_v47 = vcombine.low %v127_v25, %v127_v25 }
  0xde   :  { %1450 = vmatmul.mubr.bf16.gmra.mrb[92].mxu0 %v2413_v52 }
  0xdf   :  { %2012 = vmatprep.mubr.msk.bf16.mxu0 %vm881_vm0, %v2415_v53 }
  0xe1   :  { %1162 = vmatmul.mubr.bf16.gmra.mrb[80].mxu1 %v2396_v50 }
  0xe2   :  { %1169 = vmatprep.mubr.bf16.mxu1 %v2399_v51 }
  0xe6   :  { %1458 = vmatmul.mubr.bf16.gmra.mrb[96].mxu0 %v2419_v56 }
  0xe7   :  { %2013 = vmatprep.mubr.msk.bf16.mxu0 %vm881_vm0, %v2421_v57 }
  0xe9   :  { %1170 = vmatmul.mubr.bf16.gmra.mrb[84].mxu1 %v2402_v54 }
  0xea   :  { %1177 = vmatprep.mubr.bf16.mxu1 %v2405_v55 }
  0xee   :  { %1466 = vmatmul.mubr.bf16.gmra.mrb[100].mxu0 %v2425_v60 }
  0xef   :  { %2014 = vmatprep.mubr.msk.bf16.mxu0 %vm881_vm0, %v2427_v61 }
  0xf1   :  { %1178 = vmatmul.mubr.bf16.gmra.mrb[88].mxu1 %v2408_v58 }
  0xf2   :  { %1185 = vmatprep.mubr.bf16.mxu1 %v2411_v59 }
  0xf6   :  { %1474 = vmatmul.mubr.bf16.gmra.mrb[104].mxu0 %v2431_v0 }
  0xf7   :  { %2015 = vmatprep.mubr.msk.bf16.mxu0 %vm881_vm0, %v2433_v1 }
  0xf9   :  { %1186 = vmatmul.mubr.bf16.gmra.mrb[92].mxu1 %v2414_v62  ;;  %v1267_v5 = vpop.f32.mrb[0].mxu0 }
  0xfa   :  { %1193 = vmatprep.mubr.bf16.mxu1 %v2417_v63  ;;  %v1269_v6 = vpop.f32.mrb[1].mxu0 }
  0xfb   :  { %v1270_v8 = vpop.f32.mrb[2].mxu0 }
  0xfc   :  { %v1272_v10 = vpop.f32.mrb[3].mxu0 }
  0xfe   :  { %1482 = vmatmul.mubr.bf16.gmra.mrb[108].mxu0 %v2437_v7 }
  0xff   :  { %2016 = vmatprep.mubr.msk.bf16.mxu0 %vm881_vm0, %v1962_v9 }
 0x101   :  { %1194 = vmatmul.mubr.bf16.gmra.mrb[96].mxu1 %v2420_v2  ;;  %v1275_v13 = vpop.f32.mrb[4].mxu0 }
 0x102   :  { %1201 = vmatprep.mubr.bf16.mxu1 %v2423_v3  ;;  %v1277_v14 = vpop.f32.mrb[5].mxu0 }
 0x103   :  { %v1278_v16 = vpop.f32.mrb[6].mxu0 }
 0x104   :  { %v1280_v17 = vpop.f32.mrb[7].mxu0 }
 0x106   :  { %1490 = vmatmul.mubr.bf16.gmra.mrb[112].mxu0 %v1961_v15 }
 0x109   :  { %1202 = vmatmul.mubr.bf16.gmra.mrb[100].mxu1 %v2426_v11  ;;  %v1283_v20 = vpop.f32.mrb[8].mxu0 }
 0x10a   :  { %1209 = vmatprep.mubr.bf16.mxu1 %v2429_v12  ;;  %v1285_v21 = vpop.f32.mrb[9].mxu0 }
 0x10b   :  { %v1286_v22 = vpop.f32.mrb[10].mxu0 }
 0x10c   :  { %v1288_v24 = vpop.f32.mrb[11].mxu0 }
 0x111   :  { %1210 = vmatmul.mubr.bf16.gmra.mrb[104].mxu1 %v2432_v18  ;;  %v1291_v35 = vpop.f32.mrb[12].mxu0 }
 0x112   :  { %1217 = vmatprep.mubr.bf16.mxu1 %v2435_v19  ;;  %v1293_v36 = vpop.f32.mrb[13].mxu0 }
 0x113   :  { %v1294_v39 = vpop.f32.mrb[14].mxu0 }
 0x114   :  { %v1003_v26 = vpop.f32.mrb[0].mxu1  ;;  %v1296_v40 = vpop.f32.mrb[15].mxu0 }
 0x115   :  { %v1004_v27 = vadd.f32 %v2932_v23, %v1003_v26  ;;  %v1005_v28 = vpop.f32.mrb[1].mxu1 }
 0x116   :  { %v1006_v30 = vpop.f32.mrb[2].mxu1 }
 0x117   :  { %v1268_v32 = vadd.f32 %v1267_v5, %v1004_v27  ;;  %v1007_v33 = vadd.f32 %v2932_v23, %v1006_v30  ;;  %v1008_v34 = vpop.f32.mrb[3].mxu1 }
 0x119   :  { %v1497_v37 = vmax.f32 %v1268_v32, 0.0  ;;  %v1271_v38 = vadd.f32 %v1270_v8, %v1007_v33  ;;  %1218 = vmatmul.mubr.bf16.gmra.mrb[108].mxu1 %v2438_v29  ;;  %v1299_v52 = vpop.f32.mrb[16].mxu0 }
 0x11a   :  { %1225 = vmatprep.mubr.bf16.mxu1 %v1960_v31  ;;  %v1301_v53 = vpop.f32.mrb[17].mxu0 }
 0x11b   :  { %v2074_v41 = vpack.c.bf16 %v1497_v37, %v1497_v37  ;;  %v1498_v42 = vmax.f32 %v1271_v38, 0.0  ;;  %v1302_v56 = vpop.f32.mrb[18].mxu0 }
 0x11c   :  { %v1011_v43 = vpop.f32.mrb[4].mxu1  ;;  %v1304_v57 = vpop.f32.mrb[19].mxu0 }
 0x11d   :  { %1784 = vst.msk [vmem:[%s3227_s3] sm:$0xf] %vm1783_vm1, %v2074_v41  ;;  %v2075_v44 = vpack.c.bf16 %v1498_v42, %v1498_v42  ;;  %v1012_v45 = vadd.f32 %v2932_v23, %v1011_v43  ;;  %v1013_v46 = vpop.f32.mrb[5].mxu1 }
 0x11e   :  { %v1014_v48 = vpop.f32.mrb[6].mxu1 }
 0x11f   :  { %1785 = vst.msk [vmem:[%s3227_s3 + $0x4] sm:$0xf] %vm1783_vm1, %v2075_v44  ;;  %v1276_v49 = vadd.f32 %v1275_v13, %v1012_v45  ;;  %v1015_v50 = vadd.f32 %v2932_v23, %v1014_v48  ;;  %v1016_v51 = vpop.f32.mrb[7].mxu1 }
 0x121   :  { %v1499_v54 = vmax.f32 %v1276_v49, 0.0  ;;  %v1279_v55 = vadd.f32 %v1278_v16, %v1015_v50  ;;  %1226 = vmatmul.mubr.bf16.gmra.mrb[112].mxu1 %v1959_v47  ;;  %v1307_v4 = vpop.f32.mrb[20].mxu0 }
 0x122   :  { %v1309_v5 = vpop.f32.mrb[21].mxu0 }
 0x123   :  { %v2076_v58 = vpack.c.bf16 %v1499_v54, %v1499_v54  ;;  %v1500_v59 = vmax.f32 %v1279_v55, 0.0  ;;  %v1310_v8 = vpop.f32.mrb[22].mxu0 }
 0x124   :  { %v1019_v60 = vpop.f32.mrb[8].mxu1  ;;  %v1312_v9 = vpop.f32.mrb[23].mxu0 }
 0x125   :  { %1786 = vst.msk [vmem:[%s3227_s3 + $0x8] sm:$0xf] %vm1783_vm1, %v2076_v58  ;;  %v2077_v61 = vpack.c.bf16 %v1500_v59, %v1500_v59  ;;  %v1020_v62 = vadd.f32 %v2932_v23, %v1019_v60  ;;  %v1021_v63 = vpop.f32.mrb[9].mxu1 }
 0x126   :  { %v1022_v0 = vpop.f32.mrb[10].mxu1 }
 0x127   :  { %1787 = vst.msk [vmem:[%s3227_s3 + $0xc] sm:$0xf] %vm1783_vm1, %v2077_v61  ;;  %v1284_v1 = vadd.f32 %v1283_v20, %v1020_v62  ;;  %v1023_v2 = vadd.f32 %v2932_v23, %v1022_v0  ;;  %v1024_v3 = vpop.f32.mrb[11].mxu1 }
 0x129   :  { %v1501_v6 = vmax.f32 %v1284_v1, 0.0  ;;  %v1287_v7 = vadd.f32 %v1286_v22, %v1023_v2  ;;  %v1315_v20 = vpop.f32.mrb[24].mxu0 }
 0x12a   :  { %v1317_v21 = vpop.f32.mrb[25].mxu0 }
 0x12b   :  { %v2078_v10 = vpack.c.bf16 %v1501_v6, %v1501_v6  ;;  %v1502_v11 = vmax.f32 %v1287_v7, 0.0  ;;  %v1318_v25 = vpop.f32.mrb[26].mxu0 }
 0x12c   :  { %v1027_v12 = vpop.f32.mrb[12].mxu1  ;;  %v1320_v26 = vpop.f32.mrb[27].mxu0 }
 0x12d   :  { %1788 = vst.msk [vmem:[%s3227_s3 + $0x10] sm:$0xf] %vm1783_vm1, %v2078_v10  ;;  %v2079_v13 = vpack.c.bf16 %v1502_v11, %v1502_v11  ;;  %v1028_v14 = vadd.f32 %v2932_v23, %v1027_v12  ;;  %v1029_v15 = vpop.f32.mrb[13].mxu1 }
 0x12e   :  { %v1030_v16 = vpop.f32.mrb[14].mxu1 }
 0x12f   :  { %1789 = vst.msk [vmem:[%s3227_s3 + $0x14] sm:$0xf] %vm1783_vm1, %v2079_v13  ;;  %v1292_v17 = vadd.f32 %v1291_v35, %v1028_v14  ;;  %v1031_v18 = vadd.f32 %v2932_v23, %v1030_v16  ;;  %v1032_v19 = vpop.f32.mrb[15].mxu1 }
 0x131   :  { %v1503_v22 = vmax.f32 %v1292_v17, 0.0  ;;  %v1295_v24 = vadd.f32 %v1294_v39, %v1031_v18  ;;  %v1323_v37 = vpop.f32.mrb[28].mxu0 }
 0x132   :  { %v1325_v38 = vpop.f32.mrb[29].mxu0 }
 0x133   :  { %v2080_v27 = vpack.c.bf16 %v1503_v22, %v1503_v22  ;;  %v1504_v28 = vmax.f32 %v1295_v24, 0.0  ;;  %v1326_v41 = vpop.f32.mrb[30].mxu0 }
 0x134   :  { %v1035_v29 = vpop.f32.mrb[16].mxu1  ;;  %v1328_v42 = vpop.f32.mrb[31].mxu0 }
 0x135   :  { %1790 = vst.msk [vmem:[%s3227_s3 + $0x18] sm:$0xf] %vm1783_vm1, %v2080_v27  ;;  %v2081_v30 = vpack.c.bf16 %v1504_v28, %v1504_v28  ;;  %v1036_v31 = vadd.f32 %v2932_v23, %v1035_v29  ;;  %v1037_v32 = vpop.f32.mrb[17].mxu1 }
 0x136   :  { %v1038_v33 = vpop.f32.mrb[18].mxu1 }
 0x137   :  { %1791 = vst.msk [vmem:[%s3227_s3 + $0x1c] sm:$0xf] %vm1783_vm1, %v2081_v30  ;;  %v1300_v34 = vadd.f32 %v1299_v52, %v1036_v31  ;;  %v1039_v35 = vadd.f32 %v2932_v23, %v1038_v33  ;;  %v1040_v36 = vpop.f32.mrb[19].mxu1 }
 0x139   :  { %v1505_v39 = vmax.f32 %v1300_v34, 0.0  ;;  %v1303_v40 = vadd.f32 %v1302_v56, %v1039_v35  ;;  %v1331_v53 = vpop.f32.mrb[32].mxu0 }
 0x13a   :  { %v1333_v54 = vpop.f32.mrb[33].mxu0 }
 0x13b   :  { %v2082_v43 = vpack.c.bf16 %v1505_v39, %v1505_v39  ;;  %v1506_v44 = vmax.f32 %v1303_v40, 0.0  ;;  %v1334_v57 = vpop.f32.mrb[34].mxu0 }
 0x13c   :  { %v1043_v45 = vpop.f32.mrb[20].mxu1  ;;  %v1336_v58 = vpop.f32.mrb[35].mxu0 }
 0x13d   :  { %1792 = vst.msk [vmem:[%s3227_s3 + $0x20] sm:$0xf] %vm1783_vm1, %v2082_v43  ;;  %v2083_v46 = vpack.c.bf16 %v1506_v44, %v1506_v44  ;;  %v1044_v47 = vadd.f32 %v2932_v23, %v1043_v45  ;;  %v1045_v48 = vpop.f32.mrb[21].mxu1 }
 0x13e   :  { %v1046_v49 = vpop.f32.mrb[22].mxu1 }
 0x13f   :  { %1793 = vst.msk [vmem:[%s3227_s3 + $0x24] sm:$0xf] %vm1783_vm1, %v2083_v46  ;;  %v1308_v50 = vadd.f32 %v1307_v4, %v1044_v47  ;;  %v1047_v51 = vadd.f32 %v2932_v23, %v1046_v49  ;;  %v1048_v52 = vpop.f32.mrb[23].mxu1 }
 0x141   :  { %v1507_v55 = vmax.f32 %v1308_v50, 0.0  ;;  %v1311_v56 = vadd.f32 %v1310_v8, %v1047_v51  ;;  %v1339_v5 = vpop.f32.mrb[36].mxu0 }
 0x142   :  { %v1341_v6 = vpop.f32.mrb[37].mxu0 }
 0x143   :  { %v2084_v59 = vpack.c.bf16 %v1507_v55, %v1507_v55  ;;  %v1508_v60 = vmax.f32 %v1311_v56, 0.0  ;;  %v1342_v9 = vpop.f32.mrb[38].mxu0 }
 0x144   :  { %v1051_v61 = vpop.f32.mrb[24].mxu1  ;;  %v1344_v10 = vpop.f32.mrb[39].mxu0 }
 0x145   :  { %1794 = vst.msk [vmem:[%s3227_s3 + $0x28] sm:$0xf] %vm1783_vm1, %v2084_v59  ;;  %v2085_v62 = vpack.c.bf16 %v1508_v60, %v1508_v60  ;;  %v1052_v63 = vadd.f32 %v2932_v23, %v1051_v61  ;;  %v1053_v0 = vpop.f32.mrb[25].mxu1 }
 0x146   :  { %v1054_v1 = vpop.f32.mrb[26].mxu1 }
 0x147   :  { %1795 = vst.msk [vmem:[%s3227_s3 + $0x2c] sm:$0xf] %vm1783_vm1, %v2085_v62  ;;  %v1316_v2 = vadd.f32 %v1315_v20, %v1052_v63  ;;  %v1055_v3 = vadd.f32 %v2932_v23, %v1054_v1  ;;  %v1056_v4 = vpop.f32.mrb[27].mxu1 }
 0x149   :  { %v1509_v7 = vmax.f32 %v1316_v2, 0.0  ;;  %v1319_v8 = vadd.f32 %v1318_v25, %v1055_v3  ;;  %v1347_v21 = vpop.f32.mrb[40].mxu0 }
 0x14a   :  { %v1349_v22 = vpop.f32.mrb[41].mxu0 }
 0x14b   :  { %v2086_v11 = vpack.c.bf16 %v1509_v7, %v1509_v7  ;;  %v1510_v12 = vmax.f32 %v1319_v8, 0.0  ;;  %v1350_v26 = vpop.f32.mrb[42].mxu0 }
 0x14c   :  { %v1059_v13 = vpop.f32.mrb[28].mxu1  ;;  %v1352_v27 = vpop.f32.mrb[43].mxu0 }
 0x14d   :  { %1796 = vst.msk [vmem:[%s3227_s3 + $0x30] sm:$0xf] %vm1783_vm1, %v2086_v11  ;;  %v2087_v14 = vpack.c.bf16 %v1510_v12, %v1510_v12  ;;  %v1060_v15 = vadd.f32 %v2932_v23, %v1059_v13  ;;  %v1061_v16 = vpop.f32.mrb[29].mxu1 }
 0x14e   :  { %v1062_v17 = vpop.f32.mrb[30].mxu1 }
 0x14f   :  { %1797 = vst.msk [vmem:[%s3227_s3 + $0x34] sm:$0xf] %vm1783_vm1, %v2087_v14  ;;  %v1324_v18 = vadd.f32 %v1323_v37, %v1060_v15  ;;  %v1063_v19 = vadd.f32 %v2932_v23, %v1062_v17  ;;  %v1064_v20 = vpop.f32.mrb[31].mxu1 }
 0x151   :  { %v1511_v24 = vmax.f32 %v1324_v18, 0.0  ;;  %v1327_v25 = vadd.f32 %v1326_v41, %v1063_v19  ;;  %v1355_v38 = vpop.f32.mrb[44].mxu0 }
 0x152   :  { %v1357_v39 = vpop.f32.mrb[45].mxu0 }
 0x153   :  { %v2088_v28 = vpack.c.bf16 %v1511_v24, %v1511_v24  ;;  %v1512_v29 = vmax.f32 %v1327_v25, 0.0  ;;  %v1358_v42 = vpop.f32.mrb[46].mxu0 }
 0x154   :  { %v1067_v30 = vpop.f32.mrb[32].mxu1  ;;  %v1360_v43 = vpop.f32.mrb[47].mxu0 }
 0x155   :  { %1798 = vst.msk [vmem:[%s3227_s3 + $0x38] sm:$0xf] %vm1783_vm1, %v2088_v28  ;;  %v2089_v31 = vpack.c.bf16 %v1512_v29, %v1512_v29  ;;  %v1068_v32 = vadd.f32 %v2932_v23, %v1067_v30  ;;  %v1069_v33 = vpop.f32.mrb[33].mxu1 }
 0x156   :  { %v1070_v34 = vpop.f32.mrb[34].mxu1 }
 0x157   :  { %1799 = vst.msk [vmem:[%s3227_s3 + $0x3c] sm:$0xf] %vm1783_vm1, %v2089_v31  ;;  %v1332_v35 = vadd.f32 %v1331_v53, %v1068_v32  ;;  %v1071_v36 = vadd.f32 %v2932_v23, %v1070_v34  ;;  %v1072_v37 = vpop.f32.mrb[35].mxu1 }
 0x159   :  { %v1513_v40 = vmax.f32 %v1332_v35, 0.0  ;;  %v1335_v41 = vadd.f32 %v1334_v57, %v1071_v36  ;;  %v1363_v54 = vpop.f32.mrb[48].mxu0 }
 0x15a   :  { %v1365_v55 = vpop.f32.mrb[49].mxu0 }
 0x15b   :  { %v2090_v44 = vpack.c.bf16 %v1513_v40, %v1513_v40  ;;  %v1514_v45 = vmax.f32 %v1335_v41, 0.0  ;;  %v1366_v58 = vpop.f32.mrb[50].mxu0 }
 0x15c   :  { %v1075_v46 = vpop.f32.mrb[36].mxu1  ;;  %v1368_v59 = vpop.f32.mrb[51].mxu0 }
 0x15d   :  { %1800 = vst.msk [vmem:[%s3227_s3 + $0x40] sm:$0xf] %vm1783_vm1, %v2090_v44  ;;  %v2091_v47 = vpack.c.bf16 %v1514_v45, %v1514_v45  ;;  %v1076_v48 = vadd.f32 %v2932_v23, %v1075_v46  ;;  %v1077_v49 = vpop.f32.mrb[37].mxu1 }
 0x15e   :  { %v1078_v50 = vpop.f32.mrb[38].mxu1 }
 0x15f   :  { %1801 = vst.msk [vmem:[%s3227_s3 + $0x44] sm:$0xf] %vm1783_vm1, %v2091_v47  ;;  %v1340_v51 = vadd.f32 %v1339_v5, %v1076_v48  ;;  %v1079_v52 = vadd.f32 %v2932_v23, %v1078_v50  ;;  %v1080_v53 = vpop.f32.mrb[39].mxu1 }
 0x161   :  { %v1515_v56 = vmax.f32 %v1340_v51, 0.0  ;;  %v1343_v57 = vadd.f32 %v1342_v9, %v1079_v52  ;;  %v1371_v6 = vpop.f32.mrb[52].mxu0 }
 0x162   :  { %v1373_v7 = vpop.f32.mrb[53].mxu0 }
 0x163   :  { %v2092_v60 = vpack.c.bf16 %v1515_v56, %v1515_v56  ;;  %v1516_v61 = vmax.f32 %v1343_v57, 0.0  ;;  %v1374_v10 = vpop.f32.mrb[54].mxu0 }
 0x164   :  { %v1083_v62 = vpop.f32.mrb[40].mxu1  ;;  %v1376_v11 = vpop.f32.mrb[55].mxu0 }
 0x165   :  { %1802 = vst.msk [vmem:[%s3227_s3 + $0x48] sm:$0xf] %vm1783_vm1, %v2092_v60  ;;  %v2093_v63 = vpack.c.bf16 %v1516_v61, %v1516_v61  ;;  %v1084_v0 = vadd.f32 %v2932_v23, %v1083_v62  ;;  %v1085_v1 = vpop.f32.mrb[41].mxu1 }
 0x166   :  { %v1086_v2 = vpop.f32.mrb[42].mxu1 }
 0x167   :  { %1803 = vst.msk [vmem:[%s3227_s3 + $0x4c] sm:$0xf] %vm1783_vm1, %v2093_v63  ;;  %v1348_v3 = vadd.f32 %v1347_v21, %v1084_v0  ;;  %v1087_v4 = vadd.f32 %v2932_v23, %v1086_v2  ;;  %v1088_v5 = vpop.f32.mrb[43].mxu1 }
 0x169   :  { %v1517_v8 = vmax.f32 %v1348_v3, 0.0  ;;  %v1351_v9 = vadd.f32 %v1350_v26, %v1087_v4  ;;  %v1379_v22 = vpop.f32.mrb[56].mxu0 }
 0x16a   :  { %v1381_v24 = vpop.f32.mrb[57].mxu0 }
 0x16b   :  { %v2094_v12 = vpack.c.bf16 %v1517_v8, %v1517_v8  ;;  %v1518_v13 = vmax.f32 %v1351_v9, 0.0  ;;  %v1382_v27 = vpop.f32.mrb[58].mxu0 }
 0x16c   :  { %v1091_v14 = vpop.f32.mrb[44].mxu1  ;;  %v1384_v28 = vpop.f32.mrb[59].mxu0 }
 0x16d   :  { %1804 = vst.msk [vmem:[%s3227_s3 + $0x50] sm:$0xf] %vm1783_vm1, %v2094_v12  ;;  %v2095_v15 = vpack.c.bf16 %v1518_v13, %v1518_v13  ;;  %v1092_v16 = vadd.f32 %v2932_v23, %v1091_v14  ;;  %v1093_v17 = vpop.f32.mrb[45].mxu1 }
 0x16e   :  { %v1094_v18 = vpop.f32.mrb[46].mxu1 }
 0x16f   :  { %1805 = vst.msk [vmem:[%s3227_s3 + $0x54] sm:$0xf] %vm1783_vm1, %v2095_v15  ;;  %v1356_v19 = vadd.f32 %v1355_v38, %v1092_v16  ;;  %v1095_v20 = vadd.f32 %v2932_v23, %v1094_v18  ;;  %v1096_v21 = vpop.f32.mrb[47].mxu1 }
 0x171   :  { %v1519_v25 = vmax.f32 %v1356_v19, 0.0  ;;  %v1359_v26 = vadd.f32 %v1358_v42, %v1095_v20  ;;  %v1387_v39 = vpop.f32.mrb[60].mxu0 }
 0x172   :  { %v1389_v40 = vpop.f32.mrb[61].mxu0 }
 0x173   :  { %v2096_v29 = vpack.c.bf16 %v1519_v25, %v1519_v25  ;;  %v1520_v30 = vmax.f32 %v1359_v26, 0.0  ;;  %v1390_v43 = vpop.f32.mrb[62].mxu0 }
 0x174   :  { %v1099_v31 = vpop.f32.mrb[48].mxu1  ;;  %v1392_v44 = vpop.f32.mrb[63].mxu0 }
 0x175   :  { %1806 = vst.msk [vmem:[%s3227_s3 + $0x58] sm:$0xf] %vm1783_vm1, %v2096_v29  ;;  %v2097_v32 = vpack.c.bf16 %v1520_v30, %v1520_v30  ;;  %v1100_v33 = vadd.f32 %v2932_v23, %v1099_v31  ;;  %v1101_v34 = vpop.f32.mrb[49].mxu1 }
 0x176   :  { %v1102_v35 = vpop.f32.mrb[50].mxu1 }
 0x177   :  { %1807 = vst.msk [vmem:[%s3227_s3 + $0x5c] sm:$0xf] %vm1783_vm1, %v2097_v32  ;;  %v1364_v36 = vadd.f32 %v1363_v54, %v1100_v33  ;;  %v1103_v37 = vadd.f32 %v2932_v23, %v1102_v35  ;;  %v1104_v38 = vpop.f32.mrb[51].mxu1 }
 0x179   :  { %v1521_v41 = vmax.f32 %v1364_v36, 0.0  ;;  %v1367_v42 = vadd.f32 %v1366_v58, %v1103_v37  ;;  %v1395_v55 = vpop.f32.mrb[64].mxu0 }
 0x17a   :  { %v1397_v56 = vpop.f32.mrb[65].mxu0 }
 0x17b   :  { %v2098_v45 = vpack.c.bf16 %v1521_v41, %v1521_v41  ;;  %v1522_v46 = vmax.f32 %v1367_v42, 0.0  ;;  %v1398_v59 = vpop.f32.mrb[66].mxu0 }
 0x17c   :  { %v1107_v47 = vpop.f32.mrb[52].mxu1  ;;  %v1400_v60 = vpop.f32.mrb[67].mxu0 }
 0x17d   :  { %1808 = vst.msk [vmem:[%s3227_s3 + $0x60] sm:$0xf] %vm1783_vm1, %v2098_v45  ;;  %v2099_v48 = vpack.c.bf16 %v1522_v46, %v1522_v46  ;;  %v1108_v49 = vadd.f32 %v2932_v23, %v1107_v47  ;;  %v1109_v50 = vpop.f32.mrb[53].mxu1 }
 0x17e   :  { %v1110_v51 = vpop.f32.mrb[54].mxu1 }
 0x17f   :  { %1809 = vst.msk [vmem:[%s3227_s3 + $0x64] sm:$0xf] %vm1783_vm1, %v2099_v48  ;;  %v1372_v52 = vadd.f32 %v1371_v6, %v1108_v49  ;;  %v1111_v53 = vadd.f32 %v2932_v23, %v1110_v51  ;;  %v1112_v54 = vpop.f32.mrb[55].mxu1 }
 0x181   :  { %v1523_v57 = vmax.f32 %v1372_v52, 0.0  ;;  %v1375_v58 = vadd.f32 %v1374_v10, %v1111_v53  ;;  %v1403_v7 = vpop.f32.mrb[68].mxu0 }
 0x182   :  { %v1405_v8 = vpop.f32.mrb[69].mxu0 }
 0x183   :  { %v2100_v61 = vpack.c.bf16 %v1523_v57, %v1523_v57  ;;  %v1524_v62 = vmax.f32 %v1375_v58, 0.0  ;;  %v1406_v11 = vpop.f32.mrb[70].mxu0 }
 0x184   :  { %v1115_v63 = vpop.f32.mrb[56].mxu1  ;;  %v1408_v12 = vpop.f32.mrb[71].mxu0 }
 0x185   :  { %1810 = vst.msk [vmem:[%s3227_s3 + $0x68] sm:$0xf] %vm1783_vm1, %v2100_v61  ;;  %v2101_v0 = vpack.c.bf16 %v1524_v62, %v1524_v62  ;;  %v1116_v1 = vadd.f32 %v2932_v23, %v1115_v63  ;;  %v1117_v2 = vpop.f32.mrb[57].mxu1 }
 0x186   :  { %v1118_v3 = vpop.f32.mrb[58].mxu1 }
 0x187   :  { %1811 = vst.msk [vmem:[%s3227_s3 + $0x6c] sm:$0xf] %vm1783_vm1, %v2101_v0  ;;  %v1380_v4 = vadd.f32 %v1379_v22, %v1116_v1  ;;  %v1119_v5 = vadd.f32 %v2932_v23, %v1118_v3  ;;  %v1120_v6 = vpop.f32.mrb[59].mxu1 }
 0x189   :  { %v1525_v9 = vmax.f32 %v1380_v4, 0.0  ;;  %v1383_v10 = vadd.f32 %v1382_v27, %v1119_v5  ;;  %v1411_v24 = vpop.f32.mrb[72].mxu0 }
 0x18a   :  { %v1413_v25 = vpop.f32.mrb[73].mxu0 }
 0x18b   :  { %v2102_v13 = vpack.c.bf16 %v1525_v9, %v1525_v9  ;;  %v1526_v14 = vmax.f32 %v1383_v10, 0.0  ;;  %v1414_v28 = vpop.f32.mrb[74].mxu0 }
 0x18c   :  { %v1123_v15 = vpop.f32.mrb[60].mxu1  ;;  %v1416_v29 = vpop.f32.mrb[75].mxu0 }
 0x18d   :  { %1812 = vst.msk [vmem:[%s3227_s3 + $0x70] sm:$0xf] %vm1783_vm1, %v2102_v13  ;;  %v2103_v16 = vpack.c.bf16 %v1526_v14, %v1526_v14  ;;  %v1124_v17 = vadd.f32 %v2932_v23, %v1123_v15  ;;  %v1125_v18 = vpop.f32.mrb[61].mxu1 }
 0x18e   :  { %v1126_v19 = vpop.f32.mrb[62].mxu1 }
 0x18f   :  { %1813 = vst.msk [vmem:[%s3227_s3 + $0x74] sm:$0xf] %vm1783_vm1, %v2103_v16  ;;  %v1388_v20 = vadd.f32 %v1387_v39, %v1124_v17  ;;  %v1127_v21 = vadd.f32 %v2932_v23, %v1126_v19  ;;  %v1128_v22 = vpop.f32.mrb[63].mxu1 }
 0x191   :  { %v1527_v26 = vmax.f32 %v1388_v20, 0.0  ;;  %v1391_v27 = vadd.f32 %v1390_v43, %v1127_v21  ;;  %v1419_v40 = vpop.f32.mrb[76].mxu0 }
 0x192   :  { %v1421_v41 = vpop.f32.mrb[77].mxu0 }
 0x193   :  { %v2104_v30 = vpack.c.bf16 %v1527_v26, %v1527_v26  ;;  %v1528_v31 = vmax.f32 %v1391_v27, 0.0  ;;  %v1422_v44 = vpop.f32.mrb[78].mxu0 }
 0x194   :  { %v1131_v32 = vpop.f32.mrb[64].mxu1  ;;  %v1424_v45 = vpop.f32.mrb[79].mxu0 }
 0x195   :  { %1814 = vst.msk [vmem:[%s3227_s3 + $0x78] sm:$0xf] %vm1783_vm1, %v2104_v30  ;;  %v2105_v33 = vpack.c.bf16 %v1528_v31, %v1528_v31  ;;  %v1132_v34 = vadd.f32 %v2932_v23, %v1131_v32  ;;  %v1133_v35 = vpop.f32.mrb[65].mxu1 }
 0x196   :  { %v1134_v36 = vpop.f32.mrb[66].mxu1 }
 0x197   :  { %1815 = vst.msk [vmem:[%s3227_s3 + $0x7c] sm:$0xf] %vm1783_vm1, %v2105_v33  ;;  %v1396_v37 = vadd.f32 %v1395_v55, %v1132_v34  ;;  %v1135_v38 = vadd.f32 %v2932_v23, %v1134_v36  ;;  %v1136_v39 = vpop.f32.mrb[67].mxu1 }
 0x199   :  { %v1529_v42 = vmax.f32 %v1396_v37, 0.0  ;;  %v1399_v43 = vadd.f32 %v1398_v59, %v1135_v38  ;;  %v1427_v56 = vpop.f32.mrb[80].mxu0 }
 0x19a   :  { %v1429_v57 = vpop.f32.mrb[81].mxu0 }
 0x19b   :  { %v2106_v46 = vpack.c.bf16 %v1529_v42, %v1529_v42  ;;  %v1530_v47 = vmax.f32 %v1399_v43, 0.0  ;;  %v1430_v60 = vpop.f32.mrb[82].mxu0 }
 0x19c   :  { %v1139_v48 = vpop.f32.mrb[68].mxu1  ;;  %v1432_v61 = vpop.f32.mrb[83].mxu0 }
 0x19d   :  { %1816 = vst.msk [vmem:[%s3227_s3 + $0x80] sm:$0xf] %vm1783_vm1, %v2106_v46  ;;  %v2107_v49 = vpack.c.bf16 %v1530_v47, %v1530_v47  ;;  %v1140_v50 = vadd.f32 %v2932_v23, %v1139_v48  ;;  %v1141_v51 = vpop.f32.mrb[69].mxu1 }
 0x19e   :  { %v1142_v52 = vpop.f32.mrb[70].mxu1 }
 0x19f   :  { %1817 = vst.msk [vmem:[%s3227_s3 + $0x84] sm:$0xf] %vm1783_vm1, %v2107_v49  ;;  %v1404_v53 = vadd.f32 %v1403_v7, %v1140_v50  ;;  %v1143_v54 = vadd.f32 %v2932_v23, %v1142_v52  ;;  %v1144_v55 = vpop.f32.mrb[71].mxu1 }
 0x1a1   :  { %v1531_v58 = vmax.f32 %v1404_v53, 0.0  ;;  %v1407_v59 = vadd.f32 %v1406_v11, %v1143_v54  ;;  %v1435_v8 = vpop.f32.mrb[84].mxu0 }
 0x1a2   :  { %v1437_v9 = vpop.f32.mrb[85].mxu0 }
 0x1a3   :  { %v2108_v62 = vpack.c.bf16 %v1531_v58, %v1531_v58  ;;  %v1532_v63 = vmax.f32 %v1407_v59, 0.0  ;;  %v1438_v12 = vpop.f32.mrb[86].mxu0 }
 0x1a4   :  { %v1147_v0 = vpop.f32.mrb[72].mxu1  ;;  %v1440_v13 = vpop.f32.mrb[87].mxu0 }
 0x1a5   :  { %1818 = vst.msk [vmem:[%s3227_s3 + $0x88] sm:$0xf] %vm1783_vm1, %v2108_v62  ;;  %v2109_v1 = vpack.c.bf16 %v1532_v63, %v1532_v63  ;;  %v1148_v2 = vadd.f32 %v2932_v23, %v1147_v0  ;;  %v1149_v3 = vpop.f32.mrb[73].mxu1 }
 0x1a6   :  { %v1150_v4 = vpop.f32.mrb[74].mxu1 }
 0x1a7   :  { %1819 = vst.msk [vmem:[%s3227_s3 + $0x8c] sm:$0xf] %vm1783_vm1, %v2109_v1  ;;  %v1412_v5 = vadd.f32 %v1411_v24, %v1148_v2  ;;  %v1151_v6 = vadd.f32 %v2932_v23, %v1150_v4  ;;  %v1152_v7 = vpop.f32.mrb[75].mxu1 }
 0x1a9   :  { %v1533_v10 = vmax.f32 %v1412_v5, 0.0  ;;  %v1415_v11 = vadd.f32 %v1414_v28, %v1151_v6  ;;  %v1443_v25 = vpop.f32.mrb[88].mxu0 }
 0x1aa   :  { %v1445_v26 = vpop.f32.mrb[89].mxu0 }
 0x1ab   :  { %v2110_v14 = vpack.c.bf16 %v1533_v10, %v1533_v10  ;;  %v1534_v15 = vmax.f32 %v1415_v11, 0.0  ;;  %v1446_v29 = vpop.f32.mrb[90].mxu0 }
 0x1ac   :  { %v1155_v16 = vpop.f32.mrb[76].mxu1  ;;  %v1448_v30 = vpop.f32.mrb[91].mxu0 }
 0x1ad   :  { %1820 = vst.msk [vmem:[%s3227_s3 + $0x90] sm:$0xf] %vm1783_vm1, %v2110_v14  ;;  %v2111_v17 = vpack.c.bf16 %v1534_v15, %v1534_v15  ;;  %v1156_v18 = vadd.f32 %v2932_v23, %v1155_v16  ;;  %v1157_v19 = vpop.f32.mrb[77].mxu1 }
 0x1ae   :  { %v1158_v20 = vpop.f32.mrb[78].mxu1 }
 0x1af   :  { %1821 = vst.msk [vmem:[%s3227_s3 + $0x94] sm:$0xf] %vm1783_vm1, %v2111_v17  ;;  %v1420_v21 = vadd.f32 %v1419_v40, %v1156_v18  ;;  %v1159_v22 = vadd.f32 %v2932_v23, %v1158_v20  ;;  %v1160_v24 = vpop.f32.mrb[79].mxu1 }
 0x1b1   :  { %v1535_v27 = vmax.f32 %v1420_v21, 0.0  ;;  %v1423_v28 = vadd.f32 %v1422_v44, %v1159_v22  ;;  %v1451_v41 = vpop.f32.mrb[92].mxu0 }
 0x1b2   :  { %v1453_v42 = vpop.f32.mrb[93].mxu0 }
 0x1b3   :  { %v2112_v31 = vpack.c.bf16 %v1535_v27, %v1535_v27  ;;  %v1536_v32 = vmax.f32 %v1423_v28, 0.0  ;;  %v1454_v45 = vpop.f32.mrb[94].mxu0 }
 0x1b4   :  { %v1163_v33 = vpop.f32.mrb[80].mxu1  ;;  %v1456_v46 = vpop.f32.mrb[95].mxu0 }
 0x1b5   :  { %1822 = vst.msk [vmem:[%s3227_s3 + $0x98] sm:$0xf] %vm1783_vm1, %v2112_v31  ;;  %v2113_v34 = vpack.c.bf16 %v1536_v32, %v1536_v32  ;;  %v1164_v35 = vadd.f32 %v2932_v23, %v1163_v33  ;;  %v1165_v36 = vpop.f32.mrb[81].mxu1 }
 0x1b6   :  { %v1166_v37 = vpop.f32.mrb[82].mxu1 }
 0x1b7   :  { %1823 = vst.msk [vmem:[%s3227_s3 + $0x9c] sm:$0xf] %vm1783_vm1, %v2113_v34  ;;  %v1428_v38 = vadd.f32 %v1427_v56, %v1164_v35  ;;  %v1167_v39 = vadd.f32 %v2932_v23, %v1166_v37  ;;  %v1168_v40 = vpop.f32.mrb[83].mxu1 }
 0x1b9   :  { %v1537_v43 = vmax.f32 %v1428_v38, 0.0  ;;  %v1431_v44 = vadd.f32 %v1430_v60, %v1167_v39  ;;  %v1459_v57 = vpop.f32.mrb[96].mxu0 }
 0x1ba   :  { %v1461_v58 = vpop.f32.mrb[97].mxu0 }
 0x1bb   :  { %v2114_v47 = vpack.c.bf16 %v1537_v43, %v1537_v43  ;;  %v1538_v48 = vmax.f32 %v1431_v44, 0.0  ;;  %v1462_v61 = vpop.f32.mrb[98].mxu0 }
 0x1bc   :  { %v1171_v49 = vpop.f32.mrb[84].mxu1  ;;  %v1464_v62 = vpop.f32.mrb[99].mxu0 }
 0x1bd   :  { %1824 = vst.msk [vmem:[%s3227_s3 + $0xa0] sm:$0xf] %vm1783_vm1, %v2114_v47  ;;  %v2115_v50 = vpack.c.bf16 %v1538_v48, %v1538_v48  ;;  %v1172_v51 = vadd.f32 %v2932_v23, %v1171_v49  ;;  %v1173_v52 = vpop.f32.mrb[85].mxu1 }
 0x1be   :  { %v1174_v53 = vpop.f32.mrb[86].mxu1 }
 0x1bf   :  { %1825 = vst.msk [vmem:[%s3227_s3 + $0xa4] sm:$0xf] %vm1783_vm1, %v2115_v50  ;;  %v1436_v54 = vadd.f32 %v1435_v8, %v1172_v51  ;;  %v1175_v55 = vadd.f32 %v2932_v23, %v1174_v53  ;;  %v1176_v56 = vpop.f32.mrb[87].mxu1 }
 0x1c1   :  { %v1539_v59 = vmax.f32 %v1436_v54, 0.0  ;;  %v1439_v60 = vadd.f32 %v1438_v12, %v1175_v55  ;;  %v1467_v9 = vpop.f32.mrb[100].mxu0 }
 0x1c2   :  { %v1469_v10 = vpop.f32.mrb[101].mxu0 }
 0x1c3   :  { %v2116_v63 = vpack.c.bf16 %v1539_v59, %v1539_v59  ;;  %v1540_v0 = vmax.f32 %v1439_v60, 0.0  ;;  %v1470_v13 = vpop.f32.mrb[102].mxu0 }
 0x1c4   :  { %v1179_v1 = vpop.f32.mrb[88].mxu1  ;;  %v1472_v14 = vpop.f32.mrb[103].mxu0 }
 0x1c5   :  { %1826 = vst.msk [vmem:[%s3227_s3 + $0xa8] sm:$0xf] %vm1783_vm1, %v2116_v63  ;;  %v2117_v2 = vpack.c.bf16 %v1540_v0, %v1540_v0  ;;  %v1180_v3 = vadd.f32 %v2932_v23, %v1179_v1  ;;  %v1181_v4 = vpop.f32.mrb[89].mxu1 }
 0x1c6   :  { %v1182_v5 = vpop.f32.mrb[90].mxu1 }
 0x1c7   :  { %1827 = vst.msk [vmem:[%s3227_s3 + $0xac] sm:$0xf] %vm1783_vm1, %v2117_v2  ;;  %v1444_v6 = vadd.f32 %v1443_v25, %v1180_v3  ;;  %v1183_v7 = vadd.f32 %v2932_v23, %v1182_v5  ;;  %v1184_v8 = vpop.f32.mrb[91].mxu1 }
 0x1c9   :  { %v1541_v11 = vmax.f32 %v1444_v6, 0.0  ;;  %v1447_v12 = vadd.f32 %v1446_v29, %v1183_v7  ;;  %v1475_v26 = vpop.f32.mrb[104].mxu0 }
 0x1ca   :  { %v1477_v27 = vpop.f32.mrb[105].mxu0 }
 0x1cb   :  { %v2118_v15 = vpack.c.bf16 %v1541_v11, %v1541_v11  ;;  %v1542_v16 = vmax.f32 %v1447_v12, 0.0  ;;  %v1478_v30 = vpop.f32.mrb[106].mxu0 }
 0x1cc   :  { %v1187_v17 = vpop.f32.mrb[92].mxu1  ;;  %v1480_v31 = vpop.f32.mrb[107].mxu0 }
 0x1cd   :  { %1828 = vst.msk [vmem:[%s3227_s3 + $0xb0] sm:$0xf] %vm1783_vm1, %v2118_v15  ;;  %v2119_v18 = vpack.c.bf16 %v1542_v16, %v1542_v16  ;;  %v1188_v19 = vadd.f32 %v2932_v23, %v1187_v17  ;;  %v1189_v20 = vpop.f32.mrb[93].mxu1 }
 0x1ce   :  { %v1190_v21 = vpop.f32.mrb[94].mxu1 }
 0x1cf   :  { %1829 = vst.msk [vmem:[%s3227_s3 + $0xb4] sm:$0xf] %vm1783_vm1, %v2119_v18  ;;  %v1452_v22 = vadd.f32 %v1451_v41, %v1188_v19  ;;  %v1191_v24 = vadd.f32 %v2932_v23, %v1190_v21  ;;  %v1192_v25 = vpop.f32.mrb[95].mxu1 }
 0x1d1   :  { %v1543_v28 = vmax.f32 %v1452_v22, 0.0  ;;  %v1455_v29 = vadd.f32 %v1454_v45, %v1191_v24  ;;  %v1483_v42 = vpop.f32.mrb[108].mxu0 }
 0x1d2   :  { %v1485_v43 = vpop.f32.mrb[109].mxu0 }
 0x1d3   :  { %v2120_v32 = vpack.c.bf16 %v1543_v28, %v1543_v28  ;;  %v1544_v33 = vmax.f32 %v1455_v29, 0.0  ;;  %v1486_v46 = vpop.f32.mrb[110].mxu0 }
 0x1d4   :  { %v1195_v34 = vpop.f32.mrb[96].mxu1  ;;  %v1488_v47 = vpop.f32.mrb[111].mxu0 }
 0x1d5   :  { %1830 = vst.msk [vmem:[%s3227_s3 + $0xb8] sm:$0xf] %vm1783_vm1, %v2120_v32  ;;  %v2121_v35 = vpack.c.bf16 %v1544_v33, %v1544_v33  ;;  %v1196_v36 = vadd.f32 %v2932_v23, %v1195_v34  ;;  %v1197_v37 = vpop.f32.mrb[97].mxu1 }
 0x1d6   :  { %v1198_v38 = vpop.f32.mrb[98].mxu1 }
 0x1d7   :  { %1831 = vst.msk [vmem:[%s3227_s3 + $0xbc] sm:$0xf] %vm1783_vm1, %v2121_v35  ;;  %v1460_v39 = vadd.f32 %v1459_v57, %v1196_v36  ;;  %v1199_v40 = vadd.f32 %v2932_v23, %v1198_v38  ;;  %v1200_v41 = vpop.f32.mrb[99].mxu1 }
 0x1d9   :  { %v1545_v44 = vmax.f32 %v1460_v39, 0.0  ;;  %v1463_v45 = vadd.f32 %v1462_v61, %v1199_v40  ;;  %v1491_v58 = vpop.f32.mrb[112].mxu0 }
 0x1da   :  { %v1493_v59 = vpop.f32.mrb[113].mxu0 }
 0x1db   :  { %v2122_v48 = vpack.c.bf16 %v1545_v44, %v1545_v44  ;;  %v1546_v49 = vmax.f32 %v1463_v45, 0.0  ;;  %v1494_v62 = vpop.f32.mrb[114].mxu0 }
 0x1dc   :  { %v1203_v50 = vpop.f32.mrb[100].mxu1  ;;  %v1495_v63 = vpop.f32.mrb[115].mxu0 }
 0x1dd   :  { %1832 = vst.msk [vmem:[%s3227_s3 + $0xc0] sm:$0xf] %vm1783_vm1, %v2122_v48  ;;  %v2123_v51 = vpack.c.bf16 %v1546_v49, %v1546_v49  ;;  %v1204_v52 = vadd.f32 %v2932_v23, %v1203_v50  ;;  %v1205_v53 = vpop.f32.mrb[101].mxu1 }
 0x1de   :  { %v1206_v54 = vpop.f32.mrb[102].mxu1 }
 0x1df   :  { %1833 = vst.msk [vmem:[%s3227_s3 + $0xc4] sm:$0xf] %vm1783_vm1, %v2123_v51  ;;  %v1468_v55 = vadd.f32 %v1467_v9, %v1204_v52  ;;  %v1207_v56 = vadd.f32 %v2932_v23, %v1206_v54  ;;  %v1208_v57 = vpop.f32.mrb[103].mxu1 }
 0x1e1   :  { %v1547_v60 = vmax.f32 %v1468_v55, 0.0  ;;  %v1471_v61 = vadd.f32 %v1470_v13, %v1207_v56 }
 0x1e3   :  { %v2124_v0 = vpack.c.bf16 %v1547_v60, %v1547_v60  ;;  %v1548_v1 = vmax.f32 %v1471_v61, 0.0 }
 0x1e4   :  { %v1211_v2 = vpop.f32.mrb[104].mxu1 }
 0x1e5   :  { %1834 = vst.msk [vmem:[%s3227_s3 + $0xc8] sm:$0xf] %vm1783_vm1, %v2124_v0  ;;  %v2125_v3 = vpack.c.bf16 %v1548_v1, %v1548_v1  ;;  %v1212_v4 = vadd.f32 %v2932_v23, %v1211_v2  ;;  %v1213_v5 = vpop.f32.mrb[105].mxu1 }
 0x1e6   :  { %v1214_v6 = vpop.f32.mrb[106].mxu1 }
 0x1e7   :  { %1835 = vst.msk [vmem:[%s3227_s3 + $0xcc] sm:$0xf] %vm1783_vm1, %v2125_v3  ;;  %v1476_v7 = vadd.f32 %v1475_v26, %v1212_v4  ;;  %v1215_v8 = vadd.f32 %v2932_v23, %v1214_v6  ;;  %v1216_v9 = vpop.f32.mrb[107].mxu1 }
 0x1e9   :  { %v1549_v10 = vmax.f32 %v1476_v7, 0.0  ;;  %v1479_v11 = vadd.f32 %v1478_v30, %v1215_v8 }
 0x1eb   :  { %v2126_v12 = vpack.c.bf16 %v1549_v10, %v1549_v10  ;;  %v1550_v13 = vmax.f32 %v1479_v11, 0.0 }
 0x1ec   :  { %v1219_v14 = vpop.f32.mrb[108].mxu1 }
 0x1ed   :  { %1836 = vst.msk [vmem:[%s3227_s3 + $0xd0] sm:$0xf] %vm1783_vm1, %v2126_v12  ;;  %v2127_v15 = vpack.c.bf16 %v1550_v13, %v1550_v13  ;;  %v1220_v16 = vadd.f32 %v2932_v23, %v1219_v14  ;;  %v1221_v17 = vpop.f32.mrb[109].mxu1 }
 0x1ee   :  { %v1222_v18 = vpop.f32.mrb[110].mxu1 }
 0x1ef   :  { %1837 = vst.msk [vmem:[%s3227_s3 + $0xd4] sm:$0xf] %vm1783_vm1, %v2127_v15  ;;  %v1484_v19 = vadd.f32 %v1483_v42, %v1220_v16  ;;  %v1223_v20 = vadd.f32 %v2932_v23, %v1222_v18  ;;  %v1224_v21 = vpop.f32.mrb[111].mxu1 }
 0x1f1   :  { %v1551_v22 = vmax.f32 %v1484_v19, 0.0  ;;  %v1487_v24 = vadd.f32 %v1486_v46, %v1223_v20 }
 0x1f3   :  { %v2128_v25 = vpack.c.bf16 %v1551_v22, %v1551_v22  ;;  %v1552_v26 = vmax.f32 %v1487_v24, 0.0 }
 0x1f4   :  { %v1227_v27 = vpop.f32.mrb[112].mxu1 }
 0x1f5   :  { %1838 = vst.msk [vmem:[%s3227_s3 + $0xd8] sm:$0xf] %vm1783_vm1, %v2128_v25  ;;  %v2129_v28 = vpack.c.bf16 %v1552_v26, %v1552_v26  ;;  %v1228_v29 = vadd.f32 %v2932_v23, %v1227_v27  ;;  %v1229_v30 = vpop.f32.mrb[113].mxu1 }
 0x1f6   :  { %v1230_v31 = vpop.f32.mrb[114].mxu1 }
 0x1f7   :  { %1839 = vst.msk [vmem:[%s3227_s3 + $0xdc] sm:$0xf] %vm1783_vm1, %v2129_v28  ;;  %v1492_v32 = vadd.f32 %v1491_v58, %v1228_v29  ;;  %v1231_v33 = vpop.f32.mrb[115].mxu1 }
 0x1f9   :  { %v1553_v34 = vmax.f32 %v1492_v32, 0.0 }
 0x1fb   :  { %v2130_v35 = vpack.c.bf16 %v1553_v34, %v1553_v34 }
 0x1fd   :  { %1841 = vst.msk [vmem:[%s3227_s3 + $0xe0] sm:$0x1] %vm1840_vm2, %v2130_v35 }

// kernel: xtma_cnn_forward.10
= control target key start
LH: loop header
LB: loop body
LE: loop exit
PB: predicated region body
PF: predicated region fallthrough
CT: control target
= control target key end

     0   :  { %v794_v1 = vmov 0.0   ;;  %vm795_vm0 = vmmov 0   ;;  %vm292_vm1 = vcmask 261120   ;;  %vm556_vm2 = vcmask 519168   ;;  %s1022_s1 = inlined_call_operand.vmem [shape: bf16[288,64], index: 1, kind: input, shape index: {}]   ;;  %s1023_s0 = inlined_call_operand.vmem [shape: bf16[98,288], index: 0, kind: input, shape index: {}]   ;;  %s1024_s2 = inlined_call_operand.vmem [shape: f32[1,64], index: 2, kind: input, shape index: {}]   ;;  %s1025_s3 = inlined_call_operand.vmem [shape: bf16[98,64], index: 3, kind: output, shape index: {}]  }
   0x1   :  { %v749_v0 = vld [vmem:[%s1022_s1 + $0x40] sm:$0xff]   ;;  %715 = vmatprep.subr.bf16.mxu1 %v794_v1  ;;  %719 = vmatprep.mubr.msk.bf16.mxu1 %vm795_vm0, %v794_v1  ;;  %v751_v3 = vld [vmem:[%s1022_s1 + $0x48] sm:$0xff]   ;;  %v753_v5 = vld [vmem:[%s1022_s1 + $0x50] sm:$0xff]   ;;  %vm569_vm3 = vcmask 516096  }
   0x2   :  { %v750_v2 = vld [vmem:[%s1022_s1] sm:$0xff]   ;;  %648 = vmatprep.subr.bf16.mxu0 %v749_v0  ;;  %v752_v4 = vld [vmem:[%s1022_s1 + $0x8] sm:$0xff]   ;;  %v754_v6 = vld [vmem:[%s1022_s1 + $0x10] sm:$0xff]  }
   0x3   :  { %649 = vmatpush3.bf16.msra.mxu0 %v750_v2  ;;  %v755_v7 = vld [vmem:[%s1022_s1 + $0x58] sm:$0xff]   ;;  %v757_v9 = vld [vmem:[%s1022_s1 + $0x60] sm:$0xff]   ;;  %v759_v12 = vld [vmem:[%s1022_s1 + $0x68] sm:$0xff]  }
   0x4   :  { %650 = vmatprep.subr.bf16.mxu0 %v751_v3  ;;  %v756_v8 = vld [vmem:[%s1022_s1 + $0x18] sm:$0xff]   ;;  %v763_v10 = vld [vmem:[%s1022_s1 + $0x80] sm:$0xff]   ;;  %v760_v13 = vld [vmem:[%s1022_s1 + $0x28] sm:$0xff]  }
   0x5   :  { %v758_v11 = vld [vmem:[%s1022_s1 + $0x20] sm:$0xff]   ;;  %716 = vmatpush3.bf16.msra.mxu1 %v763_v10  ;;  %v761_v14 = vld [vmem:[%s1022_s1 + $0x70] sm:$0xff]   ;;  %v769_v16 = vld [vmem:[%s1022_s1 + $0x88] sm:$0xff]  }
   0x6   :  { %717 = vmatprep.subr.bf16.mxu1 %v794_v1  ;;  %v768_v15 = vld [vmem:[%s1023_s0 + $0x4] ss:$12 sps:$4 sm:$0xff]   ;;  %v770_v17 = vld [vmem:[%s1023_s0 + $0x8] ss:$12 sps:$4 sm:$0xff]   ;;  %v764_v19 = vld [vmem:[%s1022_s1 + $0x78] sm:$0xff]  }
   0x7   :  { %651 = vmatpush3.bf16.msra.mxu0 %v752_v4  ;;  %346 = vmatprep.mubr.bf16.mxu0 %v768_v15  ;;  %v762_v18 = vld [vmem:[%s1022_s1 + $0x30] sm:$0xff]   ;;  %v765_v20 = vld [vmem:[%s1022_s1 + $0x38] sm:$0xff]   ;;  %v774_v21 = vld [vmem:[%s1023_s0 + $0x20] ss:$12 sps:$4 sm:$0xff]  }
   0x8   :  { %652 = vmatprep.subr.bf16.mxu0 %v753_v5  ;;  %v766_v22 = vld [vmem:[%s1023_s0] ss:$12 sps:$4 sm:$0xff]   ;;  %v771_v23 = vld [vmem:[%s1023_s0 + $0x1c] ss:$12 sps:$4 sm:$0xff]   ;;  %v778_v24 = vld [vmem:[%s1023_s0 + $0x38] ss:$12 sps:$4 sm:$0xff]  }
   0x9   :  { %718 = vmatpush3.bf16.msra.mxu1 %v769_v16  ;;  %v773_v25 = vld [vmem:[%s1023_s0 + $0x18] ss:$12 sps:$4 sm:$0xff]   ;;  %v775_v26 = vld [vmem:[%s1023_s0 + $0x34] ss:$12 sps:$4 sm:$0xff]   ;;  %v782_v27 = vld [vmem:[%s1023_s0 + $0x50] ss:$12 sps:$4 sm:$0xff]  }
   0xa   :  { %v777_v28 = vld [vmem:[%s1023_s0 + $0x30] ss:$12 sps:$4 sm:$0xff]   ;;  %v779_v29 = vld [vmem:[%s1023_s0 + $0x4c] ss:$12 sps:$4 sm:$0xff]   ;;  %v786_v30 = vld [vmem:[%s1023_s0 + $0x68] ss:$12 sps:$4 sm:$0xff]  }
   0xb   :  { %653 = vmatpush3.bf16.msra.mxu0 %v754_v6  ;;  %v781_v31 = vld [vmem:[%s1023_s0 + $0x48] ss:$12 sps:$4 sm:$0xff]   ;;  %v783_v32 = vld [vmem:[%s1023_s0 + $0x64] ss:$12 sps:$4 sm:$0xff]   ;;  %v790_v33 = vld [vmem:[%s1023_s0 + $0x80] ss:$12 sps:$4 sm:$0xff]  }
   0xc   :  { %654 = vmatprep.subr.bf16.mxu0 %v755_v7  ;;  %720 = vmatmul.mubr.msk.bf16.vlgmr.msra.gmra.mrb[0].mxu1 %vm292_vm1, %v770_v17  ;;  %v785_v34 = vld [vmem:[%s1023_s0 + $0x60] ss:$12 sps:$4 sm:$0xff]   ;;  %v787_v35 = vld [vmem:[%s1023_s0 + $0x7c] ss:$12 sps:$4 sm:$0xff]   ;;  %v39_v36 = vld [vmem:[%s1023_s0 + $0x90] sm:$0x11] }
   0xd   :  { %723 = vmatprep.mubr.msk.bf16.mxu1 %vm795_vm0, %v794_v1  ;;  %v793_v37 = vld [vmem:[%s1023_s0 + $0x98] ss:$0 sps:$4 sm:$0x11]   ;;  %v595_v39 = vcombine.high %v39_v36, %v39_v36  ;;  %v594_v40 = vcombine.low %v39_v36, %v39_v36  ;;  %v956_v50 = vld [vmem:[%s1024_s2] ss:$0 sm:$0xff] }
   0xe   :  { %v789_v38 = vld [vmem:[%s1023_s0 + $0x78] ss:$12 sps:$4 sm:$0xff]  }
   0xf   :  { %655 = vmatpush3.bf16.msra.mxu0 %v756_v8 }
  0x10   :  { %656 = vmatprep.subr.bf16.mxu0 %v757_v9 }
  0x13   :  { %657 = vmatpush3.bf16.msra.mxu0 %v758_v11 }
  0x14   :  { %658 = vmatprep.subr.bf16.mxu0 %v759_v12  ;;  %724 = vmatmul.mubr.msk.bf16.gmra.mrb[4].mxu1 %vm292_vm1, %v774_v21 }
  0x15   :  { %727 = vmatprep.mubr.msk.bf16.mxu1 %vm795_vm0, %v794_v1 }
  0x17   :  { %659 = vmatpush3.bf16.msra.mxu0 %v760_v13 }
  0x18   :  { %660 = vmatprep.subr.bf16.mxu0 %v761_v14 }
  0x1b   :  { %661 = vmatpush3.bf16.msra.mxu0 %v762_v18 }
  0x1c   :  { %662 = vmatprep.subr.bf16.mxu0 %v764_v19  ;;  %728 = vmatmul.mubr.msk.bf16.gmra.mrb[8].mxu1 %vm292_vm1, %v778_v24 }
  0x1d   :  { %731 = vmatprep.mubr.msk.bf16.mxu1 %vm795_vm0, %v794_v1 }
  0x1f   :  { %663 = vmatpush3.bf16.msra.mxu0 %v765_v20 }
  0x22   :  { %347 = vmatmul.mubr.bf16.vlgmr.msra.gmra.mrb[0].mxu0 %v766_v22 }
  0x23   :  { %354 = vmatprep.mubr.bf16.mxu0 %v771_v23 }
  0x24   :  { %732 = vmatmul.mubr.msk.bf16.gmra.mrb[12].mxu1 %vm292_vm1, %v782_v27 }
  0x25   :  { %735 = vmatprep.mubr.msk.bf16.mxu1 %vm795_vm0, %v794_v1 }
  0x2a   :  { %355 = vmatmul.mubr.bf16.gmra.mrb[4].mxu0 %v773_v25 }
  0x2b   :  { %362 = vmatprep.mubr.bf16.mxu0 %v775_v26 }
  0x2c   :  { %736 = vmatmul.mubr.msk.bf16.gmra.mrb[16].mxu1 %vm292_vm1, %v786_v30 }
  0x2d   :  { %739 = vmatprep.mubr.msk.bf16.mxu1 %vm795_vm0, %v794_v1 }
  0x32   :  { %363 = vmatmul.mubr.bf16.gmra.mrb[8].mxu0 %v777_v28 }
  0x33   :  { %370 = vmatprep.mubr.bf16.mxu0 %v779_v29 }
  0x34   :  { %740 = vmatmul.mubr.msk.bf16.gmra.mrb[20].mxu1 %vm292_vm1, %v790_v33 }
  0x35   :  { %743 = vmatprep.mubr.msk.bf16.mxu1 %vm795_vm0, %v794_v1 }
  0x3a   :  { %371 = vmatmul.mubr.bf16.gmra.mrb[12].mxu0 %v781_v31 }
  0x3b   :  { %378 = vmatprep.mubr.bf16.mxu0 %v783_v32 }
  0x3c   :  { %744 = vmatmul.mubr.msk.bf16.gmra.mrb[24].mxu1 %vm292_vm1, %v793_v37 }
  0x42   :  { %379 = vmatmul.mubr.bf16.gmra.mrb[16].mxu0 %v785_v34 }
  0x43   :  { %386 = vmatprep.mubr.bf16.mxu0 %v787_v35 }
  0x4a   :  { %387 = vmatmul.mubr.bf16.gmra.mrb[20].mxu0 %v789_v38 }
  0x4b   :  { %394 = vmatprep.mubr.bf16.mxu0 %v595_v39 }
  0x52   :  { %395 = vmatmul.mubr.bf16.gmra.mrb[24].mxu0 %v594_v40 }
  0xdf   :  { %v436_v41 = vpop.f32.mrb[0].mxu1 }
  0xe0   :  { %v721_v42 = vpop.f32.mrb[1].mxu1 }
  0xe1   :  { %v439_v43 = vpop.f32.mrb[2].mxu1 }
  0xe2   :  { %v722_v44 = vpop.f32.mrb[3].mxu1 }
  0xe7   :  { %v444_v45 = vpop.f32.mrb[4].mxu1 }
  0xe8   :  { %v725_v46 = vpop.f32.mrb[5].mxu1 }
  0xe9   :  { %v447_v48 = vpop.f32.mrb[6].mxu1 }
  0xea   :  { %v726_v51 = vpop.f32.mrb[7].mxu1 }
  0xef   :  { %v452_v59 = vpop.f32.mrb[8].mxu1 }
  0xf0   :  { %v729_v60 = vpop.f32.mrb[9].mxu1 }
  0xf1   :  { %v455_v0 = vpop.f32.mrb[10].mxu1 }
  0xf2   :  { %v730_v2 = vpop.f32.mrb[11].mxu1 }
  0xf5   :  { %v664_v47 = vpop.f32.mrb[0].mxu0 }
  0xf6   :  { %v665_v49 = vpop.f32.mrb[1].mxu0 }
  0xf7   :  { %v666_v52 = vadd.f32 %v665_v49, %v664_v47  ;;  %v667_v53 = vpop.f32.mrb[2].mxu0  ;;  %v460_v13 = vpop.f32.mrb[12].mxu1 }
  0xf8   :  { %v668_v54 = vpop.f32.mrb[3].mxu0  ;;  %v733_v14 = vpop.f32.mrb[13].mxu1 }
  0xf9   :  { %v349_v55 = vadd.f32 %v666_v52, %v956_v50  ;;  %v669_v56 = vadd.f32 %v668_v54, %v667_v53  ;;  %v463_v18 = vpop.f32.mrb[14].mxu1 }
  0xfa   :  { %v734_v20 = vpop.f32.mrb[15].mxu1 }
  0xfb   :  { %v437_v57 = vadd.f32 %v436_v41, %v349_v55  ;;  %v352_v58 = vadd.f32 %v669_v56, %v956_v50 }
  0xfd   :  { %v490_v61 = vmax.f32 %v437_v57, 0.0  ;;  %v440_v62 = vadd.f32 %v439_v43, %v352_v58  ;;  %v670_v63 = vpop.f32.mrb[4].mxu0 }
  0xfe   :  { %v671_v1 = vpop.f32.mrb[5].mxu0 }
  0xff   :  { %v635_v3 = vpack.c.bf16 %v490_v61, %v490_v61  ;;  %v491_v4 = vmax.f32 %v440_v62, 0.0  ;;  %v672_v5 = vadd.f32 %v671_v1, %v670_v63  ;;  %v673_v6 = vpop.f32.mrb[6].mxu0  ;;  %v468_v31 = vpop.f32.mrb[16].mxu1 }
 0x100   :  { %v674_v7 = vpop.f32.mrb[7].mxu0  ;;  %v737_v32 = vpop.f32.mrb[17].mxu1 }
 0x101   :  { %557 = vst.msk [vmem:[%s1025_s3] sm:$0xf] %vm556_vm2, %v635_v3  ;;  %v636_v8 = vpack.c.bf16 %v491_v4, %v491_v4  ;;  %v357_v9 = vadd.f32 %v672_v5, %v956_v50  ;;  %v675_v10 = vadd.f32 %v674_v7, %v673_v6  ;;  %v471_v36 = vpop.f32.mrb[18].mxu1 }
 0x102   :  { %v738_v38 = vpop.f32.mrb[19].mxu1 }
 0x103   :  { %558 = vst.msk [vmem:[%s1025_s3 + $0x4] sm:$0xf] %vm556_vm2, %v636_v8  ;;  %v445_v11 = vadd.f32 %v444_v45, %v357_v9  ;;  %v360_v12 = vadd.f32 %v675_v10, %v956_v50 }
 0x105   :  { %v492_v15 = vmax.f32 %v445_v11, 0.0  ;;  %v448_v16 = vadd.f32 %v447_v48, %v360_v12  ;;  %v676_v17 = vpop.f32.mrb[8].mxu0 }
 0x106   :  { %v677_v19 = vpop.f32.mrb[9].mxu0 }
 0x107   :  { %v637_v21 = vpack.c.bf16 %v492_v15, %v492_v15  ;;  %v493_v22 = vmax.f32 %v448_v16, 0.0  ;;  %v678_v23 = vadd.f32 %v677_v19, %v676_v17  ;;  %v679_v24 = vpop.f32.mrb[10].mxu0  ;;  %v476_v49 = vpop.f32.mrb[20].mxu1 }
 0x108   :  { %v680_v25 = vpop.f32.mrb[11].mxu0  ;;  %v741_v51 = vpop.f32.mrb[21].mxu1 }
 0x109   :  { %559 = vst.msk [vmem:[%s1025_s3 + $0x8] sm:$0xf] %vm556_vm2, %v637_v21  ;;  %v638_v26 = vpack.c.bf16 %v493_v22, %v493_v22  ;;  %v365_v27 = vadd.f32 %v678_v23, %v956_v50  ;;  %v681_v28 = vadd.f32 %v680_v25, %v679_v24  ;;  %v479_v55 = vpop.f32.mrb[22].mxu1 }
 0x10a   :  { %v742_v57 = vpop.f32.mrb[23].mxu1 }
 0x10b   :  { %560 = vst.msk [vmem:[%s1025_s3 + $0xc] sm:$0xf] %vm556_vm2, %v638_v26  ;;  %v453_v29 = vadd.f32 %v452_v59, %v365_v27  ;;  %v368_v30 = vadd.f32 %v681_v28, %v956_v50 }
 0x10d   :  { %v494_v33 = vmax.f32 %v453_v29, 0.0  ;;  %v456_v34 = vadd.f32 %v455_v0, %v368_v30  ;;  %v682_v35 = vpop.f32.mrb[12].mxu0 }
 0x10e   :  { %v683_v37 = vpop.f32.mrb[13].mxu0 }
 0x10f   :  { %v639_v39 = vpack.c.bf16 %v494_v33, %v494_v33  ;;  %v495_v40 = vmax.f32 %v456_v34, 0.0  ;;  %v684_v41 = vadd.f32 %v683_v37, %v682_v35  ;;  %v685_v42 = vpop.f32.mrb[14].mxu0  ;;  %v484_v4 = vpop.f32.mrb[24].mxu1 }
 0x110   :  { %v686_v43 = vpop.f32.mrb[15].mxu0  ;;  %v745_v5 = vpop.f32.mrb[25].mxu1 }
 0x111   :  { %561 = vst.msk [vmem:[%s1025_s3 + $0x10] sm:$0xf] %vm556_vm2, %v639_v39  ;;  %v640_v44 = vpack.c.bf16 %v495_v40, %v495_v40  ;;  %v373_v45 = vadd.f32 %v684_v41, %v956_v50  ;;  %v687_v46 = vadd.f32 %v686_v43, %v685_v42  ;;  %v487_v9 = vpop.f32.mrb[26].mxu1 }
 0x112   :  { %v746_v11 = vpop.f32.mrb[27].mxu1 }
 0x113   :  { %562 = vst.msk [vmem:[%s1025_s3 + $0x14] sm:$0xf] %vm556_vm2, %v640_v44  ;;  %v461_v47 = vadd.f32 %v460_v13, %v373_v45  ;;  %v376_v48 = vadd.f32 %v687_v46, %v956_v50 }
 0x115   :  { %v496_v52 = vmax.f32 %v461_v47, 0.0  ;;  %v464_v53 = vadd.f32 %v463_v18, %v376_v48  ;;  %v688_v54 = vpop.f32.mrb[16].mxu0 }
 0x116   :  { %v689_v56 = vpop.f32.mrb[17].mxu0 }
 0x117   :  { %v641_v58 = vpack.c.bf16 %v496_v52, %v496_v52  ;;  %v497_v59 = vmax.f32 %v464_v53, 0.0  ;;  %v690_v60 = vadd.f32 %v689_v56, %v688_v54  ;;  %v691_v61 = vpop.f32.mrb[18].mxu0 }
 0x118   :  { %v692_v62 = vpop.f32.mrb[19].mxu0 }
 0x119   :  { %563 = vst.msk [vmem:[%s1025_s3 + $0x18] sm:$0xf] %vm556_vm2, %v641_v58  ;;  %v642_v63 = vpack.c.bf16 %v497_v59, %v497_v59  ;;  %v381_v0 = vadd.f32 %v690_v60, %v956_v50  ;;  %v693_v1 = vadd.f32 %v692_v62, %v691_v61 }
 0x11b   :  { %564 = vst.msk [vmem:[%s1025_s3 + $0x1c] sm:$0xf] %vm556_vm2, %v642_v63  ;;  %v469_v2 = vadd.f32 %v468_v31, %v381_v0  ;;  %v384_v3 = vadd.f32 %v693_v1, %v956_v50 }
 0x11d   :  { %v498_v6 = vmax.f32 %v469_v2, 0.0  ;;  %v472_v7 = vadd.f32 %v471_v36, %v384_v3  ;;  %v694_v8 = vpop.f32.mrb[20].mxu0 }
 0x11e   :  { %v695_v10 = vpop.f32.mrb[21].mxu0 }
 0x11f   :  { %v643_v12 = vpack.c.bf16 %v498_v6, %v498_v6  ;;  %v499_v13 = vmax.f32 %v472_v7, 0.0  ;;  %v696_v14 = vadd.f32 %v695_v10, %v694_v8  ;;  %v697_v15 = vpop.f32.mrb[22].mxu0 }
 0x120   :  { %v698_v16 = vpop.f32.mrb[23].mxu0 }
 0x121   :  { %565 = vst.msk [vmem:[%s1025_s3 + $0x20] sm:$0xf] %vm556_vm2, %v643_v12  ;;  %v644_v17 = vpack.c.bf16 %v499_v13, %v499_v13  ;;  %v389_v18 = vadd.f32 %v696_v14, %v956_v50  ;;  %v699_v19 = vadd.f32 %v698_v16, %v697_v15 }
 0x123   :  { %566 = vst.msk [vmem:[%s1025_s3 + $0x24] sm:$0xf] %vm556_vm2, %v644_v17  ;;  %v477_v20 = vadd.f32 %v476_v49, %v389_v18  ;;  %v392_v21 = vadd.f32 %v699_v19, %v956_v50 }
 0x125   :  { %v500_v22 = vmax.f32 %v477_v20, 0.0  ;;  %v480_v23 = vadd.f32 %v479_v55, %v392_v21  ;;  %v700_v24 = vpop.f32.mrb[24].mxu0 }
 0x126   :  { %v701_v25 = vpop.f32.mrb[25].mxu0 }
 0x127   :  { %v645_v26 = vpack.c.bf16 %v500_v22, %v500_v22  ;;  %v501_v27 = vmax.f32 %v480_v23, 0.0  ;;  %v702_v28 = vadd.f32 %v701_v25, %v700_v24  ;;  %v703_v29 = vpop.f32.mrb[26].mxu0 }
 0x128   :  { %v704_v30 = vpop.f32.mrb[27].mxu0 }
 0x129   :  { %567 = vst.msk [vmem:[%s1025_s3 + $0x28] sm:$0xf] %vm556_vm2, %v645_v26  ;;  %v646_v31 = vpack.c.bf16 %v501_v27, %v501_v27  ;;  %v397_v32 = vadd.f32 %v702_v28, %v956_v50 }
 0x12b   :  { %568 = vst.msk [vmem:[%s1025_s3 + $0x2c] sm:$0xf] %vm556_vm2, %v646_v31  ;;  %v485_v33 = vadd.f32 %v484_v4, %v397_v32 }
 0x12d   :  { %v502_v34 = vmax.f32 %v485_v33, 0.0 }
 0x12f   :  { %v647_v35 = vpack.c.bf16 %v502_v34, %v502_v34 }
 0x131   :  { %570 = vst.msk [vmem:[%s1025_s3 + $0x30] sm:$0x1] %vm569_vm3, %v647_v35 }

// kernel: xtma_cnn_forward.11
= control target key start
LH: loop header
LB: loop body
LE: loop exit
PB: predicated region body
PF: predicated region fallthrough
CT: control target
= control target key end

     0   :  { %vm361_vm0 = vcmask 523264   ;;  %s878_s1 = inlined_call_operand.vmem [shape: bf16[576,128], index: 1, kind: input, shape index: {}]   ;;  %s879_s0 = inlined_call_operand.vmem [shape: bf16[18,576], index: 0, kind: input, shape index: {}]   ;;  %s880_s2 = inlined_call_operand.vmem [shape: f32[1,128], index: 2, kind: input, shape index: {}]   ;;  %s881_s3 = inlined_call_operand.vmem [shape: bf16[18,128], index: 3, kind: output, shape index: {}]  }
   0x1   :  { %v669_v0 = vld [vmem:[%s878_s1 + $0x40] sm:$0xff]   ;;  %v673_v4 = vld [vmem:[%s878_s1 + $0x48] sm:$0xff]   ;;  %v677_v8 = vld [vmem:[%s878_s1 + $0x50] sm:$0xff]  }
   0x2   :  { %v670_v1 = vld [vmem:[%s878_s1] sm:$0xff]   ;;  %595 = vmatprep.subr.bf16.mxu0 %v669_v0  ;;  %v674_v5 = vld [vmem:[%s878_s1 + $0x8] sm:$0xff]   ;;  %v678_v9 = vld [vmem:[%s878_s1 + $0x10] sm:$0xff]  }
   0x3   :  { %v671_v2 = vld [vmem:[%s878_s1 + $0xc0] sm:$0xff]   ;;  %596 = vmatpush3.bf16.msra.mxu0 %v670_v1  ;;  %v675_v6 = vld [vmem:[%s878_s1 + $0xc8] sm:$0xff]   ;;  %v679_v10 = vld [vmem:[%s878_s1 + $0xd0] sm:$0xff]  }
   0x4   :  { %v672_v3 = vld [vmem:[%s878_s1 + $0x80] sm:$0xff]   ;;  %623 = vmatprep.subr.bf16.mxu1 %v671_v2  ;;  %597 = vmatprep.subr.bf16.mxu0 %v673_v4  ;;  %v676_v7 = vld [vmem:[%s878_s1 + $0x88] sm:$0xff]   ;;  %v680_v11 = vld [vmem:[%s878_s1 + $0x90] sm:$0xff]  }
   0x5   :  { %624 = vmatpush3.bf16.msra.mxu1 %v672_v3  ;;  %v681_v12 = vld [vmem:[%s878_s1 + $0x58] sm:$0xff]   ;;  %v685_v16 = vld [vmem:[%s878_s1 + $0x60] sm:$0xff]   ;;  %v689_v20 = vld [vmem:[%s878_s1 + $0x68] sm:$0xff]  }
   0x6   :  { %625 = vmatprep.subr.bf16.mxu1 %v675_v6  ;;  %v682_v13 = vld [vmem:[%s878_s1 + $0x18] sm:$0xff]   ;;  %v686_v17 = vld [vmem:[%s878_s1 + $0x20] sm:$0xff]   ;;  %v690_v21 = vld [vmem:[%s878_s1 + $0x28] sm:$0xff]  }
   0x7   :  { %598 = vmatpush3.bf16.msra.mxu0 %v674_v5  ;;  %v683_v14 = vld [vmem:[%s878_s1 + $0xd8] sm:$0xff]   ;;  %v687_v18 = vld [vmem:[%s878_s1 + $0xe0] sm:$0xff]   ;;  %v691_v22 = vld [vmem:[%s878_s1 + $0xe8] sm:$0xff]  }
   0x8   :  { %599 = vmatprep.subr.bf16.mxu0 %v677_v8  ;;  %v684_v15 = vld [vmem:[%s878_s1 + $0x98] sm:$0xff]   ;;  %v688_v19 = vld [vmem:[%s878_s1 + $0xa0] sm:$0xff]   ;;  %v692_v23 = vld [vmem:[%s878_s1 + $0xa8] sm:$0xff]  }
   0x9   :  { %626 = vmatpush3.bf16.msra.mxu1 %v676_v7  ;;  %v693_v24 = vld [vmem:[%s878_s1 + $0x70] sm:$0xff]   ;;  %v697_v28 = vld [vmem:[%s878_s1 + $0x78] sm:$0xff]   ;;  %v704_v34 = vld [vmem:[%s878_s1 + $0x100] sm:$0xff]  }
   0xa   :  { %627 = vmatprep.subr.bf16.mxu1 %v679_v10  ;;  %v694_v25 = vld [vmem:[%s878_s1 + $0x30] sm:$0xff]   ;;  %v698_v29 = vld [vmem:[%s878_s1 + $0x38] sm:$0xff]   ;;  %v707_v36 = vld [vmem:[%s879_s0 + $0xc] ss:$20 sps:$4 sm:$0xff]  }
   0xb   :  { %600 = vmatpush3.bf16.msra.mxu0 %v678_v9  ;;  %v695_v26 = vld [vmem:[%s878_s1 + $0xf0] sm:$0xff]   ;;  %v699_v30 = vld [vmem:[%s878_s1 + $0xf8] sm:$0xff]   ;;  %v708_v37 = vld [vmem:[%s878_s1 + $0x108] sm:$0xff]   ;;  %448 = vmatprep.mubr.bf16.mxu1 %v707_v36 }
   0xc   :  { %601 = vmatprep.subr.bf16.mxu0 %v681_v12  ;;  %v696_v27 = vld [vmem:[%s878_s1 + $0xb0] sm:$0xff]   ;;  %v702_v32 = vld [vmem:[%s879_s0 + $0x4] ss:$20 sps:$4 sm:$0xff]   ;;  %v705_v35 = vld [vmem:[%s879_s0 + $0x8] ss:$20 sps:$4 sm:$0xff]  }
   0xd   :  { %628 = vmatpush3.bf16.msra.mxu1 %v680_v11  ;;  %v700_v31 = vld [vmem:[%s879_s0] ss:$20 sps:$4 sm:$0xff]   ;;  %v703_v33 = vld [vmem:[%s878_s1 + $0xb8] sm:$0xff]   ;;  %400 = vmatprep.mubr.bf16.mxu0 %v702_v32  ;;  %v21_v38 = vld [vmem:[%s879_s0 + $0x28] sm:$0x11] }
   0xe   :  { %629 = vmatprep.subr.bf16.mxu1 %v683_v14  ;;  %v542_v39 = vcombine.high %v21_v38, %v21_v38  ;;  %v711_v40 = vld [vmem:[%s878_s1 + $0x110] sm:$0xff]   ;;  %v541_v42 = vcombine.low %v21_v38, %v21_v38  ;;  %v714_v46 = vld [vmem:[%s878_s1 + $0x118] sm:$0xff]   ;;  %v535_v49 = vld [vmem:[%s880_s2] ss:$0 sm:$0xff] }
   0xf   :  { %602 = vmatpush3.bf16.msra.mxu0 %v682_v13  ;;  %v22_v41 = vld [vmem:[%s879_s0 + $0x30] sm:$0x11]  ;;  %v716_v47 = vld [vmem:[%s879_s0 + $0x38] ss:$0 sps:$4 sm:$0x11]  }
  0x10   :  { %603 = vmatprep.subr.bf16.mxu0 %v685_v16  ;;  %v544_v43 = vcombine.high %v22_v41, %v22_v41  ;;  %v715_v44 = vld [vmem:[%s879_s0 + $0x10] ss:$20 sps:$4 sm:$0xff]   ;;  %v543_v45 = vcombine.low %v22_v41, %v22_v41 }
  0x11   :  { %630 = vmatpush3.bf16.msra.mxu1 %v684_v15 }
  0x12   :  { %631 = vmatprep.subr.bf16.mxu1 %v687_v18 }
  0x13   :  { %604 = vmatpush3.bf16.msra.mxu0 %v686_v17 }
  0x14   :  { %605 = vmatprep.subr.bf16.mxu0 %v689_v20 }
  0x15   :  { %632 = vmatpush3.bf16.msra.mxu1 %v688_v19 }
  0x16   :  { %633 = vmatprep.subr.bf16.mxu1 %v691_v22 }
  0x17   :  { %606 = vmatpush3.bf16.msra.mxu0 %v690_v21 }
  0x18   :  { %607 = vmatprep.subr.bf16.mxu0 %v693_v24 }
  0x19   :  { %634 = vmatpush3.bf16.msra.mxu1 %v692_v23 }
  0x1a   :  { %635 = vmatprep.subr.bf16.mxu1 %v695_v26 }
  0x1b   :  { %608 = vmatpush3.bf16.msra.mxu0 %v694_v25 }
  0x1c   :  { %609 = vmatprep.subr.bf16.mxu0 %v697_v28 }
  0x1d   :  { %636 = vmatpush3.bf16.msra.mxu1 %v696_v27 }
  0x1e   :  { %637 = vmatprep.subr.bf16.mxu1 %v699_v30 }
  0x1f   :  { %610 = vmatpush3.bf16.msra.mxu0 %v698_v29 }
  0x20   :  { %657 = vmatprep.subr.bf16.mxu0 %v704_v34 }
  0x21   :  { %638 = vmatpush3.bf16.msra.mxu1 %v703_v33 }
  0x22   :  { %401 = vmatmul.mubr.bf16.vlgmr.msra.gmra.mrb[0].mxu0 %v700_v31 }
  0x23   :  { %658 = vmatpush3.bf16.msra.mxu0 %v704_v34  ;;  %408 = vmatprep.mubr.bf16.mxu0 %v542_v39 }
  0x24   :  { %449 = vmatmul.mubr.bf16.vlgmr.msra.gmra.mrb[0].mxu1 %v705_v35  ;;  %659 = vmatprep.subr.bf16.mxu0 %v708_v37 }
  0x25   :  { %456 = vmatprep.mubr.bf16.mxu1 %v544_v43 }
  0x27   :  { %660 = vmatpush3.bf16.msra.mxu0 %v708_v37 }
  0x28   :  { %661 = vmatprep.subr.bf16.mxu0 %v711_v40 }
  0x2a   :  { %409 = vmatmul.mubr.bf16.gmra.mrb[4].mxu0 %v541_v42 }
  0x2b   :  { %665 = vmatprep.mubr.msk.bf16.mxu0 %vm361_vm0, %v715_v44  ;;  %662 = vmatpush3.bf16.msra.mxu0 %v711_v40 }
  0x2c   :  { %457 = vmatmul.mubr.bf16.gmra.mrb[4].mxu1 %v543_v45  ;;  %663 = vmatprep.subr.bf16.mxu0 %v714_v46 }
  0x2f   :  { %664 = vmatpush3.bf16.msra.mxu0 %v714_v46 }
  0x32   :  { %666 = vmatmul.mubr.msk.bf16.vlgmr.msra.gmra.mrb[8].mxu0 %vm361_vm0, %v716_v47 }
  0xf5   :  { %v611_v48 = vpop.f32.mrb[0].mxu0 }
  0xf6   :  { %v612_v50 = vpop.f32.mrb[1].mxu0 }
  0xf7   :  { %v613_v51 = vadd.f32 %v612_v50, %v611_v48  ;;  %v614_v52 = vpop.f32.mrb[2].mxu0  ;;  %v639_v53 = vpop.f32.mrb[0].mxu1 }
  0xf8   :  { %v615_v54 = vpop.f32.mrb[3].mxu0  ;;  %v640_v57 = vpop.f32.mrb[1].mxu1 }
  0xf9   :  { %v403_v55 = vadd.f32 %v613_v51, %v535_v49  ;;  %v616_v56 = vadd.f32 %v615_v54, %v614_v52  ;;  %v641_v58 = vadd.f32 %v640_v57, %v639_v53  ;;  %v642_v59 = vpop.f32.mrb[2].mxu1 }
  0xfa   :  { %v643_v61 = vpop.f32.mrb[3].mxu1 }
  0xfb   :  { %v406_v60 = vadd.f32 %v616_v56, %v535_v49  ;;  %v644_v62 = vadd.f32 %v643_v61, %v642_v59  ;;  %v451_v63 = vadd.f32 %v641_v58, %v403_v55 }
  0xfd   :  { %v617_v0 = vpop.f32.mrb[4].mxu0  ;;  %v454_v2 = vadd.f32 %v644_v62, %v406_v60 }
  0xfe   :  { %v618_v1 = vpop.f32.mrb[5].mxu0 }
  0xff   :  { %v619_v3 = vadd.f32 %v618_v1, %v617_v0  ;;  %v620_v4 = vpop.f32.mrb[6].mxu0  ;;  %v645_v5 = vpop.f32.mrb[4].mxu1 }
 0x100   :  { %v621_v6 = vpop.f32.mrb[7].mxu0  ;;  %v646_v8 = vpop.f32.mrb[5].mxu1 }
 0x101   :  { %v411_v7 = vadd.f32 %v619_v3, %v535_v49  ;;  %v647_v9 = vadd.f32 %v646_v8, %v645_v5  ;;  %v648_v10 = vpop.f32.mrb[6].mxu1 }
 0x102   :  { %v649_v11 = vpop.f32.mrb[7].mxu1 }
 0x103   :  { %v459_v12 = vadd.f32 %v647_v9, %v411_v7 }
 0x105   :  { %v667_v13 = vpop.f32.mrb[8].mxu0 }
 0x106   :  { %v507_v14 = vadd.f32 %v667_v13, %v459_v12  ;;  %v498_v15 = vpop.f32.mrb[9].mxu0 }
 0x107   :  { %v499_v16 = vadd.f32 %v498_v15, %v451_v63  ;;  %v668_v17 = vpop.f32.mrb[10].mxu0 }
 0x108   :  { %v514_v18 = vmax.f32 %v507_v14, 0.0  ;;  %v501_v19 = vpop.f32.mrb[11].mxu0 }
 0x109   :  { %v502_v20 = vadd.f32 %v501_v19, %v454_v2  ;;  %v512_v22 = vmax.f32 %v499_v16, 0.0 }
 0x10a   :  { %v589_v21 = vpack.c.bf16 %v514_v18, %v514_v18 }
 0x10b   :  { %v513_v23 = vmax.f32 %v502_v20, 0.0 }
 0x10c   :  { %530 = vst [vmem:[%s881_s3 + $0x8] sm:$0x1] %v589_v21 }
 0x10d   :  { %v593_v24 = vpack.c.bf16 %v513_v23, %v512_v22 }
 0x10f   :  { %594 = vst [vmem:[%s881_s3] sm:$0xff] %v593_v24  }

// kernel: xtma_cnn_forward.12
= control target key start
LH: loop header
LB: loop body
LE: loop exit
PB: predicated region body
PF: predicated region fallthrough
CT: control target
= control target key end

     0   :  { %v163_v36 = vlaneseq  ;;  %v1581_v37 = vmov 1966171168   ;;  %s2072_s1 = inlined_call_operand.vmem [shape: bf16[1152,256], index: 1, kind: input, shape index: {}]   ;;  %s2073_s0 = inlined_call_operand.vmem [shape: bf16[2,1152], index: 0, kind: input, shape index: {}]   ;;  %s2074_s2 = inlined_call_operand.vmem [shape: f32[1,256], index: 2, kind: input, shape index: {}]   ;;  %s2075_s3 = inlined_call_operand.vmem [shape: bf16[2,256], index: 3, kind: output, shape index: {}]  }
   0x1   :  { %v1364_v0 = vld [vmem:[%s2072_s1 + $0x4] ss:$8 sps:$4 sm:$0xff]   ;;  %v1368_v2 = vld [vmem:[%s2072_s1] ss:$8 sps:$4 sm:$0xff]   ;;  %v1370_v4 = vld [vmem:[%s2072_s1 + $0x14] ss:$8 sps:$4 sm:$0xff]   ;;  %v177_v38 = vunpack.c.l.s4 %v1581_v37 }
   0x2   :  { %v1366_v1 = vld [vmem:[%s2072_s1 + $0x204] ss:$8 sps:$4 sm:$0xff]   ;;  %967 = vmatprep.subr.bf16.mxu1 %v1364_v0  ;;  %v1369_v3 = vld [vmem:[%s2072_s1 + $0x200] ss:$8 sps:$4 sm:$0xff]   ;;  %v1372_v5 = vld [vmem:[%s2072_s1 + $0x214] ss:$8 sps:$4 sm:$0xff]  }
   0x3   :  { %1049 = vmatprep.subr.bf16.mxu0 %v1366_v1  ;;  %968 = vmatpush1.bf16.msra.mxu1 %v1368_v2  ;;  %v1374_v6 = vld [vmem:[%s2072_s1 + $0x10] ss:$8 sps:$4 sm:$0xff]   ;;  %v1376_v8 = vld [vmem:[%s2072_s1 + $0x24] ss:$8 sps:$4 sm:$0xff]   ;;  %v1380_v10 = vld [vmem:[%s2072_s1 + $0x20] ss:$8 sps:$4 sm:$0xff]   ;;  %v178_v43 = vunpack.c.0.s8 %v177_v38 }
   0x4   :  { %1050 = vmatpush1.bf16.msra.mxu0 %v1369_v3  ;;  %969 = vmatprep.subr.bf16.mxu1 %v1370_v4  ;;  %v1375_v7 = vld [vmem:[%s2072_s1 + $0x210] ss:$8 sps:$4 sm:$0xff]   ;;  %v1378_v9 = vld [vmem:[%s2072_s1 + $0x224] ss:$8 sps:$4 sm:$0xff]   ;;  %v1381_v11 = vld [vmem:[%s2072_s1 + $0x220] ss:$8 sps:$4 sm:$0xff]  }
   0x5   :  { %1051 = vmatprep.subr.bf16.mxu0 %v1372_v5  ;;  %v1382_v12 = vld [vmem:[%s2072_s1 + $0x34] ss:$8 sps:$4 sm:$0xff]   ;;  %v1386_v14 = vld [vmem:[%s2072_s1 + $0x30] ss:$8 sps:$4 sm:$0xff]   ;;  %v1388_v16 = vld [vmem:[%s2072_s1 + $0x44] ss:$8 sps:$4 sm:$0xff]  }
   0x6   :  { %v1384_v13 = vld [vmem:[%s2072_s1 + $0x234] ss:$8 sps:$4 sm:$0xff]   ;;  %v1387_v15 = vld [vmem:[%s2072_s1 + $0x230] ss:$8 sps:$4 sm:$0xff]   ;;  %v1390_v17 = vld [vmem:[%s2072_s1 + $0x244] ss:$8 sps:$4 sm:$0xff]  }
   0x7   :  { %970 = vmatpush1.bf16.msra.mxu1 %v1374_v6  ;;  %v1392_v18 = vld [vmem:[%s2072_s1 + $0x40] ss:$8 sps:$4 sm:$0xff]   ;;  %v1394_v20 = vld [vmem:[%s2072_s1 + $0x54] ss:$8 sps:$4 sm:$0xff]   ;;  %v1398_v22 = vld [vmem:[%s2072_s1 + $0x50] ss:$8 sps:$4 sm:$0xff]  }
   0x8   :  { %1052 = vmatpush1.bf16.msra.mxu0 %v1375_v7  ;;  %971 = vmatprep.subr.bf16.mxu1 %v1376_v8  ;;  %v1393_v19 = vld [vmem:[%s2072_s1 + $0x240] ss:$8 sps:$4 sm:$0xff]   ;;  %v1396_v21 = vld [vmem:[%s2072_s1 + $0x254] ss:$8 sps:$4 sm:$0xff]   ;;  %v1399_v23 = vld [vmem:[%s2072_s1 + $0x250] ss:$8 sps:$4 sm:$0xff]  }
   0x9   :  { %1053 = vmatprep.subr.bf16.mxu0 %v1378_v9  ;;  %v1400_v24 = vld [vmem:[%s2072_s1 + $0x64] ss:$8 sps:$4 sm:$0xff]   ;;  %v1404_v26 = vld [vmem:[%s2072_s1 + $0x60] ss:$8 sps:$4 sm:$0xff]   ;;  %v1406_v28 = vld [vmem:[%s2072_s1 + $0x74] ss:$8 sps:$4 sm:$0xff]  }
   0xa   :  { %v1402_v25 = vld [vmem:[%s2072_s1 + $0x264] ss:$8 sps:$4 sm:$0xff]   ;;  %v1405_v27 = vld [vmem:[%s2072_s1 + $0x260] ss:$8 sps:$4 sm:$0xff]   ;;  %v1408_v29 = vld [vmem:[%s2072_s1 + $0x274] ss:$8 sps:$4 sm:$0xff]  }
   0xb   :  { %972 = vmatpush1.bf16.msra.mxu1 %v1380_v10  ;;  %v1410_v30 = vld [vmem:[%s2072_s1 + $0x70] ss:$8 sps:$4 sm:$0xff]   ;;  %v1412_v32 = vld [vmem:[%s2072_s1 + $0x84] ss:$8 sps:$4 sm:$0xff]   ;;  %v1416_v34 = vld [vmem:[%s2072_s1 + $0x80] ss:$8 sps:$4 sm:$0xff]  }
   0xc   :  { %1054 = vmatpush1.bf16.msra.mxu0 %v1381_v11  ;;  %973 = vmatprep.subr.bf16.mxu1 %v1382_v12  ;;  %v1411_v31 = vld [vmem:[%s2072_s1 + $0x270] ss:$8 sps:$4 sm:$0xff]   ;;  %v1414_v33 = vld [vmem:[%s2072_s1 + $0x284] ss:$8 sps:$4 sm:$0xff]   ;;  %v1417_v35 = vld [vmem:[%s2072_s1 + $0x280] ss:$8 sps:$4 sm:$0xff]  }
   0xd   :  { %1055 = vmatprep.subr.bf16.mxu0 %v1384_v13  ;;  %v1418_v39 = vld [vmem:[%s2072_s1 + $0x94] ss:$8 sps:$4 sm:$0xff]   ;;  %v1422_v41 = vld [vmem:[%s2072_s1 + $0x90] ss:$8 sps:$4 sm:$0xff]   ;;  %v1720_v42 = vshrl.u32 %v163_v36, 7  ;;  %v15_v52 = vld [vmem:[%s2073_s0] sm:$0xff] }
   0xe   :  { %v1420_v40 = vld [vmem:[%s2072_s1 + $0x294] ss:$8 sps:$4 sm:$0xff]   ;;  %v1423_v44 = vld [vmem:[%s2072_s1 + $0x290] ss:$8 sps:$4 sm:$0xff]   ;;  %v1424_v45 = vld [vmem:[%s2072_s1 + $0xa4] ss:$8 sps:$4 sm:$0xff]   ;;  %v175_v55 = vcombine.high %v15_v52, %v15_v52 }
   0xf   :  { %974 = vmatpush1.bf16.msra.mxu1 %v1386_v14  ;;  %v1426_v46 = vld [vmem:[%s2072_s1 + $0x2a4] ss:$8 sps:$4 sm:$0xff]   ;;  %v1428_v47 = vld [vmem:[%s2072_s1 + $0xa0] ss:$8 sps:$4 sm:$0xff]   ;;  %v1738_v49 = vsub.s32 %v178_v43, %v1720_v42  ;;  %v1430_v50 = vld [vmem:[%s2072_s1 + $0xb4] ss:$8 sps:$4 sm:$0xff]  }
  0x10   :  { %1056 = vmatpush1.bf16.msra.mxu0 %v1387_v15  ;;  %975 = vmatprep.subr.bf16.mxu1 %v1388_v16  ;;  %v1429_v48 = vld [vmem:[%s2072_s1 + $0x2a0] ss:$8 sps:$4 sm:$0xff]   ;;  %v1432_v51 = vld [vmem:[%s2072_s1 + $0x2b4] ss:$8 sps:$4 sm:$0xff]   ;;  %v1434_v53 = vld [vmem:[%s2072_s1 + $0xb0] ss:$8 sps:$4 sm:$0xff]  }
  0x11   :  { %1057 = vmatprep.subr.bf16.mxu0 %v1390_v17  ;;  %v182_v54 = vrot.slane %v15_v52, %v1738_v49  ;;  %v1435_v56 = vld [vmem:[%s2072_s1 + $0x2b0] ss:$8 sps:$4 sm:$0xff]   ;;  %v1436_v57 = vld [vmem:[%s2072_s1 + $0xc4] ss:$8 sps:$4 sm:$0xff]   ;;  %v189_v60 = vrot.slane %v175_v55, %v1738_v49  ;;  %v1440_v61 = vld [vmem:[%s2072_s1 + $0xc0] ss:$8 sps:$4 sm:$0xff]  }
  0x12   :  { %v1438_v58 = vld [vmem:[%s2072_s1 + $0x2c4] ss:$8 sps:$4 sm:$0xff]   ;;  %v1441_v0 = vld [vmem:[%s2072_s1 + $0x2c0] ss:$8 sps:$4 sm:$0xff]   ;;  %v1442_v1 = vld [vmem:[%s2072_s1 + $0xd4] ss:$8 sps:$4 sm:$0xff]  }
  0x13   :  { %976 = vmatpush1.bf16.msra.mxu1 %v1392_v18  ;;  %v190_v59 = vcombine.high %v182_v54, %v182_v54  ;;  %v191_v63 = vcombine.high %v189_v60, %v189_v60  ;;  %v1444_v2 = vld [vmem:[%s2072_s1 + $0x2d4] ss:$8 sps:$4 sm:$0xff]   ;;  %v1446_v4 = vld [vmem:[%s2072_s1 + $0xd0] ss:$8 sps:$4 sm:$0xff]   ;;  %v1448_v6 = vld [vmem:[%s2072_s1 + $0xe4] ss:$8 sps:$4 sm:$0xff]   ;;  %v1817_v17 = vrot.slane %v182_v54, %v1738_v49  ;;  %v1820_v18 = vrot.slane %v189_v60, %v1738_v49 }
  0x14   :  { %1058 = vmatpush1.bf16.msra.mxu0 %v1393_v19  ;;  %977 = vmatprep.subr.bf16.mxu1 %v1394_v20  ;;  %v1447_v5 = vld [vmem:[%s2072_s1 + $0x2d0] ss:$8 sps:$4 sm:$0xff]   ;;  %v1450_v7 = vld [vmem:[%s2072_s1 + $0x2e4] ss:$8 sps:$4 sm:$0xff]   ;;  %v1452_v8 = vld [vmem:[%s2072_s1 + $0xe0] ss:$8 sps:$4 sm:$0xff]  }
  0x15   :  { %1059 = vmatprep.subr.bf16.mxu0 %v1396_v21  ;;  %v212_v62 = vrot.slane %v190_v59, %v1738_v49  ;;  %v219_v3 = vrot.slane %v191_v63, %v1738_v49  ;;  %v1453_v9 = vld [vmem:[%s2072_s1 + $0x2e0] ss:$8 sps:$4 sm:$0xff]   ;;  %v1454_v10 = vld [vmem:[%s2072_s1 + $0xf4] ss:$8 sps:$4 sm:$0xff]   ;;  %v1458_v12 = vld [vmem:[%s2072_s1 + $0xf0] ss:$8 sps:$4 sm:$0xff]  }
  0x16   :  { %v1456_v11 = vld [vmem:[%s2072_s1 + $0x2f4] ss:$8 sps:$4 sm:$0xff]   ;;  %v1459_v13 = vld [vmem:[%s2072_s1 + $0x2f0] ss:$8 sps:$4 sm:$0xff]   ;;  %v1462_v14 = vld [vmem:[%s2072_s1 + $0x104] ss:$8 sps:$4 sm:$0xff]  }
  0x17   :  { %978 = vmatpush1.bf16.msra.mxu1 %v1398_v22  ;;  %999 = vmatprep.mubr.bf16.mxu1 %v212_v62  ;;  %v1466_v15 = vld [vmem:[%s2072_s1 + $0x304] ss:$8 sps:$4 sm:$0xff]   ;;  %v1460_v16 = vld [vmem:[%s2072_s1 + $0x100] ss:$8 sps:$4 sm:$0xff]   ;;  %v1469_v20 = vld [vmem:[%s2072_s1 + $0x114] ss:$8 sps:$4 sm:$0xff]   ;;  %v222_v22 = vcombine.high %v212_v62, %v212_v62 }
  0x18   :  { %1060 = vmatpush1.bf16.msra.mxu0 %v1399_v23  ;;  %979 = vmatprep.subr.bf16.mxu1 %v1400_v24  ;;  %v1464_v19 = vld [vmem:[%s2072_s1 + $0x300] ss:$8 sps:$4 sm:$0xff]   ;;  %v1472_v21 = vld [vmem:[%s2072_s1 + $0x314] ss:$8 sps:$4 sm:$0xff]   ;;  %v223_v23 = vcombine.high %v219_v3, %v219_v3  ;;  %v1467_v24 = vld [vmem:[%s2072_s1 + $0x110] ss:$8 sps:$4 sm:$0xff]  }
  0x19   :  { %1061 = vmatprep.subr.bf16.mxu0 %v1402_v25  ;;  %1081 = vmatprep.mubr.bf16.mxu0 %v219_v3  ;;  %v1470_v25 = vld [vmem:[%s2072_s1 + $0x310] ss:$8 sps:$4 sm:$0xff]   ;;  %v1485_v36 = vld [vmem:[%s2072_s1 + $0x140] ss:$8 sps:$4 sm:$0xff]   ;;  %v1493_v38 = vld [vmem:[%s2072_s1 + $0x154] ss:$8 sps:$4 sm:$0xff]  }
  0x1a   :  { %v1488_v37 = vld [vmem:[%s2072_s1 + $0x340] ss:$8 sps:$4 sm:$0xff]   ;;  %v1499_v43 = vld [vmem:[%s2072_s1 + $0x164] ss:$8 sps:$4 sm:$0xff]   ;;  %v1518_v59 = vld [vmem:[%s2072_s1 + $0x390] ss:$8 sps:$4 sm:$0xff]  }
  0x1b   :  { %980 = vmatpush1.bf16.msra.mxu1 %v1404_v26  ;;  %v1475_v26 = vld [vmem:[%s2072_s1 + $0x124] ss:$8 sps:$4 sm:$0xff]   ;;  %v1509_v54 = vld [vmem:[%s2072_s1 + $0x180] ss:$8 sps:$4 sm:$0xff]   ;;  %v1530_v3 = vld [vmem:[%s2072_s1 + $0x3b0] ss:$8 sps:$4 sm:$0xff]  }
  0x1c   :  { %1062 = vmatpush1.bf16.msra.mxu0 %v1405_v27  ;;  %981 = vmatprep.subr.bf16.mxu1 %v1406_v28  ;;  %v1478_v27 = vld [vmem:[%s2072_s1 + $0x324] ss:$8 sps:$4 sm:$0xff]   ;;  %v1473_v28 = vld [vmem:[%s2072_s1 + $0x120] ss:$8 sps:$4 sm:$0xff]  }
  0x1d   :  { %1063 = vmatprep.subr.bf16.mxu0 %v1408_v29  ;;  %v1476_v29 = vld [vmem:[%s2072_s1 + $0x320] ss:$8 sps:$4 sm:$0xff]   ;;  %v1511_v52 = vld [vmem:[%s2072_s1 + $0x184] ss:$8 sps:$4 sm:$0xff]  }
  0x1e   :  { %v1512_v55 = vld [vmem:[%s2072_s1 + $0x380] ss:$8 sps:$4 sm:$0xff]   ;;  %v1523_v60 = vld [vmem:[%s2072_s1 + $0x1a4] ss:$8 sps:$4 sm:$0xff]  }
  0x1f   :  { %982 = vmatpush1.bf16.msra.mxu1 %v1410_v30  ;;  %v1481_v30 = vld [vmem:[%s2072_s1 + $0x134] ss:$8 sps:$4 sm:$0xff]   ;;  %v1521_v62 = vld [vmem:[%s2072_s1 + $0x1a0] ss:$8 sps:$4 sm:$0xff]  }
  0x20   :  { %1064 = vmatpush1.bf16.msra.mxu0 %v1411_v31  ;;  %983 = vmatprep.subr.bf16.mxu1 %v1412_v32  ;;  %v1484_v31 = vld [vmem:[%s2072_s1 + $0x334] ss:$8 sps:$4 sm:$0xff]   ;;  %v1479_v32 = vld [vmem:[%s2072_s1 + $0x130] ss:$8 sps:$4 sm:$0xff]   ;;  %v1524_v63 = vld [vmem:[%s2072_s1 + $0x3a0] ss:$8 sps:$4 sm:$0xff]  }
  0x21   :  { %1065 = vmatprep.subr.bf16.mxu0 %v1414_v33  ;;  %v1482_v33 = vld [vmem:[%s2072_s1 + $0x330] ss:$8 sps:$4 sm:$0xff]  }
  0x23   :  { %984 = vmatpush1.bf16.msra.mxu1 %v1416_v34  ;;  %v1487_v34 = vld [vmem:[%s2072_s1 + $0x144] ss:$8 sps:$4 sm:$0xff]  }
  0x24   :  { %1066 = vmatpush1.bf16.msra.mxu0 %v1417_v35  ;;  %985 = vmatprep.subr.bf16.mxu1 %v1418_v39  ;;  %v1490_v35 = vld [vmem:[%s2072_s1 + $0x344] ss:$8 sps:$4 sm:$0xff]   ;;  %v1496_v39 = vld [vmem:[%s2072_s1 + $0x354] ss:$8 sps:$4 sm:$0xff]  }
  0x25   :  { %1067 = vmatprep.subr.bf16.mxu0 %v1420_v40  ;;  %v1491_v40 = vld [vmem:[%s2072_s1 + $0x150] ss:$8 sps:$4 sm:$0xff]  }
  0x27   :  { %986 = vmatpush1.bf16.msra.mxu1 %v1422_v41  ;;  %v1494_v41 = vld [vmem:[%s2072_s1 + $0x350] ss:$8 sps:$4 sm:$0xff]  }
  0x28   :  { %1068 = vmatpush1.bf16.msra.mxu0 %v1423_v44  ;;  %987 = vmatprep.subr.bf16.mxu1 %v1424_v45  ;;  %v1502_v44 = vld [vmem:[%s2072_s1 + $0x364] ss:$8 sps:$4 sm:$0xff]   ;;  %v1497_v45 = vld [vmem:[%s2072_s1 + $0x160] ss:$8 sps:$4 sm:$0xff]  }
  0x29   :  { %1069 = vmatprep.subr.bf16.mxu0 %v1426_v46  ;;  %v1500_v46 = vld [vmem:[%s2072_s1 + $0x360] ss:$8 sps:$4 sm:$0xff]  }
  0x2b   :  { %988 = vmatpush1.bf16.msra.mxu1 %v1428_v47  ;;  %v1505_v47 = vld [vmem:[%s2072_s1 + $0x174] ss:$8 sps:$4 sm:$0xff]  }
  0x2c   :  { %1070 = vmatpush1.bf16.msra.mxu0 %v1429_v48  ;;  %989 = vmatprep.subr.bf16.mxu1 %v1430_v50  ;;  %v1508_v48 = vld [vmem:[%s2072_s1 + $0x374] ss:$8 sps:$4 sm:$0xff]   ;;  %v1503_v50 = vld [vmem:[%s2072_s1 + $0x170] ss:$8 sps:$4 sm:$0xff]  }
  0x2d   :  { %1071 = vmatprep.subr.bf16.mxu0 %v1432_v51  ;;  %v1506_v51 = vld [vmem:[%s2072_s1 + $0x370] ss:$8 sps:$4 sm:$0xff]  }
  0x2f   :  { %990 = vmatpush1.bf16.msra.mxu1 %v1434_v53  ;;  %v1514_v53 = vld [vmem:[%s2072_s1 + $0x384] ss:$8 sps:$4 sm:$0xff]  }
  0x30   :  { %1072 = vmatpush1.bf16.msra.mxu0 %v1435_v56  ;;  %991 = vmatprep.subr.bf16.mxu1 %v1436_v57  ;;  %v1517_v56 = vld [vmem:[%s2072_s1 + $0x194] ss:$8 sps:$4 sm:$0xff]  }
  0x31   :  { %1073 = vmatprep.subr.bf16.mxu0 %v1438_v58  ;;  %v1520_v57 = vld [vmem:[%s2072_s1 + $0x394] ss:$8 sps:$4 sm:$0xff]   ;;  %v1515_v58 = vld [vmem:[%s2072_s1 + $0x190] ss:$8 sps:$4 sm:$0xff]  }
  0x33   :  { %992 = vmatpush1.bf16.msra.mxu1 %v1440_v61  ;;  %v1526_v61 = vld [vmem:[%s2072_s1 + $0x3a4] ss:$8 sps:$4 sm:$0xff]  }
  0x34   :  { %1074 = vmatpush1.bf16.msra.mxu0 %v1441_v0  ;;  %993 = vmatprep.subr.bf16.mxu1 %v1442_v1  ;;  %v1529_v0 = vld [vmem:[%s2072_s1 + $0x1b4] ss:$8 sps:$4 sm:$0xff]  }
  0x35   :  { %1075 = vmatprep.subr.bf16.mxu0 %v1444_v2  ;;  %v1532_v1 = vld [vmem:[%s2072_s1 + $0x3b4] ss:$8 sps:$4 sm:$0xff]   ;;  %v1527_v2 = vld [vmem:[%s2072_s1 + $0x1b0] ss:$8 sps:$4 sm:$0xff]  }
  0x37   :  { %994 = vmatpush1.bf16.msra.mxu1 %v1446_v4  ;;  %v1535_v4 = vld [vmem:[%s2072_s1 + $0x1c4] ss:$8 sps:$4 sm:$0xff]  }
  0x38   :  { %1076 = vmatpush1.bf16.msra.mxu0 %v1447_v5  ;;  %995 = vmatprep.subr.bf16.mxu1 %v1448_v6  ;;  %v1538_v5 = vld [vmem:[%s2072_s1 + $0x3c4] ss:$8 sps:$4 sm:$0xff]   ;;  %v1533_v6 = vld [vmem:[%s2072_s1 + $0x1c0] ss:$8 sps:$4 sm:$0xff]  }
  0x39   :  { %1077 = vmatprep.subr.bf16.mxu0 %v1450_v7  ;;  %v1536_v7 = vld [vmem:[%s2072_s1 + $0x3c0] ss:$8 sps:$4 sm:$0xff]  }
  0x3b   :  { %996 = vmatpush1.bf16.msra.mxu1 %v1452_v8  ;;  %v1541_v8 = vld [vmem:[%s2072_s1 + $0x1d4] ss:$8 sps:$4 sm:$0xff]  }
  0x3c   :  { %1078 = vmatpush1.bf16.msra.mxu0 %v1453_v9  ;;  %997 = vmatprep.subr.bf16.mxu1 %v1454_v10  ;;  %v1544_v9 = vld [vmem:[%s2072_s1 + $0x3d4] ss:$8 sps:$4 sm:$0xff]   ;;  %v1539_v10 = vld [vmem:[%s2072_s1 + $0x1d0] ss:$8 sps:$4 sm:$0xff]  }
  0x3d   :  { %1079 = vmatprep.subr.bf16.mxu0 %v1456_v11  ;;  %v1542_v11 = vld [vmem:[%s2072_s1 + $0x3d0] ss:$8 sps:$4 sm:$0xff]  }
  0x3f   :  { %998 = vmatpush1.bf16.msra.mxu1 %v1458_v12  ;;  %v1547_v12 = vld [vmem:[%s2072_s1 + $0x1e4] ss:$8 sps:$4 sm:$0xff]  }
  0x40   :  { %1080 = vmatpush1.bf16.msra.mxu0 %v1459_v13  ;;  %1008 = vmatprep.subr.bf16.mxu1 %v1462_v14  ;;  %v1550_v13 = vld [vmem:[%s2072_s1 + $0x3e4] ss:$8 sps:$4 sm:$0xff]   ;;  %v1545_v14 = vld [vmem:[%s2072_s1 + $0x1e0] ss:$8 sps:$4 sm:$0xff]  }
  0x41   :  { %1090 = vmatprep.subr.bf16.mxu0 %v1466_v15  ;;  %v1548_v15 = vld [vmem:[%s2072_s1 + $0x3e0] ss:$8 sps:$4 sm:$0xff]  }
  0x42   :  { %1000 = vmatmul.mubr.bf16.vlgmr.msra.gmra.mrb[0].mxu1 %v1817_v17 }
  0x43   :  { %1082 = vmatmul.mubr.bf16.vlgmr.msra.gmra.mrb[0].mxu0 %v1820_v18  ;;  %1009 = vmatpush1.bf16.msra.mxu1 %v1460_v16  ;;  %v1553_v16 = vld [vmem:[%s2072_s1 + $0x1f4] ss:$8 sps:$4 sm:$0xff]  }
  0x44   :  { %1091 = vmatpush1.bf16.msra.mxu0 %v1464_v19  ;;  %1010 = vmatprep.subr.bf16.mxu1 %v1469_v20  ;;  %v1556_v19 = vld [vmem:[%s2072_s1 + $0x3f4] ss:$8 sps:$4 sm:$0xff]   ;;  %v1551_v20 = vld [vmem:[%s2072_s1 + $0x1f0] ss:$8 sps:$4 sm:$0xff]  }
  0x45   :  { %1092 = vmatprep.subr.bf16.mxu0 %v1472_v21  ;;  %1040 = vmatprep.mubr.bf16.mxu1 %v222_v22  ;;  %v1554_v21 = vld [vmem:[%s2072_s1 + $0x3f0] ss:$8 sps:$4 sm:$0xff]   ;;  %v1559_v22 = vld [vmem:[%s2072_s1 + $0x404] ss:$8 sps:$4 sm:$0xff]  }
  0x46   :  { %1122 = vmatprep.mubr.bf16.mxu0 %v223_v23  ;;  %v220_v23 = vcombine.high %v1817_v17, %v1817_v17  ;;  %v1560_v17 = vld [vmem:[%s2072_s1 + $0x410] ss:$8 sps:$4 sm:$0xff]  }
  0x47   :  { %1011 = vmatpush1.bf16.msra.mxu1 %v1467_v24  ;;  %v221_v24 = vcombine.high %v1820_v18, %v1820_v18  ;;  %v1565_v18 = vld [vmem:[%s2072_s1 + $0x424] ss:$8 sps:$4 sm:$0xff]  }
  0x48   :  { %1093 = vmatpush1.bf16.msra.mxu0 %v1470_v25  ;;  %1012 = vmatprep.subr.bf16.mxu1 %v1475_v26  ;;  %v1557_v25 = vld [vmem:[%s2072_s1 + $0x400] ss:$8 sps:$4 sm:$0xff]   ;;  %v1562_v26 = vld [vmem:[%s2072_s1 + $0x414] ss:$8 sps:$4 sm:$0xff]  }
  0x49   :  { %1094 = vmatprep.subr.bf16.mxu0 %v1478_v27  ;;  %v1582_v27 = vmov 0  }
  0x4b   :  { %1013 = vmatpush1.bf16.msra.mxu1 %v1473_v28  ;;  %v1563_v28 = vld [vmem:[%s2072_s1 + $0x420] ss:$8 sps:$4 sm:$0xff]  }
  0x4c   :  { %1095 = vmatpush1.bf16.msra.mxu0 %v1476_v29  ;;  %1014 = vmatprep.subr.bf16.mxu1 %v1481_v30  ;;  %v1568_v29 = vld [vmem:[%s2072_s1 + $0x434] ss:$8 sps:$4 sm:$0xff]   ;;  %v1566_v30 = vld [vmem:[%s2072_s1 + $0x430] ss:$8 sps:$4 sm:$0xff]  }
  0x4d   :  { %1096 = vmatprep.subr.bf16.mxu0 %v1484_v31  ;;  %v1571_v31 = vld [vmem:[%s2072_s1 + $0x444] ss:$8 sps:$4 sm:$0xff]  }
  0x4f   :  { %1015 = vmatpush1.bf16.msra.mxu1 %v1479_v32  ;;  %v1569_v32 = vld [vmem:[%s2072_s1 + $0x440] ss:$8 sps:$4 sm:$0xff]  }
  0x50   :  { %1097 = vmatpush1.bf16.msra.mxu0 %v1482_v33  ;;  %1016 = vmatprep.subr.bf16.mxu1 %v1487_v34  ;;  %v1574_v33 = vld [vmem:[%s2072_s1 + $0x454] ss:$8 sps:$4 sm:$0xff]   ;;  %v1572_v34 = vld [vmem:[%s2072_s1 + $0x450] ss:$8 sps:$4 sm:$0xff]  }
  0x51   :  { %1098 = vmatprep.subr.bf16.mxu0 %v1490_v35  ;;  %v1577_v35 = vld [vmem:[%s2072_s1 + $0x464] ss:$8 sps:$4 sm:$0xff]  }
  0x53   :  { %1017 = vmatpush1.bf16.msra.mxu1 %v1485_v36  ;;  %v1575_v36 = vld [vmem:[%s2072_s1 + $0x460] ss:$8 sps:$4 sm:$0xff]  }
  0x54   :  { %1099 = vmatpush1.bf16.msra.mxu0 %v1488_v37  ;;  %1018 = vmatprep.subr.bf16.mxu1 %v1493_v38  ;;  %v1580_v37 = vld [vmem:[%s2072_s1 + $0x474] ss:$8 sps:$4 sm:$0xff]   ;;  %v1578_v38 = vld [vmem:[%s2072_s1 + $0x470] ss:$8 sps:$4 sm:$0xff]  }
  0x55   :  { %1100 = vmatprep.subr.bf16.mxu0 %v1496_v39  ;;  %v1199_v39 = vld.sshfl [vmem:[%s2073_s0 + $0x8] sm:$0x1 pattern:$0x75316420] }
  0x57   :  { %1019 = vmatpush1.bf16.msra.mxu1 %v1491_v40  ;;  %v237_v40 = vrot.slane %v1199_v39, %v1738_v49 }
  0x58   :  { %1101 = vmatpush1.bf16.msra.mxu0 %v1494_v41  ;;  %1020 = vmatprep.subr.bf16.mxu1 %v1499_v43 }
  0x59   :  { %1102 = vmatprep.subr.bf16.mxu0 %v1502_v44 }
  0x5b   :  { %1021 = vmatpush1.bf16.msra.mxu1 %v1497_v45 }
  0x5c   :  { %1103 = vmatpush1.bf16.msra.mxu0 %v1500_v46  ;;  %1022 = vmatprep.subr.bf16.mxu1 %v1505_v47  ;;  %v165_v46 = vsub.s32 0, %v1720_v42  ;;  %v161_v47 = vld [vmem:[%s2074_s2] sm:$0x3] }
  0x5d   :  { %1104 = vmatprep.subr.bf16.mxu0 %v1508_v48  ;;  %v169_v48 = vsub.s32 1, %v1720_v42 }
  0x5f   :  { %1023 = vmatpush1.bf16.msra.mxu1 %v1503_v50  ;;  %v166_v50 = vrot.slane %v161_v47, %v165_v46 }
  0x60   :  { %1105 = vmatpush1.bf16.msra.mxu0 %v1506_v51  ;;  %1024 = vmatprep.subr.bf16.mxu1 %v1511_v52  ;;  %v170_v51 = vrot.slane %v161_v47, %v169_v48 }
  0x61   :  { %1106 = vmatprep.subr.bf16.mxu0 %v1514_v53 }
  0x63   :  { %1025 = vmatpush1.bf16.msra.mxu1 %v1509_v54 }
  0x64   :  { %1107 = vmatpush1.bf16.msra.mxu0 %v1512_v55  ;;  %1026 = vmatprep.subr.bf16.mxu1 %v1517_v56 }
  0x65   :  { %1108 = vmatprep.subr.bf16.mxu0 %v1520_v57 }
  0x67   :  { %1027 = vmatpush1.bf16.msra.mxu1 %v1515_v58 }
  0x68   :  { %1109 = vmatpush1.bf16.msra.mxu0 %v1518_v59  ;;  %1028 = vmatprep.subr.bf16.mxu1 %v1523_v60 }
  0x69   :  { %1110 = vmatprep.subr.bf16.mxu0 %v1526_v61 }
  0x6b   :  { %1029 = vmatpush1.bf16.msra.mxu1 %v1521_v62 }
  0x6c   :  { %1111 = vmatpush1.bf16.msra.mxu0 %v1524_v63  ;;  %1030 = vmatprep.subr.bf16.mxu1 %v1529_v0 }
  0x6d   :  { %1112 = vmatprep.subr.bf16.mxu0 %v1532_v1 }
  0x6f   :  { %1031 = vmatpush1.bf16.msra.mxu1 %v1527_v2 }
  0x70   :  { %1113 = vmatpush1.bf16.msra.mxu0 %v1530_v3  ;;  %1032 = vmatprep.subr.bf16.mxu1 %v1535_v4 }
  0x71   :  { %1114 = vmatprep.subr.bf16.mxu0 %v1538_v5 }
  0x73   :  { %1033 = vmatpush1.bf16.msra.mxu1 %v1533_v6 }
  0x74   :  { %1115 = vmatpush1.bf16.msra.mxu0 %v1536_v7  ;;  %1034 = vmatprep.subr.bf16.mxu1 %v1541_v8 }
  0x75   :  { %1116 = vmatprep.subr.bf16.mxu0 %v1544_v9 }
  0x77   :  { %1035 = vmatpush1.bf16.msra.mxu1 %v1539_v10 }
  0x78   :  { %1117 = vmatpush1.bf16.msra.mxu0 %v1542_v11  ;;  %1036 = vmatprep.subr.bf16.mxu1 %v1547_v12 }
  0x79   :  { %1118 = vmatprep.subr.bf16.mxu0 %v1550_v13 }
  0x7b   :  { %1037 = vmatpush1.bf16.msra.mxu1 %v1545_v14 }
  0x7c   :  { %1119 = vmatpush1.bf16.msra.mxu0 %v1548_v15  ;;  %1038 = vmatprep.subr.bf16.mxu1 %v1553_v16 }
  0x7d   :  { %1120 = vmatprep.subr.bf16.mxu0 %v1556_v19 }
  0x7f   :  { %1039 = vmatpush1.bf16.msra.mxu1 %v1551_v20 }
  0x80   :  { %1121 = vmatpush1.bf16.msra.mxu0 %v1554_v21 }
  0x81   :  { %1131 = vmatprep.subr.bf16.mxu0 %v1559_v22 }
  0x82   :  { %1041 = vmatmul.mubr.bf16.vlgmr.msra.gmra.mrb[0].mxu1 %v220_v23 }
  0x83   :  { %1123 = vmatmul.mubr.bf16.vlgmr.msra.gmra.mrb[0].mxu0 %v221_v24 }
  0x84   :  { %1132 = vmatpush1.bf16.msra.mxu0 %v1557_v25  ;;  %1163 = vmatprep.mubr.bf16.mxu0 %v1582_v27 }
  0x85   :  { %1133 = vmatprep.subr.bf16.mxu0 %v1562_v26 }
  0x88   :  { %1134 = vmatpush1.bf16.msra.mxu0 %v1560_v17 }
  0x89   :  { %1135 = vmatprep.subr.bf16.mxu0 %v1565_v18 }
  0x8c   :  { %1136 = vmatpush1.bf16.msra.mxu0 %v1563_v28 }
  0x8d   :  { %1137 = vmatprep.subr.bf16.mxu0 %v1568_v29 }
  0x90   :  { %1138 = vmatpush1.bf16.msra.mxu0 %v1566_v30 }
  0x91   :  { %1139 = vmatprep.subr.bf16.mxu0 %v1571_v31 }
  0x94   :  { %1140 = vmatpush1.bf16.msra.mxu0 %v1569_v32 }
  0x95   :  { %1141 = vmatprep.subr.bf16.mxu0 %v1574_v33 }
  0x98   :  { %1142 = vmatpush1.bf16.msra.mxu0 %v1572_v34 }
  0x99   :  { %1143 = vmatprep.subr.bf16.mxu0 %v1577_v35 }
  0x9c   :  { %1144 = vmatpush1.bf16.msra.mxu0 %v1575_v36 }
  0x9d   :  { %1145 = vmatprep.subr.bf16.mxu0 %v1580_v37 }
  0xa0   :  { %1146 = vmatpush1.bf16.msra.mxu0 %v1578_v38 }
  0xa3   :  { %1164 = vmatmul.mubr.bf16.vlgmr.msra.gmra.mrb[0].mxu0 %v237_v40 }
 0x155   :  { %v1042_v41 = vpop.f32.mrb[0].mxu1 }
 0x156   :  { %v1044_v43 = vpop.f32.mrb[1].mxu1  ;;  %v1346_v52 = vadd.f32 %v1042_v41, %v166_v50 }
 0x157   :  { %v1046_v44 = vpop.f32.mrb[2].mxu1  ;;  %v1348_v53 = vadd.f32 %v1044_v43, %v170_v51 }
 0x158   :  { %v1047_v45 = vpop.f32.mrb[3].mxu1 }
 0x176   :  { %v1165_v54 = vpop.f32.mrb[0].mxu0 }
 0x177   :  { %v1347_v55 = vadd.f32 %v1346_v52, %v1165_v54  ;;  %v1167_v56 = vpop.f32.mrb[1].mxu0 }
 0x178   :  { %v1349_v57 = vadd.f32 %v1348_v53, %v1167_v56  ;;  %v1169_v58 = vpop.f32.mrb[2].mxu0 }
 0x179   :  { %v1172_v59 = vmax.f32 %v1347_v55, 0.0  ;;  %v1170_v60 = vpop.f32.mrb[3].mxu0 }
 0x17a   :  { %v1173_v61 = vmax.f32 %v1349_v57, 0.0 }
 0x17c   :  { %v1344_v62 = vpack.c.bf16 %v1173_v61, %v1172_v59 }
 0x17e   :  { %v1185_v63 = vrot.slane %v1344_v62, %v1738_v49 }
 0x180   :  { %1345 = vst.sshfl [vmem:[%s2075_s3] sm:$0x5 pattern:$0x73625140] %v1185_v63 }

// kernel: xtma_cnn_forward.13
= control target key start
LH: loop header
LB: loop body
LE: loop exit
PB: predicated region body
PF: predicated region fallthrough
CT: control target
= control target key end

     0   :  { %vm57_vm0 = vcmask 1043456   ;;  %v2128_v3 = vmov 0   ;;  %vm53_vm1 = vcmask 64512   ;;  %s2822_s0 = inlined_call_operand.vmem [shape: bf16[2,256], index: 0, kind: input, shape index: {}]   ;;  %s2823_s1 = inlined_call_operand.vmem [shape: bf16[2,8], index: 1, kind: input, shape index: {}]   ;;  %s2824_s2 = inlined_call_operand.vmem [shape: bf16[8,256], index: 2, kind: input, shape index: {}]   ;;  %s2825_s3 = inlined_call_operand.vmem [shape: f32[1,256], index: 3, kind: input, shape index: {}]   ;;  %s2826_s4 = inlined_call_operand.vmem [shape: bf16[256,512], index: 4, kind: input, shape index: {}]   ;;  %s2827_s5 = inlined_call_operand.vmem [shape: bf16[256,512], index: 5, kind: input, shape index: {}]   ;;  %s2828_s6 = inlined_call_operand.vmem [shape: f32[1,512], index: 6, kind: input, shape index: {}]   ;;  %s2829_s7 = inlined_call_operand.vmem [shape: bf16[512,256], index: 7, kind: input, shape index: {}]   ;;  %s2830_s8 = inlined_call_operand.vmem [shape: f32[1,256], index: 8, kind: input, shape index: {}]   ;;  %s2831_s9 = inlined_call_operand.hbm [shape: f32[2,256], index: 9, kind: output, shape index: {}]  }
   0x1   :  { %v35_v0 = vld [vmem:[%s2824_s2] sm:$0xff]  ;;  %96 = vmatprep.mubr.bf16.mxu0 %v2128_v3 }
   0x2   :  { %v1608_v1 = vcombine.high %v35_v0, %v35_v0  ;;  %v1607_v2 = vcombine.low %v35_v0, %v35_v0  ;;  %v34_v4 = vld [vmem:[%s2823_s1] sm:$0x1]  ;;  %v1818_v5 = vld [vmem:[%s2827_s5 + $0x4] ss:$16 sps:$4 sm:$0xff]  }
   0x3   :  { %v1819_v7 = vld [vmem:[%s2826_s4 + $0x4] ss:$16 sps:$4 sm:$0xff]   ;;  %v1821_v8 = vld [vmem:[%s2826_s4] ss:$16 sps:$4 sm:$0xff]  }
   0x4   :  { %1609 = vmatprep.subr.msk.bf16.mxu0 %vm57_vm0, %v1608_v1  ;;  %v59_v6 = vsel %vm57_vm0, %v1607_v2, 0  ;;  %v1816_v9 = vld [vmem:[%s2827_s5] ss:$16 sps:$4 sm:$0xff]   ;;  %v1824_v10 = vld [vmem:[%s2827_s5 + $0x24] ss:$16 sps:$4 sm:$0xff]   ;;  %985 = vmatprep.subr.bf16.mxu1 %v1819_v7 }
   0x5   :  { %65 = vmatpush1.bf16.msra.mxu0 %v59_v6  ;;  %v1825_v11 = vld [vmem:[%s2826_s4 + $0x24] ss:$16 sps:$4 sm:$0xff]   ;;  %986 = vmatpush1.bf16.msra.mxu1 %v1821_v8  ;;  %v1827_v12 = vld [vmem:[%s2826_s4 + $0x20] ss:$16 sps:$4 sm:$0xff]  }
   0x6   :  { %558 = vmatprep.subr.bf16.mxu0 %v1818_v5  ;;  %987 = vmatprep.subr.bf16.mxu1 %v1825_v11  ;;  %v1822_v13 = vld [vmem:[%s2827_s5 + $0x20] ss:$16 sps:$4 sm:$0xff]   ;;  %v1831_v14 = vld [vmem:[%s2826_s4 + $0x44] ss:$16 sps:$4 sm:$0xff]  }
   0x7   :  { %v1830_v15 = vld [vmem:[%s2827_s5 + $0x44] ss:$16 sps:$4 sm:$0xff]   ;;  %v1833_v16 = vld [vmem:[%s2826_s4 + $0x40] ss:$16 sps:$4 sm:$0xff]  }
   0x8   :  { %1610 = vmatmul.mubr.msk.bf16.vlgmr.msra.gmra.mrb[0].mxu0 %vm53_vm1, %v34_v4  ;;  %v1837_v17 = vld [vmem:[%s2826_s4 + $0x64] ss:$16 sps:$4 sm:$0xff]   ;;  %v1828_v18 = vld [vmem:[%s2827_s5 + $0x40] ss:$16 sps:$4 sm:$0xff]  }
   0x9   :  { %559 = vmatpush1.bf16.msra.mxu0 %v1816_v9  ;;  %988 = vmatpush1.bf16.msra.mxu1 %v1827_v12  ;;  %v1836_v19 = vld [vmem:[%s2827_s5 + $0x64] ss:$16 sps:$4 sm:$0xff]   ;;  %v1839_v20 = vld [vmem:[%s2826_s4 + $0x60] ss:$16 sps:$4 sm:$0xff]  }
   0xa   :  { %560 = vmatprep.subr.bf16.mxu0 %v1824_v10  ;;  %989 = vmatprep.subr.bf16.mxu1 %v1831_v14  ;;  %v1843_v21 = vld [vmem:[%s2826_s4 + $0x84] ss:$16 sps:$4 sm:$0xff]   ;;  %v1834_v22 = vld [vmem:[%s2827_s5 + $0x60] ss:$16 sps:$4 sm:$0xff]  }
   0xb   :  { %v1842_v23 = vld [vmem:[%s2827_s5 + $0x84] ss:$16 sps:$4 sm:$0xff]   ;;  %v1845_v24 = vld [vmem:[%s2826_s4 + $0x80] ss:$16 sps:$4 sm:$0xff]  }
   0xc   :  { %v1849_v25 = vld [vmem:[%s2826_s4 + $0xa4] ss:$16 sps:$4 sm:$0xff]   ;;  %v1840_v26 = vld [vmem:[%s2827_s5 + $0x80] ss:$16 sps:$4 sm:$0xff]  }
   0xd   :  { %561 = vmatpush1.bf16.msra.mxu0 %v1822_v13  ;;  %990 = vmatpush1.bf16.msra.mxu1 %v1833_v16  ;;  %v1848_v27 = vld [vmem:[%s2827_s5 + $0xa4] ss:$16 sps:$4 sm:$0xff]   ;;  %v1851_v28 = vld [vmem:[%s2826_s4 + $0xa0] ss:$16 sps:$4 sm:$0xff]  }
   0xe   :  { %562 = vmatprep.subr.bf16.mxu0 %v1830_v15  ;;  %991 = vmatprep.subr.bf16.mxu1 %v1837_v17  ;;  %v1855_v29 = vld [vmem:[%s2826_s4 + $0xc4] ss:$16 sps:$4 sm:$0xff]   ;;  %v1846_v30 = vld [vmem:[%s2827_s5 + $0xa0] ss:$16 sps:$4 sm:$0xff]  }
   0xf   :  { %v1854_v31 = vld [vmem:[%s2827_s5 + $0xc4] ss:$16 sps:$4 sm:$0xff]   ;;  %v1857_v32 = vld [vmem:[%s2826_s4 + $0xc0] ss:$16 sps:$4 sm:$0xff]  }
  0x10   :  { %v1861_v33 = vld [vmem:[%s2826_s4 + $0xe4] ss:$16 sps:$4 sm:$0xff]   ;;  %v1852_v34 = vld [vmem:[%s2827_s5 + $0xc0] ss:$16 sps:$4 sm:$0xff]  }
  0x11   :  { %563 = vmatpush1.bf16.msra.mxu0 %v1828_v18  ;;  %992 = vmatpush1.bf16.msra.mxu1 %v1839_v20  ;;  %v1860_v35 = vld [vmem:[%s2827_s5 + $0xe4] ss:$16 sps:$4 sm:$0xff]   ;;  %v1863_v36 = vld [vmem:[%s2826_s4 + $0xe0] ss:$16 sps:$4 sm:$0xff]  }
  0x12   :  { %564 = vmatprep.subr.bf16.mxu0 %v1836_v19  ;;  %993 = vmatprep.subr.bf16.mxu1 %v1843_v21  ;;  %v1867_v37 = vld [vmem:[%s2826_s4 + $0x104] ss:$16 sps:$4 sm:$0xff]   ;;  %v1858_v38 = vld [vmem:[%s2827_s5 + $0xe0] ss:$16 sps:$4 sm:$0xff]  }
  0x13   :  { %v1866_v39 = vld [vmem:[%s2827_s5 + $0x104] ss:$16 sps:$4 sm:$0xff]   ;;  %v1869_v40 = vld [vmem:[%s2826_s4 + $0x100] ss:$16 sps:$4 sm:$0xff]  }
  0x14   :  { %v1873_v41 = vld [vmem:[%s2826_s4 + $0x124] ss:$16 sps:$4 sm:$0xff]   ;;  %v1864_v42 = vld [vmem:[%s2827_s5 + $0x100] ss:$16 sps:$4 sm:$0xff]  }
  0x15   :  { %565 = vmatpush1.bf16.msra.mxu0 %v1834_v22  ;;  %994 = vmatpush1.bf16.msra.mxu1 %v1845_v24  ;;  %v1872_v43 = vld [vmem:[%s2827_s5 + $0x124] ss:$16 sps:$4 sm:$0xff]   ;;  %v1870_v44 = vld [vmem:[%s2827_s5 + $0x120] ss:$16 sps:$4 sm:$0xff]  }
  0x16   :  { %566 = vmatprep.subr.bf16.mxu0 %v1842_v23  ;;  %995 = vmatprep.subr.bf16.mxu1 %v1849_v25  ;;  %v1875_v45 = vld [vmem:[%s2826_s4 + $0x120] ss:$16 sps:$4 sm:$0xff]   ;;  %v1879_v46 = vld [vmem:[%s2826_s4 + $0x144] ss:$16 sps:$4 sm:$0xff]  }
  0x17   :  { %v1878_v47 = vld [vmem:[%s2827_s5 + $0x144] ss:$16 sps:$4 sm:$0xff]   ;;  %v1881_v48 = vld [vmem:[%s2826_s4 + $0x140] ss:$16 sps:$4 sm:$0xff]  }
  0x18   :  { %v1885_v49 = vld [vmem:[%s2826_s4 + $0x164] ss:$16 sps:$4 sm:$0xff]   ;;  %v1876_v50 = vld [vmem:[%s2827_s5 + $0x140] ss:$16 sps:$4 sm:$0xff]  }
  0x19   :  { %567 = vmatpush1.bf16.msra.mxu0 %v1840_v26  ;;  %996 = vmatpush1.bf16.msra.mxu1 %v1851_v28  ;;  %v1884_v51 = vld [vmem:[%s2827_s5 + $0x164] ss:$16 sps:$4 sm:$0xff]   ;;  %v1887_v52 = vld [vmem:[%s2826_s4 + $0x160] ss:$16 sps:$4 sm:$0xff]  }
  0x1a   :  { %568 = vmatprep.subr.bf16.mxu0 %v1848_v27  ;;  %997 = vmatprep.subr.bf16.mxu1 %v1855_v29  ;;  %v1891_v53 = vld [vmem:[%s2826_s4 + $0x184] ss:$16 sps:$4 sm:$0xff]   ;;  %v1882_v54 = vld [vmem:[%s2827_s5 + $0x160] ss:$16 sps:$4 sm:$0xff]  }
  0x1b   :  { %v1890_v55 = vld [vmem:[%s2827_s5 + $0x184] ss:$16 sps:$4 sm:$0xff]   ;;  %v1893_v56 = vld [vmem:[%s2826_s4 + $0x180] ss:$16 sps:$4 sm:$0xff]  }
  0x1c   :  { %v1897_v57 = vld [vmem:[%s2826_s4 + $0x1a4] ss:$16 sps:$4 sm:$0xff]   ;;  %v1888_v58 = vld [vmem:[%s2827_s5 + $0x180] ss:$16 sps:$4 sm:$0xff]  }
  0x1d   :  { %569 = vmatpush1.bf16.msra.mxu0 %v1846_v30  ;;  %998 = vmatpush1.bf16.msra.mxu1 %v1857_v32  ;;  %v1896_v59 = vld [vmem:[%s2827_s5 + $0x1a4] ss:$16 sps:$4 sm:$0xff]   ;;  %v1899_v60 = vld [vmem:[%s2826_s4 + $0x1a0] ss:$16 sps:$4 sm:$0xff]  }
  0x1e   :  { %570 = vmatprep.subr.bf16.mxu0 %v1854_v31  ;;  %999 = vmatprep.subr.bf16.mxu1 %v1861_v33  ;;  %v1894_v61 = vld [vmem:[%s2827_s5 + $0x1a0] ss:$16 sps:$4 sm:$0xff]  }
  0x21   :  { %571 = vmatpush1.bf16.msra.mxu0 %v1852_v34  ;;  %1000 = vmatpush1.bf16.msra.mxu1 %v1863_v36 }
  0x22   :  { %572 = vmatprep.subr.bf16.mxu0 %v1860_v35  ;;  %1001 = vmatprep.subr.bf16.mxu1 %v1867_v37 }
  0x25   :  { %573 = vmatpush1.bf16.msra.mxu0 %v1858_v38  ;;  %1002 = vmatpush1.bf16.msra.mxu1 %v1869_v40 }
  0x26   :  { %574 = vmatprep.subr.bf16.mxu0 %v1866_v39  ;;  %1003 = vmatprep.subr.bf16.mxu1 %v1873_v41 }
  0x29   :  { %575 = vmatpush1.bf16.msra.mxu0 %v1864_v42  ;;  %1004 = vmatpush1.bf16.msra.mxu1 %v1875_v45 }
  0x2a   :  { %576 = vmatprep.subr.bf16.mxu0 %v1872_v43  ;;  %1005 = vmatprep.subr.bf16.mxu1 %v1879_v46 }
  0x2d   :  { %577 = vmatpush1.bf16.msra.mxu0 %v1870_v44  ;;  %1006 = vmatpush1.bf16.msra.mxu1 %v1881_v48 }
  0x2e   :  { %578 = vmatprep.subr.bf16.mxu0 %v1878_v47  ;;  %1007 = vmatprep.subr.bf16.mxu1 %v1885_v49 }
  0x31   :  { %579 = vmatpush1.bf16.msra.mxu0 %v1876_v50  ;;  %1008 = vmatpush1.bf16.msra.mxu1 %v1887_v52 }
  0x32   :  { %580 = vmatprep.subr.bf16.mxu0 %v1884_v51  ;;  %1009 = vmatprep.subr.bf16.mxu1 %v1891_v53 }
  0x35   :  { %581 = vmatpush1.bf16.msra.mxu0 %v1882_v54  ;;  %1010 = vmatpush1.bf16.msra.mxu1 %v1893_v56 }
  0x36   :  { %582 = vmatprep.subr.bf16.mxu0 %v1890_v55  ;;  %1011 = vmatprep.subr.bf16.mxu1 %v1897_v57 }
  0x39   :  { %583 = vmatpush1.bf16.msra.mxu0 %v1888_v58  ;;  %1012 = vmatpush1.bf16.msra.mxu1 %v1899_v60 }
  0x3a   :  { %584 = vmatprep.subr.bf16.mxu0 %v1896_v59 }
  0x3d   :  { %585 = vmatpush1.bf16.msra.mxu0 %v1894_v61 }
  0x3e   :  { %14 = vsyncpa [#allocation3], 0  ;;  %v38_v62 = vlaneseq  ;;  %v1902_v63 = vld [vmem:[%s2827_s5 + $0x1c4] ss:$16 sps:$4 sm:$0xff]   ;;  %v1900_v0 = vld [vmem:[%s2827_s5 + $0x1c0] ss:$16 sps:$4 sm:$0xff]  }
  0x3f   :  { %v1903_v1 = vld [vmem:[%s2826_s4 + $0x1c4] ss:$16 sps:$4 sm:$0xff]   ;;  %586 = vmatprep.subr.bf16.mxu0 %v1902_v63  ;;  %v1905_v2 = vld [vmem:[%s2826_s4 + $0x1c0] ss:$16 sps:$4 sm:$0xff]   ;;  %v2129_v3 = vmov 1966171168  }
  0x40   :  { %v650_v4 = vunpack.c.l.s4 %v2129_v3  ;;  %1013 = vmatprep.subr.bf16.mxu1 %v1903_v1  ;;  %v2367_v5 = vshrl.u32 %v38_v62, 7  ;;  %v1908_v6 = vld [vmem:[%s2827_s5 + $0x1e4] ss:$16 sps:$4 sm:$0xff]   ;;  %v1906_v8 = vld [vmem:[%s2827_s5 + $0x1e0] ss:$16 sps:$4 sm:$0xff]   ;;  %s2130_s26 = smov [#allocation2]  }
  0x41   :  { %587 = vmatpush1.bf16.msra.mxu0 %v1900_v0  ;;  %1014 = vmatpush1.bf16.msra.mxu1 %v1905_v2  ;;  %v1909_v9 = vld [vmem:[%s2826_s4 + $0x1e4] ss:$16 sps:$4 sm:$0xff]   ;;  %v1911_v10 = vld [vmem:[%s2826_s4 + $0x1e0] ss:$16 sps:$4 sm:$0xff]   ;;  %v1914_v14 = vld [vmem:[%s2827_s5 + $0xc] ss:$16 sps:$4 sm:$0xff]  }
  0x42   :  { %v651_v7 = vunpack.c.0.s8 %v650_v4  ;;  %588 = vmatprep.subr.bf16.mxu0 %v1908_v6  ;;  %v1675_v11 = vld.sshfl [vmem:[%s2822_s0] sm:$0x11 pattern:$0x75316420]  ;;  %1015 = vmatprep.subr.bf16.mxu1 %v1909_v9  ;;  %v2395_v17 = vsub.s32 0, %v2367_v5  ;;  %v2401_v19 = vsub.s32 1, %v2367_v5 }
  0x43   :  { %v648_v13 = vcombine.high %v1675_v11, %v1675_v11  ;;  %v36_v18 = vld [vmem:[%s2825_s3] sm:$0x3]  ;;  %v1912_v31 = vld [vmem:[%s2827_s5 + $0x8] ss:$16 sps:$4 sm:$0xff]   ;;  %v1917_v33 = vld [vmem:[%s2827_s5 + $0x2c] ss:$16 sps:$4 sm:$0xff]  }
  0x44   :  { %v654_v12 = vsub.s32 %v651_v7, %v2367_v5  ;;  %v41_v20 = vrot.slane %v36_v18, %v2395_v17  ;;  %v45_v21 = vrot.slane %v36_v18, %v2401_v19  ;;  %v2008_v34 = vld [vmem:[%s2829_s7] ss:$8 sps:$4 sm:$0xff]   ;;  %v2010_v35 = vld [vmem:[%s2829_s7 + $0x4] ss:$8 sps:$4 sm:$0xff]   ;;  %v2013_v37 = vld [vmem:[%s2829_s7 + $0x14] ss:$8 sps:$4 sm:$0xff]  }
  0x45   :  { %589 = vmatpush1.bf16.msra.mxu0 %v1906_v8  ;;  %1016 = vmatpush1.bf16.msra.mxu1 %v1911_v10  ;;  %v1915_v36 = vld [vmem:[%s2827_s5 + $0x28] ss:$16 sps:$4 sm:$0xff]   ;;  %v1920_v38 = vld [vmem:[%s2827_s5 + $0x4c] ss:$16 sps:$4 sm:$0xff]   ;;  %s1599_s27 = sshll.u32 %s2130_s26, 4  ;;  %s1600_s27 = int_to_ptr.vmem [resolvable:$true] %s1599_s27 }
  0x46   :  { %v2388_v15 = vrot.slane %v648_v13, %v654_v12  ;;  %599 = vmatprep.subr.bf16.mxu0 %v1914_v14  ;;  %v2390_v16 = vrot.slane %v1675_v11, %v654_v12  ;;  %1497 = vmatprep.subr.bf16.mxu1 %v2010_v35  ;;  %v2011_v39 = vld [vmem:[%s2829_s7 + $0x10] ss:$8 sps:$4 sm:$0xff]   ;;  %v2016_v40 = vld [vmem:[%s2829_s7 + $0x24] ss:$8 sps:$4 sm:$0xff]   ;;  %v2014_v43 = vld [vmem:[%s2829_s7 + $0x20] ss:$8 sps:$4 sm:$0xff]   ;;  %p2109_p1 = scmp.lt.s32.totalorder %s1600_s27, %s1600_s27 }
  0x47   :  { %v1918_v41 = vld [vmem:[%s2827_s5 + $0x48] ss:$16 sps:$4 sm:$0xff]   ;;  %v1923_v42 = vld [vmem:[%s2827_s5 + $0x6c] ss:$16 sps:$4 sm:$0xff]   ;;  %s2104_s0 = scalar_lea.vmem %s1600_s27, 64 }
  0x48   :  { %1017 = vmatprep.mubr.bf16.mxu1 %v2388_v15  ;;  %v2019_v44 = vld [vmem:[%s2829_s7 + $0x34] ss:$8 sps:$4 sm:$0xff]   ;;  %v1921_v45 = vld [vmem:[%s2827_s5 + $0x68] ss:$16 sps:$4 sm:$0xff]   ;;  %v2022_v48 = vld [vmem:[%s2829_s7 + $0x44] ss:$8 sps:$4 sm:$0xff]   ;;  %p2105_p0 = scmp.ne.s32.totalorder %s1600_s27, %s2104_s0  ;;  %p2110_p2 = scmp.lt.s32.totalorder %s2104_s0, %s2104_s0 }
  0x49   :  { %1018 = vmatmul.mubr.bf16.vlgmr.msra.gmra.mrb[0].mxu1 %v2390_v16  ;;  %v1926_v46 = vld [vmem:[%s2827_s5 + $0x8c] ss:$16 sps:$4 sm:$0xff]   ;;  %v2017_v47 = vld [vmem:[%s2829_s7 + $0x30] ss:$8 sps:$4 sm:$0xff]   ;;  %v2020_v51 = vld [vmem:[%s2829_s7 + $0x40] ss:$8 sps:$4 sm:$0xff]  }
  0x4a   :  { %1498 = vmatpush1.bf16.msra.mxu1 %v2008_v34  ;;  %v1924_v49 = vld [vmem:[%s2827_s5 + $0x88] ss:$16 sps:$4 sm:$0xff]   ;;  %v1929_v50 = vld [vmem:[%s2827_s5 + $0xac] ss:$16 sps:$4 sm:$0xff]   ;;  %p2111_p3 = por %p2110_p2, %p2109_p1 }
  0x4b   :  { %1499 = vmatprep.subr.bf16.mxu1 %v2013_v37  ;;  %v2025_v52 = vld [vmem:[%s2829_s7 + $0x54] ss:$8 sps:$4 sm:$0xff]   ;;  %v1927_v53 = vld [vmem:[%s2827_s5 + $0xa8] ss:$16 sps:$4 sm:$0xff]   ;;  %v2028_v56 = vld [vmem:[%s2829_s7 + $0x64] ss:$8 sps:$4 sm:$0xff]  }
  0x4c   :  { %v1932_v54 = vld [vmem:[%s2827_s5 + $0xcc] ss:$16 sps:$4 sm:$0xff]   ;;  %v2023_v55 = vld [vmem:[%s2829_s7 + $0x50] ss:$8 sps:$4 sm:$0xff]   ;;  %v2026_v59 = vld [vmem:[%s2829_s7 + $0x60] ss:$8 sps:$4 sm:$0xff]   ;;  %p2112_p4 = pnand %p2111_p3, %p2105_p0 }
  0x4d   :  { %v1930_v57 = vld [vmem:[%s2827_s5 + $0xc8] ss:$16 sps:$4 sm:$0xff]   ;;  %v1935_v58 = vld [vmem:[%s2827_s5 + $0xec] ss:$16 sps:$4 sm:$0xff]  }
  0x4e   :  { %1500 = vmatpush1.bf16.msra.mxu1 %v2011_v39  ;;  %v2031_v60 = vld [vmem:[%s2829_s7 + $0x74] ss:$8 sps:$4 sm:$0xff]   ;;  %v1933_v61 = vld [vmem:[%s2827_s5 + $0xe8] ss:$16 sps:$4 sm:$0xff]   ;;  %v2034_v0 = vld [vmem:[%s2829_s7 + $0x84] ss:$8 sps:$4 sm:$0xff]  }
  0x4f   :  { %1501 = vmatprep.subr.bf16.mxu1 %v2016_v40  ;;  %v1938_v62 = vld [vmem:[%s2827_s5 + $0x10c] ss:$16 sps:$4 sm:$0xff]   ;;  %v2029_v63 = vld [vmem:[%s2829_s7 + $0x70] ss:$8 sps:$4 sm:$0xff]   ;;  %v2032_v3 = vld [vmem:[%s2829_s7 + $0x80] ss:$8 sps:$4 sm:$0xff]  }
  0x50   :  { %v1936_v1 = vld [vmem:[%s2827_s5 + $0x108] ss:$16 sps:$4 sm:$0xff]   ;;  %v1941_v2 = vld [vmem:[%s2827_s5 + $0x12c] ss:$16 sps:$4 sm:$0xff]  }
  0x51   :  { %v2037_v4 = vld [vmem:[%s2829_s7 + $0x94] ss:$8 sps:$4 sm:$0xff]   ;;  %v1939_v6 = vld [vmem:[%s2827_s5 + $0x128] ss:$16 sps:$4 sm:$0xff]   ;;  %v2040_v9 = vld [vmem:[%s2829_s7 + $0xa4] ss:$8 sps:$4 sm:$0xff]  }
  0x52   :  { %1502 = vmatpush1.bf16.msra.mxu1 %v2014_v43  ;;  %v1944_v7 = vld [vmem:[%s2827_s5 + $0x14c] ss:$16 sps:$4 sm:$0xff]   ;;  %v2035_v8 = vld [vmem:[%s2829_s7 + $0x90] ss:$8 sps:$4 sm:$0xff]   ;;  %v2038_v12 = vld [vmem:[%s2829_s7 + $0xa0] ss:$8 sps:$4 sm:$0xff]  }
  0x53   :  { %1503 = vmatprep.subr.bf16.mxu1 %v2019_v44  ;;  %v1942_v10 = vld [vmem:[%s2827_s5 + $0x148] ss:$16 sps:$4 sm:$0xff]   ;;  %v1947_v11 = vld [vmem:[%s2827_s5 + $0x16c] ss:$16 sps:$4 sm:$0xff]  }
  0x54   :  { %v2043_v13 = vld [vmem:[%s2829_s7 + $0xb4] ss:$8 sps:$4 sm:$0xff]   ;;  %v1945_v14 = vld [vmem:[%s2827_s5 + $0x168] ss:$16 sps:$4 sm:$0xff]  }
  0x55   :  { %v1950_v18 = vld [vmem:[%s2827_s5 + $0x18c] ss:$16 sps:$4 sm:$0xff]   ;;  %v1960_v34 = vld [vmem:[%s2826_s4 + $0x8] ss:$16 sps:$4 sm:$0xff]  }
  0x56   :  { %1504 = vmatpush1.bf16.msra.mxu1 %v2017_v47  ;;  %v1965_v35 = vld [vmem:[%s2826_s4 + $0x2c] ss:$16 sps:$4 sm:$0xff]   ;;  %v1972_v40 = vld [vmem:[%s2826_s4 + $0x88] ss:$16 sps:$4 sm:$0xff]  }
  0x57   :  { %1505 = vmatprep.subr.bf16.mxu1 %v2022_v48  ;;  %v1968_v37 = vld [vmem:[%s2826_s4 + $0x4c] ss:$16 sps:$4 sm:$0xff]  }
  0x58   :  { %v1974_v39 = vld [vmem:[%s2826_s4 + $0x8c] ss:$16 sps:$4 sm:$0xff]  }
  0x59   :  { %v1980_v43 = vld [vmem:[%s2826_s4 + $0xcc] ss:$16 sps:$4 sm:$0xff]  }
  0x5a   :  { %1506 = vmatpush1.bf16.msra.mxu1 %v2020_v51  ;;  %v2052_v47 = vld [vmem:[%s2829_s7 + $0xe4] ss:$8 sps:$4 sm:$0xff]  }
  0x5b   :  { %1507 = vmatprep.subr.bf16.mxu1 %v2025_v52  ;;  %v1983_v48 = vld [vmem:[%s2826_s4 + $0xec] ss:$16 sps:$4 sm:$0xff]   ;;  %v1981_v52 = vld [vmem:[%s2826_s4 + $0xe8] ss:$16 sps:$4 sm:$0xff]  }
  0x5e   :  { %1508 = vmatpush1.bf16.msra.mxu1 %v2023_v55  ;;  %v2053_v55 = vld [vmem:[%s2829_s7 + $0xf0] ss:$8 sps:$4 sm:$0xff]  }
  0x5f   :  { %1509 = vmatprep.subr.bf16.mxu1 %v2028_v56  ;;  %v1984_v56 = vld [vmem:[%s2826_s4 + $0x108] ss:$16 sps:$4 sm:$0xff]  }
  0x62   :  { %1510 = vmatpush1.bf16.msra.mxu1 %v2026_v59  ;;  %v1992_v59 = vld [vmem:[%s2826_s4 + $0x14c] ss:$16 sps:$4 sm:$0xff]  }
  0x63   :  { %1511 = vmatprep.subr.bf16.mxu1 %v2031_v60  ;;  %v1990_v60 = vld [vmem:[%s2826_s4 + $0x148] ss:$16 sps:$4 sm:$0xff]  }
  0x66   :  { %1512 = vmatpush1.bf16.msra.mxu1 %v2029_v63  ;;  %v1998_v63 = vld [vmem:[%s2826_s4 + $0x18c] ss:$16 sps:$4 sm:$0xff]  }
  0x67   :  { %1513 = vmatprep.subr.bf16.mxu1 %v2034_v0  ;;  %v1996_v0 = vld [vmem:[%s2826_s4 + $0x188] ss:$16 sps:$4 sm:$0xff]  }
  0x6a   :  { %1514 = vmatpush1.bf16.msra.mxu1 %v2032_v3  ;;  %v2004_v3 = vld [vmem:[%s2826_s4 + $0x1cc] ss:$16 sps:$4 sm:$0xff]  }
  0x6b   :  { %1515 = vmatprep.subr.bf16.mxu1 %v2037_v4  ;;  %v2002_v4 = vld [vmem:[%s2826_s4 + $0x1c8] ss:$16 sps:$4 sm:$0xff]  }
  0x6e   :  { %1516 = vmatpush1.bf16.msra.mxu1 %v2035_v8  ;;  %v2058_v8 = vld [vmem:[%s2829_s7 + $0x104] ss:$8 sps:$4 sm:$0xff]  }
  0x6f   :  { %1517 = vmatprep.subr.bf16.mxu1 %v2040_v9  ;;  %v2702_v9 = vld [vmem:[%s2828_s6] sm:$0xf] }
  0x72   :  { %1518 = vmatpush1.bf16.msra.mxu1 %v2038_v12  ;;  %v1076_v12 = vrot.slane %v2702_v9, %v2401_v19 }
  0x73   :  { %1519 = vmatprep.subr.bf16.mxu1 %v2043_v13 }
  0xdb   :  { %v98_v22 = vpop.f32.mrb[0].mxu0 }
  0xdc   :  { %v99_v23 = vadd.f32 %v98_v22, %v41_v20  ;;  %v100_v24 = vpop.f32.mrb[1].mxu0  ;;  %v2041_v20 = vld [vmem:[%s2829_s7 + $0xb0] ss:$8 sps:$4 sm:$0xff]  }
  0xdd   :  { %v101_v25 = vadd.f32 %v100_v24, %v45_v21  ;;  %v102_v26 = vpop.f32.mrb[2].mxu0  ;;  %v2046_v21 = vld [vmem:[%s2829_s7 + $0xc4] ss:$8 sps:$4 sm:$0xff]   ;;  %v1948_v22 = vld [vmem:[%s2827_s5 + $0x188] ss:$16 sps:$4 sm:$0xff]   ;;  %1520 = vmatpush1.bf16.msra.mxu1 %v2041_v20 }
  0xde   :  { %v105_v27 = vmax.f32 %v99_v23, 0.0  ;;  %v103_v28 = vpop.f32.mrb[3].mxu0  ;;  %v1953_v23 = vld [vmem:[%s2827_s5 + $0x1ac] ss:$16 sps:$4 sm:$0xff]   ;;  %v2044_v24 = vld [vmem:[%s2829_s7 + $0xc0] ss:$8 sps:$4 sm:$0xff]   ;;  %1521 = vmatprep.subr.bf16.mxu1 %v2046_v21 }
  0xdf   :  { %v106_v29 = vmax.f32 %v101_v25, 0.0  ;;  %v2049_v25 = vld [vmem:[%s2829_s7 + $0xd4] ss:$8 sps:$4 sm:$0xff]   ;;  %v1951_v26 = vld [vmem:[%s2827_s5 + $0x1a8] ss:$16 sps:$4 sm:$0xff]  }
  0xe0   :  { %v2408_v32 = vpack.c.bf16 %v105_v27, %v105_v27  ;;  %v1956_v27 = vld [vmem:[%s2827_s5 + $0x1cc] ss:$16 sps:$4 sm:$0xff]   ;;  %v2047_v28 = vld [vmem:[%s2829_s7 + $0xd0] ss:$8 sps:$4 sm:$0xff]  }
  0xe1   :  { %v173_v30 = vpack.c.bf16 %v106_v29, %v106_v29  ;;  %1522 = vmatpush1.bf16.msra.mxu1 %v2044_v24  ;;  %v1954_v29 = vld [vmem:[%s2827_s5 + $0x1c8] ss:$16 sps:$4 sm:$0xff]  }
  0xe2   :  { %1523 = vmatprep.subr.bf16.mxu1 %v2049_v25 }
  0xe3   :  { %590 = vmatprep.mubr.bf16.mxu0 %v173_v30 }
  0xe4   :  { %591 = vmatmul.mubr.bf16.vlgmr.msra.gmra.mrb[4].mxu0 %v2408_v32 }
  0xe5   :  { %600 = vmatpush1.bf16.msra.mxu0 %v1912_v31  ;;  %631 = vmatprep.mubr.bf16.mxu0 %v173_v30  ;;  %v1959_v30 = vld [vmem:[%s2827_s5 + $0x1ec] ss:$16 sps:$4 sm:$0xff]   ;;  %v1957_v31 = vld [vmem:[%s2827_s5 + $0x1e8] ss:$16 sps:$4 sm:$0xff]  }
  0xe6   :  { %601 = vmatprep.subr.bf16.mxu0 %v1917_v33  ;;  %1524 = vmatpush1.bf16.msra.mxu1 %v2047_v28  ;;  %v1962_v33 = vld [vmem:[%s2826_s4 + $0xc] ss:$16 sps:$4 sm:$0xff]  }
  0xe7   :  { %1525 = vmatprep.subr.bf16.mxu1 %v2052_v47  ;;  %v2061_v28 = vld [vmem:[%s2829_s7 + $0x114] ss:$8 sps:$4 sm:$0xff]  }
  0xe8   :  { %v2091_v47 = vld [vmem:[%s2829_s7 + $0x1b4] ss:$8 sps:$4 sm:$0xff]  }
  0xe9   :  { %602 = vmatpush1.bf16.msra.mxu0 %v1915_v36  ;;  %v1963_v36 = vld [vmem:[%s2826_s4 + $0x28] ss:$16 sps:$4 sm:$0xff]  }
  0xea   :  { %603 = vmatprep.subr.bf16.mxu0 %v1920_v38  ;;  %v1966_v38 = vld [vmem:[%s2826_s4 + $0x48] ss:$16 sps:$4 sm:$0xff]  }
  0xed   :  { %604 = vmatpush1.bf16.msra.mxu0 %v1918_v41  ;;  %v1977_v41 = vld [vmem:[%s2826_s4 + $0xac] ss:$16 sps:$4 sm:$0xff]  }
  0xee   :  { %605 = vmatprep.subr.bf16.mxu0 %v1923_v42  ;;  %v1975_v42 = vld [vmem:[%s2826_s4 + $0xa8] ss:$16 sps:$4 sm:$0xff]  }
  0xf1   :  { %606 = vmatpush1.bf16.msra.mxu0 %v1921_v45  ;;  %v1978_v45 = vld [vmem:[%s2826_s4 + $0xc8] ss:$16 sps:$4 sm:$0xff]  }
  0xf2   :  { %607 = vmatprep.subr.bf16.mxu0 %v1926_v46 }
  0xf5   :  { %608 = vmatpush1.bf16.msra.mxu0 %v1924_v49  ;;  %v2050_v49 = vld [vmem:[%s2829_s7 + $0xe0] ss:$8 sps:$4 sm:$0xff]  }
  0xf6   :  { %609 = vmatprep.subr.bf16.mxu0 %v1929_v50  ;;  %1526 = vmatpush1.bf16.msra.mxu1 %v2050_v49  ;;  %v2094_v49 = vld [vmem:[%s2829_s7 + $0x1c4] ss:$8 sps:$4 sm:$0xff]  }
  0xf9   :  { %610 = vmatpush1.bf16.msra.mxu0 %v1927_v53  ;;  %v2055_v53 = vld [vmem:[%s2829_s7 + $0xf4] ss:$8 sps:$4 sm:$0xff]  }
  0xfa   :  { %611 = vmatprep.subr.bf16.mxu0 %v1932_v54  ;;  %v1986_v54 = vld [vmem:[%s2826_s4 + $0x10c] ss:$16 sps:$4 sm:$0xff]   ;;  %1527 = vmatprep.subr.bf16.mxu1 %v2055_v53 }
  0xfb   :  { %1528 = vmatpush1.bf16.msra.mxu1 %v2053_v55  ;;  %v2100_v53 = vld [vmem:[%s2829_s7 + $0x1e4] ss:$8 sps:$4 sm:$0xff]   ;;  %v2098_v55 = vld [vmem:[%s2829_s7 + $0x1e0] ss:$8 sps:$4 sm:$0xff]  }
  0xfc   :  { %1538 = vmatprep.subr.bf16.mxu1 %v2058_v8 }
  0xfd   :  { %612 = vmatpush1.bf16.msra.mxu0 %v1930_v57  ;;  %v1989_v57 = vld [vmem:[%s2826_s4 + $0x12c] ss:$16 sps:$4 sm:$0xff]  }
  0xfe   :  { %613 = vmatprep.subr.bf16.mxu0 %v1935_v58  ;;  %v1987_v58 = vld [vmem:[%s2826_s4 + $0x128] ss:$16 sps:$4 sm:$0xff]  }
 0x101   :  { %614 = vmatpush1.bf16.msra.mxu0 %v1933_v61  ;;  %v1995_v61 = vld [vmem:[%s2826_s4 + $0x16c] ss:$16 sps:$4 sm:$0xff]  }
 0x102   :  { %615 = vmatprep.subr.bf16.mxu0 %v1938_v62  ;;  %v1993_v62 = vld [vmem:[%s2826_s4 + $0x168] ss:$16 sps:$4 sm:$0xff]  }
 0x105   :  { %616 = vmatpush1.bf16.msra.mxu0 %v1936_v1  ;;  %v2001_v1 = vld [vmem:[%s2826_s4 + $0x1ac] ss:$16 sps:$4 sm:$0xff]  }
 0x106   :  { %617 = vmatprep.subr.bf16.mxu0 %v1941_v2  ;;  %v1999_v2 = vld [vmem:[%s2826_s4 + $0x1a8] ss:$16 sps:$4 sm:$0xff]  }
 0x109   :  { %618 = vmatpush1.bf16.msra.mxu0 %v1939_v6  ;;  %v2007_v6 = vld [vmem:[%s2826_s4 + $0x1ec] ss:$16 sps:$4 sm:$0xff]  }
 0x10a   :  { %619 = vmatprep.subr.bf16.mxu0 %v1944_v7  ;;  %v2005_v7 = vld [vmem:[%s2826_s4 + $0x1e8] ss:$16 sps:$4 sm:$0xff]  }
 0x10d   :  { %620 = vmatpush1.bf16.msra.mxu0 %v1942_v10  ;;  %v1072_v10 = vrot.slane %v2702_v9, %v2395_v17 }
 0x10e   :  { %621 = vmatprep.subr.bf16.mxu0 %v1947_v11 }
 0x111   :  { %622 = vmatpush1.bf16.msra.mxu0 %v1945_v14 }
 0x112   :  { %623 = vmatprep.subr.bf16.mxu0 %v1950_v18 }
 0x115   :  { %624 = vmatpush1.bf16.msra.mxu0 %v1948_v22 }
 0x116   :  { %625 = vmatprep.subr.bf16.mxu0 %v1953_v23 }
 0x119   :  { %626 = vmatpush1.bf16.msra.mxu0 %v1951_v26  ;;  %v2056_v26 = vld [vmem:[%s2829_s7 + $0x100] ss:$8 sps:$4 sm:$0xff]  }
 0x11a   :  { %627 = vmatprep.subr.bf16.mxu0 %v1956_v27 }
 0x11c   :  { %v1019_v44 = vpop.f32.mrb[0].mxu1 }
 0x11d   :  { %628 = vmatpush1.bf16.msra.mxu0 %v1954_v29  ;;  %v1021_v46 = vpop.f32.mrb[1].mxu1  ;;  %v2059_v29 = vld [vmem:[%s2829_s7 + $0x110] ss:$8 sps:$4 sm:$0xff]  }
 0x11e   :  { %629 = vmatprep.subr.bf16.mxu0 %v1959_v30  ;;  %v1023_v50 = vpop.f32.mrb[2].mxu1  ;;  %v2064_v30 = vld [vmem:[%s2829_s7 + $0x124] ss:$8 sps:$4 sm:$0xff]  }
 0x11f   :  { %v1024_v51 = vpop.f32.mrb[3].mxu1  ;;  %v2092_v50 = vld [vmem:[%s2829_s7 + $0x1c0] ss:$8 sps:$4 sm:$0xff]  }
 0x120   :  { %v2097_v51 = vld [vmem:[%s2829_s7 + $0x1d4] ss:$8 sps:$4 sm:$0xff]  }
 0x121   :  { %630 = vmatpush1.bf16.msra.mxu0 %v1957_v31  ;;  %v2062_v31 = vld [vmem:[%s2829_s7 + $0x120] ss:$8 sps:$4 sm:$0xff]  }
 0x122   :  { %1026 = vmatprep.subr.bf16.mxu0 %v1962_v33  ;;  %v2067_v33 = vld [vmem:[%s2829_s7 + $0x134] ss:$8 sps:$4 sm:$0xff]  }
 0x124   :  { %632 = vmatmul.mubr.bf16.vlgmr.msra.gmra.mrb[8].mxu0 %v2408_v32  ;;  %v1971_v32 = vld [vmem:[%s2826_s4 + $0x6c] ss:$16 sps:$4 sm:$0xff]  }
 0x125   :  { %1027 = vmatpush1.bf16.msra.mxu0 %v1960_v34  ;;  %1058 = vmatprep.mubr.bf16.mxu0 %v2388_v15  ;;  %v1969_v15 = vld [vmem:[%s2826_s4 + $0x68] ss:$16 sps:$4 sm:$0xff]  }
 0x126   :  { %1028 = vmatprep.subr.bf16.mxu0 %v1965_v35  ;;  %v2065_v34 = vld [vmem:[%s2829_s7 + $0x130] ss:$8 sps:$4 sm:$0xff]   ;;  %v2070_v35 = vld [vmem:[%s2829_s7 + $0x144] ss:$8 sps:$4 sm:$0xff]  }
 0x129   :  { %1029 = vmatpush1.bf16.msra.mxu0 %v1963_v36  ;;  %v2068_v36 = vld [vmem:[%s2829_s7 + $0x140] ss:$8 sps:$4 sm:$0xff]  }
 0x12a   :  { %1030 = vmatprep.subr.bf16.mxu0 %v1968_v37  ;;  %v2073_v37 = vld [vmem:[%s2829_s7 + $0x154] ss:$8 sps:$4 sm:$0xff]  }
 0x12d   :  { %1031 = vmatpush1.bf16.msra.mxu0 %v1966_v38  ;;  %v2071_v38 = vld [vmem:[%s2829_s7 + $0x150] ss:$8 sps:$4 sm:$0xff]  }
 0x12e   :  { %1032 = vmatprep.subr.bf16.mxu0 %v1971_v32  ;;  %v2076_v32 = vld [vmem:[%s2829_s7 + $0x164] ss:$8 sps:$4 sm:$0xff]  }
 0x131   :  { %1033 = vmatpush1.bf16.msra.mxu0 %v1969_v15  ;;  %v2074_v15 = vld [vmem:[%s2829_s7 + $0x160] ss:$8 sps:$4 sm:$0xff]  }
 0x132   :  { %1034 = vmatprep.subr.bf16.mxu0 %v1974_v39  ;;  %v2079_v39 = vld [vmem:[%s2829_s7 + $0x174] ss:$8 sps:$4 sm:$0xff]  }
 0x135   :  { %1035 = vmatpush1.bf16.msra.mxu0 %v1972_v40  ;;  %v2077_v40 = vld [vmem:[%s2829_s7 + $0x170] ss:$8 sps:$4 sm:$0xff]  }
 0x136   :  { %1036 = vmatprep.subr.bf16.mxu0 %v1977_v41  ;;  %v2082_v41 = vld [vmem:[%s2829_s7 + $0x184] ss:$8 sps:$4 sm:$0xff]  }
 0x139   :  { %1037 = vmatpush1.bf16.msra.mxu0 %v1975_v42  ;;  %v2080_v42 = vld [vmem:[%s2829_s7 + $0x180] ss:$8 sps:$4 sm:$0xff]  }
 0x13a   :  { %1038 = vmatprep.subr.bf16.mxu0 %v1980_v43  ;;  %v2085_v43 = vld [vmem:[%s2829_s7 + $0x194] ss:$8 sps:$4 sm:$0xff]  }
 0x13d   :  { %1039 = vmatpush1.bf16.msra.mxu0 %v1978_v45  ;;  %v2088_v45 = vld [vmem:[%s2829_s7 + $0x1a4] ss:$8 sps:$4 sm:$0xff]  }
 0x13e   :  { %1040 = vmatprep.subr.bf16.mxu0 %v1983_v48  ;;  %v2089_v48 = vld [vmem:[%s2829_s7 + $0x1b0] ss:$8 sps:$4 sm:$0xff]  }
 0x141   :  { %1041 = vmatpush1.bf16.msra.mxu0 %v1981_v52  ;;  %v2095_v52 = vld [vmem:[%s2829_s7 + $0x1d0] ss:$8 sps:$4 sm:$0xff]  }
 0x142   :  { %1042 = vmatprep.subr.bf16.mxu0 %v1986_v54 }
 0x145   :  { %1043 = vmatpush1.bf16.msra.mxu0 %v1984_v56 }
 0x146   :  { %1044 = vmatprep.subr.bf16.mxu0 %v1989_v57  ;;  %v2103_v57 = vld [vmem:[%s2829_s7 + $0x1f4] ss:$8 sps:$4 sm:$0xff]  }
 0x149   :  { %1045 = vmatpush1.bf16.msra.mxu0 %v1987_v58 }
 0x14a   :  { %1046 = vmatprep.subr.bf16.mxu0 %v1992_v59 }
 0x14d   :  { %1047 = vmatpush1.bf16.msra.mxu0 %v1990_v60  ;;  %v2101_v60 = vld [vmem:[%s2829_s7 + $0x1f0] ss:$8 sps:$4 sm:$0xff]  }
 0x14e   :  { %1048 = vmatprep.subr.bf16.mxu0 %v1995_v61  ;;  %v1079_v61 = vsub.s32 2, %v2367_v5 }
 0x151   :  { %1049 = vmatpush1.bf16.msra.mxu0 %v1993_v62  ;;  %v1083_v62 = vsub.s32 3, %v2367_v5  ;;  %v1165_v5 = vld [vmem:[%s2830_s8] sm:$0x3] }
 0x152   :  { %1050 = vmatprep.subr.bf16.mxu0 %v1998_v63  ;;  %v1080_v63 = vrot.slane %v2702_v9, %v1079_v61 }
 0x155   :  { %1051 = vmatpush1.bf16.msra.mxu0 %v1996_v0 }
 0x156   :  { %1052 = vmatprep.subr.bf16.mxu0 %v2001_v1  ;;  %v1084_v1 = vrot.slane %v2702_v9, %v1083_v62  ;;  %v1174_v9 = vrot.slane %v1165_v5, %v2401_v19 }
 0x159   :  { %1053 = vmatpush1.bf16.msra.mxu0 %v1999_v2 }
 0x15a   :  { %1054 = vmatprep.subr.bf16.mxu0 %v2004_v3 }
 0x15d   :  { %1055 = vmatpush1.bf16.msra.mxu0 %v2002_v4 }
 0x15e   :  { %1056 = vmatprep.subr.bf16.mxu0 %v2007_v6 }
 0x161   :  { %1057 = vmatpush1.bf16.msra.mxu0 %v2005_v7 }
 0x164   :  { %1059 = vmatmul.mubr.bf16.vlgmr.msra.gmra.mrb[12].mxu0 %v2390_v16 }
 0x1b7   :  { %v592_v11 = vpop.f32.mrb[4].mxu0 }
 0x1b8   :  { %v1020_v13 = vadd.f32 %v1019_v44, %v592_v11  ;;  %v594_v14 = vpop.f32.mrb[5].mxu0  ;;  %v2083_v44 = vld [vmem:[%s2829_s7 + $0x190] ss:$8 sps:$4 sm:$0xff]  }
 0x1b9   :  { %v1022_v16 = vadd.f32 %v1021_v46, %v594_v14  ;;  %v596_v18 = vpop.f32.mrb[6].mxu0  ;;  %v2086_v46 = vld [vmem:[%s2829_s7 + $0x1a0] ss:$8 sps:$4 sm:$0xff]  }
 0x1ba   :  { %v1089_v20 = vadd.f32 %v1072_v10, %v1020_v13  ;;  %v597_v21 = vpop.f32.mrb[7].mxu0 }
 0x1bb   :  { %v1090_v22 = vadd.f32 %v1076_v12, %v1022_v16  ;;  %v1170_v16 = vrot.slane %v1165_v5, %v2395_v17 }
 0x1bc   :  { %v1093_v23 = vmax.f32 %v1089_v20, 0.0 }
 0x1bd   :  { %v1094_v24 = vmax.f32 %v1090_v22, 0.0 }
 0x1be   :  { %v1097_v27 = vpack.c.bf16 %v1093_v23, %v1093_v23 }
 0x1bf   :  { %v1098_v25 = vpack.c.bf16 %v1094_v24, %v1094_v24 }
 0x1c1   :  { %1529 = vmatprep.mubr.bf16.mxu1 %v1098_v25 }
 0x1c2   :  { %1530 = vmatmul.mubr.bf16.vlgmr.msra.gmra.mrb[4].mxu1 %v1097_v27 }
 0x1c3   :  { %1539 = vmatpush1.bf16.msra.mxu1 %v2056_v26 }
 0x1c4   :  { %1540 = vmatprep.subr.bf16.mxu1 %v2061_v28 }
 0x1c7   :  { %1541 = vmatpush1.bf16.msra.mxu1 %v2059_v29 }
 0x1c8   :  { %1542 = vmatprep.subr.bf16.mxu1 %v2064_v30 }
 0x1cb   :  { %1543 = vmatpush1.bf16.msra.mxu1 %v2062_v31 }
 0x1cc   :  { %1544 = vmatprep.subr.bf16.mxu1 %v2067_v33 }
 0x1cf   :  { %1545 = vmatpush1.bf16.msra.mxu1 %v2065_v34 }
 0x1d0   :  { %1546 = vmatprep.subr.bf16.mxu1 %v2070_v35 }
 0x1d3   :  { %1547 = vmatpush1.bf16.msra.mxu1 %v2068_v36 }
 0x1d4   :  { %1548 = vmatprep.subr.bf16.mxu1 %v2073_v37 }
 0x1d7   :  { %1549 = vmatpush1.bf16.msra.mxu1 %v2071_v38 }
 0x1d8   :  { %1550 = vmatprep.subr.bf16.mxu1 %v2076_v32 }
 0x1db   :  { %1551 = vmatpush1.bf16.msra.mxu1 %v2074_v15 }
 0x1dc   :  { %1552 = vmatprep.subr.bf16.mxu1 %v2079_v39 }
 0x1df   :  { %1553 = vmatpush1.bf16.msra.mxu1 %v2077_v40 }
 0x1e0   :  { %1554 = vmatprep.subr.bf16.mxu1 %v2082_v41 }
 0x1e3   :  { %1555 = vmatpush1.bf16.msra.mxu1 %v2080_v42 }
 0x1e4   :  { %1556 = vmatprep.subr.bf16.mxu1 %v2085_v43 }
 0x1e7   :  { %1557 = vmatpush1.bf16.msra.mxu1 %v2083_v44 }
 0x1e8   :  { %1558 = vmatprep.subr.bf16.mxu1 %v2088_v45 }
 0x1eb   :  { %1559 = vmatpush1.bf16.msra.mxu1 %v2086_v46 }
 0x1ec   :  { %1560 = vmatprep.subr.bf16.mxu1 %v2091_v47 }
 0x1ef   :  { %1561 = vmatpush1.bf16.msra.mxu1 %v2089_v48 }
 0x1f0   :  { %1562 = vmatprep.subr.bf16.mxu1 %v2094_v49 }
 0x1f3   :  { %1563 = vmatpush1.bf16.msra.mxu1 %v2092_v50 }
 0x1f4   :  { %1564 = vmatprep.subr.bf16.mxu1 %v2097_v51 }
 0x1f7   :  { %v633_v54 = vpop.f32.mrb[8].mxu0  ;;  %1565 = vmatpush1.bf16.msra.mxu1 %v2095_v52 }
 0x1f8   :  { %v635_v56 = vpop.f32.mrb[9].mxu0  ;;  %1566 = vmatprep.subr.bf16.mxu1 %v2100_v53 }
 0x1f9   :  { %v637_v58 = vpop.f32.mrb[10].mxu0 }
 0x1fa   :  { %v638_v59 = vpop.f32.mrb[11].mxu0 }
 0x1fb   :  { %1567 = vmatpush1.bf16.msra.mxu1 %v2098_v55 }
 0x1fc   :  { %1568 = vmatprep.subr.bf16.mxu1 %v2103_v57 }
 0x1ff   :  { %1569 = vmatpush1.bf16.msra.mxu1 %v2101_v60 }
 0x237   :  { %v1060_v0 = vpop.f32.mrb[12].mxu0 }
 0x238   :  { %v1061_v2 = vadd.f32 %v1060_v0, %v633_v54  ;;  %v1062_v3 = vpop.f32.mrb[13].mxu0 }
 0x239   :  { %v1063_v4 = vadd.f32 %v1062_v3, %v635_v56  ;;  %v1064_v6 = vpop.f32.mrb[14].mxu0 }
 0x23a   :  { %v1091_v7 = vadd.f32 %v1080_v63, %v1061_v2  ;;  %v1065_v8 = vpop.f32.mrb[15].mxu0 }
 0x23b   :  { %v1092_v10 = vadd.f32 %v1084_v1, %v1063_v4 }
 0x23c   :  { %v1095_v11 = vmax.f32 %v1091_v7, 0.0 }
 0x23d   :  { %v1096_v12 = vmax.f32 %v1092_v10, 0.0 }
 0x23e   :  { %v1099_v14 = vpack.c.bf16 %v1095_v11, %v1095_v11 }
 0x23f   :  { %v1100_v13 = vpack.c.bf16 %v1096_v12, %v1096_v12 }
 0x241   :  { %1570 = vmatprep.mubr.bf16.mxu1 %v1100_v13 }
 0x242   :  { %1571 = vmatmul.mubr.bf16.vlgmr.msra.gmra.mrb[4].mxu1 %v1099_v14 }
 0x315   :  { %v1572_v18 = vpop.f32.mrb[4].mxu1 }
 0x316   :  { %v1805_v20 = vadd.f32 %v1572_v18, %v1170_v16  ;;  %v1574_v21 = vpop.f32.mrb[5].mxu1 }
 0x317   :  { %v1806_v22 = vadd.f32 %v1574_v21, %v1174_v9  ;;  %v1576_v23 = vpop.f32.mrb[6].mxu1 }
 0x318   :  { %v1579_v24 = vmax.f32 %v1805_v20, 0.0  ;;  %v1577_v25 = vpop.f32.mrb[7].mxu1 }
 0x319   :  { %v1580_v26 = vmax.f32 %v1806_v22, 0.0 }
 0x31b   :  { %v1583_v27 = vcombine.low %v1579_v24, %v1580_v26 }
 0x31d   :  { %1804 = vst.sshfl [vmem:[#allocation2] sm:$0x33 pattern:$0x76325410] %v1583_v27 }
 0x31e   :  { %2115 = shalt.err (!%p2112_p4)
}
 0x31f   :  { %s2116_s5 = scalar_lea.hbm %s2831_s9, 64 }
 0x320   :  { %p2117_p5 = scmp.ne.s32.totalorder %s2831_s9, %s2116_s5  ;;  %p2120_p6 = scmp.lt.u32.totalorder %s2116_s5, %s2831_s9 }
 0x322   :  { %p2122_p7 = pnand %p2120_p6, %p2117_p5 }
 0x324   :  { %2125 = shalt.err (!%p2122_p7)
}
 0x325   :  { %1602 = dma.vmem_to_hbm [thread:$0]  %s1600_s27, 64, %s2831_s9, [#allocation3]  }
 0x326   :  { %2126 = dma.done.wait [#allocation3], 64  }
 0x327   :  { %2127 = vsyncadd [#allocation3], 4294967232 }
 0x328   :  { %1606 = vsyncpa [#allocation3], 1 }

</bundles_post_ra>
